<compile_context>
chip_gen: v7x
topology: tpu7x:2x2x1
jax: 0.10.0
libtpu: 0.0.40
codegen_flags: <defaults>
</compile_context>

<pallas_src>
import functools

import jax
import jax.numpy as jnp
from jax.experimental import pallas as pl
from jax.experimental.pallas import tpu as pltpu


# -----------------------------------------------------------------------------
# im2col (XLA side, tiny at these shapes)
# -----------------------------------------------------------------------------
def im2col_3x3(x):
    """x: (B, H, W, C) -> (B, H*W, 9*C), zero padded (padding=1)."""
    B, H, W, C = x.shape
    xp = jnp.pad(x, ((0, 0), (1, 1), (1, 1), (0, 0)))
    patches = []
    for kh in range(3):
        for kw in range(3):
            patches.append(xp[:, kh:kh + H, kw:kw + W, :])
    p = jnp.stack(patches, axis=3)            # (B, H, W, 9, C)
    return p.reshape(B, H * W, 9 * C)


# -----------------------------------------------------------------------------
# Fused kernel: conv(+BN+ReLU) x2, +pos_embed, cross attention, LN, FFN.
# One grid step per `bblk` batch elements; all intermediates stay in VMEM and
# every token-wise matmul runs with M = bblk * N rows.
# -----------------------------------------------------------------------------
def _projector_kernel(colsS_ref, colsP_ref, pe_ref,
                      wps_ref, bps_ref, wpp_ref, bpp_ref,
                      wq_ref, bq_ref, wkv_ref, bkv_ref,
                      wo_ref, bo_ref, lng_ref, lnb_ref,
                      w1_ref, b1_ref, w2_ref, b2_ref,
                      o_ref, *, num_heads, bblk, ns, nq):
    f32 = jnp.float32
    bf16 = jnp.bfloat16

    # ---- Flatten the batch block into the matmul M dimension.
    colsS = colsS_ref[...].reshape(bblk * ns, -1)        # (M_s, 9*Cs) bf16
    colsP = colsP_ref[...].reshape(bblk * nq, -1)        # (M_q, 9*Ct) bf16

    # ---- Conv3x3 + folded BN + ReLU (im2col matmul), bf16 operands, f32 acc.
    s = jnp.dot(colsS, wps_ref[...], preferred_element_type=f32) + bps_ref[...]
    s = jnp.maximum(s, 0.0)
    cs = s.shape[-1]
    # + pos_embed (broadcast over the batch block)
    s = (s.reshape(bblk, ns, cs) + pe_ref[...]).reshape(bblk * ns, cs)

    p = jnp.dot(colsP, wpp_ref[...], preferred_element_type=f32) + bpp_ref[...]
    p = jnp.maximum(p, 0.0)                              # (M_q, Ct) pos tokens

    sb = s.astype(bf16)
    pb = p.astype(bf16)

    # ---- Q (1/sqrt(dh) pre-folded into wq/bq) and fused K|V projection.
    q = jnp.dot(pb, wq_ref[...], preferred_element_type=f32) + bq_ref[...]      # (M_q, D)
    kv = jnp.dot(sb, wkv_ref[...], preferred_element_type=f32) + bkv_ref[...]   # (M_s, 2D)

    D = q.shape[-1]
    dh = D // num_heads

    # bf16 casts hoisted out of the head loop; keep batch separation for attn.
    qb = q.astype(bf16).reshape(bblk, nq, D)
    kb = kv[:, :D].astype(bf16).reshape(bblk, ns, D)
    vb = kv[:, D:].astype(bf16).reshape(bblk, ns, D)

    # ---- Per-head attention (static unroll). Head outputs are lane-
    #      concatenated; a single Wo matmul follows the loop.
    heads = []
    for h in range(num_heads):
        qh = qb[:, :, h * dh:(h + 1) * dh]
        kh = kb[:, :, h * dh:(h + 1) * dh]
        vh = vb[:, :, h * dh:(h + 1) * dh]
        sc = jnp.einsum('bqd,bkd->bqk', qh, kh, preferred_element_type=f32)
        sc = sc - jnp.max(sc, axis=-1, keepdims=True)    # softmax in f32
        pr = jnp.exp(sc)
        rs = jnp.sum(pr, axis=-1, keepdims=True)
        oh = jnp.einsum('bqk,bkd->bqd', pr.astype(bf16), vh,
                        preferred_element_type=f32)      # (bblk, Nq, dh)
        # Normalize the small head output, not the (Nq, Ns) prob matrix.
        heads.append(oh * pl.reciprocal(rs, approx=True))
    attn = jnp.concatenate(heads, axis=-1).reshape(bblk * nq, D)   # (M_q, D) f32

    # ---- Single output projection (K = D), then bias.
    fea = jnp.dot(attn.astype(bf16), wo_ref[...],
                  preferred_element_type=f32) + bo_ref[...]

    # ---- LayerNorm (f32)
    mu = jnp.mean(fea, axis=-1, keepdims=True)
    var = jnp.mean(jnp.square(fea - mu), axis=-1, keepdims=True)
    y = (fea - mu) * jax.lax.rsqrt(var + 1e-5) * lng_ref[...] + lnb_ref[...]

    # ---- FFN: Linear -> ReLU -> Linear, + identity residual
    yb = y.astype(bf16)
    hid = jnp.maximum(
        jnp.dot(yb, w1_ref[...], preferred_element_type=f32) + b1_ref[...], 0.0)
    out = y + jnp.dot(hid.astype(bf16), w2_ref[...],
                      preferred_element_type=f32) + b2_ref[...]
    o_ref[...] = out.reshape(bblk, nq, D).astype(o_ref.dtype)


def _pick_batch_block(B, Ns):
    """Fill ~128 MXU rows per step, but keep >=2 grid steps when the batch
    allows so both v7x TensorCores get work ("parallel" axis)."""
    target = max(1, 128 // max(Ns, 1))
    bb = 1
    for cand in range(min(target, B), 0, -1):
        if B % cand == 0:
            bb = cand
            break
    if B > 1 and B // bb < 2:
        for cand in range(max(1, B // 2), 0, -1):
            if B % cand == 0:
                bb = cand
                break
    return bb


def attention_projector_forward(params, preds_S_nchw, pos_emb_nchw, num_heads=8,
                                batch_block=None):
    xs = jnp.transpose(preds_S_nchw, (0, 2, 3, 1))        # NCHW -> NHWC
    xp = jnp.transpose(pos_emb_nchw, (0, 2, 3, 1))
    B, Hs, Ws, Cs = xs.shape
    _, Ht, Wt, Ct = xp.shape
    Ns, Nq = Hs * Ws, Ht * Wt

    colsS = im2col_3x3(xs).astype(jnp.bfloat16)           # (B, Ns, 9*Cs)
    colsP = im2col_3x3(xp).astype(jnp.bfloat16)           # (B, Nq, 9*Ct)
    pe = params['pos_embed'].reshape(1, Ns, Cs)           # f32

    D = params['wq'].shape[1]
    F = params['w1'].shape[1]
    dh = D // num_heads

    # Fold the 1/sqrt(dh) attention scale into the Q projection (zero kernel ops).
    scale = 1.0 / float(dh) ** 0.5
    wq = (params['wq'].astype(jnp.float32) * scale).astype(jnp.bfloat16)
    bq = (params['bq'] * scale).reshape(1, D)

    # Fuse K|V projections into one (Cs, 2D) matmul (better MXU N-fill).
    wkv = jnp.concatenate([params['wk'], params['wv']], axis=1)     # bf16 (Cs, 2D)
    bkv = jnp.concatenate([params['bk'], params['bv']]).reshape(1, 2 * D)

    if batch_block is None:
        batch_block = _pick_batch_block(B, Ns)
    assert B % batch_block == 0, "batch_block must divide batch"
    grid_b = B // batch_block

    kernel = functools.partial(_projector_kernel, num_heads=num_heads,
                               bblk=batch_block, ns=Ns, nq=Nq)
    mat = lambda shape: pl.BlockSpec(shape, lambda b: (0, 0))

    return pl.pallas_call(
        kernel,
        out_shape=jax.ShapeDtypeStruct((B, Nq, D), jnp.float32),
        grid_spec=pltpu.PrefetchScalarGridSpec(
            num_scalar_prefetch=0,
            grid=(grid_b,),
            in_specs=[
                pl.BlockSpec((batch_block, Ns, 9 * Cs), lambda b: (b, 0, 0)),  # student cols
                pl.BlockSpec((batch_block, Nq, 9 * Ct), lambda b: (b, 0, 0)),  # pos cols
                pl.BlockSpec((1, Ns, Cs), lambda b: (0, 0, 0)),                # pos_embed
                mat((9 * Cs, Cs)), mat((1, Cs)),                               # proj_student
                mat((9 * Ct, Ct)), mat((1, Ct)),                               # proj_pos
                mat((Ct, D)), mat((1, D)),                                     # Wq (scaled), bq
                mat((Cs, 2 * D)), mat((1, 2 * D)),                             # Wkv, bkv (fused)
                mat((D, D)), mat((1, D)),                                      # Wo, bo
                mat((1, D)), mat((1, D)),                                      # LN gamma/beta
                mat((D, F)), mat((1, F)),                                      # FFN W1, b1
                mat((F, D)), mat((1, D)),                                      # FFN W2, b2
            ],
            out_specs=pl.BlockSpec((batch_block, Nq, D), lambda b: (b, 0, 0)),
        ),
        compiler_params=pltpu.CompilerParams(
            dimension_semantics=("parallel",)),           # megacore on v7x
    )(colsS, colsP, pe,
      params['ps_wmat'], params['ps_bfold'].reshape(1, Cs),
      params['pp_wmat'], params['pp_bfold'].reshape(1, Ct),
      wq, bq,
      wkv, bkv,
      params['wo'], params['bo'].reshape(1, D),
      params['ln_g'].reshape(1, D), params['ln_b'].reshape(1, D),
      params['w1'], params['b1'].reshape(1, F),
      params['w2'], params['b2'].reshape(1, D))


# -----------------------------------------------------------------------------
# Parameter setup (deterministic, synthetic) + BN folding
# -----------------------------------------------------------------------------
def trunc_normal(key, shape, std=0.02):
    return jax.random.truncated_normal(key, -2.0, 2.0, shape, jnp.float32) * std


def fold_bn_into_conv(w, b, gamma, beta, mean, var, eps=1e-5):
    """w: (Cout, Cin, 3, 3) PyTorch layout -> im2col weight (9*Cin, Cout) + bias."""
    scale = gamma / jnp.sqrt(var + eps)
    w_f = w * scale[:, None, None, None]
    b_f = (b - mean) * scale + beta
    cout, cin = w.shape[0], w.shape[1]
    w_mat = jnp.transpose(w_f, (2, 3, 1, 0)).reshape(9 * cin, cout)
    return w_mat, b_f


def init_params(key, student_dims, teacher_dims, student_res, ffn_hidden):
    Cs, Ct = student_dims, teacher_dims
    Hs, Ws = student_res
    ks = jax.random.split(key, 32)
    it = iter(range(32))
    nk = lambda: ks[next(it)]

    def conv_block(cdim):
        w = 0.05 * jax.random.normal(nk(), (cdim, cdim, 3, 3), jnp.float32)
        b = 0.01 * jax.random.normal(nk(), (cdim,), jnp.float32)
        gamma = 1.0 + 0.1 * jax.random.normal(nk(), (cdim,), jnp.float32)
        beta = 0.05 * jax.random.normal(nk(), (cdim,), jnp.float32)
        mean = 0.1 * jax.random.normal(nk(), (cdim,), jnp.float32)
        var = 1.0 + 0.1 * jax.random.uniform(nk(), (cdim,), jnp.float32)
        return fold_bn_into_conv(w, b, gamma, beta, mean, var)

    p = {}
    p['ps_wmat'], p['ps_bfold'] = conv_block(Cs)           # proj_student
    p['pp_wmat'], p['pp_bfold'] = conv_block(Ct)           # proj_pos
    p['pos_embed'] = trunc_normal(nk(), (1, Hs, Ws, Cs))   # NHWC layout

    p['wq'] = 0.2 * jax.random.normal(nk(), (Ct, Ct), jnp.float32)
    p['bq'] = jnp.zeros((Ct,), jnp.float32)
    p['wk'] = 0.2 * jax.random.normal(nk(), (Cs, Ct), jnp.float32)
    p['bk'] = jnp.zeros((Ct,), jnp.float32)
    p['wv'] = 0.1 * jax.random.normal(nk(), (Cs, Ct), jnp.float32)
    p['bv'] = jnp.zeros((Ct,), jnp.float32)
    p['wo'] = 0.1 * jax.random.normal(nk(), (Ct, Ct), jnp.float32)
    p['bo'] = 0.1 * jax.random.normal(nk(), (Ct,), jnp.float32)

    p['ln_g'] = 1.0 + 0.05 * jax.random.normal(nk(), (Ct,), jnp.float32)
    p['ln_b'] = 0.02 * jax.random.normal(nk(), (Ct,), jnp.float32)

    p['w1'] = 0.05 * jax.random.normal(nk(), (Ct, ffn_hidden), jnp.float32)
    p['b1'] = 0.01 * jax.random.normal(nk(), (ffn_hidden,), jnp.float32)
    p['w2'] = 0.05 * jax.random.normal(nk(), (ffn_hidden, Ct), jnp.float32)
    p['b2'] = 0.01 * jax.random.normal(nk(), (Ct,), jnp.float32)

    # bf16 matmul operands (MXU native); biases / LN / pos_embed stay f32.
    for name in ('ps_wmat', 'pp_wmat', 'wq', 'wk', 'wv', 'wo', 'w1', 'w2'):
        p[name] = p[name].astype(jnp.bfloat16)
    return p


# -----------------------------------------------------------------------------
# Pure-JAX f32 reference (same weight values; bf16-rounded matrices upcast)
# -----------------------------------------------------------------------------
def reference_forward(params, preds_S_nchw, pos_emb_nchw, num_heads=8):
    xs = jnp.transpose(preds_S_nchw, (0, 2, 3, 1))
    xp = jnp.transpose(pos_emb_nchw, (0, 2, 3, 1))
    B, _, _, Cs = xs.shape

    def conv(x, w_mat, b):
        cols = im2col_3x3(x)
        return jnp.maximum(cols @ w_mat.astype(jnp.float32) + b[None, None, :], 0.0)

    s_tok = conv(xs, params['ps_wmat'], params['ps_bfold'])
    s_tok = s_tok + params['pos_embed'].reshape(1, -1, Cs)
    p_tok = conv(xp, params['pp_wmat'], params['pp_bfold'])

    q = p_tok @ params['wq'].astype(jnp.float32) + params['bq']
    k = s_tok @ params['wk'].astype(jnp.float32) + params['bk']
    v = s_tok @ params['wv'].astype(jnp.float32) + params['bv']
    D = q.shape[-1]
    dh = D // num_heads
    qh = q.reshape(B, -1, num_heads, dh).transpose(0, 2, 1, 3)
    kh = k.reshape(B, -1, num_heads, dh).transpose(0, 2, 1, 3)
    vh = v.reshape(B, -1, num_heads, dh).transpose(0, 2, 1, 3)
    sc = jnp.einsum('bhqd,bhkd->bhqk', qh, kh) / jnp.sqrt(dh)
    pr = jax.nn.softmax(sc, axis=-1)
    ao = jnp.einsum('bhqk,bhkd->bhqd', pr, vh).transpose(0, 2, 1, 3).reshape(B, -1, D)
    fea = ao @ params['wo'].astype(jnp.float32) + params['bo']

    mu = fea.mean(-1, keepdims=True)
    var = ((fea - mu) ** 2).mean(-1, keepdims=True)
    y = (fea - mu) / jnp.sqrt(var + 1e-5) * params['ln_g'] + params['ln_b']
    h = jnp.maximum(y @ params['w1'].astype(jnp.float32) + params['b1'], 0.0)
    return y + h @ params['w2'].astype(jnp.float32) + params['b2']


# -----------------------------------------------------------------------------
if __name__ == "__main__":
    B = 4                   # 2 grid steps x 2 batch elems merged into M=128
    student_dims = 32
    teacher_dims = 32
    Hs = Ws = 8             # student_resolution
    Ht = Wt = 8             # teacher (pos_emb) resolution
    num_heads = 8
    ffn_hidden = 384 * 4

    key = jax.random.PRNGKey(0)
    k_in, k_par = jax.random.split(key)
    k1, k2 = jax.random.split(k_in)
    preds_S = jax.random.normal(k1, (B, student_dims, Hs, Ws), jnp.float32)
    pos_emb = jax.random.normal(k2, (B, teacher_dims, Ht, Wt), jnp.float32)

    params = init_params(k_par, student_dims, teacher_dims, (Hs, Ws), ffn_hidden)

    fwd = jax.jit(functools.partial(attention_projector_forward, num_heads=num_heads))
    out = jax.block_until_ready(fwd(params, preds_S, pos_emb))

    ref = reference_forward(params, preds_S, pos_emb, num_heads=num_heads)
    assert out.shape == (B, Ht * Wt, teacher_dims)
    max_err = float(jnp.max(jnp.abs(out - ref)))
    # bf16 matmul operands (f32 accumulation) + approx reciprocal -> loose tol.
    assert jnp.allclose(out, ref, atol=5e-2, rtol=5e-2), (
        f"mismatch vs JAX reference (max abs err {max_err})")

    print("KERNEL_OK")
</pallas_src>

<mosaic_0001>
module attributes {stable_mosaic.version = 11 : i64} {
  func.func @_projector_kernel(%arg0: i32, %arg1: memref<2x64x288xbf16, #tpu.memory_space<vmem>>, %arg2: memref<2x64x288xbf16, #tpu.memory_space<vmem>>, %arg3: memref<1x64x32xf32, #tpu.memory_space<vmem>>, %arg4: memref<288x32xbf16, #tpu.memory_space<vmem>>, %arg5: memref<1x32xf32, #tpu.memory_space<vmem>>, %arg6: memref<288x32xbf16, #tpu.memory_space<vmem>>, %arg7: memref<1x32xf32, #tpu.memory_space<vmem>>, %arg8: memref<32x32xbf16, #tpu.memory_space<vmem>>, %arg9: memref<1x32xf32, #tpu.memory_space<vmem>>, %arg10: memref<32x64xbf16, #tpu.memory_space<vmem>>, %arg11: memref<1x64xf32, #tpu.memory_space<vmem>>, %arg12: memref<32x32xbf16, #tpu.memory_space<vmem>>, %arg13: memref<1x32xf32, #tpu.memory_space<vmem>>, %arg14: memref<1x32xf32, #tpu.memory_space<vmem>>, %arg15: memref<1x32xf32, #tpu.memory_space<vmem>>, %arg16: memref<32x1536xbf16, #tpu.memory_space<vmem>>, %arg17: memref<1x1536xf32, #tpu.memory_space<vmem>>, %arg18: memref<1536x32xbf16, #tpu.memory_space<vmem>>, %arg19: memref<1x32xf32, #tpu.memory_space<vmem>>, %arg20: memref<2x64x32xf32, #tpu.memory_space<vmem>>) attributes {dimension_semantics = [#tpu.dimension_semantics<parallel>], iteration_bounds = array<i64: 2>, scalar_prefetch = 0 : i64, scratch_operands = 0 : i64, tpu.core_type = #tpu.core_type<tc>, window_params = [{transform_indices = @transform_0, window_bounds = array<i64: 2, 64, 288>}, {transform_indices = @transform_1, window_bounds = array<i64: 2, 64, 288>}, {pipeline_mode = #tpu.pipeline_mode<synchronous>, transform_indices = @transform_2, window_bounds = array<i64: 1, 64, 32>}, {pipeline_mode = #tpu.pipeline_mode<synchronous>, transform_indices = @transform_3, window_bounds = array<i64: 288, 32>}, {pipeline_mode = #tpu.pipeline_mode<synchronous>, transform_indices = @transform_4, window_bounds = array<i64: 1, 32>}, {pipeline_mode = #tpu.pipeline_mode<synchronous>, transform_indices = @transform_5, window_bounds = array<i64: 288, 32>}, {pipeline_mode = #tpu.pipeline_mode<synchronous>, transform_indices = @transform_6, window_bounds = array<i64: 1, 32>}, {pipeline_mode = #tpu.pipeline_mode<synchronous>, transform_indices = @transform_7, window_bounds = array<i64: 32, 32>}, {pipeline_mode = #tpu.pipeline_mode<synchronous>, transform_indices = @transform_8, window_bounds = array<i64: 1, 32>}, {pipeline_mode = #tpu.pipeline_mode<synchronous>, transform_indices = @transform_9, window_bounds = array<i64: 32, 64>}, {pipeline_mode = #tpu.pipeline_mode<synchronous>, transform_indices = @transform_10, window_bounds = array<i64: 1, 64>}, {pipeline_mode = #tpu.pipeline_mode<synchronous>, transform_indices = @transform_11, window_bounds = array<i64: 32, 32>}, {pipeline_mode = #tpu.pipeline_mode<synchronous>, transform_indices = @transform_12, window_bounds = array<i64: 1, 32>}, {pipeline_mode = #tpu.pipeline_mode<synchronous>, transform_indices = @transform_13, window_bounds = array<i64: 1, 32>}, {pipeline_mode = #tpu.pipeline_mode<synchronous>, transform_indices = @transform_14, window_bounds = array<i64: 1, 32>}, {pipeline_mode = #tpu.pipeline_mode<synchronous>, transform_indices = @transform_15, window_bounds = array<i64: 32, 1536>}, {pipeline_mode = #tpu.pipeline_mode<synchronous>, transform_indices = @transform_16, window_bounds = array<i64: 1, 1536>}, {pipeline_mode = #tpu.pipeline_mode<synchronous>, transform_indices = @transform_17, window_bounds = array<i64: 1536, 32>}, {pipeline_mode = #tpu.pipeline_mode<synchronous>, transform_indices = @transform_18, window_bounds = array<i64: 1, 32>}, {transform_indices = @transform_19, window_bounds = array<i64: 2, 64, 32>}]} {
    %c0 = arith.constant 0 : index
    %c0_0 = arith.constant 0 : index
    %c0_1 = arith.constant 0 : index
    %0 = vector.load %arg1[%c0, %c0_0, %c0_1] : memref<2x64x288xbf16, #tpu.memory_space<vmem>>, vector<2x64x288xbf16>
    %1 = vector.shape_cast %0 : vector<2x64x288xbf16> to vector<128x288xbf16>
    %c0_2 = arith.constant 0 : index
    %c0_3 = arith.constant 0 : index
    %c0_4 = arith.constant 0 : index
    %2 = vector.load %arg2[%c0_2, %c0_3, %c0_4] : memref<2x64x288xbf16, #tpu.memory_space<vmem>>, vector<2x64x288xbf16>
    %3 = vector.shape_cast %2 : vector<2x64x288xbf16> to vector<128x288xbf16>
    %c0_5 = arith.constant 0 : index
    %c0_6 = arith.constant 0 : index
    %4 = vector.load %arg4[%c0_5, %c0_6] : memref<288x32xbf16, #tpu.memory_space<vmem>>, vector<288x32xbf16>
    %cst = arith.constant dense<0.000000e+00> : vector<128x32xf32>
    %5 = tpu.matmul %1, %4, %cst {dimension_numbers = #tpu.dot_dimension_numbers<[1], [0], [0], [1], [0, 0, 1, 1], [], []>} : vector<128x288xbf16>, vector<288x32xbf16>, vector<128x32xf32> -> vector<128x32xf32>
    %c0_7 = arith.constant 0 : index
    %c0_8 = arith.constant 0 : index
    %6 = vector.load %arg5[%c0_7, %c0_8] : memref<1x32xf32, #tpu.memory_space<vmem>>, vector<1x32xf32>
    %7 = vector.broadcast %6 : vector<1x32xf32> to vector<128x32xf32>
    %8 = arith.addf %5, %7 : vector<128x32xf32>
    %cst_9 = arith.constant 0.000000e+00 : f32
    %9 = vector.broadcast %cst_9 : f32 to vector<128x32xf32>
    %10 = arith.maximumf %8, %9 : vector<128x32xf32>
    %11 = vector.shape_cast %10 : vector<128x32xf32> to vector<2x64x32xf32>
    %c0_10 = arith.constant 0 : index
    %c0_11 = arith.constant 0 : index
    %c0_12 = arith.constant 0 : index
    %12 = vector.load %arg3[%c0_10, %c0_11, %c0_12] : memref<1x64x32xf32, #tpu.memory_space<vmem>>, vector<1x64x32xf32>
    %13 = vector.broadcast %12 : vector<1x64x32xf32> to vector<2x64x32xf32>
    %14 = arith.addf %11, %13 : vector<2x64x32xf32>
    %15 = vector.shape_cast %14 : vector<2x64x32xf32> to vector<128x32xf32>
    %c0_13 = arith.constant 0 : index
    %c0_14 = arith.constant 0 : index
    %16 = vector.load %arg6[%c0_13, %c0_14] : memref<288x32xbf16, #tpu.memory_space<vmem>>, vector<288x32xbf16>
    %cst_15 = arith.constant dense<0.000000e+00> : vector<128x32xf32>
    %17 = tpu.matmul %3, %16, %cst_15 {dimension_numbers = #tpu.dot_dimension_numbers<[1], [0], [0], [1], [0, 0, 1, 1], [], []>} : vector<128x288xbf16>, vector<288x32xbf16>, vector<128x32xf32> -> vector<128x32xf32>
    %c0_16 = arith.constant 0 : index
    %c0_17 = arith.constant 0 : index
    %18 = vector.load %arg7[%c0_16, %c0_17] : memref<1x32xf32, #tpu.memory_space<vmem>>, vector<1x32xf32>
    %19 = vector.broadcast %18 : vector<1x32xf32> to vector<128x32xf32>
    %20 = arith.addf %17, %19 : vector<128x32xf32>
    %cst_18 = arith.constant 0.000000e+00 : f32
    %21 = vector.broadcast %cst_18 : f32 to vector<128x32xf32>
    %22 = arith.maximumf %20, %21 : vector<128x32xf32>
    %23 = arith.truncf %15 : vector<128x32xf32> to vector<128x32xbf16>
    %24 = arith.truncf %22 : vector<128x32xf32> to vector<128x32xbf16>
    %c0_19 = arith.constant 0 : index
    %c0_20 = arith.constant 0 : index
    %25 = vector.load %arg8[%c0_19, %c0_20] : memref<32x32xbf16, #tpu.memory_space<vmem>>, vector<32x32xbf16>
    %cst_21 = arith.constant dense<0.000000e+00> : vector<128x32xf32>
    %26 = tpu.matmul %24, %25, %cst_21 {dimension_numbers = #tpu.dot_dimension_numbers<[1], [0], [0], [1], [0, 0, 1, 1], [], []>} : vector<128x32xbf16>, vector<32x32xbf16>, vector<128x32xf32> -> vector<128x32xf32>
    %c0_22 = arith.constant 0 : index
    %c0_23 = arith.constant 0 : index
    %27 = vector.load %arg9[%c0_22, %c0_23] : memref<1x32xf32, #tpu.memory_space<vmem>>, vector<1x32xf32>
    %28 = vector.broadcast %27 : vector<1x32xf32> to vector<128x32xf32>
    %29 = arith.addf %26, %28 : vector<128x32xf32>
    %c0_24 = arith.constant 0 : index
    %c0_25 = arith.constant 0 : index
    %30 = vector.load %arg10[%c0_24, %c0_25] : memref<32x64xbf16, #tpu.memory_space<vmem>>, vector<32x64xbf16>
    %cst_26 = arith.constant dense<0.000000e+00> : vector<128x64xf32>
    %31 = tpu.matmul %23, %30, %cst_26 {dimension_numbers = #tpu.dot_dimension_numbers<[1], [0], [0], [1], [0, 0, 1, 1], [], []>} : vector<128x32xbf16>, vector<32x64xbf16>, vector<128x64xf32> -> vector<128x64xf32>
    %c0_27 = arith.constant 0 : index
    %c0_28 = arith.constant 0 : index
    %32 = vector.load %arg11[%c0_27, %c0_28] : memref<1x64xf32, #tpu.memory_space<vmem>>, vector<1x64xf32>
    %33 = vector.broadcast %32 : vector<1x64xf32> to vector<128x64xf32>
    %34 = arith.addf %31, %33 : vector<128x64xf32>
    %35 = arith.truncf %29 : vector<128x32xf32> to vector<128x32xbf16>
    %36 = vector.shape_cast %35 : vector<128x32xbf16> to vector<2x64x32xbf16>
    %37 = vector.extract_strided_slice %34 {offsets = [0, 0], sizes = [128, 32], strides = [1, 1]} : vector<128x64xf32> to vector<128x32xf32>
    %38 = arith.truncf %37 : vector<128x32xf32> to vector<128x32xbf16>
    %39 = vector.shape_cast %38 : vector<128x32xbf16> to vector<2x64x32xbf16>
    %40 = vector.extract_strided_slice %34 {offsets = [0, 32], sizes = [128, 32], strides = [1, 1]} : vector<128x64xf32> to vector<128x32xf32>
    %41 = arith.truncf %40 : vector<128x32xf32> to vector<128x32xbf16>
    %42 = vector.shape_cast %41 : vector<128x32xbf16> to vector<2x64x32xbf16>
    %43 = vector.extract_strided_slice %36 {offsets = [0, 0, 0], sizes = [2, 64, 4], strides = [1, 1, 1]} : vector<2x64x32xbf16> to vector<2x64x4xbf16>
    %44 = vector.extract_strided_slice %39 {offsets = [0, 0, 0], sizes = [2, 64, 4], strides = [1, 1, 1]} : vector<2x64x32xbf16> to vector<2x64x4xbf16>
    %45 = vector.extract_strided_slice %42 {offsets = [0, 0, 0], sizes = [2, 64, 4], strides = [1, 1, 1]} : vector<2x64x32xbf16> to vector<2x64x4xbf16>
    "tpu.trace_start"() <{level = 10 : i32, message = "bqd,bkd->bqk"}> : () -> ()
    %cst_29 = arith.constant dense<0.000000e+00> : vector<2x64x64xf32>
    %46 = tpu.matmul %43, %44, %cst_29 {dimension_numbers = #tpu.dot_dimension_numbers<[2], [2], [1], [1], [0, 0, 0, 1, 1, 1], [0], [0]>} : vector<2x64x4xbf16>, vector<2x64x4xbf16>, vector<2x64x64xf32> -> vector<2x64x64xf32>
    "tpu.trace_stop"() : () -> ()
    %cst_30 = arith.constant dense<0xFF800000> : vector<2x64xf32>
    %47 = vector.multi_reduction <maximumf>, %46, %cst_30 [2] : vector<2x64x64xf32> to vector<2x64xf32>
    %48 = vector.shape_cast %47 : vector<2x64xf32> to vector<2x64x1xf32>
    %49 = vector.broadcast %48 : vector<2x64x1xf32> to vector<2x64x64xf32>
    %50 = arith.subf %46, %49 : vector<2x64x64xf32>
    %51 = math.exp %50 : vector<2x64x64xf32>
    %cst_31 = arith.constant dense<0.000000e+00> : vector<2x64xf32>
    %52 = vector.multi_reduction <add>, %51, %cst_31 [2] : vector<2x64x64xf32> to vector<2x64xf32>
    %53 = vector.shape_cast %52 : vector<2x64xf32> to vector<2x64x1xf32>
    %54 = arith.truncf %51 : vector<2x64x64xf32> to vector<2x64x64xbf16>
    "tpu.trace_start"() <{level = 10 : i32, message = "bqk,bkd->bqd"}> : () -> ()
    %cst_32 = arith.constant dense<0.000000e+00> : vector<2x64x4xf32>
    %55 = tpu.matmul %54, %45, %cst_32 {dimension_numbers = #tpu.dot_dimension_numbers<[2], [1], [1], [2], [0, 0, 0, 1, 1, 2], [0], [0]>} : vector<2x64x64xbf16>, vector<2x64x4xbf16>, vector<2x64x4xf32> -> vector<2x64x4xf32>
    "tpu.trace_stop"() : () -> ()
    %56 = tpu.reciprocal %53 {approx = true} : vector<2x64x1xf32> -> vector<2x64x1xf32>
    %57 = vector.broadcast %56 : vector<2x64x1xf32> to vector<2x64x4xf32>
    %58 = arith.mulf %55, %57 : vector<2x64x4xf32>
    %59 = vector.extract_strided_slice %36 {offsets = [0, 0, 4], sizes = [2, 64, 4], strides = [1, 1, 1]} : vector<2x64x32xbf16> to vector<2x64x4xbf16>
    %60 = vector.extract_strided_slice %39 {offsets = [0, 0, 4], sizes = [2, 64, 4], strides = [1, 1, 1]} : vector<2x64x32xbf16> to vector<2x64x4xbf16>
    %61 = vector.extract_strided_slice %42 {offsets = [0, 0, 4], sizes = [2, 64, 4], strides = [1, 1, 1]} : vector<2x64x32xbf16> to vector<2x64x4xbf16>
    "tpu.trace_start"() <{level = 10 : i32, message = "bqd,bkd->bqk"}> : () -> ()
    %cst_33 = arith.constant dense<0.000000e+00> : vector<2x64x64xf32>
    %62 = tpu.matmul %59, %60, %cst_33 {dimension_numbers = #tpu.dot_dimension_numbers<[2], [2], [1], [1], [0, 0, 0, 1, 1, 1], [0], [0]>} : vector<2x64x4xbf16>, vector<2x64x4xbf16>, vector<2x64x64xf32> -> vector<2x64x64xf32>
    "tpu.trace_stop"() : () -> ()
    %cst_34 = arith.constant dense<0xFF800000> : vector<2x64xf32>
    %63 = vector.multi_reduction <maximumf>, %62, %cst_34 [2] : vector<2x64x64xf32> to vector<2x64xf32>
    %64 = vector.shape_cast %63 : vector<2x64xf32> to vector<2x64x1xf32>
    %65 = vector.broadcast %64 : vector<2x64x1xf32> to vector<2x64x64xf32>
    %66 = arith.subf %62, %65 : vector<2x64x64xf32>
    %67 = math.exp %66 : vector<2x64x64xf32>
    %cst_35 = arith.constant dense<0.000000e+00> : vector<2x64xf32>
    %68 = vector.multi_reduction <add>, %67, %cst_35 [2] : vector<2x64x64xf32> to vector<2x64xf32>
    %69 = vector.shape_cast %68 : vector<2x64xf32> to vector<2x64x1xf32>
    %70 = arith.truncf %67 : vector<2x64x64xf32> to vector<2x64x64xbf16>
    "tpu.trace_start"() <{level = 10 : i32, message = "bqk,bkd->bqd"}> : () -> ()
    %cst_36 = arith.constant dense<0.000000e+00> : vector<2x64x4xf32>
    %71 = tpu.matmul %70, %61, %cst_36 {dimension_numbers = #tpu.dot_dimension_numbers<[2], [1], [1], [2], [0, 0, 0, 1, 1, 2], [0], [0]>} : vector<2x64x64xbf16>, vector<2x64x4xbf16>, vector<2x64x4xf32> -> vector<2x64x4xf32>
    "tpu.trace_stop"() : () -> ()
    %72 = tpu.reciprocal %69 {approx = true} : vector<2x64x1xf32> -> vector<2x64x1xf32>
    %73 = vector.broadcast %72 : vector<2x64x1xf32> to vector<2x64x4xf32>
    %74 = arith.mulf %71, %73 : vector<2x64x4xf32>
    %75 = vector.extract_strided_slice %36 {offsets = [0, 0, 8], sizes = [2, 64, 4], strides = [1, 1, 1]} : vector<2x64x32xbf16> to vector<2x64x4xbf16>
    %76 = vector.extract_strided_slice %39 {offsets = [0, 0, 8], sizes = [2, 64, 4], strides = [1, 1, 1]} : vector<2x64x32xbf16> to vector<2x64x4xbf16>
    %77 = vector.extract_strided_slice %42 {offsets = [0, 0, 8], sizes = [2, 64, 4], strides = [1, 1, 1]} : vector<2x64x32xbf16> to vector<2x64x4xbf16>
    "tpu.trace_start"() <{level = 10 : i32, message = "bqd,bkd->bqk"}> : () -> ()
    %cst_37 = arith.constant dense<0.000000e+00> : vector<2x64x64xf32>
    %78 = tpu.matmul %75, %76, %cst_37 {dimension_numbers = #tpu.dot_dimension_numbers<[2], [2], [1], [1], [0, 0, 0, 1, 1, 1], [0], [0]>} : vector<2x64x4xbf16>, vector<2x64x4xbf16>, vector<2x64x64xf32> -> vector<2x64x64xf32>
    "tpu.trace_stop"() : () -> ()
    %cst_38 = arith.constant dense<0xFF800000> : vector<2x64xf32>
    %79 = vector.multi_reduction <maximumf>, %78, %cst_38 [2] : vector<2x64x64xf32> to vector<2x64xf32>
    %80 = vector.shape_cast %79 : vector<2x64xf32> to vector<2x64x1xf32>
    %81 = vector.broadcast %80 : vector<2x64x1xf32> to vector<2x64x64xf32>
    %82 = arith.subf %78, %81 : vector<2x64x64xf32>
    %83 = math.exp %82 : vector<2x64x64xf32>
    %cst_39 = arith.constant dense<0.000000e+00> : vector<2x64xf32>
    %84 = vector.multi_reduction <add>, %83, %cst_39 [2] : vector<2x64x64xf32> to vector<2x64xf32>
    %85 = vector.shape_cast %84 : vector<2x64xf32> to vector<2x64x1xf32>
    %86 = arith.truncf %83 : vector<2x64x64xf32> to vector<2x64x64xbf16>
    "tpu.trace_start"() <{level = 10 : i32, message = "bqk,bkd->bqd"}> : () -> ()
    %cst_40 = arith.constant dense<0.000000e+00> : vector<2x64x4xf32>
    %87 = tpu.matmul %86, %77, %cst_40 {dimension_numbers = #tpu.dot_dimension_numbers<[2], [1], [1], [2], [0, 0, 0, 1, 1, 2], [0], [0]>} : vector<2x64x64xbf16>, vector<2x64x4xbf16>, vector<2x64x4xf32> -> vector<2x64x4xf32>
    "tpu.trace_stop"() : () -> ()
    %88 = tpu.reciprocal %85 {approx = true} : vector<2x64x1xf32> -> vector<2x64x1xf32>
    %89 = vector.broadcast %88 : vector<2x64x1xf32> to vector<2x64x4xf32>
    %90 = arith.mulf %87, %89 : vector<2x64x4xf32>
    %91 = vector.extract_strided_slice %36 {offsets = [0, 0, 12], sizes = [2, 64, 4], strides = [1, 1, 1]} : vector<2x64x32xbf16> to vector<2x64x4xbf16>
    %92 = vector.extract_strided_slice %39 {offsets = [0, 0, 12], sizes = [2, 64, 4], strides = [1, 1, 1]} : vector<2x64x32xbf16> to vector<2x64x4xbf16>
    %93 = vector.extract_strided_slice %42 {offsets = [0, 0, 12], sizes = [2, 64, 4], strides = [1, 1, 1]} : vector<2x64x32xbf16> to vector<2x64x4xbf16>
    "tpu.trace_start"() <{level = 10 : i32, message = "bqd,bkd->bqk"}> : () -> ()
    %cst_41 = arith.constant dense<0.000000e+00> : vector<2x64x64xf32>
    %94 = tpu.matmul %91, %92, %cst_41 {dimension_numbers = #tpu.dot_dimension_numbers<[2], [2], [1], [1], [0, 0, 0, 1, 1, 1], [0], [0]>} : vector<2x64x4xbf16>, vector<2x64x4xbf16>, vector<2x64x64xf32> -> vector<2x64x64xf32>
    "tpu.trace_stop"() : () -> ()
    %cst_42 = arith.constant dense<0xFF800000> : vector<2x64xf32>
    %95 = vector.multi_reduction <maximumf>, %94, %cst_42 [2] : vector<2x64x64xf32> to vector<2x64xf32>
    %96 = vector.shape_cast %95 : vector<2x64xf32> to vector<2x64x1xf32>
    %97 = vector.broadcast %96 : vector<2x64x1xf32> to vector<2x64x64xf32>
    %98 = arith.subf %94, %97 : vector<2x64x64xf32>
    %99 = math.exp %98 : vector<2x64x64xf32>
    %cst_43 = arith.constant dense<0.000000e+00> : vector<2x64xf32>
    %100 = vector.multi_reduction <add>, %99, %cst_43 [2] : vector<2x64x64xf32> to vector<2x64xf32>
    %101 = vector.shape_cast %100 : vector<2x64xf32> to vector<2x64x1xf32>
    %102 = arith.truncf %99 : vector<2x64x64xf32> to vector<2x64x64xbf16>
    "tpu.trace_start"() <{level = 10 : i32, message = "bqk,bkd->bqd"}> : () -> ()
    %cst_44 = arith.constant dense<0.000000e+00> : vector<2x64x4xf32>
    %103 = tpu.matmul %102, %93, %cst_44 {dimension_numbers = #tpu.dot_dimension_numbers<[2], [1], [1], [2], [0, 0, 0, 1, 1, 2], [0], [0]>} : vector<2x64x64xbf16>, vector<2x64x4xbf16>, vector<2x64x4xf32> -> vector<2x64x4xf32>
    "tpu.trace_stop"() : () -> ()
    %104 = tpu.reciprocal %101 {approx = true} : vector<2x64x1xf32> -> vector<2x64x1xf32>
    %105 = vector.broadcast %104 : vector<2x64x1xf32> to vector<2x64x4xf32>
    %106 = arith.mulf %103, %105 : vector<2x64x4xf32>
    %107 = vector.extract_strided_slice %36 {offsets = [0, 0, 16], sizes = [2, 64, 4], strides = [1, 1, 1]} : vector<2x64x32xbf16> to vector<2x64x4xbf16>
    %108 = vector.extract_strided_slice %39 {offsets = [0, 0, 16], sizes = [2, 64, 4], strides = [1, 1, 1]} : vector<2x64x32xbf16> to vector<2x64x4xbf16>
    %109 = vector.extract_strided_slice %42 {offsets = [0, 0, 16], sizes = [2, 64, 4], strides = [1, 1, 1]} : vector<2x64x32xbf16> to vector<2x64x4xbf16>
    "tpu.trace_start"() <{level = 10 : i32, message = "bqd,bkd->bqk"}> : () -> ()
    %cst_45 = arith.constant dense<0.000000e+00> : vector<2x64x64xf32>
    %110 = tpu.matmul %107, %108, %cst_45 {dimension_numbers = #tpu.dot_dimension_numbers<[2], [2], [1], [1], [0, 0, 0, 1, 1, 1], [0], [0]>} : vector<2x64x4xbf16>, vector<2x64x4xbf16>, vector<2x64x64xf32> -> vector<2x64x64xf32>
    "tpu.trace_stop"() : () -> ()
    %cst_46 = arith.constant dense<0xFF800000> : vector<2x64xf32>
    %111 = vector.multi_reduction <maximumf>, %110, %cst_46 [2] : vector<2x64x64xf32> to vector<2x64xf32>
    %112 = vector.shape_cast %111 : vector<2x64xf32> to vector<2x64x1xf32>
    %113 = vector.broadcast %112 : vector<2x64x1xf32> to vector<2x64x64xf32>
    %114 = arith.subf %110, %113 : vector<2x64x64xf32>
    %115 = math.exp %114 : vector<2x64x64xf32>
    %cst_47 = arith.constant dense<0.000000e+00> : vector<2x64xf32>
    %116 = vector.multi_reduction <add>, %115, %cst_47 [2] : vector<2x64x64xf32> to vector<2x64xf32>
    %117 = vector.shape_cast %116 : vector<2x64xf32> to vector<2x64x1xf32>
    %118 = arith.truncf %115 : vector<2x64x64xf32> to vector<2x64x64xbf16>
    "tpu.trace_start"() <{level = 10 : i32, message = "bqk,bkd->bqd"}> : () -> ()
    %cst_48 = arith.constant dense<0.000000e+00> : vector<2x64x4xf32>
    %119 = tpu.matmul %118, %109, %cst_48 {dimension_numbers = #tpu.dot_dimension_numbers<[2], [1], [1], [2], [0, 0, 0, 1, 1, 2], [0], [0]>} : vector<2x64x64xbf16>, vector<2x64x4xbf16>, vector<2x64x4xf32> -> vector<2x64x4xf32>
    "tpu.trace_stop"() : () -> ()
    %120 = tpu.reciprocal %117 {approx = true} : vector<2x64x1xf32> -> vector<2x64x1xf32>
    %121 = vector.broadcast %120 : vector<2x64x1xf32> to vector<2x64x4xf32>
    %122 = arith.mulf %119, %121 : vector<2x64x4xf32>
    %123 = vector.extract_strided_slice %36 {offsets = [0, 0, 20], sizes = [2, 64, 4], strides = [1, 1, 1]} : vector<2x64x32xbf16> to vector<2x64x4xbf16>
    %124 = vector.extract_strided_slice %39 {offsets = [0, 0, 20], sizes = [2, 64, 4], strides = [1, 1, 1]} : vector<2x64x32xbf16> to vector<2x64x4xbf16>
    %125 = vector.extract_strided_slice %42 {offsets = [0, 0, 20], sizes = [2, 64, 4], strides = [1, 1, 1]} : vector<2x64x32xbf16> to vector<2x64x4xbf16>
    "tpu.trace_start"() <{level = 10 : i32, message = "bqd,bkd->bqk"}> : () -> ()
    %cst_49 = arith.constant dense<0.000000e+00> : vector<2x64x64xf32>
    %126 = tpu.matmul %123, %124, %cst_49 {dimension_numbers = #tpu.dot_dimension_numbers<[2], [2], [1], [1], [0, 0, 0, 1, 1, 1], [0], [0]>} : vector<2x64x4xbf16>, vector<2x64x4xbf16>, vector<2x64x64xf32> -> vector<2x64x64xf32>
    "tpu.trace_stop"() : () -> ()
    %cst_50 = arith.constant dense<0xFF800000> : vector<2x64xf32>
    %127 = vector.multi_reduction <maximumf>, %126, %cst_50 [2] : vector<2x64x64xf32> to vector<2x64xf32>
    %128 = vector.shape_cast %127 : vector<2x64xf32> to vector<2x64x1xf32>
    %129 = vector.broadcast %128 : vector<2x64x1xf32> to vector<2x64x64xf32>
    %130 = arith.subf %126, %129 : vector<2x64x64xf32>
    %131 = math.exp %130 : vector<2x64x64xf32>
    %cst_51 = arith.constant dense<0.000000e+00> : vector<2x64xf32>
    %132 = vector.multi_reduction <add>, %131, %cst_51 [2] : vector<2x64x64xf32> to vector<2x64xf32>
    %133 = vector.shape_cast %132 : vector<2x64xf32> to vector<2x64x1xf32>
    %134 = arith.truncf %131 : vector<2x64x64xf32> to vector<2x64x64xbf16>
    "tpu.trace_start"() <{level = 10 : i32, message = "bqk,bkd->bqd"}> : () -> ()
    %cst_52 = arith.constant dense<0.000000e+00> : vector<2x64x4xf32>
    %135 = tpu.matmul %134, %125, %cst_52 {dimension_numbers = #tpu.dot_dimension_numbers<[2], [1], [1], [2], [0, 0, 0, 1, 1, 2], [0], [0]>} : vector<2x64x64xbf16>, vector<2x64x4xbf16>, vector<2x64x4xf32> -> vector<2x64x4xf32>
    "tpu.trace_stop"() : () -> ()
    %136 = tpu.reciprocal %133 {approx = true} : vector<2x64x1xf32> -> vector<2x64x1xf32>
    %137 = vector.broadcast %136 : vector<2x64x1xf32> to vector<2x64x4xf32>
    %138 = arith.mulf %135, %137 : vector<2x64x4xf32>
    %139 = vector.extract_strided_slice %36 {offsets = [0, 0, 24], sizes = [2, 64, 4], strides = [1, 1, 1]} : vector<2x64x32xbf16> to vector<2x64x4xbf16>
    %140 = vector.extract_strided_slice %39 {offsets = [0, 0, 24], sizes = [2, 64, 4], strides = [1, 1, 1]} : vector<2x64x32xbf16> to vector<2x64x4xbf16>
    %141 = vector.extract_strided_slice %42 {offsets = [0, 0, 24], sizes = [2, 64, 4], strides = [1, 1, 1]} : vector<2x64x32xbf16> to vector<2x64x4xbf16>
    "tpu.trace_start"() <{level = 10 : i32, message = "bqd,bkd->bqk"}> : () -> ()
    %cst_53 = arith.constant dense<0.000000e+00> : vector<2x64x64xf32>
    %142 = tpu.matmul %139, %140, %cst_53 {dimension_numbers = #tpu.dot_dimension_numbers<[2], [2], [1], [1], [0, 0, 0, 1, 1, 1], [0], [0]>} : vector<2x64x4xbf16>, vector<2x64x4xbf16>, vector<2x64x64xf32> -> vector<2x64x64xf32>
    "tpu.trace_stop"() : () -> ()
    %cst_54 = arith.constant dense<0xFF800000> : vector<2x64xf32>
    %143 = vector.multi_reduction <maximumf>, %142, %cst_54 [2] : vector<2x64x64xf32> to vector<2x64xf32>
    %144 = vector.shape_cast %143 : vector<2x64xf32> to vector<2x64x1xf32>
    %145 = vector.broadcast %144 : vector<2x64x1xf32> to vector<2x64x64xf32>
    %146 = arith.subf %142, %145 : vector<2x64x64xf32>
    %147 = math.exp %146 : vector<2x64x64xf32>
    %cst_55 = arith.constant dense<0.000000e+00> : vector<2x64xf32>
    %148 = vector.multi_reduction <add>, %147, %cst_55 [2] : vector<2x64x64xf32> to vector<2x64xf32>
    %149 = vector.shape_cast %148 : vector<2x64xf32> to vector<2x64x1xf32>
    %150 = arith.truncf %147 : vector<2x64x64xf32> to vector<2x64x64xbf16>
    "tpu.trace_start"() <{level = 10 : i32, message = "bqk,bkd->bqd"}> : () -> ()
    %cst_56 = arith.constant dense<0.000000e+00> : vector<2x64x4xf32>
    %151 = tpu.matmul %150, %141, %cst_56 {dimension_numbers = #tpu.dot_dimension_numbers<[2], [1], [1], [2], [0, 0, 0, 1, 1, 2], [0], [0]>} : vector<2x64x64xbf16>, vector<2x64x4xbf16>, vector<2x64x4xf32> -> vector<2x64x4xf32>
    "tpu.trace_stop"() : () -> ()
    %152 = tpu.reciprocal %149 {approx = true} : vector<2x64x1xf32> -> vector<2x64x1xf32>
    %153 = vector.broadcast %152 : vector<2x64x1xf32> to vector<2x64x4xf32>
    %154 = arith.mulf %151, %153 : vector<2x64x4xf32>
    %155 = vector.extract_strided_slice %36 {offsets = [0, 0, 28], sizes = [2, 64, 4], strides = [1, 1, 1]} : vector<2x64x32xbf16> to vector<2x64x4xbf16>
    %156 = vector.extract_strided_slice %39 {offsets = [0, 0, 28], sizes = [2, 64, 4], strides = [1, 1, 1]} : vector<2x64x32xbf16> to vector<2x64x4xbf16>
    %157 = vector.extract_strided_slice %42 {offsets = [0, 0, 28], sizes = [2, 64, 4], strides = [1, 1, 1]} : vector<2x64x32xbf16> to vector<2x64x4xbf16>
    "tpu.trace_start"() <{level = 10 : i32, message = "bqd,bkd->bqk"}> : () -> ()
    %cst_57 = arith.constant dense<0.000000e+00> : vector<2x64x64xf32>
    %158 = tpu.matmul %155, %156, %cst_57 {dimension_numbers = #tpu.dot_dimension_numbers<[2], [2], [1], [1], [0, 0, 0, 1, 1, 1], [0], [0]>} : vector<2x64x4xbf16>, vector<2x64x4xbf16>, vector<2x64x64xf32> -> vector<2x64x64xf32>
    "tpu.trace_stop"() : () -> ()
    %cst_58 = arith.constant dense<0xFF800000> : vector<2x64xf32>
    %159 = vector.multi_reduction <maximumf>, %158, %cst_58 [2] : vector<2x64x64xf32> to vector<2x64xf32>
    %160 = vector.shape_cast %159 : vector<2x64xf32> to vector<2x64x1xf32>
    %161 = vector.broadcast %160 : vector<2x64x1xf32> to vector<2x64x64xf32>
    %162 = arith.subf %158, %161 : vector<2x64x64xf32>
    %163 = math.exp %162 : vector<2x64x64xf32>
    %cst_59 = arith.constant dense<0.000000e+00> : vector<2x64xf32>
    %164 = vector.multi_reduction <add>, %163, %cst_59 [2] : vector<2x64x64xf32> to vector<2x64xf32>
    %165 = vector.shape_cast %164 : vector<2x64xf32> to vector<2x64x1xf32>
    %166 = arith.truncf %163 : vector<2x64x64xf32> to vector<2x64x64xbf16>
    "tpu.trace_start"() <{level = 10 : i32, message = "bqk,bkd->bqd"}> : () -> ()
    %cst_60 = arith.constant dense<0.000000e+00> : vector<2x64x4xf32>
    %167 = tpu.matmul %166, %157, %cst_60 {dimension_numbers = #tpu.dot_dimension_numbers<[2], [1], [1], [2], [0, 0, 0, 1, 1, 2], [0], [0]>} : vector<2x64x64xbf16>, vector<2x64x4xbf16>, vector<2x64x4xf32> -> vector<2x64x4xf32>
    "tpu.trace_stop"() : () -> ()
    %168 = tpu.reciprocal %165 {approx = true} : vector<2x64x1xf32> -> vector<2x64x1xf32>
    %169 = vector.broadcast %168 : vector<2x64x1xf32> to vector<2x64x4xf32>
    %170 = arith.mulf %167, %169 : vector<2x64x4xf32>
    %171 = tpu.concatenate %58, %74, %90, %106, %122, %138, %154, %170 in 2 : vector<2x64x4xf32>, vector<2x64x4xf32>, vector<2x64x4xf32>, vector<2x64x4xf32>, vector<2x64x4xf32>, vector<2x64x4xf32>, vector<2x64x4xf32>, vector<2x64x4xf32> -> vector<2x64x32xf32>
    %172 = vector.shape_cast %171 : vector<2x64x32xf32> to vector<128x32xf32>
    %173 = arith.truncf %172 : vector<128x32xf32> to vector<128x32xbf16>
    %c0_61 = arith.constant 0 : index
    %c0_62 = arith.constant 0 : index
    %174 = vector.load %arg12[%c0_61, %c0_62] : memref<32x32xbf16, #tpu.memory_space<vmem>>, vector<32x32xbf16>
    %cst_63 = arith.constant dense<0.000000e+00> : vector<128x32xf32>
    %175 = tpu.matmul %173, %174, %cst_63 {dimension_numbers = #tpu.dot_dimension_numbers<[1], [0], [0], [1], [0, 0, 1, 1], [], []>} : vector<128x32xbf16>, vector<32x32xbf16>, vector<128x32xf32> -> vector<128x32xf32>
    %c0_64 = arith.constant 0 : index
    %c0_65 = arith.constant 0 : index
    %176 = vector.load %arg13[%c0_64, %c0_65] : memref<1x32xf32, #tpu.memory_space<vmem>>, vector<1x32xf32>
    %177 = vector.broadcast %176 : vector<1x32xf32> to vector<128x32xf32>
    %178 = arith.addf %175, %177 : vector<128x32xf32>
    %cst_66 = arith.constant dense<0.000000e+00> : vector<128xf32>
    %179 = vector.multi_reduction <add>, %178, %cst_66 [1] : vector<128x32xf32> to vector<128xf32>
    %180 = vector.shape_cast %179 : vector<128xf32> to vector<128x1xf32>
    %cst_67 = arith.constant 3.200000e+01 : f32
    %181 = vector.broadcast %cst_67 : f32 to vector<128x1xf32>
    %182 = arith.divf %180, %181 : vector<128x1xf32>
    %183 = vector.broadcast %182 : vector<128x1xf32> to vector<128x32xf32>
    %184 = arith.subf %178, %183 : vector<128x32xf32>
    %185 = arith.mulf %184, %184 : vector<128x32xf32>
    %cst_68 = arith.constant dense<0.000000e+00> : vector<128xf32>
    %186 = vector.multi_reduction <add>, %185, %cst_68 [1] : vector<128x32xf32> to vector<128xf32>
    %187 = vector.shape_cast %186 : vector<128xf32> to vector<128x1xf32>
    %cst_69 = arith.constant 3.200000e+01 : f32
    %188 = vector.broadcast %cst_69 : f32 to vector<128x1xf32>
    %189 = arith.divf %187, %188 : vector<128x1xf32>
    %190 = vector.broadcast %182 : vector<128x1xf32> to vector<128x32xf32>
    %191 = arith.subf %178, %190 : vector<128x32xf32>
    %cst_70 = arith.constant 9.99999974E-6 : f32
    %192 = vector.broadcast %cst_70 : f32 to vector<128x1xf32>
    %193 = arith.addf %189, %192 : vector<128x1xf32>
    %194 = math.rsqrt %193 : vector<128x1xf32>
    %195 = vector.broadcast %194 : vector<128x1xf32> to vector<128x32xf32>
    %196 = arith.mulf %191, %195 : vector<128x32xf32>
    %c0_71 = arith.constant 0 : index
    %c0_72 = arith.constant 0 : index
    %197 = vector.load %arg14[%c0_71, %c0_72] : memref<1x32xf32, #tpu.memory_space<vmem>>, vector<1x32xf32>
    %198 = vector.broadcast %197 : vector<1x32xf32> to vector<128x32xf32>
    %199 = arith.mulf %196, %198 : vector<128x32xf32>
    %c0_73 = arith.constant 0 : index
    %c0_74 = arith.constant 0 : index
    %200 = vector.load %arg15[%c0_73, %c0_74] : memref<1x32xf32, #tpu.memory_space<vmem>>, vector<1x32xf32>
    %201 = vector.broadcast %200 : vector<1x32xf32> to vector<128x32xf32>
    %202 = arith.addf %199, %201 : vector<128x32xf32>
    %203 = arith.truncf %202 : vector<128x32xf32> to vector<128x32xbf16>
    %c0_75 = arith.constant 0 : index
    %c0_76 = arith.constant 0 : index
    %204 = vector.load %arg16[%c0_75, %c0_76] : memref<32x1536xbf16, #tpu.memory_space<vmem>>, vector<32x1536xbf16>
    %cst_77 = arith.constant dense<0.000000e+00> : vector<128x1536xf32>
    %205 = tpu.matmul %203, %204, %cst_77 {dimension_numbers = #tpu.dot_dimension_numbers<[1], [0], [0], [1], [0, 0, 1, 1], [], []>} : vector<128x32xbf16>, vector<32x1536xbf16>, vector<128x1536xf32> -> vector<128x1536xf32>
    %c0_78 = arith.constant 0 : index
    %c0_79 = arith.constant 0 : index
    %206 = vector.load %arg17[%c0_78, %c0_79] : memref<1x1536xf32, #tpu.memory_space<vmem>>, vector<1x1536xf32>
    %207 = vector.broadcast %206 : vector<1x1536xf32> to vector<128x1536xf32>
    %208 = arith.addf %205, %207 : vector<128x1536xf32>
    %cst_80 = arith.constant 0.000000e+00 : f32
    %209 = vector.broadcast %cst_80 : f32 to vector<128x1536xf32>
    %210 = arith.maximumf %208, %209 : vector<128x1536xf32>
    %211 = arith.truncf %210 : vector<128x1536xf32> to vector<128x1536xbf16>
    %c0_81 = arith.constant 0 : index
    %c0_82 = arith.constant 0 : index
    %212 = vector.load %arg18[%c0_81, %c0_82] : memref<1536x32xbf16, #tpu.memory_space<vmem>>, vector<1536x32xbf16>
    %cst_83 = arith.constant dense<0.000000e+00> : vector<128x32xf32>
    %213 = tpu.matmul %211, %212, %cst_83 {dimension_numbers = #tpu.dot_dimension_numbers<[1], [0], [0], [1], [0, 0, 1, 1], [], []>} : vector<128x1536xbf16>, vector<1536x32xbf16>, vector<128x32xf32> -> vector<128x32xf32>
    %214 = arith.addf %202, %213 : vector<128x32xf32>
    %c0_84 = arith.constant 0 : index
    %c0_85 = arith.constant 0 : index
    %215 = vector.load %arg19[%c0_84, %c0_85] : memref<1x32xf32, #tpu.memory_space<vmem>>, vector<1x32xf32>
    %216 = vector.broadcast %215 : vector<1x32xf32> to vector<128x32xf32>
    %217 = arith.addf %214, %216 : vector<128x32xf32>
    %218 = vector.shape_cast %217 : vector<128x32xf32> to vector<2x64x32xf32>
    %c0_86 = arith.constant 0 : index
    %c0_87 = arith.constant 0 : index
    %c0_88 = arith.constant 0 : index
    %219 = vector.load %arg20[%c0_86, %c0_87, %c0_88] : memref<2x64x32xf32, #tpu.memory_space<vmem>>, vector<2x64x32xf32>
    tpu.vector_store %arg20[%c0_86, %c0_87, %c0_88], %218 {strides = array<i32>} : memref<2x64x32xf32, #tpu.memory_space<vmem>>, vector<2x64x32xf32>,
    return
  }
  func.func @transform_0(%arg0: i32) -> (i32, i32, i32) {
    %c0_i32 = arith.constant 0 : i32
    %c0_i32_0 = arith.constant 0 : i32
    %c0_i32_1 = arith.constant 0 : i32
    return %arg0, %c0_i32, %c0_i32_0 : i32, i32, i32
  }
  func.func @transform_1(%arg0: i32) -> (i32, i32, i32) {
    %c0_i32 = arith.constant 0 : i32
    %c0_i32_0 = arith.constant 0 : i32
    %c0_i32_1 = arith.constant 0 : i32
    return %arg0, %c0_i32, %c0_i32_0 : i32, i32, i32
  }
  func.func @transform_2(%arg0: i32) -> (i32, i32, i32) {
    %c0_i32 = arith.constant 0 : i32
    %c0_i32_0 = arith.constant 0 : i32
    %c0_i32_1 = arith.constant 0 : i32
    %c0_i32_2 = arith.constant 0 : i32
    return %c0_i32, %c0_i32_0, %c0_i32_1 : i32, i32, i32
  }
  func.func @transform_3(%arg0: i32) -> (i32, i32) {
    %c0_i32 = arith.constant 0 : i32
    %c0_i32_0 = arith.constant 0 : i32
    %c0_i32_1 = arith.constant 0 : i32
    return %c0_i32, %c0_i32_0 : i32, i32
  }
  func.func @transform_4(%arg0: i32) -> (i32, i32) {
    %c0_i32 = arith.constant 0 : i32
    %c0_i32_0 = arith.constant 0 : i32
    %c0_i32_1 = arith.constant 0 : i32
    return %c0_i32, %c0_i32_0 : i32, i32
  }
  func.func @transform_5(%arg0: i32) -> (i32, i32) {
    %c0_i32 = arith.constant 0 : i32
    %c0_i32_0 = arith.constant 0 : i32
    %c0_i32_1 = arith.constant 0 : i32
    return %c0_i32, %c0_i32_0 : i32, i32
  }
  func.func @transform_6(%arg0: i32) -> (i32, i32) {
    %c0_i32 = arith.constant 0 : i32
    %c0_i32_0 = arith.constant 0 : i32
    %c0_i32_1 = arith.constant 0 : i32
    return %c0_i32, %c0_i32_0 : i32, i32
  }
  func.func @transform_7(%arg0: i32) -> (i32, i32) {
    %c0_i32 = arith.constant 0 : i32
    %c0_i32_0 = arith.constant 0 : i32
    %c0_i32_1 = arith.constant 0 : i32
    return %c0_i32, %c0_i32_0 : i32, i32
  }
  func.func @transform_8(%arg0: i32) -> (i32, i32) {
    %c0_i32 = arith.constant 0 : i32
    %c0_i32_0 = arith.constant 0 : i32
    %c0_i32_1 = arith.constant 0 : i32
    return %c0_i32, %c0_i32_0 : i32, i32
  }
  func.func @transform_9(%arg0: i32) -> (i32, i32) {
    %c0_i32 = arith.constant 0 : i32
    %c0_i32_0 = arith.constant 0 : i32
    %c0_i32_1 = arith.constant 0 : i32
    return %c0_i32, %c0_i32_0 : i32, i32
  }
  func.func @transform_10(%arg0: i32) -> (i32, i32) {
    %c0_i32 = arith.constant 0 : i32
    %c0_i32_0 = arith.constant 0 : i32
    %c0_i32_1 = arith.constant 0 : i32
    return %c0_i32, %c0_i32_0 : i32, i32
  }
  func.func @transform_11(%arg0: i32) -> (i32, i32) {
    %c0_i32 = arith.constant 0 : i32
    %c0_i32_0 = arith.constant 0 : i32
    %c0_i32_1 = arith.constant 0 : i32
    return %c0_i32, %c0_i32_0 : i32, i32
  }
  func.func @transform_12(%arg0: i32) -> (i32, i32) {
    %c0_i32 = arith.constant 0 : i32
    %c0_i32_0 = arith.constant 0 : i32
    %c0_i32_1 = arith.constant 0 : i32
    return %c0_i32, %c0_i32_0 : i32, i32
  }
  func.func @transform_13(%arg0: i32) -> (i32, i32) {
    %c0_i32 = arith.constant 0 : i32
    %c0_i32_0 = arith.constant 0 : i32
    %c0_i32_1 = arith.constant 0 : i32
    return %c0_i32, %c0_i32_0 : i32, i32
  }
  func.func @transform_14(%arg0: i32) -> (i32, i32) {
    %c0_i32 = arith.constant 0 : i32
    %c0_i32_0 = arith.constant 0 : i32
    %c0_i32_1 = arith.constant 0 : i32
    return %c0_i32, %c0_i32_0 : i32, i32
  }
  func.func @transform_15(%arg0: i32) -> (i32, i32) {
    %c0_i32 = arith.constant 0 : i32
    %c0_i32_0 = arith.constant 0 : i32
    %c0_i32_1 = arith.constant 0 : i32
    return %c0_i32, %c0_i32_0 : i32, i32
  }
  func.func @transform_16(%arg0: i32) -> (i32, i32) {
    %c0_i32 = arith.constant 0 : i32
    %c0_i32_0 = arith.constant 0 : i32
    %c0_i32_1 = arith.constant 0 : i32
    return %c0_i32, %c0_i32_0 : i32, i32
  }
  func.func @transform_17(%arg0: i32) -> (i32, i32) {
    %c0_i32 = arith.constant 0 : i32
    %c0_i32_0 = arith.constant 0 : i32
    %c0_i32_1 = arith.constant 0 : i32
    return %c0_i32, %c0_i32_0 : i32, i32
  }
  func.func @transform_18(%arg0: i32) -> (i32, i32) {
    %c0_i32 = arith.constant 0 : i32
    %c0_i32_0 = arith.constant 0 : i32
    %c0_i32_1 = arith.constant 0 : i32
    return %c0_i32, %c0_i32_0 : i32, i32
  }
  func.func @transform_19(%arg0: i32) -> (i32, i32, i32) {
    %c0_i32 = arith.constant 0 : i32
    %c0_i32_0 = arith.constant 0 : i32
    %c0_i32_1 = arith.constant 0 : i32
    return %arg0, %c0_i32, %c0_i32_0 : i32, i32, i32
  }
}

</mosaic_0001>

<bundles_post_ra>
// kernel: attention_projector_forward.1
= control target key start
LH: loop header
LB: loop body
LE: loop exit
PB: predicated region body
PF: predicated region fallthrough
CT: control target
= control target key end

     0   :  { %s18402_s0 = inlined_call_operand.vmem [shape: bf16[4,64,288], index: 0, kind: input, shape index: {}]   ;;  %s18403_s1 = inlined_call_operand.vmem [shape: bf16[4,64,288], index: 1, kind: input, shape index: {}]   ;;  %s18404_s2 = inlined_call_operand.vmem [shape: f32[1,64,32], index: 2, kind: input, shape index: {}]   ;;  %s18405_s3 = inlined_call_operand.vmem [shape: bf16[288,32], index: 3, kind: input, shape index: {}]   ;;  %s18406_s4 = inlined_call_operand.vmem [shape: f32[1,32], index: 4, kind: input, shape index: {}]   ;;  %s18407_s5 = inlined_call_operand.vmem [shape: bf16[288,32], index: 5, kind: input, shape index: {}]   ;;  %s18408_s6 = inlined_call_operand.vmem [shape: f32[1,32], index: 6, kind: input, shape index: {}]   ;;  %s18409_s7 = inlined_call_operand.vmem [shape: bf16[32,32], index: 7, kind: input, shape index: {}]   ;;  %s18410_s8 = inlined_call_operand.vmem [shape: f32[1,32], index: 8, kind: input, shape index: {}]   ;;  %s18411_s9 = inlined_call_operand.vmem [shape: bf16[32,64], index: 9, kind: input, shape index: {}]   ;;  %s18412_s10 = inlined_call_operand.vmem [shape: f32[1,64], index: 10, kind: input, shape index: {}]   ;;  %s18413_s11 = inlined_call_operand.vmem [shape: bf16[32,32], index: 11, kind: input, shape index: {}]   ;;  %s18414_s12 = inlined_call_operand.vmem [shape: f32[1,32], index: 12, kind: input, shape index: {}]   ;;  %s18415_s13 = inlined_call_operand.vmem [shape: f32[1,32], index: 13, kind: input, shape index: {}]   ;;  %s18416_s14 = inlined_call_operand.vmem [shape: f32[1,32], index: 14, kind: input, shape index: {}]   ;;  %s18417_s15 = inlined_call_operand.vmem [shape: bf16[32,1536], index: 15, kind: input, shape index: {}]   ;;  %s18418_s16 = inlined_call_operand.vmem [shape: f32[1,1536], index: 16, kind: input, shape index: {}]   ;;  %s18419_s17 = inlined_call_operand.vmem [shape: bf16[1536,32], index: 17, kind: input, shape index: {}]   ;;  %s18420_s18 = inlined_call_operand.vmem [shape: f32[1,32], index: 18, kind: input, shape index: {}]   ;;  %s18421_s19 = inlined_call_operand.vmem [shape: f32[4,64,32], index: 19, kind: output, shape index: {}]  }
   0x1   :  { %18550 = sst [smem:[#allocation171_spill]] %s18402_s0  ;;  %s13444_s0 = smov 0  }
   0x2   :  { %18551 = sst [smem:[#allocation172_spill]] %s18403_s1 }
   0x3   :  { %18552 = sst [smem:[#allocation173_spill]] %s18404_s2 }
   0x4   :  { %18553 = sst [smem:[#allocation174_spill]] %s18405_s3 }
   0x5 LB: > { %s10272_s30 = sadd.s32 4294967295, %s13319_s0   ;;  %p10276_p0 = scmp.ge.s32.totalorder %s13319_s0, 1  ;;  %s13319_s0 = sphi %s13444_s0, %s29_s0  }
   0x6   : > { %p551_p1 = scmp.lt.s32.totalorder %s13319_s0, 3 }
   0x8   : > { %p552_p2 = pnand %p10276_p0, %p551_p1 }
   0xa   : > { %555 = sbr.rel (%p552_p2) target bundleno = 5699 (0x1643), region = 96 }
  0x11   : > { %s18554_s1 = sld [smem:[#allocation174_spill]]  ;;  %s10277_s22 = sshll.u32 %s10272_s30, 1  ;;  %vm972_vm0 = vcmask 261120   ;;  %v12555_v20 = vld [vmem:[%s18407_s5 + $0x40] sm:$0xff]   ;;  %v12559_v24 = vld [vmem:[%s18407_s5 + $0x48] sm:$0xff]   ;;  %v12564_v30 = vld [vmem:[%s18407_s5 + $0x50] sm:$0xff]  }
  0x12   : > { %p616_p3 = scmp.lt.s32.totalorder %s10277_s22, 3  ;;  %s18555_s21 = sld [smem:[#allocation171_spill]]  ;;  %v12556_v21 = vld [vmem:[%s18407_s5] sm:$0xff]   ;;  %v12561_v25 = vld [vmem:[%s18407_s5 + $0x8] sm:$0xff]   ;;  %v12565_v31 = vld [vmem:[%s18407_s5 + $0x10] sm:$0xff]   ;;  %vm2056_vm1 = vcmask 31744  }
  0x13   : > { %v13530_v23 = vld [vmem:[%s18407_s5 + $0x80] sm:$0xff]   ;;  %v12568_v32 = vld [vmem:[%s18407_s5 + $0x58] sm:$0xff]   ;;  %v12577_v40 = vld [vmem:[%s18407_s5 + $0x68] sm:$0xff]   ;;  %s18556_s20 = sld [smem:[#allocation172_spill]]  ;;  %s13321_s23 = smov 96   ;;  %vm2235_vm2 = vcmask 523264  }
  0x14   : > { %s19060_s22 = smov (!%p616_p3, %s10277_s22), 3  ;;  %v12570_v33 = vld [vmem:[%s18407_s5 + $0x18] sm:$0xff]   ;;  %v12573_v37 = vld [vmem:[%s18407_s5 + $0x60] sm:$0xff]   ;;  %v12579_v41 = vld [vmem:[%s18407_s5 + $0x28] sm:$0xff]   ;;  %s13322_s25 = smov 124   ;;  %vm7082_vm3 = vcmask 64512  }
  0x15   : > { %s12219_s24 = smul.u32 96, %s19060_s22  ;;  %v12574_v38 = vld [vmem:[%s18407_s5 + $0x20] sm:$0xff]   ;;  %v12582_v45 = vld [vmem:[%s18407_s5 + $0x70] sm:$0xff]   ;;  %v12586_v48 = vld [vmem:[%s18407_s5 + $0x78] sm:$0xff]   ;;  %s13324_s27 = smov 120   ;;  %vm7099_vm4 = vcmask 97280  }
  0x16   : > { %v12583_v46 = vld [vmem:[%s18407_s5 + $0x30] sm:$0xff]   ;;  %v12588_v49 = vld [vmem:[%s18407_s5 + $0x38] sm:$0xff]   ;;  %v12589_v50 = vld [vmem:[%s18407_s5 + $0x88] sm:$0xff]   ;;  %s13325_s28 = smov 88   ;;  %s13326_s29 = smov 116   ;;  %vm7116_vm5 = vcmask 130048  }
  0x17   : > { %v12531_v0 = vld [vmem:[%s18554_s1 + $0x40] sm:$0xff]   ;;  %v12533_v2 = vld [vmem:[%s18554_s1 + $0x48] sm:$0xff]   ;;  %v12535_v4 = vld [vmem:[%s18554_s1 + $0x50] sm:$0xff]   ;;  %s13327_s30 = smov 84   ;;  %s13332_s3 = smov 104   ;;  %vm7133_vm6 = vcmask 162816  }
  0x18   : > { %v12532_v1 = vld [vmem:[%s18554_s1] sm:$0xff]   ;;  %10721 = vmatprep.subr.bf16.mxu0 %v12531_v0  ;;  %v12534_v3 = vld [vmem:[%s18554_s1 + $0x8] sm:$0xff]   ;;  %v12536_v5 = vld [vmem:[%s18554_s1 + $0x10] sm:$0xff]   ;;  %s13493_s2 = scalar_lea.vmem %s18555_s21, %s12219_s24  ;;  %s13333_s26 = smov 72   ;;  %vm7150_vm7 = vcmask 195584   ;;  %vm7167_vm8 = vcmask 228352  }
  0x19   : > { %10722 = vmatpush3.bf16.msra.mxu0 %v12532_v1  ;;  %v12537_v6 = vld [vmem:[%s18554_s1 + $0x58] sm:$0xff]   ;;  %v12539_v8 = vld [vmem:[%s18554_s1 + $0x60] sm:$0xff]   ;;  %v12541_v11 = vld [vmem:[%s18554_s1 + $0x68] sm:$0xff]   ;;  %s13595_s21 = scalar_lea.vmem %s18556_s20, %s12219_s24  ;;  %s18557_s24 = sld [smem:[#allocation173_spill]] }
  0x1a   : > { %10723 = vmatprep.subr.bf16.mxu0 %v12533_v2  ;;  %v12538_v7 = vld [vmem:[%s18554_s1 + $0x18] sm:$0xff]   ;;  %v12545_v9 = vld [vmem:[%s18554_s1 + $0x80] sm:$0xff]   ;;  %v12542_v12 = vld [vmem:[%s18554_s1 + $0x28] sm:$0xff]   ;;  %s13328_s20 = smov 112  }
  0x1b   : > { %v12540_v10 = vld [vmem:[%s18554_s1 + $0x20] sm:$0xff]   ;;  %11539 = vmatprep.subr.bf16.mxu1 %v12545_v9  ;;  %v12551_v14 = vld [vmem:[%s18554_s1 + $0x88] sm:$0xff]   ;;  %v12543_v15 = vld [vmem:[%s18554_s1 + $0x70] sm:$0xff]  }
  0x1c   : > { %11540 = vmatpush3.bf16.msra.mxu1 %v12545_v9  ;;  %v12550_v13 = vld [vmem:[%s13493_s2 + $0x4] ss:$12 sps:$4 sm:$0xff]   ;;  %v12553_v17 = vld [vmem:[%s13493_s2 + $0x8] ss:$12 sps:$4 sm:$0xff]   ;;  %v12546_v18 = vld [vmem:[%s18554_s1 + $0x78] sm:$0xff]  }
  0x1d   : > { %10724 = vmatpush3.bf16.msra.mxu0 %v12534_v3  ;;  %1029 = vmatprep.mubr.bf16.mxu0 %v12550_v13  ;;  %v12544_v16 = vld [vmem:[%s18554_s1 + $0x30] sm:$0xff]   ;;  %v12554_v19 = vld [vmem:[%s13493_s2 + $0x20] ss:$12 sps:$4 sm:$0xff]   ;;  %v12547_v22 = vld [vmem:[%s18554_s1 + $0x38] sm:$0xff]  }
  0x1e   : > { %10725 = vmatprep.subr.bf16.mxu0 %v12535_v4  ;;  %11541 = vmatprep.subr.bf16.mxu1 %v12551_v14  ;;  %v12548_v26 = vld [vmem:[%s13493_s2] ss:$12 sps:$4 sm:$0xff]   ;;  %v12562_v27 = vld [vmem:[%s13493_s2 + $0x38] ss:$12 sps:$4 sm:$0xff]   ;;  %v12557_v28 = vld [vmem:[%s13493_s2 + $0x1c] ss:$12 sps:$4 sm:$0xff]  }
  0x1f   : > { %11543 = vmatprep.mubr.msk.bf16.mxu1 %vm972_vm0, %v12553_v17  ;;  %v12563_v29 = vld [vmem:[%s13493_s2 + $0x50] ss:$12 sps:$4 sm:$0xff]   ;;  %v12571_v34 = vld [vmem:[%s13493_s2 + $0x68] ss:$12 sps:$4 sm:$0xff]   ;;  %v12560_v35 = vld [vmem:[%s13493_s2 + $0x18] ss:$12 sps:$4 sm:$0xff]  }
  0x20   : > { %11542 = vmatpush3.bf16.msra.mxu1 %v12551_v14  ;;  %v12572_v36 = vld [vmem:[%s13493_s2 + $0x80] ss:$12 sps:$4 sm:$0xff]   ;;  %v12580_v42 = vld [vmem:[%s13493_s2 + $0x98] ss:$12 sps:$4 sm:$0xff]   ;;  %v12569_v43 = vld [vmem:[%s13493_s2 + $0x30] ss:$12 sps:$4 sm:$0xff]  }
  0x21   : > { %10726 = vmatpush3.bf16.msra.mxu0 %v12536_v5  ;;  %10795 = vmatprep.subr.bf16.mxu1 %v12555_v20  ;;  %v12566_v39 = vld [vmem:[%s13493_s2 + $0x34] ss:$12 sps:$4 sm:$0xff]   ;;  %v12581_v44 = vld [vmem:[%s13493_s2 + $0xb0] ss:$12 sps:$4 sm:$0xff]   ;;  %v12575_v47 = vld [vmem:[%s13493_s2 + $0x4c] ss:$12 sps:$4 sm:$0xff]  }
  0x22   : > { %10727 = vmatprep.subr.bf16.mxu0 %v12537_v6  ;;  %v12592_v51 = vld [vmem:[%s13595_s21 + $0x4] ss:$12 sps:$4 sm:$0xff]   ;;  %v12590_v52 = vld [vmem:[%s13595_s21] ss:$12 sps:$4 sm:$0xff]   ;;  %v12578_v53 = vld [vmem:[%s13493_s2 + $0x48] ss:$12 sps:$4 sm:$0xff]  }
  0x23   : > { %11544 = vmatmul.mubr.msk.bf16.vlgmr.msra.gmra.mrb[0].mxu1 %vm972_vm0, %v12554_v19  ;;  %v12596_v54 = vld [vmem:[%s13595_s21 + $0x1c] ss:$12 sps:$4 sm:$0xff]   ;;  %v12584_v55 = vld [vmem:[%s13493_s2 + $0x64] ss:$12 sps:$4 sm:$0xff]   ;;  %v12587_v56 = vld [vmem:[%s13493_s2 + $0x60] ss:$12 sps:$4 sm:$0xff]  }
  0x24   : > { %10796 = vmatpush3.bf16.msra.mxu1 %v12556_v21  ;;  %11547 = vmatprep.mubr.msk.bf16.mxu1 %vm972_vm0, %v12562_v27  ;;  %v12598_v57 = vld [vmem:[%s13595_s21 + $0x18] ss:$12 sps:$4 sm:$0xff]   ;;  %v12602_v58 = vld [vmem:[%s13595_s21 + $0x34] ss:$12 sps:$4 sm:$0xff]   ;;  %v12593_v59 = vld [vmem:[%s13493_s2 + $0x7c] ss:$12 sps:$4 sm:$0xff]  }
  0x25   : > { %10728 = vmatpush3.bf16.msra.mxu0 %v12538_v7  ;;  %10797 = vmatprep.subr.bf16.mxu1 %v12559_v24  ;;  %v12595_v60 = vld [vmem:[%s13493_s2 + $0x78] ss:$12 sps:$4 sm:$0xff]   ;;  %v12604_v61 = vld [vmem:[%s13595_s21 + $0x30] ss:$12 sps:$4 sm:$0xff]   ;;  %v12599_v63 = vld [vmem:[%s13493_s2 + $0x94] ss:$12 sps:$4 sm:$0xff]  }
  0x26   : > { %10729 = vmatprep.subr.bf16.mxu0 %v12539_v8  ;;  %v12608_v62 = vld [vmem:[%s13595_s21 + $0x4c] ss:$12 sps:$4 sm:$0xff]   ;;  %v12610_v0 = vld [vmem:[%s13595_s21 + $0x48] ss:$12 sps:$4 sm:$0xff]   ;;  %v12601_v1 = vld [vmem:[%s13493_s2 + $0x90] ss:$12 sps:$4 sm:$0xff]  }
  0x27   : > { %v12613_v2 = vld [vmem:[%s13595_s21 + $0x64] ss:$12 sps:$4 sm:$0xff]   ;;  %v12605_v3 = vld [vmem:[%s13493_s2 + $0xac] ss:$12 sps:$4 sm:$0xff]   ;;  %v12607_v5 = vld [vmem:[%s13493_s2 + $0xa8] ss:$12 sps:$4 sm:$0xff]  }
  0x28   : > { %10798 = vmatpush3.bf16.msra.mxu1 %v12561_v25  ;;  %v12615_v4 = vld [vmem:[%s13595_s21 + $0x60] ss:$12 sps:$4 sm:$0xff]   ;;  %v12618_v6 = vld [vmem:[%s13595_s21 + $0x7c] ss:$12 sps:$4 sm:$0xff]   ;;  %v12620_v8 = vld [vmem:[%s13595_s21 + $0x78] ss:$12 sps:$4 sm:$0xff]  }
  0x29   : > { %10730 = vmatpush3.bf16.msra.mxu0 %v12540_v10  ;;  %10799 = vmatprep.subr.bf16.mxu1 %v12564_v30  ;;  %v12611_v7 = vld [vmem:[%s13595_s21 + $0x8] ss:$12 sps:$4 sm:$0xff]   ;;  %v12612_v9 = vld [vmem:[%s13595_s21 + $0x20] ss:$12 sps:$4 sm:$0xff]   ;;  %v12617_v13 = vld [vmem:[%s13595_s21 + $0x50] ss:$12 sps:$4 sm:$0xff]  }
  0x2a   : > { %10731 = vmatprep.subr.bf16.mxu0 %v12541_v11  ;;  %v12623_v10 = vld [vmem:[%s13595_s21 + $0x94] ss:$12 sps:$4 sm:$0xff]   ;;  %v12616_v11 = vld [vmem:[%s13595_s21 + $0x38] ss:$12 sps:$4 sm:$0xff]   ;;  %v12630_v19 = vld [vmem:[%s13595_s21 + $0xb0] ss:$12 sps:$4 sm:$0xff]  }
  0x2b   : > { %11548 = vmatmul.mubr.msk.bf16.gmra.mrb[4].mxu1 %vm972_vm0, %v12563_v29  ;;  %v12626_v14 = vld [vmem:[%s13595_s21 + $0xac] ss:$12 sps:$4 sm:$0xff]   ;;  %v12631_v20 = vld [vmem:[%s18411_s9] sm:$0xff]   ;;  %s13323_s2 = smov 92  }
  0x2c   : > { %10800 = vmatpush3.bf16.msra.mxu1 %v12565_v31  ;;  %11551 = vmatprep.mubr.msk.bf16.mxu1 %vm972_vm0, %v12571_v34  ;;  %v12622_v17 = vld [vmem:[%s13595_s21 + $0x80] ss:$12 sps:$4 sm:$0xff]  }
  0x2d   : > { %10732 = vmatpush3.bf16.msra.mxu0 %v12542_v12  ;;  %10801 = vmatprep.subr.bf16.mxu1 %v12568_v32  ;;  %v12625_v12 = vld [vmem:[%s13595_s21 + $0x90] ss:$12 sps:$4 sm:$0xff]   ;;  %v12632_v21 = vld [vmem:[%s18411_s9 + $0x8] sm:$0xff]   ;;  %v13664_v32 = vld [vmem:[%s18406_s4] ss:$0 sm:$0xff] }
  0x2e   : > { %10733 = vmatprep.subr.bf16.mxu0 %v12543_v15  ;;  %v12621_v15 = vld [vmem:[%s13595_s21 + $0x68] ss:$12 sps:$4 sm:$0xff]  }
  0x30   : > { %10802 = vmatpush3.bf16.msra.mxu1 %v12570_v33 }
  0x31   : > { %10734 = vmatpush3.bf16.msra.mxu0 %v12544_v16  ;;  %10803 = vmatprep.subr.bf16.mxu1 %v12573_v37  ;;  %v12628_v16 = vld [vmem:[%s13595_s21 + $0xa8] ss:$12 sps:$4 sm:$0xff]  }
  0x32   : > { %10735 = vmatprep.subr.bf16.mxu0 %v12546_v18  ;;  %v12629_v18 = vld [vmem:[%s13595_s21 + $0x98] ss:$12 sps:$4 sm:$0xff]   ;;  %s13329_s21 = smov 80  }
  0x33   : > { %11552 = vmatmul.mubr.msk.bf16.gmra.mrb[8].mxu1 %vm972_vm0, %v12572_v36 }
  0x34   : > { %10804 = vmatpush3.bf16.msra.mxu1 %v12574_v38  ;;  %11555 = vmatprep.mubr.msk.bf16.mxu1 %vm972_vm0, %v12580_v42 }
  0x35   : > { %10736 = vmatpush3.bf16.msra.mxu0 %v12547_v22  ;;  %10805 = vmatprep.subr.bf16.mxu1 %v12577_v40  ;;  %v12633_v22 = vld [vmem:[%s18409_s7] sm:$0xff]  }
  0x36   : > { %11559 = vmatprep.subr.bf16.mxu0 %v13530_v23 }
  0x38   : > { %1030 = vmatmul.mubr.bf16.vlgmr.msra.gmra.mrb[0].mxu0 %v12548_v26  ;;  %10806 = vmatpush3.bf16.msra.mxu1 %v12579_v41 }
  0x39   : > { %11560 = vmatpush3.bf16.msra.mxu0 %v13530_v23  ;;  %1037 = vmatprep.mubr.bf16.mxu0 %v12557_v28 }
  0x3a   : > { %10807 = vmatprep.subr.bf16.mxu1 %v12582_v45  ;;  %11561 = vmatprep.subr.bf16.mxu0 %v12589_v50 }
  0x3b   : > { %11556 = vmatmul.mubr.msk.bf16.gmra.mrb[12].mxu1 %vm972_vm0, %v12581_v44 }
  0x3c   : > { %10808 = vmatpush3.bf16.msra.mxu1 %v12583_v46  ;;  %1558 = vmatprep.mubr.bf16.mxu1 %v12592_v51 }
  0x3d   : > { %10809 = vmatprep.subr.bf16.mxu1 %v12586_v48  ;;  %11562 = vmatpush3.bf16.msra.mxu0 %v12589_v50  ;;  %v13682_v48 = vld [vmem:[%s18557_s24 + $0x8] sm:$0xff] }
  0x3e   : > { %11599 = vmatprep.subr.bf16.mxu0 %v12631_v20 }
  0x40   : > { %1038 = vmatmul.mubr.bf16.gmra.mrb[4].mxu0 %v12560_v35  ;;  %10810 = vmatpush3.bf16.msra.mxu1 %v12588_v49 }
  0x41   : > { %1045 = vmatprep.mubr.bf16.mxu0 %v12566_v39  ;;  %12151 = vmatprep.subr.bf16.mxu1 %v13530_v23 }
  0x43   : > { %1559 = vmatmul.mubr.bf16.vlgmr.msra.gmra.mrb[16].mxu1 %v12590_v52 }
  0x44   : > { %1566 = vmatprep.mubr.bf16.mxu1 %v12596_v54  ;;  %12153 = vmatpush3.bf16.msra.mxu1 %v13530_v23  ;;  %v12634_v23 = vld [vmem:[%s18409_s7 + $0x8] sm:$0xff]  }
  0x45   : > { %12152 = vmatprep.subr.bf16.mxu1 %v12589_v50 }
  0x48   : > { %1046 = vmatmul.mubr.bf16.gmra.mrb[8].mxu0 %v12569_v43  ;;  %12154 = vmatpush3.bf16.msra.mxu1 %v12589_v50 }
  0x49   : > { %1053 = vmatprep.mubr.bf16.mxu0 %v12575_v47  ;;  %11579 = vmatprep.subr.bf16.mxu1 %v12633_v22  ;;  %v13677_v47 = vld [vmem:[%s18557_s24] sm:$0xff] }
  0x4b   : > { %1567 = vmatmul.mubr.bf16.gmra.mrb[20].mxu1 %v12598_v57 }
  0x4c   : > { %1574 = vmatprep.mubr.bf16.mxu1 %v12602_v58 }
  0x50   : > { %1054 = vmatmul.mubr.bf16.gmra.mrb[12].mxu0 %v12578_v53 }
  0x51   : > { %1061 = vmatprep.mubr.bf16.mxu0 %v12584_v55 }
  0x53   : > { %1575 = vmatmul.mubr.bf16.gmra.mrb[24].mxu1 %v12604_v61 }
  0x54   : > { %1582 = vmatprep.mubr.bf16.mxu1 %v12608_v62 }
  0x58   : > { %1062 = vmatmul.mubr.bf16.gmra.mrb[16].mxu0 %v12587_v56 }
  0x59   : > { %1069 = vmatprep.mubr.bf16.mxu0 %v12593_v59 }
  0x5b   : > { %1583 = vmatmul.mubr.bf16.gmra.mrb[28].mxu1 %v12610_v0 }
  0x5c   : > { %1590 = vmatprep.mubr.bf16.mxu1 %v12613_v2 }
  0x60   : > { %1070 = vmatmul.mubr.bf16.gmra.mrb[20].mxu0 %v12595_v60 }
  0x61   : > { %1077 = vmatprep.mubr.bf16.mxu0 %v12599_v63 }
  0x63   : > { %1591 = vmatmul.mubr.bf16.gmra.mrb[32].mxu1 %v12615_v4  ;;  %v13700_v4 = vld [vmem:[%s18557_s24 + $0x10] sm:$0xff] }
  0x64   : > { %1598 = vmatprep.mubr.bf16.mxu1 %v12618_v6 }
  0x68   : > { %1078 = vmatmul.mubr.bf16.gmra.mrb[24].mxu0 %v12601_v1 }
  0x69   : > { %1085 = vmatprep.mubr.bf16.mxu0 %v12605_v3 }
  0x6b   : > { %1599 = vmatmul.mubr.bf16.gmra.mrb[36].mxu1 %v12620_v8 }
  0x6c   : > { %1606 = vmatprep.mubr.bf16.mxu1 %v12623_v10 }
  0x70   : > { %1086 = vmatmul.mubr.bf16.gmra.mrb[28].mxu0 %v12607_v5  ;;  %v13705_v5 = vld [vmem:[%s18557_s24 + $0x18] sm:$0xff] }
  0x71   : > { %11563 = vmatprep.mubr.msk.bf16.mxu0 %vm972_vm0, %v12611_v7 }
  0x73   : > { %1607 = vmatmul.mubr.bf16.gmra.mrb[40].mxu1 %v12625_v12 }
  0x74   : > { %1614 = vmatprep.mubr.bf16.mxu1 %v12626_v14 }
  0x78   : > { %11564 = vmatmul.mubr.msk.bf16.vlgmr.msra.gmra.mrb[32].mxu0 %vm972_vm0, %v12612_v9 }
  0x79   : > { %11567 = vmatprep.mubr.msk.bf16.mxu0 %vm972_vm0, %v12616_v11  ;;  %11600 = vmatpush3.bf16.msra.mxu0 %v12631_v20 }
  0x7a   : > { %11601 = vmatprep.subr.bf16.mxu0 %v12632_v21 }
  0x7b   : > { %1615 = vmatmul.mubr.bf16.gmra.mrb[44].mxu1 %v12628_v16 }
  0x7c   : > { %11575 = vmatprep.mubr.msk.bf16.mxu1 %vm972_vm0, %v12629_v18 }
  0x7d   : > { %11602 = vmatpush3.bf16.msra.mxu0 %v12632_v21 }
  0x80   : > { %11568 = vmatmul.mubr.msk.bf16.gmra.mrb[36].mxu0 %vm972_vm0, %v12617_v13 }
  0x81   : > { %11571 = vmatprep.mubr.msk.bf16.mxu0 %vm972_vm0, %v12621_v15 }
  0x83   : > { %11576 = vmatmul.mubr.msk.bf16.vlgmr.msra.gmra.mrb[48].mxu1 %vm972_vm0, %v12630_v19 }
  0x84   : > { %11580 = vmatpush3.bf16.msra.mxu1 %v12633_v22 }
  0x85   : > { %11581 = vmatprep.subr.bf16.mxu1 %v12634_v23 }
  0x88   : > { %11572 = vmatmul.mubr.msk.bf16.gmra.mrb[40].mxu0 %vm972_vm0, %v12622_v17  ;;  %11582 = vmatpush3.bf16.msra.mxu1 %v12634_v23 }
  0xf6   : > { %v11545_v24 = vpop.f32.mrb[0].mxu1 }
  0xf7   : > { %v1128_v25 = vpop.f32.mrb[1].mxu1 }
  0xf8   : > { %v11546_v26 = vpop.f32.mrb[2].mxu1 }
  0xf9   : > { %v1131_v27 = vpop.f32.mrb[3].mxu1 }
  0xfe   : > { %v13659_v28 = vpop.f32.mrb[4].mxu1 }
  0xff   : > { %v1144_v30 = vpop.f32.mrb[5].mxu1 }
 0x100   : > { %v13666_v33 = vpop.f32.mrb[6].mxu1 }
 0x101   : > { %v1147_v36 = vpop.f32.mrb[7].mxu1 }
 0x106   : > { %v13670_v42 = vpop.f32.mrb[8].mxu1 }
 0x107   : > { %v13672_v46 = vpop.f32.mrb[9].mxu1 }
 0x108   : > { %v13684_v50 = vpop.f32.mrb[10].mxu1 }
 0x109   : > { %v13686_v54 = vpop.f32.mrb[11].mxu1 }
 0x10b   : > { %v10737_v29 = vpop.f32.mrb[0].mxu0 }
 0x10c   : > { %v10738_v31 = vpop.f32.mrb[1].mxu0 }
 0x10d   : > { %v10739_v34 = vadd.f32 %v10738_v31, %v10737_v29  ;;  %v10740_v35 = vpop.f32.mrb[2].mxu0 }
 0x10e   : > { %v10741_v37 = vpop.f32.mrb[3].mxu0  ;;  %v13692_v63 = vpop.f32.mrb[12].mxu1 }
 0x10f   : > { %v10742_v38 = vadd.f32 %v10741_v37, %v10740_v35  ;;  %v1032_v39 = vadd.f32 %v10739_v34, %v13664_v32  ;;  %v13695_v3 = vpop.f32.mrb[13].mxu1 }
 0x110   : > { %v13707_v7 = vpop.f32.mrb[14].mxu1 }
 0x111   : > { %v1129_v40 = vadd.f32 %v1128_v25, %v1032_v39  ;;  %v1035_v41 = vadd.f32 %v10742_v38, %v13664_v32  ;;  %v13709_v11 = vpop.f32.mrb[15].mxu1 }
 0x113   : > { %v1191_v43 = vmax.f32 %v1129_v40, 0.0  ;;  %v1132_v44 = vadd.f32 %v1131_v27, %v1035_v41  ;;  %v10743_v45 = vpop.f32.mrb[4].mxu0  ;;  %v13724_v27 = vld [vmem:[%s18557_s24 + $0x28] sm:$0xff] }
 0x114   : > { %v10744_v49 = vpop.f32.mrb[5].mxu0 }
 0x115   : > { %v1192_v51 = vmax.f32 %v1132_v44, 0.0  ;;  %v10745_v52 = vadd.f32 %v10744_v49, %v10743_v45  ;;  %v10746_v53 = vpop.f32.mrb[6].mxu0  ;;  %v1215_v56 = vadd.f32 %v13677_v47, %v1191_v43 }
 0x116   : > { %v10747_v55 = vpop.f32.mrb[7].mxu0  ;;  %v10811_v20 = vpop.f32.mrb[16].mxu1 }
 0x117   : > { %v1216_v57 = vadd.f32 %v13682_v48, %v1192_v51  ;;  %v1040_v58 = vadd.f32 %v10745_v52, %v13664_v32  ;;  %v10748_v59 = vadd.f32 %v10747_v55, %v10746_v53 }
 0x119   : > { %v1137_v60 = vadd.f32 %v11545_v24, %v1040_v58  ;;  %v1043_v61 = vadd.f32 %v10748_v59, %v13664_v32  ;;  %v1736_v62 = vpack.c.bf16 %v1216_v57, %v1215_v56  ;;  %v10812_v24 = vpop.f32.mrb[17].mxu1  ;;  %v13740_v58 = vld [vmem:[%s18557_s24 + $0x30] sm:$0xff] }
 0x11a   : > { %v13726_v29 = vadd.f32 %v10812_v24, %v10811_v20 }
 0x11b   : > { %v1193_v0 = vmax.f32 %v1137_v60, 0.0  ;;  %v1140_v1 = vadd.f32 %v11546_v26, %v1043_v61  ;;  %v10749_v2 = vpop.f32.mrb[8].mxu0  ;;  %11603 = vmatprep.mubr.msk.bf16.mxu0 %vm972_vm0, %v1736_v62  ;;  %v13719_v26 = vld [vmem:[%s18557_s24 + $0x20] sm:$0xff] }
 0x11c   : > { %v10750_v6 = vpop.f32.mrb[9].mxu0 }
 0x11d   : > { %v1194_v8 = vmax.f32 %v1140_v1, 0.0  ;;  %v10751_v9 = vadd.f32 %v10750_v6, %v10749_v2  ;;  %v10752_v10 = vpop.f32.mrb[10].mxu0  ;;  %v1217_v13 = vadd.f32 %v13700_v4, %v1193_v0 }
 0x11e   : > { %v10753_v12 = vpop.f32.mrb[11].mxu0 }
 0x11f   : > { %v1218_v14 = vadd.f32 %v13705_v5, %v1194_v8  ;;  %v1048_v15 = vadd.f32 %v10751_v9, %v13664_v32  ;;  %v10754_v16 = vadd.f32 %v10753_v12, %v10752_v10 }
 0x121   : > { %v1737_v17 = vpack.c.bf16 %v1218_v14, %v1217_v13  ;;  %v1145_v18 = vadd.f32 %v1144_v30, %v1048_v15  ;;  %v1051_v19 = vadd.f32 %v10754_v16, %v13664_v32  ;;  %v10814_v30 = vpop.f32.mrb[18].mxu1 }
 0x123   : > { %v1195_v21 = vmax.f32 %v1145_v18, 0.0  ;;  %v1148_v22 = vadd.f32 %v1147_v36, %v1051_v19  ;;  %v10755_v23 = vpop.f32.mrb[12].mxu0  ;;  %11604 = vmatmul.mubr.msk.bf16.vlgmr.msra.gmra.mrb[44].mxu0 %vm972_vm0, %v1737_v17  ;;  %v10815_v36 = vpop.f32.mrb[19].mxu1 }
 0x124   : > { %v10756_v25 = vpop.f32.mrb[13].mxu0  ;;  %v13728_v38 = vadd.f32 %v10815_v36, %v10814_v30  ;;  %v10817_v51 = vpop.f32.mrb[20].mxu1 }
 0x125   : > { %v1196_v31 = vmax.f32 %v1148_v22, 0.0  ;;  %v10757_v34 = vadd.f32 %v10756_v25, %v10755_v23  ;;  %v10758_v35 = vpop.f32.mrb[14].mxu0  ;;  %v1219_v41 = vadd.f32 %v13719_v26, %v1195_v21  ;;  %v10818_v56 = vpop.f32.mrb[21].mxu1 }
 0x126   : > { %v10759_v37 = vpop.f32.mrb[15].mxu0  ;;  %v13747_v59 = vadd.f32 %v10818_v56, %v10817_v51  ;;  %v10820_v60 = vpop.f32.mrb[22].mxu1 }
 0x127   : > { %v1056_v39 = vadd.f32 %v10757_v34, %v13664_v32  ;;  %v10760_v40 = vadd.f32 %v10759_v37, %v10758_v35  ;;  %v1220_v43 = vadd.f32 %v13724_v27, %v1196_v31  ;;  %v10821_v0 = vpop.f32.mrb[23].mxu1 }
 0x128   : > { %v13749_v2 = vadd.f32 %v10821_v0, %v10820_v60  ;;  %v10823_v15 = vpop.f32.mrb[24].mxu1 }
 0x129   : > { %v1153_v44 = vadd.f32 %v13659_v28, %v1056_v39  ;;  %v1059_v45 = vadd.f32 %v10760_v40, %v13664_v32  ;;  %v1738_v49 = vpack.c.bf16 %v1220_v43, %v1219_v41  ;;  %v13745_v28 = vld [vmem:[%s18557_s24 + $0x38] sm:$0xff]  ;;  %v10824_v19 = vpop.f32.mrb[25].mxu1 }
 0x12a   : > { %v13758_v21 = vadd.f32 %v10824_v19, %v10823_v15  ;;  %v10826_v22 = vpop.f32.mrb[26].mxu1 }
 0x12b   : > { %v1197_v52 = vmax.f32 %v1153_v44, 0.0  ;;  %v1156_v53 = vadd.f32 %v13666_v33, %v1059_v45  ;;  %v10761_v55 = vpop.f32.mrb[16].mxu0  ;;  %11607 = vmatprep.mubr.msk.bf16.mxu0 %vm972_vm0, %v1738_v49  ;;  %v10827_v30 = vpop.f32.mrb[27].mxu1 }
 0x12c   : > { %v10762_v57 = vpop.f32.mrb[17].mxu0  ;;  %v13760_v31 = vadd.f32 %v10827_v30, %v10826_v22 }
 0x12d   : > { %v1198_v61 = vmax.f32 %v1156_v53, 0.0  ;;  %v10763_v33 = vadd.f32 %v10762_v57, %v10761_v55  ;;  %v10764_v62 = vpop.f32.mrb[18].mxu0  ;;  %v1221_v9 = vadd.f32 %v13740_v58, %v1197_v52 }
 0x12e   : > { %v10765_v1 = vpop.f32.mrb[19].mxu0  ;;  %v10829_v41 = vpop.f32.mrb[28].mxu1 }
 0x12f   : > { %v1064_v6 = vadd.f32 %v10763_v33, %v13664_v32  ;;  %v10766_v8 = vadd.f32 %v10765_v1, %v10764_v62  ;;  %v1222_v10 = vadd.f32 %v13745_v28, %v1198_v61  ;;  %v10830_v49 = vpop.f32.mrb[29].mxu1 }
 0x130   : > { %v13769_v52 = vadd.f32 %v10830_v49, %v10829_v41  ;;  %v10832_v53 = vpop.f32.mrb[30].mxu1 }
 0x131   : > { %v1161_v12 = vadd.f32 %v13672_v46, %v1064_v6  ;;  %v1067_v13 = vadd.f32 %v10766_v8, %v13664_v32  ;;  %v1739_v14 = vpack.c.bf16 %v1222_v10, %v1221_v9  ;;  %v10833_v56 = vpop.f32.mrb[31].mxu1 }
 0x132   : > { %v13771_v57 = vadd.f32 %v10833_v56, %v10832_v53 }
 0x133   : > { %v1199_v16 = vmax.f32 %v1161_v12, 0.0  ;;  %v1164_v17 = vadd.f32 %v13686_v54, %v1067_v13  ;;  %v10767_v18 = vpop.f32.mrb[20].mxu0  ;;  %11608 = vmatmul.mubr.msk.bf16.gmra.mrb[48].mxu0 %vm972_vm0, %v1739_v14 }
 0x134   : > { %v10768_v20 = vpop.f32.mrb[21].mxu0 }
 0x135   : > { %v1200_v23 = vmax.f32 %v1164_v17, 0.0  ;;  %v10769_v24 = vadd.f32 %v10768_v20, %v10767_v18  ;;  %v10770_v25 = vpop.f32.mrb[22].mxu0  ;;  %v1223_v54 = vadd.f32 %v13677_v47, %v1199_v16 }
 0x136   : > { %v10771_v46 = vpop.f32.mrb[23].mxu0  ;;  %v10835_v6 = vpop.f32.mrb[32].mxu1 }
 0x137   : > { %v1072_v34 = vadd.f32 %v10769_v24, %v13664_v32  ;;  %v10772_v35 = vadd.f32 %v10771_v46, %v10770_v25  ;;  %v1224_v36 = vadd.f32 %v13682_v48, %v1200_v23  ;;  %v10836_v12 = vpop.f32.mrb[33].mxu1  ;;  %v13790_v23 = vld [vmem:[%s18408_s6] ss:$0 sm:$0xff] }
 0x138   : > { %v13780_v14 = vadd.f32 %v10836_v12, %v10835_v6  ;;  %v10838_v15 = vpop.f32.mrb[34].mxu1  ;;  %v1569_v46 = vadd.f32 %v13747_v59, %v13790_v23 }
 0x139   : > { %v1169_v37 = vadd.f32 %v13670_v42, %v1072_v34  ;;  %v1075_v39 = vadd.f32 %v10772_v35, %v13664_v32  ;;  %v1740_v40 = vpack.c.bf16 %v1224_v36, %v1223_v54  ;;  %v10839_v17 = vpop.f32.mrb[35].mxu1 }
 0x13a   : > { %v13782_v18 = vadd.f32 %v10839_v17, %v10838_v15 }
 0x13b   : > { %v1201_v43 = vmax.f32 %v1169_v37, 0.0  ;;  %v1172_v44 = vadd.f32 %v13684_v50, %v1075_v39  ;;  %v10773_v45 = vpop.f32.mrb[24].mxu0  ;;  %11611 = vmatprep.mubr.msk.bf16.mxu0 %vm972_vm0, %v1740_v40 }
 0x13c   : > { %v10774_v51 = vpop.f32.mrb[25].mxu0 }
 0x13d   : > { %v1202_v47 = vmax.f32 %v1172_v44, 0.0  ;;  %v10775_v55 = vadd.f32 %v10774_v51, %v10773_v45  ;;  %v10776_v48 = vpop.f32.mrb[26].mxu0  ;;  %v1225_v50 = vadd.f32 %v13700_v4, %v1201_v43 }
 0x13e   : > { %v10777_v42 = vpop.f32.mrb[27].mxu0  ;;  %v10841_v34 = vpop.f32.mrb[36].mxu1 }
 0x13f   : > { %v1080_v60 = vadd.f32 %v10775_v55, %v13664_v32  ;;  %v10778_v61 = vadd.f32 %v10777_v42, %v10776_v48  ;;  %v1226_v33 = vadd.f32 %v13705_v5, %v1202_v47  ;;  %v10842_v36 = vpop.f32.mrb[37].mxu1 }
 0x140   : > { %v10844_v40 = vpop.f32.mrb[38].mxu1 }
 0x141   : > { %v1177_v62 = vadd.f32 %v13695_v3, %v1080_v60  ;;  %v1083_v0 = vadd.f32 %v10778_v61, %v13664_v32  ;;  %v1741_v1 = vpack.c.bf16 %v1226_v33, %v1225_v50  ;;  %v10845_v44 = vpop.f32.mrb[39].mxu1  ;;  %v1585_v61 = vadd.f32 %v13769_v52, %v13790_v23 }
 0x142   : > { %v10846_v51 = vadd.f32 %v10845_v44, %v10844_v40  ;;  %v1580_v52 = vadd.f32 %v13760_v31, %v13790_v23  ;;  %v1593_v31 = vadd.f32 %v13780_v14, %v13790_v23 }
 0x143   : > { %v1203_v8 = vmax.f32 %v1177_v62, 0.0  ;;  %v1180_v9 = vadd.f32 %v13709_v11, %v1083_v0  ;;  %v10779_v10 = vpop.f32.mrb[28].mxu0  ;;  %11612 = vmatmul.mubr.msk.bf16.gmra.mrb[52].mxu0 %vm972_vm0, %v1741_v1  ;;  %v1577_v62 = vadd.f32 %v13758_v21, %v13790_v23  ;;  %v1588_v1 = vadd.f32 %v13771_v57, %v13790_v23 }
 0x144   : > { %v10780_v13 = vpop.f32.mrb[29].mxu0 }
 0x145   : > { %v1204_v4 = vmax.f32 %v1180_v9, 0.0  ;;  %v10781_v16 = vadd.f32 %v10780_v13, %v10779_v10  ;;  %v10782_v5 = vpop.f32.mrb[30].mxu0  ;;  %v1227_v11 = vadd.f32 %v13719_v26, %v1203_v8 }
 0x146   : > { %v10783_v3 = vpop.f32.mrb[31].mxu0  ;;  %v10847_v50 = vpop.f32.mrb[40].mxu1 }
 0x147   : > { %v1088_v19 = vadd.f32 %v10781_v16, %v13664_v32  ;;  %v10784_v20 = vadd.f32 %v10783_v3, %v10782_v5  ;;  %v1228_v22 = vadd.f32 %v13724_v27, %v1204_v4  ;;  %v1561_v27 = vadd.f32 %v13726_v29, %v13790_v23 }
 0x149   : > { %v1185_v24 = vadd.f32 %v13692_v63, %v1088_v19  ;;  %v1091_v25 = vadd.f32 %v10784_v20, %v13664_v32  ;;  %v1742_v30 = vpack.c.bf16 %v1228_v22, %v1227_v11  ;;  %v1572_v32 = vadd.f32 %v13749_v2, %v13790_v23 }
 0x14a   : > { %v10843_v63 = vadd.f32 %v10842_v36, %v10841_v34  ;;  %v1604_v20 = vadd.f32 %v10846_v51, %v13790_v23 }
 0x14b   : > { %v1205_v35 = vmax.f32 %v1185_v24, 0.0  ;;  %v1188_v54 = vadd.f32 %v13707_v7, %v1091_v25  ;;  %v11565_v26 = vpop.f32.mrb[32].mxu0  ;;  %11615 = vmatprep.mubr.msk.bf16.mxu0 %vm972_vm0, %v1742_v30  ;;  %v1564_v7 = vadd.f32 %v13728_v38, %v13790_v23 }
 0x14c   : > { %v1666_v37 = vadd.f32 %v11565_v26, %v1569_v46  ;;  %v1657_v39 = vpop.f32.mrb[33].mxu0  ;;  %v1601_v57 = vadd.f32 %v10843_v63, %v13790_v23 }
 0x14d   : > { %v1206_v41 = vmax.f32 %v1188_v54, 0.0  ;;  %v1658_v59 = vadd.f32 %v1657_v39, %v1561_v27  ;;  %v11566_v43 = vpop.f32.mrb[34].mxu0  ;;  %v1229_v29 = vadd.f32 %v13740_v58, %v1205_v35  ;;  %v10848_v58 = vpop.f32.mrb[41].mxu1  ;;  %v1596_v27 = vadd.f32 %v13782_v18, %v13790_v23 }
 0x14e   : > { %v1669_v45 = vadd.f32 %v11566_v43, %v1572_v32  ;;  %v1660_v49 = vpop.f32.mrb[35].mxu0  ;;  %v1722_v55 = vmax.f32 %v1666_v37, 0.0  ;;  %v10849_v6 = vadd.f32 %v10848_v58, %v10847_v50  ;;  %v10850_v8 = vpop.f32.mrb[42].mxu1 }
 0x14f   : > { %v1661_v53 = vadd.f32 %v1660_v49, %v1564_v7  ;;  %v1230_v47 = vadd.f32 %v13745_v28, %v1206_v41  ;;  %v1720_v2 = vmax.f32 %v1658_v59, 0.0  ;;  %v10851_v12 = vpop.f32.mrb[43].mxu1 }
 0x150   : > { %v1723_v48 = vmax.f32 %v1669_v45, 0.0  ;;  %v10852_v21 = vadd.f32 %v10851_v12, %v10850_v8  ;;  %v10853_v11 = vpop.f32.mrb[44].mxu1  ;;  %v1609_v59 = vadd.f32 %v10849_v6, %v13790_v23 }
 0x151   : > { %v1721_v56 = vmax.f32 %v1661_v53, 0.0  ;;  %v1743_v42 = vpack.c.bf16 %v1230_v47, %v1229_v29  ;;  %v10854_v25 = vpop.f32.mrb[45].mxu1 }
 0x152   : > { %v1745_v60 = vpack.c.bf16 %v1723_v48, %v1722_v55  ;;  %v10855_v34 = vadd.f32 %v10854_v25, %v10853_v11  ;;  %v10856_v35 = vpop.f32.mrb[46].mxu1  ;;  %v1612_v18 = vadd.f32 %v10852_v21, %v13790_v23 }
 0x153   : > { %v1744_v38 = vpack.c.bf16 %v1721_v56, %v1720_v2  ;;  %v11569_v33 = vpop.f32.mrb[36].mxu0  ;;  %11616 = vmatmul.mubr.msk.bf16.gmra.mrb[56].mxu0 %vm972_vm0, %v1743_v42  ;;  %v10857_v36 = vpop.f32.mrb[47].mxu1 }
 0x154   : > { %v1682_v0 = vadd.f32 %v11569_v33, %v1585_v61  ;;  %v1673_v28 = vpop.f32.mrb[37].mxu0  ;;  %v10858_v63 = vadd.f32 %v10857_v36, %v10856_v35  ;;  %v1617_v40 = vadd.f32 %v10855_v34, %v13790_v23 }
 0x155   : > { %v1674_v9 = vadd.f32 %v1673_v28, %v1577_v62  ;;  %v11570_v10 = vpop.f32.mrb[38].mxu0  ;;  %11583 = vmatprep.mubr.msk.bf16.mxu1 %vm972_vm0, %v1744_v38  ;;  %v13836_v62 = vld [vmem:[%s18412_s10] ss:$0 sm:$0xff] }
 0x156   : > { %v1685_v13 = vadd.f32 %v11570_v10, %v1588_v1  ;;  %v1676_v15 = vpop.f32.mrb[39].mxu0  ;;  %11584 = vmatmul.mubr.msk.bf16.vlgmr.msra.gmra.mrb[52].mxu1 %vm972_vm0, %v1745_v60  ;;  %v1726_v16 = vmax.f32 %v1682_v0, 0.0  ;;  %v1620_v44 = vadd.f32 %v10858_v63, %v13790_v23  ;;  %v11577_v49 = vpop.f32.mrb[48].mxu1 }
 0x157   : > { %v1677_v4 = vadd.f32 %v1676_v15, %v1580_v52  ;;  %v1724_v17 = vmax.f32 %v1674_v9, 0.0  ;;  %v1714_v53 = vadd.f32 %v11577_v49, %v1617_v40  ;;  %v1705_v29 = vpop.f32.mrb[49].mxu1 }
 0x158   : > { %v1727_v5 = vmax.f32 %v1685_v13, 0.0  ;;  %v1706_v47 = vadd.f32 %v1705_v29, %v1609_v59  ;;  %v11578_v55 = vpop.f32.mrb[50].mxu1  ;;  %v10386_v59 = vld [vmem:[%s18410_s8] ss:$0 sm:$0xff] }
 0x159   : > { %v1725_v3 = vmax.f32 %v1677_v4, 0.0  ;;  %v1734_v48 = vmax.f32 %v1714_v53, 0.0  ;;  %v1717_v2 = vadd.f32 %v11578_v55, %v1620_v44  ;;  %v1708_v56 = vpop.f32.mrb[51].mxu1 }
 0x15a   : > { %v1747_v19 = vpack.c.bf16 %v1727_v5, %v1726_v16  ;;  %v1732_v42 = vmax.f32 %v1706_v47, 0.0  ;;  %v1709_v60 = vadd.f32 %v1708_v56, %v1612_v18 }
 0x15b   : > { %v1746_v22 = vpack.c.bf16 %v1725_v3, %v1724_v17  ;;  %v11573_v24 = vpop.f32.mrb[40].mxu0  ;;  %v1735_v61 = vmax.f32 %v1717_v2, 0.0 }
 0x15c   : > { %v1698_v30 = vadd.f32 %v11573_v24, %v1601_v57  ;;  %v1689_v46 = vpop.f32.mrb[41].mxu0  ;;  %v1733_v50 = vmax.f32 %v1709_v60, 0.0 }
 0x15d   : > { %v1690_v54 = vadd.f32 %v1689_v46, %v1593_v31  ;;  %v11574_v26 = vpop.f32.mrb[42].mxu0  ;;  %11587 = vmatprep.mubr.msk.bf16.mxu1 %vm972_vm0, %v1746_v22  ;;  %v1751_v38 = vpack.c.bf16 %v1735_v61, %v1734_v48 }
 0x15e   : > { %v1730_v37 = vmax.f32 %v1698_v30, 0.0  ;;  %v1701_v39 = vadd.f32 %v11574_v26, %v1604_v20  ;;  %v1692_v32 = vpop.f32.mrb[43].mxu0  ;;  %11588 = vmatmul.mubr.msk.bf16.gmra.mrb[56].mxu1 %vm972_vm0, %v1747_v19  ;;  %v1750_v33 = vpack.c.bf16 %v1733_v50, %v1732_v42 }
 0x15f   : > { %v1693_v14 = vadd.f32 %v1692_v32, %v1596_v27  ;;  %v1728_v43 = vmax.f32 %v1690_v54, 0.0 }
 0x160   : > { %v1731_v41 = vmax.f32 %v1701_v39, 0.0 }
 0x161   : > { %v1729_v7 = vmax.f32 %v1693_v14, 0.0 }
 0x162   : > { %v1749_v45 = vpack.c.bf16 %v1731_v41, %v1730_v37 }
 0x163   : > { %v1748_v51 = vpack.c.bf16 %v1729_v7, %v1728_v43 }
 0x165   : > { %11591 = vmatprep.mubr.msk.bf16.mxu1 %vm972_vm0, %v1748_v51 }
 0x166   : > { %11592 = vmatmul.mubr.msk.bf16.gmra.mrb[60].mxu1 %vm972_vm0, %v1749_v45 }
 0x167   : > { %11595 = vmatprep.mubr.msk.bf16.mxu1 %vm972_vm0, %v1750_v33 }
 0x16e   : > { %11596 = vmatmul.mubr.msk.bf16.gmra.mrb[64].mxu1 %vm972_vm0, %v1751_v38 }
 0x1f6   : > { %v11605_v23 = vpop.f32.mrb[44].mxu0 }
 0x1f7   : > { %v1977_v58 = vpop.f32.mrb[45].mxu0  ;;  %v1986_v28 = vadd.f32 %v11605_v23, %v13836_v62 }
 0x1f8   : > { %v11606_v0 = vpop.f32.mrb[46].mxu0  ;;  %v1978_v8 = vadd.f32 %v13836_v62, %v1977_v58 }
 0x1f9   : > { %v1989_v1 = vadd.f32 %v11606_v0, %v13836_v62  ;;  %v1980_v6 = vpop.f32.mrb[47].mxu0 }
 0x1fa   : > { %v1981_v9 = vadd.f32 %v13836_v62, %v1980_v6 }
 0x1fb   : > { %v13842_v10 = vpack.c.bf16 %v1989_v1, %v1986_v28 }
 0x1fc   : > { %v13844_v52 = vpack.c.bf16 %v1981_v9, %v1978_v8 }
 0x1fd   : > { %2394 = vrot.lane.b32.xlu1 %v13842_v10, %s13321_s23  ;;  %v2073_v15 = vsel %vm2056_vm1, %v13842_v10, 0 }
 0x1fe   : > { %2392 = vrot.lane.b32.xlu0 %v13844_v52, %s13321_s23  ;;  %12155 = vmatprep.subr.msk.bf16.mxu1 %vm2056_vm1, %v13844_v52  ;;  %v2070_v12 = vsel %vm2056_vm1, %v13844_v52, 0 }
 0x1ff   : > { %11620 = vmatpush3.bf16.xpose.msra.mxu1 %v2070_v12 }
 0x200   : > { %12156 = vmatprep.subr.msk.bf16.mxu1 %vm2056_vm1, %v13842_v10 }
 0x201   : > { %2620 = vrot.lane.b32.xlu1 %v13842_v10, %s13322_s25 }
 0x205   : > { %2618 = vrot.lane.b32.xlu1 %v13844_v52, %s13322_s25 }
 0x206   : > { %v11609_v13 = vpop.f32.mrb[48].mxu0 }
 0x207   : > { %v1993_v21 = vpop.f32.mrb[49].mxu0  ;;  %11622 = vmatpush3.bf16.xpose.msra.mxu1 %v2073_v15  ;;  %v2002_v16 = vadd.f32 %v11609_v13, %v13836_v62 }
 0x208   : > { %v11610_v4 = vpop.f32.mrb[50].mxu0  ;;  %v1994_v17 = vadd.f32 %v13836_v62, %v1993_v21 }
 0x209   : > { %v2005_v5 = vadd.f32 %v11610_v4, %v13836_v62  ;;  %v1996_v57 = vpop.f32.mrb[51].mxu0 }
 0x20a   : > { %v1997_v3 = vadd.f32 %v13836_v62, %v1996_v57 }
 0x20b   : > { %v13866_v19 = vpack.c.bf16 %v2005_v5, %v2002_v16 }
 0x20c   : > { %v13868_v20 = vpack.c.bf16 %v1997_v3, %v1994_v17 }
 0x20d   : > { %2398 = vrot.lane.b32.xlu0 %v13866_v19, %s13321_s23  ;;  %v2079_v24 = vsel %vm2056_vm1, %v13866_v19, 0 }
 0x20e   : > { %2396 = vrot.lane.b32.xlu1 %v13868_v20, %s13321_s23  ;;  %12157 = vmatprep.subr.msk.bf16.mxu1 %vm2056_vm1, %v13868_v20  ;;  %v2076_v11 = vsel %vm2056_vm1, %v13868_v20, 0 }
 0x20f   : > { %11624 = vmatpush3.bf16.xpose.msra.mxu1 %v2076_v11 }
 0x210   : > { %12158 = vmatprep.subr.msk.bf16.mxu1 %vm2056_vm1, %v13866_v19 }
 0x211   : > { %2624 = vrot.lane.b32.xlu0 %v13866_v19, %s13322_s25 }
 0x215   : > { %2622 = vrot.lane.b32.xlu0 %v13868_v20, %s13322_s25 }
 0x216   : > { %v11613_v22 = vpop.f32.mrb[52].mxu0 }
 0x217   : > { %v2009_v31 = vpop.f32.mrb[53].mxu0  ;;  %11626 = vmatpush3.bf16.xpose.msra.mxu1 %v2079_v24  ;;  %v2018_v30 = vadd.f32 %v11613_v22, %v13836_v62 }
 0x218   : > { %v11614_v25 = vpop.f32.mrb[54].mxu0  ;;  %v2010_v35 = vadd.f32 %v13836_v62, %v2009_v31 }
 0x219   : > { %v2021_v46 = vadd.f32 %v11614_v25, %v13836_v62  ;;  %v2012_v34 = vpop.f32.mrb[55].mxu0 }
 0x21a   : > { %v2013_v54 = vadd.f32 %v13836_v62, %v2012_v34 }
 0x21b   : > { %v13890_v26 = vpack.c.bf16 %v2021_v46, %v2018_v30 }
 0x21c   : > { %v13892_v27 = vpack.c.bf16 %v2013_v54, %v2010_v35 }
 0x21d   : > { %2487 = vrot.lane.b32.xlu1 %v13890_v26, %s13321_s23  ;;  %v2162_v39 = vsel %vm2056_vm1, %v13890_v26, 0 }
 0x21e   : > { %12159 = vmatprep.subr.msk.bf16.mxu0 %vm2056_vm1, %v13892_v27  ;;  %2727 = vrot.lane.b32.xlu0 %v13892_v27, %s13322_s25  ;;  %v2159_v36 = vsel %vm2056_vm1, %v13892_v27, 0 }
 0x21f   : > { %11636 = vmatpush3.bf16.xpose.msra.mxu0 %v2159_v36 }
 0x220   : > { %12160 = vmatprep.subr.msk.bf16.mxu0 %vm2056_vm1, %v13890_v26 }
 0x221   : > { %2729 = vrot.lane.b32.xlu1 %v13890_v26, %s13322_s25 }
 0x225   : > { %2485 = vrot.lane.b32.xlu1 %v13892_v27, %s13321_s23 }
 0x226   : > { %v11617_v37 = vpop.f32.mrb[56].mxu0 }
 0x227   : > { %v2025_v32 = vpop.f32.mrb[57].mxu0  ;;  %11638 = vmatpush3.bf16.xpose.msra.mxu0 %v2162_v39  ;;  %v2034_v14 = vadd.f32 %v11617_v37, %v13836_v62 }
 0x228   : > { %v11618_v63 = vpop.f32.mrb[58].mxu0  ;;  %v2026_v7 = vadd.f32 %v13836_v62, %v2025_v32 }
 0x229   : > { %v2037_v40 = vadd.f32 %v11618_v63, %v13836_v62  ;;  %v11585_v41 = vpop.f32.mrb[52].mxu1  ;;  %v2028_v43 = vpop.f32.mrb[59].mxu0 }
 0x22a   : > { %v2029_v44 = vadd.f32 %v13836_v62, %v2028_v43  ;;  %v1833_v45 = vpop.f32.mrb[53].mxu1  ;;  %v1842_v51 = vadd.f32 %v11585_v41, %v10386_v59 }
 0x22b   : > { %v13917_v49 = vpack.c.bf16 %v2037_v40, %v2034_v14  ;;  %v11586_v18 = vpop.f32.mrb[54].mxu1  ;;  %v1834_v55 = vadd.f32 %v10386_v59, %v1833_v45 }
 0x22c   : > { %v13919_v53 = vpack.c.bf16 %v2029_v44, %v2026_v7  ;;  %v1845_v29 = vadd.f32 %v11586_v18, %v10386_v59  ;;  %v1836_v47 = vpop.f32.mrb[55].mxu1 }
 0x22d   : > { %v1837_v48 = vadd.f32 %v10386_v59, %v1836_v47  ;;  %2491 = vrot.lane.b32.xlu0 %v13917_v49, %s13321_s23  ;;  %v2168_v28 = vsel %vm2056_vm1, %v13917_v49, 0 }
 0x22e   : > { %v13923_v2 = vpack.c.bf16 %v1845_v29, %v1842_v51  ;;  %12161 = vmatprep.subr.msk.bf16.mxu0 %vm2056_vm1, %v13919_v53  ;;  %2489 = vrot.lane.b32.xlu1 %v13919_v53, %s13321_s23  ;;  %v2165_v56 = vsel %vm2056_vm1, %v13919_v53, 0  ;;  %s13330_s23 = smov 108  }
 0x22f   : > { %v13931_v42 = vpack.c.bf16 %v1837_v48, %v1834_v55  ;;  %11640 = vmatpush3.bf16.xpose.msra.mxu0 %v2165_v56 }
 0x230   : > { %12162 = vmatprep.subr.msk.bf16.mxu0 %vm2056_vm1, %v13917_v49 }
 0x231   : > { %v11589_v60 = vpop.f32.mrb[56].mxu1  ;;  %11627 = vmatprep.mubr.msk.bf16.mxu1 %vm2056_vm1, %v13931_v42  ;;  %2612 = vrot.lane.b32.xlu0 %v13923_v2, %s13322_s25 }
 0x232   : > { %v1849_v61 = vpop.f32.mrb[57].mxu1  ;;  %2610 = vrot.lane.b32.xlu1 %v13931_v42, %s13322_s25  ;;  %11628 = vmatmul.mubr.msk.bf16.vlgmr.msra.gmra.mrb[68].mxu1 %vm2056_vm1, %v13923_v2  ;;  %v1858_v38 = vadd.f32 %v11589_v60, %v10386_v59 }
 0x233   : > { %v11590_v50 = vpop.f32.mrb[58].mxu1  ;;  %v1850_v62 = vadd.f32 %v10386_v59, %v1849_v61 }
 0x234   : > { %v1861_v33 = vadd.f32 %v11590_v50, %v10386_v59  ;;  %v1852_v23 = vpop.f32.mrb[59].mxu1 }
 0x235   : > { %v1853_v58 = vadd.f32 %v10386_v59, %v1852_v23 }
 0x236   : > { %v13943_v0 = vpack.c.bf16 %v1861_v33, %v1858_v38 }
 0x237   : > { %v13947_v1 = vpack.c.bf16 %v1853_v58, %v1850_v62  ;;  %11642 = vmatpush3.bf16.xpose.msra.mxu0 %v2168_v28 }
 0x239   : > { %v11593_v6 = vpop.f32.mrb[60].mxu1  ;;  %11631 = vmatprep.mubr.msk.bf16.mxu1 %vm2056_vm1, %v13947_v1 }
 0x23a   : > { %v1865_v8 = vpop.f32.mrb[61].mxu1  ;;  %11632 = vmatmul.mubr.msk.bf16.gmra.mrb[72].mxu1 %vm2056_vm1, %v13943_v0  ;;  %v1874_v12 = vadd.f32 %v11593_v6, %v10386_v59 }
 0x23b   : > { %v11594_v9 = vpop.f32.mrb[62].mxu1  ;;  %v1866_v21 = vadd.f32 %v10386_v59, %v1865_v8 }
 0x23c   : > { %v1877_v13 = vadd.f32 %v11594_v9, %v10386_v59  ;;  %v1868_v15 = vpop.f32.mrb[63].mxu1 }
 0x23d   : > { %v1869_v4 = vadd.f32 %v10386_v59, %v1868_v15 }
 0x23e   : > { %v13953_v16 = vpack.c.bf16 %v1877_v13, %v1874_v12 }
 0x23f   : > { %v13955_v5 = vpack.c.bf16 %v1869_v4, %v1866_v21 }
 0x241   : > { %11643 = vmatprep.mubr.msk.bf16.mxu0 %vm2056_vm1, %v13955_v5  ;;  %v11597_v57 = vpop.f32.mrb[64].mxu1 }
 0x242   : > { %11644 = vmatmul.mubr.msk.bf16.vlgmr.msra.gmra.mrb[60].mxu0 %vm2056_vm1, %v13953_v16  ;;  %v1890_v17 = vadd.f32 %v11597_v57, %v10386_v59  ;;  %v1881_v3 = vpop.f32.mrb[65].mxu1 }
 0x243   : > { %v1882_v11 = vadd.f32 %v10386_v59, %v1881_v3  ;;  %v11598_v22 = vpop.f32.mrb[66].mxu1 }
 0x244   : > { %v1893_v24 = vadd.f32 %v11598_v22, %v10386_v59  ;;  %v1884_v31 = vpop.f32.mrb[67].mxu1 }
 0x245   : > { %v1885_v25 = vadd.f32 %v10386_v59, %v1884_v31 }
 0x246   : > { %v13961_v30 = vpack.c.bf16 %v1893_v24, %v1890_v17 }
 0x247   : > { %v13963_v46 = vpack.c.bf16 %v1885_v25, %v1882_v11 }
 0x249   : > { %11647 = vmatprep.mubr.msk.bf16.mxu0 %vm2056_vm1, %v13963_v46 }
 0x24a   : > { %11648 = vmatmul.mubr.msk.bf16.gmra.mrb[64].mxu0 %vm2056_vm1, %v13961_v30 }
 0x26f   : > { %v2395_v34 = vpop.permute.xlu1 %2394 }
 0x270   : > { %v2393_v35 = vpop.permute.xlu0 %2392 }
 0x271   : > { %11651 = vmatprep.subr.bf16.mxu1 %v2393_v35 }
 0x272   : > { %11652 = vmatpush3.bf16.msra.mxu1 %v2393_v35 }
 0x273   : > { %v2621_v54 = vpop.permute.xlu1 %2620  ;;  %11653 = vmatprep.subr.bf16.mxu1 %v2395_v34 }
 0x274   : > { %v2642_v63 = vsel %vm2056_vm1, %v2621_v54, 0 }
 0x276   : > { %11654 = vmatpush3.bf16.msra.mxu1 %v2395_v34 }
 0x277   : > { %v2619_v36 = vpop.permute.xlu1 %2618 }
 0x278   : > { %12163 = vmatprep.subr.msk.bf16.mxu0 %vm2056_vm1, %v2619_v36  ;;  %v2639_v37 = vsel %vm2056_vm1, %v2619_v36, 0 }
 0x279   : > { %11684 = vmatpush3.bf16.xpose.msra.mxu0 %v2639_v37 }
 0x27a   : > { %12164 = vmatprep.subr.msk.bf16.mxu0 %vm2056_vm1, %v2621_v54 }
 0x27f   : > { %v2399_v39 = vpop.permute.xlu0 %2398 }
 0x280   : > { %v2397_v32 = vpop.permute.xlu1 %2396 }
 0x281   : > { %11655 = vmatprep.subr.bf16.mxu1 %v2397_v32  ;;  %11686 = vmatpush3.bf16.xpose.msra.mxu0 %v2642_v63 }
 0x282   : > { %11656 = vmatpush3.bf16.msra.mxu1 %v2397_v32 }
 0x283   : > { %v2625_v14 = vpop.permute.xlu0 %2624  ;;  %11657 = vmatprep.subr.bf16.mxu1 %v2399_v39 }
 0x284   : > { %v2648_v43 = vsel %vm2056_vm1, %v2625_v14, 0 }
 0x286   : > { %11658 = vmatpush3.bf16.msra.mxu1 %v2399_v39 }
 0x287   : > { %v2623_v40 = vpop.permute.xlu0 %2622 }
 0x288   : > { %12165 = vmatprep.subr.msk.bf16.mxu0 %vm2056_vm1, %v2623_v40  ;;  %v2645_v41 = vsel %vm2056_vm1, %v2623_v40, 0 }
 0x289   : > { %11688 = vmatpush3.bf16.xpose.msra.mxu0 %v2645_v41 }
 0x28a   : > { %12166 = vmatprep.subr.msk.bf16.mxu0 %vm2056_vm1, %v2625_v14 }
 0x28f   : > { %v13976_v59 = vpop.permute.xlu1 %2487 }
 0x290   : > { %v13984_v45 = vpop.permute.xlu0 %2727 }
 0x291   : > { %11690 = vmatpush3.bf16.xpose.msra.mxu0 %v2648_v43 }
 0x293   : > { %v13979_v7 = vpop.permute.xlu1 %2729 }
 0x297   : > { %v13981_v44 = vpop.permute.xlu1 %2485 }
 0x298   : > { %11667 = vmatprep.subr.bf16.mxu1 %v13981_v44 }
 0x29f   : > { %v13986_v18 = vpop.permute.xlu0 %2491 }
 0x2a0   : > { %v13988_v51 = vpop.permute.xlu1 %2489 }
 0x2a3   : > { %v2613_v47 = vpop.permute.xlu0 %2612 }
 0x2a4   : > { %v2611_v29 = vpop.permute.xlu1 %2610 }
 0x2a5   : > { %11691 = vmatprep.mubr.msk.bf16.mxu0 %vm2056_vm1, %v2611_v29 }
 0x2a6   : > { %11692 = vmatmul.mubr.msk.bf16.vlgmr.msra.gmra.mrb[68].mxu0 %vm2056_vm1, %v2613_v47 }
 0x305   : > { %v13992_v55 = vpop.f32.mrb[68].mxu1 }
 0x306   : > { %v13994_v48 = vpop.f32.mrb[69].mxu1  ;;  %v2242_v56 = vsel %vm2235_vm2, %v13992_v55, -inf }
 0x307   : > { %2243 = vmax.xlane.f32.xlu1 %v2242_v56  ;;  %v13998_v60 = vpop.f32.mrb[70].mxu1  ;;  %v2236_v61 = vsel %vm2235_vm2, %v13994_v48, -inf }
 0x308   : > { %2237 = vmax.xlane.f32.xlu0 %v2236_v61  ;;  %v14002_v50 = vpop.f32.mrb[71].mxu1  ;;  %v2245_v38 = vsel %vm2235_vm2, %v13998_v60, -inf }
 0x309   : > { %v2239_v33 = vsel %vm2235_vm2, %v14002_v50, -inf }
 0x30b   : > { %2246 = vmax.xlane.f32.xlu1 %v2245_v38 }
 0x30c   : > { %2240 = vmax.xlane.f32.xlu0 %v2239_v33 }
 0x30d   : > { %v14008_v23 = vpop.f32.mrb[72].mxu1 }
 0x30e   : > { %v14010_v62 = vpop.f32.mrb[73].mxu1  ;;  %v2254_v58 = vsel %vm2235_vm2, %v14008_v23, -inf }
 0x30f   : > { %v14014_v28 = vpop.f32.mrb[74].mxu1  ;;  %v2248_v9 = vsel %vm2235_vm2, %v14010_v62, -inf }
 0x310   : > { %2255 = vmax.xlane.f32.xlu0 %v2254_v58  ;;  %v14016_v6 = vpop.f32.mrb[75].mxu1  ;;  %v2257_v8 = vsel %vm2235_vm2, %v14014_v28, -inf }
 0x311   : > { %2258 = vmax.xlane.f32.xlu1 %v2257_v8  ;;  %v2251_v12 = vsel %vm2235_vm2, %v14016_v6, -inf }
 0x314   : > { %2249 = vmax.xlane.f32.xlu0 %v2248_v9 }
 0x315   : > { %v14024_v13 = vpop.f32.mrb[60].mxu0  ;;  %2252 = vmax.xlane.f32.xlu1 %v2251_v12 }
 0x316   : > { %v14026_v15 = vpop.f32.mrb[61].mxu0  ;;  %v2266_v21 = vsel %vm2235_vm2, %v14024_v13, -inf }
 0x317   : > { %v14030_v4 = vpop.f32.mrb[62].mxu0  ;;  %v2260_v57 = vsel %vm2235_vm2, %v14026_v15, -inf }
 0x318   : > { %v14034_v17 = vpop.f32.mrb[63].mxu0  ;;  %2267 = vmax.xlane.f32.xlu0 %v2266_v21  ;;  %v2269_v3 = vsel %vm2235_vm2, %v14030_v4, -inf }
 0x319   : > { %2261 = vmax.xlane.f32.xlu1 %v2260_v57  ;;  %v2263_v24 = vsel %vm2235_vm2, %v14034_v17, -inf }
 0x31c   : > { %2270 = vmax.xlane.f32.xlu0 %v2269_v3 }
 0x31d   : > { %v14038_v11 = vpop.f32.mrb[64].mxu0 }
 0x31e   : > { %v14040_v22 = vpop.f32.mrb[65].mxu0  ;;  %v2278_v34 = vsel %vm2235_vm2, %v14038_v11, -inf }
 0x31f   : > { %v14044_v31 = vpop.f32.mrb[66].mxu0  ;;  %v2272_v35 = vsel %vm2235_vm2, %v14040_v22, -inf }
 0x320   : > { %2264 = vmax.xlane.f32.xlu0 %v2263_v24  ;;  %v14046_v25 = vpop.f32.mrb[67].mxu0  ;;  %v2281_v36 = vsel %vm2235_vm2, %v14044_v31, -inf }
 0x321   : > { %v2275_v54 = vsel %vm2235_vm2, %v14046_v25, -inf }
 0x32a   : > { %2614 = vrot.lane.b32.xlu1 %v13947_v1, %s13322_s25 }
 0x336   : > { %2731 = vrot.lane.b32.xlu0 %v13919_v53, %s13322_s25 }
 0x34e   : > { %2279 = vmax.xlane.f32.xlu1 %v2278_v34 }
 0x352   : > { %2273 = vmax.xlane.f32.xlu1 %v2272_v35 }
 0x355   : > { %2276 = vmax.xlane.f32.xlu0 %v2275_v54 }
 0x356   : > { %2282 = vmax.xlane.f32.xlu1 %v2281_v36 }
 0x367   : > { %2733 = vrot.lane.b32.xlu1 %v13917_v49, %s13322_s25 }
 0x36b   : > { %2616 = vrot.lane.b32.xlu0 %v13943_v0, %s13322_s25  ;;  %2721 = vrot.lane.b32.xlu1 %v13953_v16, %s13322_s25 }
 0x36f   : > { %2719 = vrot.lane.b32.xlu0 %v13955_v5, %s13322_s25  ;;  %2725 = vrot.lane.b32.xlu1 %v13961_v30, %s13322_s25 }
 0x373   : > { %2723 = vrot.lane.b32.xlu0 %v13963_v46, %s13322_s25  ;;  %2978 = vrot.lane.b32.xlu1 %v13842_v10, %s13323_s2  ;;  %s13331_s25 = smov 76  }
 0x377   : > { %2976 = vrot.lane.b32.xlu0 %v13844_v52, %s13323_s2  ;;  %2980 = vrot.lane.b32.xlu1 %v13868_v20, %s13323_s2 }
 0x379   : > { %v14075_v37 = vpop.f32.mrb[68].mxu0 }
 0x37a   : > { %v14077_v39 = vpop.f32.mrb[69].mxu0 }
 0x37b   : > { %v14079_v32 = vpop.f32.mrb[70].mxu0  ;;  %3194 = vrot.lane.b32.xlu0 %v13844_v52, %s13324_s27  ;;  %2982 = vrot.lane.b32.xlu1 %v13866_v19, %s13323_s2 }
 0x37c   : > { %v14084_v63 = vpop.f32.mrb[71].mxu0 }
 0x37f   : > { %3065 = vrot.lane.b32.xlu0 %v13892_v27, %s13323_s2  ;;  %3196 = vrot.lane.b32.xlu1 %v13842_v10, %s13324_s27 }
 0x383   : > { %3067 = vrot.lane.b32.xlu0 %v13890_v26, %s13323_s2  ;;  %3069 = vrot.lane.b32.xlu1 %v13919_v53, %s13323_s2 }
 0x387   : > { %3198 = vrot.lane.b32.xlu0 %v13868_v20, %s13324_s27  ;;  %3186 = vrot.lane.b32.xlu1 %v13931_v42, %s13324_s27 }
 0x38b   : > { %3071 = vrot.lane.b32.xlu0 %v13917_v49, %s13323_s2  ;;  %3301 = vrot.lane.b32.xlu1 %v13890_v26, %s13324_s27  ;;  %s13334_s2 = smov 100  }
 0x38f   : > { %3200 = vrot.lane.b32.xlu0 %v13866_v19, %s13324_s27 }
 0x393   : > { %3188 = vrot.lane.b32.xlu0 %v13923_v2, %s13324_s27 }
 0x394   : > { %v2244_v14 = vpop.xlane.xlu1 %2243 }
 0x395   : > { %v2286_v40 = vsub.f32 %v13992_v55, %v2244_v14  ;;  %v2238_v41 = vpop.xlane.xlu0 %2237 }
 0x396   : > { %v2284_v43 = vsub.f32 %v13994_v48, %v2238_v41 }
 0x397   : > { %v2304_v29 = vmul.f32 1.442695, %v2286_v40  ;;  %3299 = vrot.lane.b32.xlu0 %v13892_v27, %s13324_s27 }
 0x398   : > { %v2300_v47 = vmul.f32 1.442695, %v2284_v43  ;;  %v2247_v56 = vpop.xlane.xlu1 %2246 }
 0x399   : > { %v2287_v61 = vsub.f32 %v13998_v60, %v2247_v56  ;;  %v2241_v38 = vpop.xlane.xlu0 %2240  ;;  %12769 = vpow2.f32 %v2304_v29 }
 0x39a   : > { %v2285_v33 = vsub.f32 %v14002_v50, %v2241_v38  ;;  %12771 = vpow2.f32 %v2300_v47 }
 0x39b   : > { %v2306_v58 = vmul.f32 1.442695, %v2287_v61 }
 0x39c   : > { %v2302_v8 = vmul.f32 1.442695, %v2285_v33 }
 0x39d   : > { %12773 = vpow2.f32 %v2306_v58  ;;  %v2256_v55 = vpop.xlane.xlu0 %2255 }
 0x39e   : > { %12775 = vpow2.f32 %v2302_v8  ;;  %v2290_v48 = vsub.f32 %v14008_v23, %v2256_v55  ;;  %v2259_v9 = vpop.xlane.xlu1 %2258  ;;  %v2827_v8 = vsel %vm2235_vm2, %v14084_v63, -inf }
 0x39f   : > { %v2291_v12 = vsub.f32 %v14014_v28, %v2259_v9 }
 0x3a0   : > { %v2312_v21 = vmul.f32 1.442695, %v2290_v48 }
 0x3a1   : > { %v2314_v57 = vmul.f32 1.442695, %v2291_v12  ;;  %v2250_v3 = vpop.xlane.xlu0 %2249 }
 0x3a2   : > { %12777 = vpow2.f32 %v2312_v21  ;;  %v2288_v60 = vsub.f32 %v14010_v62, %v2250_v3  ;;  %v2253_v24 = vpop.xlane.xlu1 %2252 }
 0x3a3   : > { %12779 = vpow2.f32 %v2314_v57  ;;  %v2289_v50 = vsub.f32 %v14016_v6, %v2253_v24  ;;  %v14112_v35 = vpop.eup %12769 }
 0x3a4   : > { %v2308_v34 = vmul.f32 1.442695, %v2288_v60  ;;  %18558 = vst [vmem:[#allocation2_spill] sm:$0xff] %v14112_v35  ;;  %v14114_v14 = vpop.eup %12771 }
 0x3a5   : > { %v2310_v54 = vmul.f32 1.442695, %v2289_v50  ;;  %v2268_v36 = vpop.xlane.xlu0 %2267  ;;  %18559 = vst [vmem:[#allocation3_spill] sm:$0xff] %v14114_v14  ;;  %v2833_v50 = vsel %vm2235_vm2, %v14079_v32, -inf }
 0x3a6   : > { %12781 = vpow2.f32 %v2308_v34  ;;  %v2294_v23 = vsub.f32 %v14024_v13, %v2268_v36  ;;  %v2262_v28 = vpop.xlane.xlu1 %2261  ;;  %v2751_v34 = vsel %vm2056_vm1, %v13979_v7, 0 }
 0x3a7   : > { %v14117_v40 = vpop.eup %12773  ;;  %12783 = vpow2.f32 %v2310_v54  ;;  %v2292_v43 = vsub.f32 %v14026_v15, %v2262_v28 }
 0x3a8   : > { %18560 = vst [vmem:[#allocation4_spill] sm:$0xff] %v14117_v40  ;;  %v14119_v41 = vpop.eup %12775  ;;  %v2381_v62 = vpack.c.bf16 %v14117_v40, %v14112_v35  ;;  %v2320_v6 = vmul.f32 1.442695, %v2294_v23 }
 0x3a9   : > { %18561 = vst [vmem:[#allocation5_spill] sm:$0xff] %v14119_v41  ;;  %v2271_v29 = vpop.xlane.xlu0 %2270  ;;  %v2380_v47 = vpack.c.bf16 %v14119_v41, %v14114_v14  ;;  %v2316_v15 = vmul.f32 1.442695, %v2292_v43 }
 0x3aa   : > { %v2295_v56 = vsub.f32 %v14030_v4, %v2271_v29  ;;  %v2615_v61 = vpop.permute.xlu1 %2614  ;;  %12785 = vpow2.f32 %v2320_v6 }
 0x3ab   : > { %11659 = vmatprep.mubr.msk.bf16.mxu1 %vm2235_vm2, %v2380_v47  ;;  %11695 = vmatprep.mubr.msk.bf16.mxu0 %vm2056_vm1, %v2615_v61 }
 0x3ac   : > { %v14129_v13 = vpop.eup %12777  ;;  %v2322_v38 = vmul.f32 1.442695, %v2295_v56  ;;  %11660 = vmatmul.mubr.msk.bf16.vlgmr.msra.gmra.mrb[76].mxu1 %vm2235_vm2, %v2381_v62 }
 0x3ad   : > { %18562 = vst [vmem:[#allocation6_spill] sm:$0xff] %v14129_v13  ;;  %v14132_v33 = vpop.eup %12779  ;;  %11668 = vmatpush3.bf16.msra.mxu1 %v13981_v44  ;;  %v2265_v58 = vpop.xlane.xlu0 %2264 }
 0x3ae   : > { %18563 = vst [vmem:[#allocation7_spill] sm:$0xff] %v14132_v33  ;;  %12787 = vpow2.f32 %v2322_v38  ;;  %11669 = vmatprep.subr.bf16.mxu1 %v13976_v59  ;;  %v2293_v4 = vsub.f32 %v14034_v17, %v2265_v58  ;;  %v2383_v55 = vpack.c.bf16 %v14132_v33, %v14129_v13  ;;  %v2830_v17 = vsel %vm2235_vm2, %v14075_v37, -inf }
 0x3af   : > { %2828 = vmax.xlane.f32.xlu1 %v2827_v8  ;;  %12789 = vpow2.f32 %v2316_v15 }
 0x3b0   : > { %v14141_v48 = vpop.eup %12781  ;;  %v2318_v9 = vmul.f32 1.442695, %v2293_v4 }
 0x3b1   : > { %18564 = vst [vmem:[#allocation8_spill] sm:$0xff] %v14141_v48  ;;  %v14143_v12 = vpop.eup %12783  ;;  %11670 = vmatpush3.bf16.msra.mxu1 %v13976_v59  ;;  %v2732_v54 = vpop.permute.xlu0 %2731 }
 0x3b2   : > { %18565 = vst [vmem:[#allocation9_spill] sm:$0xff] %v14143_v12  ;;  %12791 = vpow2.f32 %v2318_v9  ;;  %11671 = vmatprep.subr.bf16.mxu1 %v13988_v51  ;;  %v2382_v44 = vpack.c.bf16 %v14143_v12, %v14141_v48  ;;  %v2754_v36 = vsel %vm2056_vm1, %v2732_v54, 0 }
 0x3b4   : > { %11663 = vmatprep.mubr.msk.bf16.mxu1 %vm2235_vm2, %v2382_v44  ;;  %v14155_v21 = vpop.eup %12785 }
 0x3b5   : > { %11672 = vmatpush3.bf16.msra.mxu1 %v13988_v51  ;;  %18566 = vst [vmem:[#allocation10_spill] sm:$0xff] %v14155_v21  ;;  %v2824_v51 = vsel %vm2235_vm2, %v14077_v39, -inf }
 0x3b6   : > { %11664 = vmatmul.mubr.msk.bf16.gmra.mrb[80].mxu1 %vm2235_vm2, %v2383_v55  ;;  %11673 = vmatprep.subr.bf16.mxu1 %v13986_v18 }
 0x3b7   : > { %2831 = vmax.xlane.f32.xlu0 %v2830_v17 }
 0x3b8   : > { %v14157_v59 = vpop.eup %12787 }
 0x3b9   : > { %18567 = vst [vmem:[#allocation11_spill] sm:$0xff] %v14157_v59  ;;  %v2385_v57 = vpack.c.bf16 %v14157_v59, %v14155_v21  ;;  %11674 = vmatpush3.bf16.msra.mxu1 %v13986_v18  ;;  %v14166_v3 = vpop.eup %12789  ;;  %v2748_v18 = vsel %vm2056_vm1, %v13984_v45, 0 }
 0x3ba   : > { %12167 = vmatprep.subr.msk.bf16.mxu1 %vm2056_vm1, %v13984_v45  ;;  %18568 = vst [vmem:[#allocation12_spill] sm:$0xff] %v14166_v3 }
 0x3bb   : > { %2825 = vmax.xlane.f32.xlu0 %v2824_v51 }
 0x3bc   : > { %v14168_v60 = vpop.eup %12791 }
 0x3bd   : > { %18569 = vst [vmem:[#allocation13_spill] sm:$0xff] %v14168_v60  ;;  %v2384_v24 = vpack.c.bf16 %v14168_v60, %v14166_v3 }
 0x3bf   : > { %2834 = vmax.xlane.f32.xlu0 %v2833_v50  ;;  %11675 = vmatprep.mubr.msk.bf16.mxu1 %vm2235_vm2, %v2384_v24 }
 0x3c0   : > { %11676 = vmatmul.mubr.msk.bf16.vlgmr.msra.gmra.mrb[84].mxu1 %vm2235_vm2, %v2385_v57 }
 0x3c2   : > { %11700 = vmatpush3.bf16.xpose.msra.mxu1 %v2748_v18 }
 0x3c3   : > { %12168 = vmatprep.subr.msk.bf16.mxu1 %vm2056_vm1, %v13979_v7 }
 0x3ca   : > { %11702 = vmatpush3.bf16.xpose.msra.mxu1 %v2751_v34 }
 0x3cb   : > { %12169 = vmatprep.subr.msk.bf16.mxu1 %vm2056_vm1, %v2732_v54 }
 0x3d2   : > { %11704 = vmatpush3.bf16.xpose.msra.mxu1 %v2754_v36 }
 0x3db   : > { %v2280_v23 = vpop.xlane.xlu1 %2279 }
 0x3dc   : > { %v2298_v28 = vsub.f32 %v14038_v11, %v2280_v23 }
 0x3de   : > { %v2328_v6 = vmul.f32 1.442695, %v2298_v28 }
 0x3df   : > { %v2274_v62 = vpop.xlane.xlu1 %2273 }
 0x3e0   : > { %v2296_v45 = vsub.f32 %v14040_v22, %v2274_v62  ;;  %12793 = vpow2.f32 %v2328_v6 }
 0x3e2   : > { %v2324_v43 = vmul.f32 1.442695, %v2296_v45  ;;  %v2277_v29 = vpop.xlane.xlu0 %2276 }
 0x3e3   : > { %v2297_v47 = vsub.f32 %v14046_v25, %v2277_v29  ;;  %v2283_v56 = vpop.xlane.xlu1 %2282 }
 0x3e4   : > { %v2299_v7 = vsub.f32 %v14044_v31, %v2283_v56  ;;  %12795 = vpow2.f32 %v2324_v43 }
 0x3e5   : > { %v2326_v61 = vmul.f32 1.442695, %v2297_v47 }
 0x3e6   : > { %v2330_v38 = vmul.f32 1.442695, %v2299_v7  ;;  %v2617_v15 = vpop.permute.xlu0 %2616 }
 0x3e7   : > { %12797 = vpow2.f32 %v2326_v61  ;;  %11696 = vmatmul.mubr.msk.bf16.gmra.mrb[72].mxu0 %vm2056_vm1, %v2617_v15  ;;  %v2734_v11 = vpop.permute.xlu1 %2733 }
 0x3e8   : > { %12799 = vpow2.f32 %v2330_v38  ;;  %12170 = vmatprep.subr.msk.bf16.mxu1 %vm2056_vm1, %v2734_v11  ;;  %v2757_v22 = vsel %vm2056_vm1, %v2734_v11, 0 }
 0x3e9   : > { %11706 = vmatpush3.bf16.xpose.msra.mxu1 %v2757_v22 }
 0x3ea   : > { %v2720_v58 = vpop.permute.xlu0 %2719  ;;  %v14191_v8 = vpop.eup %12793 }
 0x3eb   : > { %v2722_v25 = vpop.permute.xlu1 %2721  ;;  %18570 = vst [vmem:[#allocation14_spill] sm:$0xff] %v14191_v8 }
 0x3ee   : > { %v2724_v4 = vpop.permute.xlu0 %2723  ;;  %v14193_v55 = vpop.eup %12795 }
 0x3ef   : > { %v2726_v31 = vpop.permute.xlu1 %2725  ;;  %18571 = vst [vmem:[#allocation15_spill] sm:$0xff] %v14193_v55 }
 0x3f1   : > { %v14195_v9 = vpop.eup %12797 }
 0x3f2   : > { %18572 = vst [vmem:[#allocation16_spill] sm:$0xff] %v14195_v9  ;;  %v14197_v44 = vpop.eup %12799  ;;  %v2977_v17 = vpop.permute.xlu0 %2976  ;;  %v2386_v57 = vpack.c.bf16 %v14195_v9, %v14193_v55 }
 0x3f3   : > { %18573 = vst [vmem:[#allocation17_spill] sm:$0xff] %v14197_v44  ;;  %11715 = vmatprep.subr.bf16.mxu0 %v2977_v17  ;;  %v2979_v51 = vpop.permute.xlu1 %2978  ;;  %v2387_v24 = vpack.c.bf16 %v14197_v44, %v14191_v8 }
 0x3f4   : > { %11679 = vmatprep.mubr.msk.bf16.mxu1 %vm2235_vm2, %v2386_v57  ;;  %11716 = vmatpush3.bf16.msra.mxu0 %v2977_v17 }
 0x3f5   : > { %11680 = vmatmul.mubr.msk.bf16.gmra.mrb[88].mxu1 %vm2235_vm2, %v2387_v24  ;;  %11717 = vmatprep.subr.bf16.mxu0 %v2979_v51 }
 0x3f6   : > { %v3195_v50 = vpop.permute.xlu0 %3194  ;;  %11707 = vmatprep.mubr.msk.bf16.mxu1 %vm2056_vm1, %v2720_v58 }
 0x3f7   : > { %v2981_v18 = vpop.permute.xlu1 %2980 }
 0x3f8   : > { %11718 = vmatpush3.bf16.msra.mxu0 %v2979_v51 }
 0x3f9   : > { %11719 = vmatprep.subr.bf16.mxu0 %v2981_v18 }
 0x3fa   : > { %v3066_v34 = vpop.permute.xlu0 %3065 }
 0x3fb   : > { %11731 = vmatprep.subr.bf16.mxu1 %v3066_v34  ;;  %v2983_v54 = vpop.permute.xlu1 %2982 }
 0x3fc   : > { %11720 = vmatpush3.bf16.msra.mxu0 %v2981_v18 }
 0x3fd   : > { %11708 = vmatmul.mubr.msk.bf16.vlgmr.msra.gmra.mrb[92].mxu1 %vm2056_vm1, %v2722_v25  ;;  %11721 = vmatprep.subr.bf16.mxu0 %v2983_v54 }
 0x3fe   : > { %11732 = vmatpush3.bf16.msra.mxu1 %v3066_v34  ;;  %v3068_v36 = vpop.permute.xlu0 %3067  ;;  %11711 = vmatprep.mubr.msk.bf16.mxu1 %vm2056_vm1, %v2724_v4 }
 0x3ff   : > { %11733 = vmatprep.subr.bf16.mxu1 %v3068_v36  ;;  %v3197_v23 = vpop.permute.xlu1 %3196 }
 0x400   : > { %11722 = vmatpush3.bf16.msra.mxu0 %v2983_v54  ;;  %v3218_v34 = vsel %vm2056_vm1, %v3197_v23, 0 }
 0x401   : > { %12171 = vmatprep.subr.msk.bf16.mxu0 %vm2056_vm1, %v3195_v50 }
 0x402   : > { %11734 = vmatpush3.bf16.msra.mxu1 %v3068_v36  ;;  %v3199_v28 = vpop.permute.xlu0 %3198 }
 0x403   : > { %v3070_v62 = vpop.permute.xlu1 %3069  ;;  %v3221_v54 = vsel %vm2056_vm1, %v3199_v28, 0 }
 0x404   : > { %11735 = vmatprep.subr.bf16.mxu1 %v3070_v62 }
 0x405   : > { %11712 = vmatmul.mubr.msk.bf16.gmra.mrb[96].mxu1 %vm2056_vm1, %v2726_v31 }
 0x406   : > { %11736 = vmatpush3.bf16.msra.mxu1 %v3070_v62  ;;  %v3072_v45 = vpop.permute.xlu0 %3071 }
 0x407   : > { %11737 = vmatprep.subr.bf16.mxu1 %v3072_v45  ;;  %v14216_v47 = vpop.permute.xlu1 %3186 }
 0x40a   : > { %11738 = vmatpush3.bf16.msra.mxu1 %v3072_v45  ;;  %v3201_v6 = vpop.permute.xlu0 %3200 }
 0x40b   : > { %v14218_v56 = vpop.permute.xlu1 %3301  ;;  %v3224_v36 = vsel %vm2056_vm1, %v3201_v6, 0 }
 0x40e   : > { %v14210_v43 = vpop.permute.xlu0 %3188 }
 0x412   : > { %v14212_v29 = vpop.permute.xlu0 %3299 }
 0x413   : > { %12175 = vmatprep.subr.msk.bf16.mxu1 %vm2056_vm1, %v14212_v29 }
 0x43c   : > { %v2829_v7 = vpop.xlane.xlu1 %2828 }
 0x43d   : > { %v2873_v61 = vsub.f32 %v14084_v63, %v2829_v7 }
 0x43f   : > { %v2890_v15 = vmul.f32 1.442695, %v2873_v61 }
 0x441   : > { %12801 = vpow2.f32 %v2890_v15 }
 0x444   : > { %v2832_v38 = vpop.xlane.xlu0 %2831 }
 0x445   : > { %v2874_v11 = vsub.f32 %v14075_v37, %v2832_v38 }
 0x447   : > { %v2892_v4 = vmul.f32 1.442695, %v2874_v11 }
 0x448   : > { %v2826_v22 = vpop.xlane.xlu0 %2825 }
 0x449   : > { %v2872_v58 = vsub.f32 %v14077_v39, %v2826_v22 }
 0x44b   : > { %v2888_v25 = vmul.f32 1.442695, %v2872_v58  ;;  %v14224_v51 = vpop.eup %12801 }
 0x44c   : > { %v2835_v31 = vpop.xlane.xlu0 %2834 }
 0x44d   : > { %12803 = vpow2.f32 %v2888_v25  ;;  %v2875_v17 = vsub.f32 %v14079_v32, %v2835_v31  ;;  %v3215_v32 = vsel %vm2056_vm1, %v3195_v50, 0 }
 0x44e   : > { %12805 = vpow2.f32 %v2892_v4 }
 0x44f   : > { %v2894_v57 = vmul.f32 1.442695, %v2875_v17 }
 0x451   : > { %12807 = vpow2.f32 %v2894_v57 }
 0x457   : > { %v14226_v63 = vpop.eup %12803 }
 0x458   : > { %v2968_v37 = vpack.c.bf16 %v14224_v51, %v14226_v63  ;;  %v14230_v24 = vpop.eup %12805 }
 0x45a   : > { %11723 = vmatprep.mubr.msk.bf16.mxu0 %vm2235_vm2, %v2968_v37 }
 0x45b   : > { %v14233_v39 = vpop.eup %12807 }
 0x45c   : > { %v2969_v18 = vpack.c.bf16 %v14233_v39, %v14230_v24 }
 0x45e   : > { %11724 = vmatmul.mubr.msk.bf16.vlgmr.msra.gmra.mrb[76].mxu0 %vm2235_vm2, %v2969_v18 }
 0x45f   : > { %11748 = vmatpush3.bf16.xpose.msra.mxu0 %v3215_v32 }
 0x460   : > { %12172 = vmatprep.subr.msk.bf16.mxu0 %vm2056_vm1, %v3197_v23 }
 0x467   : > { %11750 = vmatpush3.bf16.xpose.msra.mxu0 %v3218_v34 }
 0x468   : > { %12173 = vmatprep.subr.msk.bf16.mxu0 %vm2056_vm1, %v3199_v28 }
 0x46f   : > { %11752 = vmatpush3.bf16.xpose.msra.mxu0 %v3221_v54 }
 0x470   : > { %12174 = vmatprep.subr.msk.bf16.mxu0 %vm2056_vm1, %v3201_v6 }
 0x477   : > { %11754 = vmatpush3.bf16.xpose.msra.mxu0 %v3224_v36 }
 0x47f   : > { %v14245_v62 = vpop.f32.mrb[76].mxu1 }
 0x480   : > { %18574 = vst [vmem:[#allocation18_spill] sm:$0xff] %v14245_v62  ;;  %v14247_v45 = vpop.f32.mrb[77].mxu1 }
 0x481   : > { %18575 = vst [vmem:[#allocation19_spill] sm:$0xff] %v14247_v45  ;;  %v14249_v50 = vpop.f32.mrb[78].mxu1 }
 0x482   : > { %18576 = vst [vmem:[#allocation20_spill] sm:$0xff] %v14249_v50  ;;  %v14251_v7 = vpop.f32.mrb[79].mxu1 }
 0x483   : > { %18577 = vst [vmem:[#allocation21_spill] sm:$0xff] %v14251_v7 }
 0x489   : > { %v14253_v23 = vpop.f32.mrb[80].mxu1 }
 0x48a   : > { %18578 = vst [vmem:[#allocation22_spill] sm:$0xff] %v14253_v23  ;;  %v14255_v61 = vpop.f32.mrb[81].mxu1 }
 0x48b   : > { %18579 = vst [vmem:[#allocation23_spill] sm:$0xff] %v14255_v61  ;;  %v14257_v38 = vpop.f32.mrb[82].mxu1 }
 0x48c   : > { %18580 = vst [vmem:[#allocation24_spill] sm:$0xff] %v14257_v38  ;;  %v14259_v28 = vpop.f32.mrb[83].mxu1 }
 0x48d   : > { %18581 = vst [vmem:[#allocation25_spill] sm:$0xff] %v14259_v28 }
 0x493   : > { %v14261_v15 = vpop.f32.mrb[84].mxu1 }
 0x494   : > { %18582 = vst [vmem:[#allocation26_spill] sm:$0xff] %v14261_v15  ;;  %v14263_v6 = vpop.f32.mrb[85].mxu1 }
 0x495   : > { %18583 = vst [vmem:[#allocation27_spill] sm:$0xff] %v14263_v6  ;;  %v14265_v11 = vpop.f32.mrb[86].mxu1 }
 0x496   : > { %18584 = vst [vmem:[#allocation28_spill] sm:$0xff] %v14265_v11  ;;  %v14267_v22 = vpop.f32.mrb[87].mxu1 }
 0x497   : > { %18585 = vst [vmem:[#allocation29_spill] sm:$0xff] %v14267_v22 }
 0x4ba   : > { %v14269_v58 = vpop.f32.mrb[72].mxu0 }
 0x4bb   : > { %v14271_v25 = vpop.f32.mrb[73].mxu0  ;;  %v2842_v4 = vsel %vm2235_vm2, %v14269_v58, -inf }
 0x4bc   : > { %2843 = vmax.xlane.f32.xlu0 %v2842_v4  ;;  %v14275_v31 = vpop.f32.mrb[74].mxu0  ;;  %v2836_v37 = vsel %vm2235_vm2, %v14271_v25, -inf }
 0x4bd   : > { %v14277_v17 = vpop.f32.mrb[75].mxu0  ;;  %v2845_v18 = vsel %vm2235_vm2, %v14275_v31, -inf }
 0x4be   : > { %v2839_v57 = vsel %vm2235_vm2, %v14277_v17, -inf }
 0x4bf   : > { %2840 = vmax.xlane.f32.xlu1 %v2839_v57 }
 0x4c0   : > { %2837 = vmax.xlane.f32.xlu0 %v2836_v37 }
 0x4c4   : > { %2846 = vmax.xlane.f32.xlu0 %v2845_v18 }
 0x4c8   : > { %v14285_v32 = vpop.f32.mrb[88].mxu1 }
 0x4c9   : > { %18586 = vst [vmem:[#allocation30_spill] sm:$0xff] %v14285_v32  ;;  %v14287_v34 = vpop.f32.mrb[89].mxu1 }
 0x4ca   : > { %18587 = vst [vmem:[#allocation31_spill] sm:$0xff] %v14287_v34  ;;  %v14289_v54 = vpop.f32.mrb[90].mxu1 }
 0x4cb   : > { %18588 = vst [vmem:[#allocation32_spill] sm:$0xff] %v14289_v54  ;;  %v14291_v36 = vpop.f32.mrb[91].mxu1 }
 0x4cc   : > { %18589 = vst [vmem:[#allocation33_spill] sm:$0xff] %v14291_v36 }
 0x4d0   : > { %v14293_v4 = vpop.f32.mrb[92].mxu1 }
 0x4d1   : > { %v14295_v28 = vpop.f32.mrb[93].mxu1  ;;  %v2854_v57 = vsel %vm2235_vm2, %v14293_v4, -inf }
 0x4d2   : > { %2855 = vmax.xlane.f32.xlu1 %v2854_v57  ;;  %v14299_v37 = vpop.f32.mrb[94].mxu1  ;;  %v2848_v18 = vsel %vm2235_vm2, %v14295_v28, -inf }
 0x4d3   : > { %v14301_v61 = vpop.f32.mrb[95].mxu1  ;;  %v2857_v36 = vsel %vm2235_vm2, %v14299_v37, -inf }
 0x4d4   : > { %v2851_v62 = vsel %vm2235_vm2, %v14301_v61, -inf }
 0x4d6   : > { %2849 = vmax.xlane.f32.xlu1 %v2848_v18 }
 0x4d8   : > { %v14305_v32 = vpop.f32.mrb[96].mxu1 }
 0x4d9   : > { %v14307_v54 = vpop.f32.mrb[97].mxu1 }
 0x4da   : > { %3303 = vrot.lane.b32.xlu0 %v13919_v53, %s13324_s27  ;;  %2858 = vmax.xlane.f32.xlu1 %v2857_v36  ;;  %v14313_v57 = vpop.f32.mrb[98].mxu1  ;;  %v2866_v36 = vsel %vm2235_vm2, %v14305_v32, -inf }
 0x4db   : > { %v14315_v50 = vpop.f32.mrb[99].mxu1 }
 0x4dc   : > { %v2863_v18 = vsel %vm2235_vm2, %v14315_v50, -inf }
 0x4de   : > { %2852 = vmax.xlane.f32.xlu1 %v2851_v62  ;;  %v2860_v62 = vsel %vm2235_vm2, %v14307_v54, -inf }
 0x4ef   : > { %3190 = vrot.lane.b32.xlu1 %v13947_v1, %s13324_s27 }
 0x4f9   : > { %2864 = vmax.xlane.f32.xlu0 %v2863_v18  ;;  %v2869_v18 = vsel %vm2235_vm2, %v14313_v57, -inf }
 0x50f   : > { %3192 = vrot.lane.b32.xlu0 %v13943_v0, %s13324_s27 }
 0x513   : > { %2867 = vmax.xlane.f32.xlu1 %v2866_v36  ;;  %3291 = vrot.lane.b32.xlu0 %v13955_v5, %s13324_s27 }
 0x517   : > { %2861 = vmax.xlane.f32.xlu1 %v2860_v62  ;;  %3295 = vrot.lane.b32.xlu0 %v13963_v46, %s13324_s27 }
 0x51b   : > { %2870 = vmax.xlane.f32.xlu1 %v2869_v18  ;;  %3548 = vrot.lane.b32.xlu0 %v13844_v52, %s13325_s28 }
 0x51f   : > { %3766 = vrot.lane.b32.xlu0 %v13844_v52, %s13326_s29 }
 0x523   : > { %3637 = vrot.lane.b32.xlu0 %v13892_v27, %s13325_s28 }
 0x527   : > { %3639 = vrot.lane.b32.xlu0 %v13890_v26, %s13325_s28 }
 0x52b   : > { %3770 = vrot.lane.b32.xlu0 %v13868_v20, %s13326_s29 }
 0x52c   : > { %3305 = vrot.lane.b32.xlu1 %v13917_v49, %s13324_s27 }
 0x52f   : > { %3643 = vrot.lane.b32.xlu0 %v13917_v49, %s13325_s28 }
 0x530   : > { %3293 = vrot.lane.b32.xlu1 %v13953_v16, %s13324_s27 }
 0x531   : > { %v14347_v36 = vpop.f32.mrb[76].mxu0 }
 0x532   : > { %18590 = vst [vmem:[#allocation34_spill] sm:$0xff] %v14347_v36  ;;  %v14349_v62 = vpop.f32.mrb[77].mxu0 }
 0x533   : > { %18591 = vst [vmem:[#allocation35_spill] sm:$0xff] %v14349_v62  ;;  %v14351_v18 = vpop.f32.mrb[78].mxu0  ;;  %3772 = vrot.lane.b32.xlu0 %v13866_v19, %s13326_s29 }
 0x534   : > { %18592 = vst [vmem:[#allocation36_spill] sm:$0xff] %v14351_v18  ;;  %v14355_v45 = vpop.f32.mrb[79].mxu0  ;;  %3297 = vrot.lane.b32.xlu1 %v13961_v30, %s13324_s27  ;;  %s13335_s27 = smov 68  }
 0x535   : > { %18593 = vst [vmem:[#allocation37_spill] sm:$0xff] %v14355_v45 }
 0x537   : > { %3760 = vrot.lane.b32.xlu0 %v13923_v2, %s13326_s29 }
 0x538   : > { %3550 = vrot.lane.b32.xlu1 %v13842_v10, %s13325_s28 }
 0x53b   : > { %3871 = vrot.lane.b32.xlu0 %v13892_v27, %s13326_s29 }
 0x53c   : > { %3552 = vrot.lane.b32.xlu1 %v13868_v20, %s13325_s28 }
 0x540   : > { %3554 = vrot.lane.b32.xlu1 %v13866_v19, %s13325_s28 }
 0x544   : > { %3768 = vrot.lane.b32.xlu1 %v13842_v10, %s13326_s29 }
 0x548   : > { %3641 = vrot.lane.b32.xlu1 %v13919_v53, %s13325_s28  ;;  %s13336_s28 = smov 4  }
 0x549   : > { %v2844_v7 = vpop.xlane.xlu0 %2843 }
 0x54a   : > { %v2878_v11 = vsub.f32 %v14269_v58, %v2844_v7 }
 0x54c   : > { %3758 = vrot.lane.b32.xlu1 %v13931_v42, %s13326_s29  ;;  %v2841_v34 = vpop.xlane.xlu1 %2840  ;;  %v2900_v22 = vmul.f32 1.442695, %v2878_v11 }
 0x54d   : > { %v2877_v8 = vsub.f32 %v14277_v17, %v2841_v34  ;;  %v2838_v44 = vpop.xlane.xlu0 %2837 }
 0x54e   : > { %v2876_v15 = vsub.f32 %v14271_v25, %v2838_v44 }
 0x54f   : > { %v2898_v38 = vmul.f32 1.442695, %v2877_v8 }
 0x550   : > { %v2896_v23 = vmul.f32 1.442695, %v2876_v15  ;;  %3873 = vrot.lane.b32.xlu1 %v13890_v26, %s13326_s29 }
 0x551   : > { %12809 = vpow2.f32 %v2898_v38  ;;  %v2847_v9 = vpop.xlane.xlu0 %2846 }
 0x552   : > { %12811 = vpow2.f32 %v2896_v23  ;;  %v2879_v6 = vsub.f32 %v14275_v31, %v2847_v9 }
 0x553   : > { %12813 = vpow2.f32 %v2900_v22 }
 0x554   : > { %v2902_v55 = vmul.f32 1.442695, %v2879_v6 }
 0x556   : > { %12815 = vpow2.f32 %v2902_v55 }
 0x55b   : > { %v14377_v7 = vpop.eup %12809 }
 0x55c   : > { %18594 = vst [vmem:[#allocation38_spill] sm:$0xff] %v14377_v7  ;;  %v14379_v58 = vpop.eup %12811 }
 0x55d   : > { %v2970_v8 = vpack.c.bf16 %v14377_v7, %v14379_v58  ;;  %v14383_v44 = vpop.eup %12813 }
 0x55e   : > { %18595 = vst [vmem:[#allocation39_spill] sm:$0xff] %v14383_v44 }
 0x55f   : > { %11727 = vmatprep.mubr.msk.bf16.mxu0 %vm2235_vm2, %v2970_v8  ;;  %v2856_v15 = vpop.xlane.xlu1 %2855 }
 0x560   : > { %v14386_v38 = vpop.eup %12815  ;;  %v2882_v23 = vsub.f32 %v14293_v4, %v2856_v15 }
 0x561   : > { %18596 = vst [vmem:[#allocation40_spill] sm:$0xff] %v14386_v38  ;;  %v2971_v9 = vpack.c.bf16 %v14386_v38, %v14383_v44 }
 0x562   : > { %v2908_v6 = vmul.f32 1.442695, %v2882_v23  ;;  %v3320_v23 = vsel %vm2056_vm1, %v14212_v29, 0 }
 0x563   : > { %11728 = vmatmul.mubr.msk.bf16.gmra.mrb[80].mxu0 %vm2235_vm2, %v2971_v9  ;;  %v2850_v55 = vpop.xlane.xlu1 %2849 }
 0x564   : > { %11755 = vmatprep.mubr.msk.bf16.mxu0 %vm2056_vm1, %v14216_v47  ;;  %v2880_v11 = vsub.f32 %v14295_v28, %v2850_v55  ;;  %12817 = vpow2.f32 %v2908_v6  ;;  %v3304_v55 = vpop.permute.xlu0 %3303 }
 0x566   : > { %v2904_v17 = vmul.f32 1.442695, %v2880_v11  ;;  %v3323_v11 = vsel %vm2056_vm1, %v14218_v56, 0 }
 0x567   : > { %v2859_v22 = vpop.xlane.xlu1 %2858 }
 0x568   : > { %v2883_v25 = vsub.f32 %v14299_v37, %v2859_v22 }
 0x56a   : > { %v2910_v31 = vmul.f32 1.442695, %v2883_v25 }
 0x56b   : > { %11756 = vmatmul.mubr.msk.bf16.vlgmr.msra.gmra.mrb[84].mxu0 %vm2056_vm1, %v14210_v43  ;;  %v2853_v34 = vpop.xlane.xlu1 %2852 }
 0x56c   : > { %12819 = vpow2.f32 %v2910_v31  ;;  %v2881_v4 = vsub.f32 %v14301_v61, %v2853_v34  ;;  %v3326_v31 = vsel %vm2056_vm1, %v3304_v55, 0 }
 0x56d   : > { %12821 = vpow2.f32 %v2904_v17 }
 0x56e   : > { %v2906_v8 = vmul.f32 1.442695, %v2881_v4  ;;  %v14400_v47 = vpop.eup %12817 }
 0x56f   : > { %v3191_v15 = vpop.permute.xlu1 %3190  ;;  %18597 = vst [vmem:[#allocation41_spill] sm:$0xff] %v14400_v47 }
 0x570   : > { %12823 = vpow2.f32 %v2906_v8  ;;  %11759 = vmatprep.mubr.msk.bf16.mxu0 %vm2056_vm1, %v3191_v15 }
 0x576   : > { %v14402_v28 = vpop.eup %12819 }
 0x577   : > { %18598 = vst [vmem:[#allocation42_spill] sm:$0xff] %v14402_v28  ;;  %v2973_v37 = vpack.c.bf16 %v14402_v28, %v14400_v47  ;;  %v14406_v9 = vpop.eup %12821 }
 0x578   : > { %18599 = vst [vmem:[#allocation43_spill] sm:$0xff] %v14406_v9 }
 0x57a   : > { %v14408_v43 = vpop.eup %12823 }
 0x57b   : > { %18600 = vst [vmem:[#allocation44_spill] sm:$0xff] %v14408_v43  ;;  %v2972_v61 = vpack.c.bf16 %v14408_v43, %v14406_v9 }
 0x57d   : > { %11739 = vmatprep.mubr.msk.bf16.mxu1 %vm2235_vm2, %v2972_v61 }
 0x57e   : > { %11740 = vmatmul.mubr.msk.bf16.vlgmr.msra.gmra.mrb[100].mxu1 %vm2235_vm2, %v2973_v37 }
 0x57f   : > { %11764 = vmatpush3.bf16.xpose.msra.mxu1 %v3320_v23 }
 0x580   : > { %12176 = vmatprep.subr.msk.bf16.mxu1 %vm2056_vm1, %v14218_v56 }
 0x586   : > { %v2865_v6 = vpop.xlane.xlu0 %2864 }
 0x587   : > { %11766 = vmatpush3.bf16.xpose.msra.mxu1 %v3323_v11  ;;  %v2885_v34 = vsub.f32 %v14315_v50, %v2865_v6 }
 0x588   : > { %12177 = vmatprep.subr.msk.bf16.mxu1 %vm2056_vm1, %v3304_v55 }
 0x589   : > { %v2914_v8 = vmul.f32 1.442695, %v2885_v34 }
 0x58a   : > { %v3193_v22 = vpop.permute.xlu0 %3192 }
 0x58b   : > { %11760 = vmatmul.mubr.msk.bf16.gmra.mrb[88].mxu0 %vm2056_vm1, %v3193_v22  ;;  %12825 = vpow2.f32 %v2914_v8 }
 0x58e   : > { %v3292_v25 = vpop.permute.xlu0 %3291 }
 0x58f   : > { %11768 = vmatpush3.bf16.xpose.msra.mxu1 %v3326_v31 }
 0x592   : > { %v3296_v29 = vpop.permute.xlu0 %3295 }
 0x595   : > { %v14431_v34 = vpop.eup %12825 }
 0x596   : > { %v3549_v17 = vpop.permute.xlu0 %3548  ;;  %18601 = vst [vmem:[#allocation45_spill] sm:$0xff] %v14431_v34 }
 0x597   : > { %11779 = vmatprep.subr.bf16.mxu0 %v3549_v17 }
 0x598   : > { %11780 = vmatpush3.bf16.msra.mxu0 %v3549_v17 }
 0x59a   : > { %v14425_v37 = vpop.permute.xlu0 %3766 }
 0x59e   : > { %v3638_v31 = vpop.permute.xlu0 %3637 }
 0x5a0   : > { %v2868_v4 = vpop.xlane.xlu1 %2867 }
 0x5a1   : > { %v2886_v56 = vsub.f32 %v14305_v32, %v2868_v4 }
 0x5a3   : > { %v2916_v11 = vmul.f32 1.442695, %v2886_v56 }
 0x5a4   : > { %v2862_v15 = vpop.xlane.xlu1 %2861 }
 0x5a5   : > { %v2884_v61 = vsub.f32 %v14307_v54, %v2862_v15  ;;  %v3640_v54 = vpop.permute.xlu0 %3639 }
 0x5a7   : > { %v2912_v23 = vmul.f32 1.442695, %v2884_v61 }
 0x5a8   : > { %v2871_v55 = vpop.xlane.xlu1 %2870 }
 0x5a9   : > { %12827 = vpow2.f32 %v2912_v23  ;;  %v2887_v22 = vsub.f32 %v14313_v57, %v2871_v55  ;;  %v14442_v61 = vpop.permute.xlu0 %3770 }
 0x5aa   : > { %12829 = vpow2.f32 %v2916_v11 }
 0x5ab   : > { %v2918_v17 = vmul.f32 1.442695, %v2887_v22 }
 0x5ac   : > { %v3306_v50 = vpop.permute.xlu1 %3305 }
 0x5ad   : > { %12831 = vpow2.f32 %v2918_v17  ;;  %12178 = vmatprep.subr.msk.bf16.mxu1 %vm2056_vm1, %v3306_v50  ;;  %v3329_v32 = vsel %vm2056_vm1, %v3306_v50, 0  ;;  %v3644_v22 = vpop.permute.xlu0 %3643 }
 0x5ae   : > { %11770 = vmatpush3.bf16.xpose.msra.mxu1 %v3329_v32 }
 0x5af   : > { %11795 = vmatprep.subr.bf16.mxu1 %v3638_v31 }
 0x5b0   : > { %v3294_v6 = vpop.permute.xlu1 %3293 }
 0x5b1   : > { %v14449_v50 = vpop.permute.xlu0 %3772 }
 0x5b3   : > { %v14433_v4 = vpop.eup %12827 }
 0x5b4   : > { %18602 = vst [vmem:[#allocation46_spill] sm:$0xff] %v14433_v4  ;;  %v3298_v8 = vpop.permute.xlu1 %3297  ;;  %v2974_v57 = vpack.c.bf16 %v14431_v34, %v14433_v4  ;;  %v14437_v56 = vpop.eup %12829 }
 0x5b5   : > { %18603 = vst [vmem:[#allocation47_spill] sm:$0xff] %v14437_v56 }
 0x5b6   : > { %11743 = vmatprep.mubr.msk.bf16.mxu1 %vm2235_vm2, %v2974_v57  ;;  %v14456_v57 = vpop.permute.xlu0 %3760 }
 0x5b7   : > { %v14440_v15 = vpop.eup %12831 }
 0x5b8   : > { %18604 = vst [vmem:[#allocation48_spill] sm:$0xff] %v14440_v15  ;;  %v3551_v23 = vpop.permute.xlu1 %3550  ;;  %v2975_v11 = vpack.c.bf16 %v14440_v15, %v14437_v56 }
 0x5b9   : > { %11781 = vmatprep.subr.bf16.mxu0 %v3551_v23 }
 0x5ba   : > { %11744 = vmatmul.mubr.msk.bf16.gmra.mrb[104].mxu1 %vm2235_vm2, %v2975_v11  ;;  %11782 = vmatpush3.bf16.msra.mxu0 %v3551_v23 }
 0x5bb   : > { %11771 = vmatprep.mubr.msk.bf16.mxu1 %vm2056_vm1, %v3292_v25 }
 0x5bc   : > { %v3553_v55 = vpop.permute.xlu1 %3552 }
 0x5bd   : > { %11783 = vmatprep.subr.bf16.mxu0 %v3553_v55 }
 0x5be   : > { %11784 = vmatpush3.bf16.msra.mxu0 %v3553_v55 }
 0x5c0   : > { %v3555_v17 = vpop.permute.xlu1 %3554 }
 0x5c1   : > { %11785 = vmatprep.subr.bf16.mxu0 %v3555_v17 }
 0x5c2   : > { %11772 = vmatmul.mubr.msk.bf16.vlgmr.msra.gmra.mrb[108].mxu1 %vm2056_vm1, %v3294_v6  ;;  %11786 = vmatpush3.bf16.msra.mxu0 %v3555_v17  ;;  %v14459_v6 = vpop.permute.xlu0 %3871 }
 0x5c3   : > { %11796 = vmatpush3.bf16.msra.mxu1 %v3638_v31  ;;  %11775 = vmatprep.mubr.msk.bf16.mxu1 %vm2056_vm1, %v3296_v29 }
 0x5c4   : > { %11797 = vmatprep.subr.bf16.mxu1 %v3640_v54  ;;  %12179 = vmatprep.subr.msk.bf16.mxu0 %vm2056_vm1, %v14425_v37  ;;  %v14454_v32 = vpop.permute.xlu1 %3768 }
 0x5c7   : > { %11798 = vmatpush3.bf16.msra.mxu1 %v3640_v54 }
 0x5c8   : > { %v3642_v25 = vpop.permute.xlu1 %3641 }
 0x5c9   : > { %11799 = vmatprep.subr.bf16.mxu1 %v3642_v25 }
 0x5ca   : > { %11776 = vmatmul.mubr.msk.bf16.gmra.mrb[112].mxu1 %vm2056_vm1, %v3298_v8 }
 0x5cb   : > { %11800 = vmatpush3.bf16.msra.mxu1 %v3642_v25 }
 0x5cc   : > { %11801 = vmatprep.subr.bf16.mxu1 %v3644_v22 }
 0x5cf   : > { %11802 = vmatpush3.bf16.msra.mxu1 %v3644_v22 }
 0x5d0   : > { %12183 = vmatprep.subr.msk.bf16.mxu1 %vm2056_vm1, %v14459_v6 }
 0x636   : > { %v14463_v29 = vpop.f32.mrb[80].mxu0 }
 0x637   : > { %18605 = vst [vmem:[#allocation49_spill] sm:$0xff] %v14463_v29  ;;  %v14465_v31 = vpop.f32.mrb[81].mxu0 }
 0x638   : > { %18606 = vst [vmem:[#allocation50_spill] sm:$0xff] %v14465_v31  ;;  %v14467_v23 = vpop.f32.mrb[82].mxu0 }
 0x639   : > { %18607 = vst [vmem:[#allocation51_spill] sm:$0xff] %v14467_v23  ;;  %v14469_v54 = vpop.f32.mrb[83].mxu0 }
 0x63a   : > { %18608 = vst [vmem:[#allocation52_spill] sm:$0xff] %v14469_v54 }
 0x63e   : > { %v14471_v11 = vpop.f32.mrb[84].mxu0 }
 0x63f   : > { %v14473_v55 = vpop.f32.mrb[85].mxu0  ;;  %v3402_v8 = vsel %vm2235_vm2, %v14471_v11, -inf }
 0x640   : > { %3403 = vmax.xlane.f32.xlu0 %v3402_v8  ;;  %v14477_v22 = vpop.f32.mrb[86].mxu0  ;;  %v3396_v59 = vsel %vm2235_vm2, %v14473_v55, -inf }
 0x641   : > { %v14479_v17 = vpop.f32.mrb[87].mxu0  ;;  %v3405_v21 = vsel %vm2235_vm2, %v14477_v22, -inf }
 0x642   : > { %v3399_v25 = vsel %vm2235_vm2, %v14479_v17, -inf }
 0x643   : > { %3400 = vmax.xlane.f32.xlu1 %v3399_v25 }
 0x644   : > { %3397 = vmax.xlane.f32.xlu0 %v3396_v59 }
 0x648   : > { %3406 = vmax.xlane.f32.xlu0 %v3405_v21 }
 0x651   : > { %v14487_v60 = vpop.f32.mrb[100].mxu1 }
 0x652   : > { %18609 = vst [vmem:[#allocation53_spill] sm:$0xff] %v14487_v60  ;;  %v14489_v3 = vpop.f32.mrb[101].mxu1 }
 0x653   : > { %18610 = vst [vmem:[#allocation54_spill] sm:$0xff] %v14489_v3  ;;  %v14491_v8 = vpop.f32.mrb[102].mxu1 }
 0x654   : > { %18611 = vst [vmem:[#allocation55_spill] sm:$0xff] %v14491_v8  ;;  %v14493_v23 = vpop.f32.mrb[103].mxu1 }
 0x655   : > { %18612 = vst [vmem:[#allocation56_spill] sm:$0xff] %v14493_v23 }
 0x65e   : > { %v14495_v29 = vpop.f32.mrb[88].mxu0 }
 0x65f   : > { %v14497_v54 = vpop.f32.mrb[89].mxu0  ;;  %v3414_v25 = vsel %vm2235_vm2, %v14495_v29, -inf }
 0x660   : > { %3415 = vmax.xlane.f32.xlu0 %v3414_v25  ;;  %v14501_v59 = vpop.f32.mrb[90].mxu0  ;;  %v3408_v8 = vsel %vm2235_vm2, %v14497_v54, -inf }
 0x661   : > { %v14503_v31 = vpop.f32.mrb[91].mxu0  ;;  %v3417_v60 = vsel %vm2235_vm2, %v14501_v59, -inf }
 0x662   : > { %v3411_v21 = vsel %vm2235_vm2, %v14503_v31, -inf }
 0x663   : > { %3412 = vmax.xlane.f32.xlu1 %v3411_v21 }
 0x664   : > { %3409 = vmax.xlane.f32.xlu0 %v3408_v8 }
 0x668   : > { %3418 = vmax.xlane.f32.xlu0 %v3417_v60 }
 0x67e   : > { %3875 = vrot.lane.b32.xlu0 %v13919_v53, %s13326_s29 }
 0x68d   : > { %v14513_v25 = vpop.f32.mrb[104].mxu1 }
 0x68e   : > { %18613 = vst [vmem:[#allocation57_spill] sm:$0xff] %v14513_v25  ;;  %v14515_v23 = vpop.f32.mrb[105].mxu1 }
 0x68f   : > { %18614 = vst [vmem:[#allocation58_spill] sm:$0xff] %v14515_v23  ;;  %v14517_v3 = vpop.f32.mrb[106].mxu1 }
 0x690   : > { %18615 = vst [vmem:[#allocation59_spill] sm:$0xff] %v14517_v3  ;;  %v14519_v33 = vpop.f32.mrb[107].mxu1 }
 0x691   : > { %18616 = vst [vmem:[#allocation60_spill] sm:$0xff] %v14519_v33 }
 0x695   : > { %v14521_v21 = vpop.f32.mrb[108].mxu1 }
 0x696   : > { %v14523_v12 = vpop.f32.mrb[109].mxu1  ;;  %v3426_v8 = vsel %vm2235_vm2, %v14521_v21, -inf }
 0x697   : > { %3427 = vmax.xlane.f32.xlu1 %v3426_v8  ;;  %v14527_v60 = vpop.f32.mrb[110].mxu1  ;;  %v3420_v25 = vsel %vm2235_vm2, %v14523_v12, -inf }
 0x698   : > { %v14529_v40 = vpop.f32.mrb[111].mxu1  ;;  %v3429_v33 = vsel %vm2235_vm2, %v14527_v60, -inf }
 0x699   : > { %v3423_v48 = vsel %vm2235_vm2, %v14529_v40, -inf }
 0x69b   : > { %3421 = vmax.xlane.f32.xlu1 %v3420_v25 }
 0x69d   : > { %v14533_v23 = vpop.f32.mrb[112].mxu1 }
 0x69e   : > { %v14535_v3 = vpop.f32.mrb[113].mxu1  ;;  %v3438_v62 = vsel %vm2235_vm2, %v14533_v23, -inf }
 0x69f   : > { %3430 = vmax.xlane.f32.xlu1 %v3429_v33  ;;  %v14539_v41 = vpop.f32.mrb[114].mxu1  ;;  %v14557_v33 = vpop.permute.xlu1 %3758 }
 0x6a0   : > { %v14541_v13 = vpop.f32.mrb[115].mxu1 }
 0x6a1   : > { %v3435_v8 = vsel %vm2235_vm2, %v14541_v13, -inf }
 0x6a2   : > { %3436 = vmax.xlane.f32.xlu0 %v3435_v8 }
 0x6a3   : > { %3424 = vmax.xlane.f32.xlu1 %v3423_v48  ;;  %v14561_v48 = vpop.permute.xlu1 %3873 }
 0x6b4   : > { %3762 = vrot.lane.b32.xlu1 %v13947_v1, %s13326_s29 }
 0x6b8   : > { %3764 = vrot.lane.b32.xlu0 %v13943_v0, %s13326_s29 }
 0x6bc   : > { %3863 = vrot.lane.b32.xlu0 %v13955_v5, %s13326_s29 }
 0x6c0   : > { %3867 = vrot.lane.b32.xlu0 %v13963_v46, %s13326_s29 }
 0x6c4   : > { %4120 = vrot.lane.b32.xlu0 %v13844_v52, %s13327_s30 }
 0x6c8   : > { %4338 = vrot.lane.b32.xlu0 %v13844_v52, %s13328_s20 }
 0x6cc   : > { %4209 = vrot.lane.b32.xlu0 %v13892_v27, %s13327_s30 }
 0x6cd   : > { %v3404_v25 = vpop.xlane.xlu0 %3403 }
 0x6ce   : > { %v3446_v35 = vsub.f32 %v14471_v11, %v3404_v25 }
 0x6d0   : > { %4211 = vrot.lane.b32.xlu0 %v13890_v26, %s13327_s30  ;;  %v3401_v8 = vpop.xlane.xlu1 %3400  ;;  %v3464_v18 = vmul.f32 1.442695, %v3446_v35 }
 0x6d1   : > { %v3445_v14 = vsub.f32 %v14479_v17, %v3401_v8  ;;  %v3398_v15 = vpop.xlane.xlu0 %3397 }
 0x6d2   : > { %v3444_v34 = vsub.f32 %v14473_v55, %v3398_v15  ;;  %v3790_v55 = vsel %vm2056_vm1, %v14454_v32, 0 }
 0x6d3   : > { %v3462_v56 = vmul.f32 1.442695, %v3445_v14  ;;  %v3432_v14 = vsel %vm2235_vm2, %v14535_v3, -inf }
 0x6d4   : > { %v3460_v4 = vmul.f32 1.442695, %v3444_v34  ;;  %4342 = vrot.lane.b32.xlu0 %v13868_v20, %s13328_s20 }
 0x6d5   : > { %12833 = vpow2.f32 %v3462_v56  ;;  %v3407_v36 = vpop.xlane.xlu0 %3406  ;;  %v3787_v56 = vsel %vm2056_vm1, %v14425_v37, 0 }
 0x6d6   : > { %12835 = vpow2.f32 %v3460_v4  ;;  %v3447_v45 = vsub.f32 %v14477_v22, %v3407_v36  ;;  %v3441_v36 = vsel %vm2235_vm2, %v14539_v41, -inf }
 0x6d7   : > { %12837 = vpow2.f32 %v3464_v18 }
 0x6d8   : > { %v3466_v11 = vmul.f32 1.442695, %v3447_v45  ;;  %3439 = vmax.xlane.f32.xlu1 %v3438_v62  ;;  %4215 = vrot.lane.b32.xlu0 %v13917_v49, %s13327_s30 }
 0x6da   : > { %12839 = vpow2.f32 %v3466_v11 }
 0x6dc   : > { %3433 = vmax.xlane.f32.xlu1 %v3432_v14  ;;  %4344 = vrot.lane.b32.xlu0 %v13866_v19, %s13328_s20 }
 0x6df   : > { %v14581_v35 = vpop.eup %12833 }
 0x6e0   : > { %v14585_v34 = vpop.eup %12835  ;;  %3442 = vmax.xlane.f32.xlu1 %v3441_v36  ;;  %4332 = vrot.lane.b32.xlu0 %v13923_v2, %s13328_s20 }
 0x6e1   : > { %v3540_v45 = vpack.c.bf16 %v14581_v35, %v14585_v34  ;;  %v14591_v62 = vpop.eup %12837 }
 0x6e3   : > { %11787 = vmatprep.mubr.msk.bf16.mxu0 %vm2235_vm2, %v3540_v45 }
 0x6e4   : > { %v14594_v18 = vpop.eup %12839  ;;  %4443 = vrot.lane.b32.xlu0 %v13892_v27, %s13328_s20 }
 0x6e5   : > { %v3541_v4 = vpack.c.bf16 %v14594_v18, %v14591_v62 }
 0x6e7   : > { %11788 = vmatmul.mubr.msk.bf16.vlgmr.msra.gmra.mrb[92].mxu0 %vm2235_vm2, %v3541_v4 }
 0x6e8   : > { %11812 = vmatpush3.bf16.xpose.msra.mxu0 %v3787_v56 }
 0x6e9   : > { %12180 = vmatprep.subr.msk.bf16.mxu0 %vm2056_vm1, %v14454_v32 }
 0x6ed   : > { %v3416_v15 = vpop.xlane.xlu0 %3415 }
 0x6ee   : > { %v3450_v17 = vsub.f32 %v14495_v29, %v3416_v15 }
 0x6f0   : > { %11814 = vmatpush3.bf16.xpose.msra.mxu0 %v3790_v55  ;;  %v3413_v22 = vpop.xlane.xlu1 %3412  ;;  %v3472_v36 = vmul.f32 1.442695, %v3450_v17 }
 0x6f1   : > { %12181 = vmatprep.subr.msk.bf16.mxu0 %vm2056_vm1, %v14442_v61  ;;  %v3449_v25 = vsub.f32 %v14503_v31, %v3413_v22  ;;  %v3410_v8 = vpop.xlane.xlu0 %3409  ;;  %3877 = vrot.lane.b32.xlu1 %v13917_v49, %s13326_s29  ;;  %v3793_v31 = vsel %vm2056_vm1, %v14442_v61, 0 }
 0x6f2   : > { %v3448_v37 = vsub.f32 %v14497_v54, %v3410_v8 }
 0x6f3   : > { %v3470_v11 = vmul.f32 1.442695, %v3449_v25 }
 0x6f4   : > { %v3468_v14 = vmul.f32 1.442695, %v3448_v37 }
 0x6f5   : > { %12841 = vpow2.f32 %v3470_v11  ;;  %v3419_v32 = vpop.xlane.xlu0 %3418  ;;  %3865 = vrot.lane.b32.xlu1 %v13953_v16, %s13326_s29 }
 0x6f6   : > { %12843 = vpow2.f32 %v3468_v14  ;;  %v3451_v29 = vsub.f32 %v14501_v59, %v3419_v32  ;;  %v3796_v59 = vsel %vm2056_vm1, %v14449_v50, 0 }
 0x6f7   : > { %12845 = vpow2.f32 %v3472_v36 }
 0x6f8   : > { %v3474_v45 = vmul.f32 1.442695, %v3451_v29  ;;  %11816 = vmatpush3.bf16.xpose.msra.mxu0 %v3793_v31 }
 0x6f9   : > { %12182 = vmatprep.subr.msk.bf16.mxu0 %vm2056_vm1, %v14449_v50  ;;  %3869 = vrot.lane.b32.xlu1 %v13961_v30, %s13326_s29  ;;  %s13337_s29 = smov 12  }
 0x6fa   : > { %12847 = vpow2.f32 %v3474_v45 }
 0x6fd   : > { %4122 = vrot.lane.b32.xlu1 %v13842_v10, %s13327_s30 }
 0x6ff   : > { %v14625_v54 = vpop.eup %12841 }
 0x700   : > { %18617 = vst [vmem:[#allocation61_spill] sm:$0xff] %v14625_v54  ;;  %v14629_v4 = vpop.eup %12843  ;;  %11818 = vmatpush3.bf16.xpose.msra.mxu0 %v3796_v59 }
 0x701   : > { %18618 = vst [vmem:[#allocation62_spill] sm:$0xff] %v14629_v4  ;;  %4124 = vrot.lane.b32.xlu1 %v13868_v20, %s13327_s30  ;;  %v3542_v61 = vpack.c.bf16 %v14625_v54, %v14629_v4  ;;  %v14635_v56 = vpop.eup %12845 }
 0x702   : > { %18619 = vst [vmem:[#allocation63_spill] sm:$0xff] %v14635_v56 }
 0x703   : > { %11791 = vmatprep.mubr.msk.bf16.mxu0 %vm2235_vm2, %v3542_v61 }
 0x704   : > { %v14638_v15 = vpop.eup %12847 }
 0x705   : > { %18620 = vst [vmem:[#allocation64_spill] sm:$0xff] %v14638_v15  ;;  %4126 = vrot.lane.b32.xlu1 %v13866_v19, %s13327_s30  ;;  %v3543_v50 = vpack.c.bf16 %v14638_v15, %v14635_v56 }
 0x707   : > { %11792 = vmatmul.mubr.msk.bf16.gmra.mrb[96].mxu0 %vm2235_vm2, %v3543_v50 }
 0x708   : > { %11819 = vmatprep.mubr.msk.bf16.mxu0 %vm2056_vm1, %v14557_v33  ;;  %v3876_v33 = vpop.permute.xlu0 %3875 }
 0x709   : > { %4340 = vrot.lane.b32.xlu1 %v13842_v10, %s13328_s20 }
 0x70d   : > { %4213 = vrot.lane.b32.xlu1 %v13919_v53, %s13327_s30  ;;  %s13338_s30 = smov 16  }
 0x70f   : > { %11820 = vmatmul.mubr.msk.bf16.vlgmr.msra.gmra.mrb[100].mxu0 %vm2056_vm1, %v14456_v57 }
 0x711   : > { %4330 = vrot.lane.b32.xlu1 %v13931_v42, %s13328_s20 }
 0x715   : > { %4445 = vrot.lane.b32.xlu1 %v13890_v26, %s13328_s20 }
 0x724   : > { %v3428_v55 = vpop.xlane.xlu1 %3427 }
 0x725   : > { %v3454_v22 = vsub.f32 %v14521_v21, %v3428_v55 }
 0x727   : > { %v3480_v25 = vmul.f32 1.442695, %v3454_v22 }
 0x728   : > { %v3422_v17 = vpop.xlane.xlu1 %3421 }
 0x729   : > { %v3452_v8 = vsub.f32 %v14523_v12, %v3422_v17  ;;  %12849 = vpow2.f32 %v3480_v25  ;;  %v3892_v25 = vsel %vm2056_vm1, %v14459_v6, 0 }
 0x72b   : > { %v3476_v57 = vmul.f32 1.442695, %v3452_v8  ;;  %v3895_v8 = vsel %vm2056_vm1, %v14561_v48, 0 }
 0x72c   : > { %v3431_v37 = vpop.xlane.xlu1 %3430 }
 0x72d   : > { %v3455_v11 = vsub.f32 %v14527_v60, %v3431_v37  ;;  %v3898_v37 = vsel %vm2056_vm1, %v3876_v33, 0 }
 0x72f   : > { %v3482_v14 = vmul.f32 1.442695, %v3455_v11  ;;  %v3437_v36 = vpop.xlane.xlu0 %3436 }
 0x730   : > { %v3425_v32 = vpop.xlane.xlu1 %3424  ;;  %v3457_v11 = vsub.f32 %v14541_v13, %v3437_v36 }
 0x731   : > { %12851 = vpow2.f32 %v3482_v14  ;;  %v3453_v29 = vsub.f32 %v14529_v40, %v3425_v32 }
 0x732   : > { %12853 = vpow2.f32 %v3476_v57  ;;  %v3486_v57 = vmul.f32 1.442695, %v3457_v11 }
 0x733   : > { %v3478_v31 = vmul.f32 1.442695, %v3453_v29  ;;  %v3765_v45 = vpop.permute.xlu0 %3764  ;;  %v14663_v59 = vpop.eup %12849 }
 0x734   : > { %v3763_v21 = vpop.permute.xlu1 %3762  ;;  %18621 = vst [vmem:[#allocation65_spill] sm:$0xff] %v14663_v59 }
 0x735   : > { %12855 = vpow2.f32 %v3478_v31  ;;  %11823 = vmatprep.mubr.msk.bf16.mxu0 %vm2056_vm1, %v3763_v21 }
 0x736   : > { %11824 = vmatmul.mubr.msk.bf16.gmra.mrb[104].mxu0 %vm2056_vm1, %v3765_v45  ;;  %12857 = vpow2.f32 %v3486_v57 }
 0x737   : > { %v3864_v12 = vpop.permute.xlu0 %3863 }
 0x73b   : > { %v14665_v60 = vpop.eup %12851  ;;  %v14667_v61 = vpop.permute.xlu0 %3867 }
 0x73c   : > { %18622 = vst [vmem:[#allocation66_spill] sm:$0xff] %v14665_v60  ;;  %v3545_v50 = vpack.c.bf16 %v14665_v60, %v14663_v59  ;;  %v14671_v40 = vpop.eup %12853 }
 0x73d   : > { %18623 = vst [vmem:[#allocation67_spill] sm:$0xff] %v14671_v40 }
 0x73f   : > { %v14673_v55 = vpop.eup %12855  ;;  %v4121_v22 = vpop.permute.xlu0 %4120 }
 0x740   : > { %18624 = vst [vmem:[#allocation68_spill] sm:$0xff] %v14673_v55  ;;  %11843 = vmatprep.subr.bf16.mxu0 %v4121_v22  ;;  %v3544_v17 = vpack.c.bf16 %v14673_v55, %v14671_v40 }
 0x741   : > { %11844 = vmatpush3.bf16.msra.mxu0 %v4121_v22 }
 0x742   : > { %11803 = vmatprep.mubr.msk.bf16.mxu1 %vm2235_vm2, %v3544_v17  ;;  %v14695_v17 = vpop.eup %12857 }
 0x743   : > { %11804 = vmatmul.mubr.msk.bf16.vlgmr.msra.gmra.mrb[116].mxu1 %vm2235_vm2, %v3545_v50  ;;  %v14689_v29 = vpop.permute.xlu0 %4338  ;;  %18625 = vst [vmem:[#allocation69_spill] sm:$0xff] %v14695_v17 }
 0x744   : > { %11828 = vmatpush3.bf16.xpose.msra.mxu1 %v3892_v25 }
 0x745   : > { %12184 = vmatprep.subr.msk.bf16.mxu1 %vm2056_vm1, %v14561_v48 }
 0x74c   : > { %11830 = vmatpush3.bf16.xpose.msra.mxu1 %v3895_v8 }
 0x74d   : > { %12185 = vmatprep.subr.msk.bf16.mxu1 %vm2056_vm1, %v3876_v33  ;;  %v4210_v33 = vpop.permute.xlu0 %4209 }
 0x754   : > { %11832 = vmatpush3.bf16.xpose.msra.mxu1 %v3898_v37 }
 0x765   : > { %v3440_v14 = vpop.xlane.xlu1 %3439 }
 0x766   : > { %v3458_v32 = vsub.f32 %v14533_v23, %v3440_v14 }
 0x768   : > { %v3488_v48 = vmul.f32 1.442695, %v3458_v32 }
 0x769   : > { %v3434_v6 = vpop.xlane.xlu1 %3433 }
 0x76a   : > { %v3456_v31 = vsub.f32 %v14535_v3, %v3434_v6  ;;  %v4212_v3 = vpop.permute.xlu0 %4211 }
 0x76c   : > { %v3484_v45 = vmul.f32 1.442695, %v3456_v31 }
 0x76d   : > { %v3443_v21 = vpop.xlane.xlu1 %3442 }
 0x76e   : > { %12859 = vpow2.f32 %v3484_v45  ;;  %v3459_v50 = vsub.f32 %v14539_v41, %v3443_v21  ;;  %v14706_v14 = vpop.permute.xlu0 %4342 }
 0x76f   : > { %12861 = vpow2.f32 %v3488_v48 }
 0x770   : > { %v3490_v22 = vmul.f32 1.442695, %v3459_v50 }
 0x771   : > { %v3878_v13 = vpop.permute.xlu1 %3877 }
 0x772   : > { %12863 = vpow2.f32 %v3490_v22  ;;  %12186 = vmatprep.subr.msk.bf16.mxu1 %vm2056_vm1, %v3878_v13  ;;  %v3901_v23 = vsel %vm2056_vm1, %v3878_v13, 0  ;;  %v4216_v31 = vpop.permute.xlu0 %4215 }
 0x773   : > { %11834 = vmatpush3.bf16.xpose.msra.mxu1 %v3901_v23 }
 0x774   : > { %11859 = vmatprep.subr.bf16.mxu1 %v4210_v33 }
 0x775   : > { %v3866_v36 = vpop.permute.xlu1 %3865 }
 0x776   : > { %v14713_v48 = vpop.permute.xlu0 %4344 }
 0x778   : > { %v14697_v25 = vpop.eup %12859 }
 0x779   : > { %18626 = vst [vmem:[#allocation70_spill] sm:$0xff] %v14697_v25  ;;  %v3870_v8 = vpop.permute.xlu1 %3869  ;;  %v3546_v41 = vpack.c.bf16 %v14695_v17, %v14697_v25  ;;  %v14701_v37 = vpop.eup %12861 }
 0x77a   : > { %18627 = vst [vmem:[#allocation71_spill] sm:$0xff] %v14701_v37  ;;  %v14721_v50 = vpop.permute.xlu0 %4332 }
 0x77b   : > { %11807 = vmatprep.mubr.msk.bf16.mxu1 %vm2235_vm2, %v3546_v41 }
 0x77c   : > { %v14704_v11 = vpop.eup %12863 }
 0x77d   : > { %18628 = vst [vmem:[#allocation72_spill] sm:$0xff] %v14704_v11  ;;  %v4123_v57 = vpop.permute.xlu1 %4122  ;;  %v3547_v32 = vpack.c.bf16 %v14704_v11, %v14701_v37 }
 0x77e   : > { %11845 = vmatprep.subr.bf16.mxu0 %v4123_v57  ;;  %v14724_v22 = vpop.permute.xlu0 %4443 }
 0x77f   : > { %11808 = vmatmul.mubr.msk.bf16.gmra.mrb[120].mxu1 %vm2235_vm2, %v3547_v32  ;;  %11846 = vmatpush3.bf16.msra.mxu0 %v4123_v57 }
 0x780   : > { %11835 = vmatprep.mubr.msk.bf16.mxu1 %vm2056_vm1, %v3864_v12 }
 0x781   : > { %v4125_v6 = vpop.permute.xlu1 %4124 }
 0x782   : > { %11847 = vmatprep.subr.bf16.mxu0 %v4125_v6 }
 0x783   : > { %11848 = vmatpush3.bf16.msra.mxu0 %v4125_v6 }
 0x785   : > { %v4127_v45 = vpop.permute.xlu1 %4126 }
 0x786   : > { %11849 = vmatprep.subr.bf16.mxu0 %v4127_v45 }
 0x787   : > { %11836 = vmatmul.mubr.msk.bf16.vlgmr.msra.gmra.mrb[124].mxu1 %vm2056_vm1, %v3866_v36  ;;  %11850 = vmatpush3.bf16.msra.mxu0 %v4127_v45 }
 0x788   : > { %11860 = vmatpush3.bf16.msra.mxu1 %v4210_v33  ;;  %11839 = vmatprep.mubr.msk.bf16.mxu1 %vm2056_vm1, %v14667_v61 }
 0x789   : > { %11861 = vmatprep.subr.bf16.mxu1 %v4212_v3  ;;  %12187 = vmatprep.subr.msk.bf16.mxu0 %vm2056_vm1, %v14689_v29  ;;  %v14719_v12 = vpop.permute.xlu1 %4340 }
 0x78c   : > { %11862 = vmatpush3.bf16.msra.mxu1 %v4212_v3 }
 0x78d   : > { %v4214_v21 = vpop.permute.xlu1 %4213 }
 0x78e   : > { %11863 = vmatprep.subr.bf16.mxu1 %v4214_v21 }
 0x78f   : > { %11840 = vmatmul.mubr.msk.bf16.gmra.mrb[128].mxu1 %vm2056_vm1, %v3870_v8 }
 0x790   : > { %11864 = vmatpush3.bf16.msra.mxu1 %v4214_v21 }
 0x791   : > { %11865 = vmatprep.subr.bf16.mxu1 %v4216_v31 }
 0x794   : > { %11866 = vmatpush3.bf16.msra.mxu1 %v4216_v31 }
 0x795   : > { %12191 = vmatprep.subr.msk.bf16.mxu1 %vm2056_vm1, %v14724_v22 }
 0x7ba   : > { %v14728_v61 = vpop.f32.mrb[92].mxu0 }
 0x7bb   : > { %18629 = vst [vmem:[#allocation73_spill] sm:$0xff] %v14728_v61  ;;  %v14730_v33 = vpop.f32.mrb[93].mxu0 }
 0x7bc   : > { %18630 = vst [vmem:[#allocation74_spill] sm:$0xff] %v14730_v33  ;;  %v14732_v13 = vpop.f32.mrb[94].mxu0 }
 0x7bd   : > { %18631 = vst [vmem:[#allocation75_spill] sm:$0xff] %v14732_v13  ;;  %v14734_v23 = vpop.f32.mrb[95].mxu0 }
 0x7be   : > { %18632 = vst [vmem:[#allocation76_spill] sm:$0xff] %v14734_v23 }
 0x7da   : > { %v14736_v36 = vpop.f32.mrb[96].mxu0 }
 0x7db   : > { %18633 = vst [vmem:[#allocation77_spill] sm:$0xff] %v14736_v36  ;;  %v14738_v3 = vpop.f32.mrb[97].mxu0 }
 0x7dc   : > { %18634 = vst [vmem:[#allocation78_spill] sm:$0xff] %v14738_v3  ;;  %v14740_v8 = vpop.f32.mrb[98].mxu0 }
 0x7dd   : > { %18635 = vst [vmem:[#allocation79_spill] sm:$0xff] %v14740_v8  ;;  %v14742_v41 = vpop.f32.mrb[99].mxu0 }
 0x7de   : > { %18636 = vst [vmem:[#allocation80_spill] sm:$0xff] %v14742_v41 }
 0x7e2   : > { %v11821_v57 = vpop.f32.mrb[100].mxu0 }
 0x7e3   : > { %v3832_v32 = vpop.f32.mrb[101].mxu0  ;;  %v3974_v6 = vsel %vm2235_vm2, %v11821_v57, -inf }
 0x7e4   : > { %3975 = vmax.xlane.f32.xlu0 %v3974_v6  ;;  %v14745_v31 = vpop.f32.mrb[102].mxu0  ;;  %v3968_v13 = vsel %vm2235_vm2, %v3832_v32, -inf }
 0x7e5   : > { %v3835_v45 = vpop.f32.mrb[103].mxu0  ;;  %v3977_v36 = vsel %vm2235_vm2, %v14745_v31, -inf }
 0x7e6   : > { %v3971_v21 = vsel %vm2235_vm2, %v3835_v45, -inf }
 0x7e7   : > { %3972 = vmax.xlane.f32.xlu1 %v3971_v21 }
 0x7e8   : > { %3969 = vmax.xlane.f32.xlu0 %v3968_v13 }
 0x7ec   : > { %3978 = vmax.xlane.f32.xlu0 %v3977_v36 }
 0x809   : > { %v14751_v8 = vpop.f32.mrb[104].mxu0 }
 0x80a   : > { %v14753_v41 = vpop.f32.mrb[105].mxu0  ;;  %v3986_v6 = vsel %vm2235_vm2, %v14751_v8, -inf }
 0x80b   : > { %3987 = vmax.xlane.f32.xlu0 %v3986_v6  ;;  %v14757_v3 = vpop.f32.mrb[106].mxu0  ;;  %v3980_v13 = vsel %vm2235_vm2, %v14753_v41, -inf }
 0x80c   : > { %v14759_v61 = vpop.f32.mrb[107].mxu0  ;;  %v3989_v36 = vsel %vm2235_vm2, %v14757_v3, -inf }
 0x80d   : > { %v3983_v21 = vsel %vm2235_vm2, %v14759_v61, -inf }
 0x80e   : > { %3984 = vmax.xlane.f32.xlu1 %v3983_v21 }
 0x80f   : > { %3981 = vmax.xlane.f32.xlu0 %v3980_v13 }
 0x813   : > { %3990 = vmax.xlane.f32.xlu0 %v3989_v36 }
 0x816   : > { %v14767_v23 = vpop.f32.mrb[116].mxu1 }
 0x817   : > { %18637 = vst [vmem:[#allocation81_spill] sm:$0xff] %v14767_v23  ;;  %v14769_v33 = vpop.f32.mrb[117].mxu1 }
 0x818   : > { %18638 = vst [vmem:[#allocation82_spill] sm:$0xff] %v14769_v33  ;;  %v14771_v6 = vpop.f32.mrb[118].mxu1 }
 0x819   : > { %18639 = vst [vmem:[#allocation83_spill] sm:$0xff] %v14771_v6  ;;  %v14773_v11 = vpop.f32.mrb[119].mxu1 }
 0x81a   : > { %18640 = vst [vmem:[#allocation84_spill] sm:$0xff] %v14773_v11 }
 0x829   : > { %4447 = vrot.lane.b32.xlu0 %v13919_v53, %s13328_s20 }
 0x852   : > { %v14777_v21 = vpop.f32.mrb[120].mxu1 }
 0x853   : > { %18641 = vst [vmem:[#allocation85_spill] sm:$0xff] %v14777_v21  ;;  %v14779_v17 = vpop.f32.mrb[121].mxu1 }
 0x854   : > { %18642 = vst [vmem:[#allocation86_spill] sm:$0xff] %v14779_v17  ;;  %v14781_v13 = vpop.f32.mrb[122].mxu1 }
 0x855   : > { %18643 = vst [vmem:[#allocation87_spill] sm:$0xff] %v14781_v13  ;;  %v14783_v37 = vpop.f32.mrb[123].mxu1 }
 0x856   : > { %18644 = vst [vmem:[#allocation88_spill] sm:$0xff] %v14783_v37 }
 0x85a   : > { %v14785_v36 = vpop.f32.mrb[124].mxu1 }
 0x85b   : > { %v14787_v23 = vpop.f32.mrb[125].mxu1  ;;  %v3998_v6 = vsel %vm2235_vm2, %v14785_v36, -inf }
 0x85c   : > { %3999 = vmax.xlane.f32.xlu1 %v3998_v6  ;;  %v14791_v11 = vpop.f32.mrb[126].mxu1  ;;  %v3992_v21 = vsel %vm2235_vm2, %v14787_v23, -inf }
 0x85d   : > { %v14793_v33 = vpop.f32.mrb[127].mxu1  ;;  %v4001_v37 = vsel %vm2235_vm2, %v14791_v11, -inf }
 0x85e   : > { %v3995_v55 = vsel %vm2235_vm2, %v14793_v33, -inf }
 0x860   : > { %3993 = vmax.xlane.f32.xlu1 %v3992_v21  ;;  %v14811_v21 = vpop.permute.xlu1 %4330 }
 0x862   : > { %v14797_v17 = vpop.f32.mrb[128].mxu1 }
 0x863   : > { %v14799_v13 = vpop.f32.mrb[129].mxu1 }
 0x864   : > { %4002 = vmax.xlane.f32.xlu1 %v4001_v37  ;;  %v14803_v25 = vpop.f32.mrb[130].mxu1  ;;  %v14813_v28 = vpop.permute.xlu1 %4445 }
 0x865   : > { %v14805_v60 = vpop.f32.mrb[131].mxu1 }
 0x866   : > { %v4007_v6 = vsel %vm2235_vm2, %v14805_v60, -inf }
 0x867   : > { %4008 = vmax.xlane.f32.xlu0 %v4007_v6 }
 0x868   : > { %3996 = vmax.xlane.f32.xlu1 %v3995_v55 }
 0x871   : > { %v3976_v43 = vpop.xlane.xlu0 %3975 }
 0x872   : > { %v4018_v40 = vsub.f32 %v11821_v57, %v3976_v43 }
 0x874   : > { %v3973_v59 = vpop.xlane.xlu1 %3972  ;;  %v4036_v38 = vmul.f32 1.442695, %v4018_v40 }
 0x875   : > { %v4017_v37 = vsub.f32 %v3835_v45, %v3973_v59  ;;  %v3970_v47 = vpop.xlane.xlu0 %3969  ;;  %v4362_v59 = vsel %vm2056_vm1, %v14719_v12, 0  ;;  %v4010_v45 = vsel %vm2235_vm2, %v14797_v17, -inf }
 0x876   : > { %v4016_v9 = vsub.f32 %v3832_v32, %v3970_v47 }
 0x877   : > { %v4034_v15 = vmul.f32 1.442695, %v4017_v37 }
 0x878   : > { %v4032_v54 = vmul.f32 1.442695, %v4016_v9 }
 0x879   : > { %12865 = vpow2.f32 %v4034_v15  ;;  %v3979_v7 = vpop.xlane.xlu0 %3978  ;;  %4334 = vrot.lane.b32.xlu1 %v13947_v1, %s13328_s20  ;;  %v4359_v15 = vsel %vm2056_vm1, %v14689_v29, 0  ;;  %v4365_v29 = vsel %vm2056_vm1, %v14706_v14, 0 }
 0x87a   : > { %12867 = vpow2.f32 %v4032_v54  ;;  %v4019_v55 = vsub.f32 %v14745_v31, %v3979_v7 }
 0x87b   : > { %12869 = vpow2.f32 %v4036_v38 }
 0x87c   : > { %v4038_v6 = vmul.f32 1.442695, %v4019_v55 }
 0x87d   : > { %4336 = vrot.lane.b32.xlu0 %v13943_v0, %s13328_s20 }
 0x87e   : > { %12871 = vpow2.f32 %v4038_v6 }
 0x881   : > { %4435 = vrot.lane.b32.xlu0 %v13955_v5, %s13328_s20 }
 0x883   : > { %v14822_v47 = vpop.eup %12865 }
 0x884   : > { %v14824_v9 = vpop.eup %12867 }
 0x885   : > { %4439 = vrot.lane.b32.xlu0 %v13963_v46, %s13328_s20  ;;  %v4112_v43 = vpack.c.bf16 %v14822_v47, %v14824_v9  ;;  %v14830_v7 = vpop.eup %12869 }
 0x887   : > { %11851 = vmatprep.mubr.msk.bf16.mxu0 %vm2235_vm2, %v4112_v43 }
 0x888   : > { %v14833_v38 = vpop.eup %12871 }
 0x889   : > { %v4113_v54 = vpack.c.bf16 %v14833_v38, %v14830_v7  ;;  %4692 = vrot.lane.b32.xlu0 %v13844_v52, %s13329_s21 }
 0x88b   : > { %11852 = vmatmul.mubr.msk.bf16.vlgmr.msra.gmra.mrb[108].mxu0 %vm2235_vm2, %v4113_v54  ;;  %v4368_v54 = vsel %vm2056_vm1, %v14713_v48, 0 }
 0x88c   : > { %11876 = vmatpush3.bf16.xpose.msra.mxu0 %v4359_v15  ;;  %v4013_v15 = vsel %vm2235_vm2, %v14803_v25, -inf }
 0x88d   : > { %12188 = vmatprep.subr.msk.bf16.mxu0 %vm2056_vm1, %v14719_v12  ;;  %4910 = vrot.lane.b32.xlu0 %v13844_v52, %s13330_s23 }
 0x891   : > { %4781 = vrot.lane.b32.xlu0 %v13892_v27, %s13329_s21 }
 0x894   : > { %11878 = vmatpush3.bf16.xpose.msra.mxu0 %v4362_v59 }
 0x895   : > { %12189 = vmatprep.subr.msk.bf16.mxu0 %vm2056_vm1, %v14706_v14  ;;  %4783 = vrot.lane.b32.xlu0 %v13890_v26, %s13329_s21 }
 0x898   : > { %v3988_v40 = vpop.xlane.xlu0 %3987 }
 0x899   : > { %4914 = vrot.lane.b32.xlu0 %v13868_v20, %s13330_s23  ;;  %v4022_v32 = vsub.f32 %v14751_v8, %v3988_v40 }
 0x89b   : > { %v3985_v57 = vpop.xlane.xlu1 %3984  ;;  %v4044_v6 = vmul.f32 1.442695, %v4022_v32 }
 0x89c   : > { %11880 = vmatpush3.bf16.xpose.msra.mxu0 %v4365_v29  ;;  %v4021_v12 = vsub.f32 %v14759_v61, %v3985_v57  ;;  %v3982_v31 = vpop.xlane.xlu0 %3981  ;;  %v4004_v61 = vsel %vm2235_vm2, %v14799_v13, -inf }
 0x89d   : > { %v4020_v37 = vsub.f32 %v14753_v41, %v3982_v31  ;;  %12190 = vmatprep.subr.msk.bf16.mxu0 %vm2056_vm1, %v14713_v48  ;;  %4011 = vmax.xlane.f32.xlu1 %v4010_v45 }
 0x89e   : > { %v4042_v55 = vmul.f32 1.442695, %v4021_v12  ;;  %4787 = vrot.lane.b32.xlu0 %v13917_v49, %s13329_s21 }
 0x89f   : > { %v4040_v14 = vmul.f32 1.442695, %v4020_v37 }
 0x8a0   : > { %12873 = vpow2.f32 %v4042_v55  ;;  %v3991_v8 = vpop.xlane.xlu0 %3990 }
 0x8a1   : > { %12875 = vpow2.f32 %v4040_v14  ;;  %v4023_v43 = vsub.f32 %v14757_v3, %v3991_v8  ;;  %4005 = vmax.xlane.f32.xlu1 %v4004_v61 }
 0x8a2   : > { %4916 = vrot.lane.b32.xlu0 %v13866_v19, %s13330_s23  ;;  %12877 = vpow2.f32 %v4044_v6 }
 0x8a3   : > { %v4046_v41 = vmul.f32 1.442695, %v4023_v43 }
 0x8a4   : > { %11882 = vmatpush3.bf16.xpose.msra.mxu0 %v4368_v54  ;;  %v4448_v12 = vpop.permute.xlu0 %4447 }
 0x8a5   : > { %12879 = vpow2.f32 %v4046_v41  ;;  %4014 = vmax.xlane.f32.xlu1 %v4013_v15 }
 0x8a6   : > { %4904 = vrot.lane.b32.xlu0 %v13923_v2, %s13330_s23 }
 0x8aa   : > { %v14878_v59 = vpop.eup %12873  ;;  %5015 = vrot.lane.b32.xlu0 %v13892_v27, %s13330_s23 }
 0x8ab   : > { %18645 = vst [vmem:[#allocation89_spill] sm:$0xff] %v14878_v59  ;;  %v14882_v3 = vpop.eup %12875 }
 0x8ac   : > { %18646 = vst [vmem:[#allocation90_spill] sm:$0xff] %v14882_v3  ;;  %v4114_v48 = vpack.c.bf16 %v14878_v59, %v14882_v3  ;;  %v14886_v40 = vpop.eup %12877 }
 0x8ad   : > { %18647 = vst [vmem:[#allocation91_spill] sm:$0xff] %v14886_v40 }
 0x8ae   : > { %11855 = vmatprep.mubr.msk.bf16.mxu0 %vm2235_vm2, %v4114_v48 }
 0x8af   : > { %v14889_v29 = vpop.eup %12879 }
 0x8b0   : > { %18648 = vst [vmem:[#allocation92_spill] sm:$0xff] %v14889_v29  ;;  %v4115_v57 = vpack.c.bf16 %v14889_v29, %v14886_v40 }
 0x8b2   : > { %11856 = vmatmul.mubr.msk.bf16.gmra.mrb[112].mxu0 %vm2235_vm2, %v4115_v57 }
 0x8b3   : > { %11883 = vmatprep.mubr.msk.bf16.mxu0 %vm2056_vm1, %v14811_v21 }
 0x8b6   : > { %4449 = vrot.lane.b32.xlu1 %v13917_v49, %s13328_s20 }
 0x8ba   : > { %4437 = vrot.lane.b32.xlu1 %v13953_v16, %s13328_s20  ;;  %11884 = vmatmul.mubr.msk.bf16.vlgmr.msra.gmra.mrb[116].mxu0 %vm2056_vm1, %v14721_v50 }
 0x8be   : > { %4441 = vrot.lane.b32.xlu1 %v13961_v30, %s13328_s20  ;;  %s13339_s20 = smov 8  }
 0x8c2   : > { %4694 = vrot.lane.b32.xlu1 %v13842_v10, %s13329_s21 }
 0x8c6   : > { %4696 = vrot.lane.b32.xlu1 %v13868_v20, %s13329_s21 }
 0x8ca   : > { %4698 = vrot.lane.b32.xlu1 %v13866_v19, %s13329_s21 }
 0x8ce   : > { %4912 = vrot.lane.b32.xlu1 %v13842_v10, %s13330_s23 }
 0x8d2   : > { %4785 = vrot.lane.b32.xlu1 %v13919_v53, %s13329_s21  ;;  %s13340_s21 = smov 20  }
 0x8d6   : > { %4902 = vrot.lane.b32.xlu1 %v13931_v42, %s13330_s23 }
 0x8da   : > { %5017 = vrot.lane.b32.xlu1 %v13890_v26, %s13330_s23 }
 0x8e9   : > { %v4000_v50 = vpop.xlane.xlu1 %3999 }
 0x8ea   : > { %v4026_v21 = vsub.f32 %v14785_v36, %v4000_v50 }
 0x8ec   : > { %v4052_v31 = vmul.f32 1.442695, %v4026_v21 }
 0x8ed   : > { %v3994_v32 = vpop.xlane.xlu1 %3993 }
 0x8ee   : > { %v4024_v45 = vsub.f32 %v14787_v23, %v3994_v32  ;;  %12881 = vpow2.f32 %v4052_v31  ;;  %v4464_v31 = vsel %vm2056_vm1, %v14724_v22, 0 }
 0x8f0   : > { %v4048_v8 = vmul.f32 1.442695, %v4024_v45  ;;  %v4467_v45 = vsel %vm2056_vm1, %v14813_v28, 0 }
 0x8f1   : > { %v4003_v37 = vpop.xlane.xlu1 %4002 }
 0x8f2   : > { %v4027_v55 = vsub.f32 %v14791_v11, %v4003_v37  ;;  %v4470_v37 = vsel %vm2056_vm1, %v4448_v12, 0 }
 0x8f4   : > { %v4054_v14 = vmul.f32 1.442695, %v4027_v55  ;;  %v4009_v6 = vpop.xlane.xlu0 %4008 }
 0x8f5   : > { %v3997_v61 = vpop.xlane.xlu1 %3996  ;;  %v4029_v55 = vsub.f32 %v14805_v60, %v4009_v6 }
 0x8f6   : > { %12883 = vpow2.f32 %v4054_v14  ;;  %v4025_v43 = vsub.f32 %v14793_v33, %v3997_v61 }
 0x8f7   : > { %12885 = vpow2.f32 %v4048_v8  ;;  %v4058_v8 = vmul.f32 1.442695, %v4029_v55 }
 0x8f8   : > { %v4050_v41 = vmul.f32 1.442695, %v4025_v43  ;;  %v4337_v54 = vpop.permute.xlu0 %4336  ;;  %v14924_v15 = vpop.eup %12881 }
 0x8f9   : > { %v4335_v36 = vpop.permute.xlu1 %4334  ;;  %18649 = vst [vmem:[#allocation93_spill] sm:$0xff] %v14924_v15 }
 0x8fa   : > { %12887 = vpow2.f32 %v4050_v41  ;;  %11887 = vmatprep.mubr.msk.bf16.mxu0 %vm2056_vm1, %v4335_v36 }
 0x8fb   : > { %11888 = vmatmul.mubr.msk.bf16.gmra.mrb[120].mxu0 %vm2056_vm1, %v4337_v54  ;;  %12889 = vpow2.f32 %v4058_v8 }
 0x8fc   : > { %v4436_v23 = vpop.permute.xlu0 %4435 }
 0x900   : > { %v14926_v11 = vpop.eup %12883  ;;  %v14928_v48 = vpop.permute.xlu0 %4439 }
 0x901   : > { %18650 = vst [vmem:[#allocation94_spill] sm:$0xff] %v14926_v11  ;;  %v4117_v57 = vpack.c.bf16 %v14926_v11, %v14924_v15  ;;  %v14932_v33 = vpop.eup %12885 }
 0x902   : > { %18651 = vst [vmem:[#allocation95_spill] sm:$0xff] %v14932_v33 }
 0x904   : > { %v14934_v50 = vpop.eup %12887  ;;  %v4693_v21 = vpop.permute.xlu0 %4692 }
 0x905   : > { %18652 = vst [vmem:[#allocation96_spill] sm:$0xff] %v14934_v50  ;;  %11907 = vmatprep.subr.bf16.mxu0 %v4693_v21  ;;  %v4116_v32 = vpack.c.bf16 %v14934_v50, %v14932_v33 }
 0x906   : > { %11908 = vmatpush3.bf16.msra.mxu0 %v4693_v21 }
 0x907   : > { %11867 = vmatprep.mubr.msk.bf16.mxu1 %vm2235_vm2, %v4116_v32  ;;  %v14956_v32 = vpop.eup %12889 }
 0x908   : > { %11868 = vmatmul.mubr.msk.bf16.vlgmr.msra.gmra.mrb[132].mxu1 %vm2235_vm2, %v4117_v57  ;;  %v14950_v43 = vpop.permute.xlu0 %4910  ;;  %18653 = vst [vmem:[#allocation97_spill] sm:$0xff] %v14956_v32 }
 0x909   : > { %11892 = vmatpush3.bf16.xpose.msra.mxu1 %v4464_v31 }
 0x90a   : > { %12192 = vmatprep.subr.msk.bf16.mxu1 %vm2056_vm1, %v14813_v28 }
 0x911   : > { %11894 = vmatpush3.bf16.xpose.msra.mxu1 %v4467_v45 }
 0x912   : > { %12193 = vmatprep.subr.msk.bf16.mxu1 %vm2056_vm1, %v4448_v12  ;;  %v4782_v12 = vpop.permute.xlu0 %4781 }
 0x919   : > { %11896 = vmatpush3.bf16.xpose.msra.mxu1 %v4470_v37 }
 0x92a   : > { %v4012_v14 = vpop.xlane.xlu1 %4011 }
 0x92b   : > { %v4030_v61 = vsub.f32 %v14797_v17, %v4012_v14 }
 0x92d   : > { %v4060_v28 = vmul.f32 1.442695, %v4030_v61 }
 0x92e   : > { %v4006_v22 = vpop.xlane.xlu1 %4005 }
 0x92f   : > { %v4028_v41 = vsub.f32 %v14799_v13, %v4006_v22  ;;  %v4784_v13 = vpop.permute.xlu0 %4783 }
 0x931   : > { %v4056_v54 = vmul.f32 1.442695, %v4028_v41 }
 0x932   : > { %v4015_v36 = vpop.xlane.xlu1 %4014 }
 0x933   : > { %12891 = vpow2.f32 %v4056_v54  ;;  %v4031_v57 = vsub.f32 %v14803_v25, %v4015_v36  ;;  %v14967_v14 = vpop.permute.xlu0 %4914 }
 0x934   : > { %12893 = vpow2.f32 %v4060_v28 }
 0x935   : > { %v4062_v21 = vmul.f32 1.442695, %v4031_v57 }
 0x936   : > { %v4450_v60 = vpop.permute.xlu1 %4449 }
 0x937   : > { %12895 = vpow2.f32 %v4062_v21  ;;  %12194 = vmatprep.subr.msk.bf16.mxu1 %vm2056_vm1, %v4450_v60  ;;  %v4473_v17 = vsel %vm2056_vm1, %v4450_v60, 0  ;;  %v4788_v41 = vpop.permute.xlu0 %4787 }
 0x938   : > { %11898 = vmatpush3.bf16.xpose.msra.mxu1 %v4473_v17 }
 0x939   : > { %11923 = vmatprep.subr.bf16.mxu1 %v4782_v12 }
 0x93a   : > { %v4438_v6 = vpop.permute.xlu1 %4437 }
 0x93b   : > { %v14974_v28 = vpop.permute.xlu0 %4916 }
 0x93d   : > { %v14958_v31 = vpop.eup %12891 }
 0x93e   : > { %18654 = vst [vmem:[#allocation98_spill] sm:$0xff] %v14958_v31  ;;  %v4442_v45 = vpop.permute.xlu1 %4441  ;;  %v4118_v25 = vpack.c.bf16 %v14956_v32, %v14958_v31  ;;  %v14962_v37 = vpop.eup %12893 }
 0x93f   : > { %18655 = vst [vmem:[#allocation99_spill] sm:$0xff] %v14962_v37  ;;  %v14982_v57 = vpop.permute.xlu0 %4904 }
 0x940   : > { %11871 = vmatprep.mubr.msk.bf16.mxu1 %vm2235_vm2, %v4118_v25 }
 0x941   : > { %v14965_v55 = vpop.eup %12895 }
 0x942   : > { %18656 = vst [vmem:[#allocation100_spill] sm:$0xff] %v14965_v55  ;;  %v4695_v8 = vpop.permute.xlu1 %4694  ;;  %v4119_v61 = vpack.c.bf16 %v14965_v55, %v14962_v37 }
 0x943   : > { %11909 = vmatprep.subr.bf16.mxu0 %v4695_v8  ;;  %v14985_v21 = vpop.permute.xlu0 %5015 }
 0x944   : > { %11872 = vmatmul.mubr.msk.bf16.gmra.mrb[136].mxu1 %vm2235_vm2, %v4119_v61  ;;  %11910 = vmatpush3.bf16.msra.mxu0 %v4695_v8 }
 0x945   : > { %11899 = vmatprep.mubr.msk.bf16.mxu1 %vm2056_vm1, %v4436_v23 }
 0x946   : > { %v4697_v22 = vpop.permute.xlu1 %4696 }
 0x947   : > { %11911 = vmatprep.subr.bf16.mxu0 %v4697_v22 }
 0x948   : > { %11912 = vmatpush3.bf16.msra.mxu0 %v4697_v22 }
 0x94a   : > { %v4699_v54 = vpop.permute.xlu1 %4698 }
 0x94b   : > { %11913 = vmatprep.subr.bf16.mxu0 %v4699_v54 }
 0x94c   : > { %11900 = vmatmul.mubr.msk.bf16.vlgmr.msra.gmra.mrb[140].mxu1 %vm2056_vm1, %v4438_v6  ;;  %11914 = vmatpush3.bf16.msra.mxu0 %v4699_v54 }
 0x94d   : > { %11924 = vmatpush3.bf16.msra.mxu1 %v4782_v12  ;;  %11903 = vmatprep.mubr.msk.bf16.mxu1 %vm2056_vm1, %v14928_v48 }
 0x94e   : > { %11925 = vmatprep.subr.bf16.mxu1 %v4784_v13  ;;  %12195 = vmatprep.subr.msk.bf16.mxu0 %vm2056_vm1, %v14950_v43  ;;  %v14980_v23 = vpop.permute.xlu1 %4912 }
 0x951   : > { %11926 = vmatpush3.bf16.msra.mxu1 %v4784_v13 }
 0x952   : > { %v4786_v36 = vpop.permute.xlu1 %4785 }
 0x953   : > { %11927 = vmatprep.subr.bf16.mxu1 %v4786_v36 }
 0x954   : > { %11904 = vmatmul.mubr.msk.bf16.gmra.mrb[144].mxu1 %vm2056_vm1, %v4442_v45 }
 0x955   : > { %11928 = vmatpush3.bf16.msra.mxu1 %v4786_v36 }
 0x956   : > { %11929 = vmatprep.subr.bf16.mxu1 %v4788_v41 }
 0x959   : > { %11930 = vmatpush3.bf16.msra.mxu1 %v4788_v41 }
 0x95a   : > { %12199 = vmatprep.subr.msk.bf16.mxu1 %vm2056_vm1, %v14985_v21 }
 0x95e   : > { %v14989_v48 = vpop.f32.mrb[108].mxu0 }
 0x95f   : > { %18657 = vst [vmem:[#allocation101_spill] sm:$0xff] %v14989_v48  ;;  %v14991_v12 = vpop.f32.mrb[109].mxu0 }
 0x960   : > { %18658 = vst [vmem:[#allocation102_spill] sm:$0xff] %v14991_v12  ;;  %v14993_v60 = vpop.f32.mrb[110].mxu0 }
 0x961   : > { %18659 = vst [vmem:[#allocation103_spill] sm:$0xff] %v14993_v60  ;;  %v14995_v17 = vpop.f32.mrb[111].mxu0 }
 0x962   : > { %18660 = vst [vmem:[#allocation104_spill] sm:$0xff] %v14995_v17 }
 0x985   : > { %v14997_v6 = vpop.f32.mrb[112].mxu0 }
 0x986   : > { %18661 = vst [vmem:[#allocation105_spill] sm:$0xff] %v14997_v6  ;;  %v14999_v13 = vpop.f32.mrb[113].mxu0 }
 0x987   : > { %18662 = vst [vmem:[#allocation106_spill] sm:$0xff] %v14999_v13  ;;  %v15001_v45 = vpop.f32.mrb[114].mxu0 }
 0x988   : > { %18663 = vst [vmem:[#allocation107_spill] sm:$0xff] %v15001_v45  ;;  %v15003_v25 = vpop.f32.mrb[115].mxu0 }
 0x989   : > { %18664 = vst [vmem:[#allocation108_spill] sm:$0xff] %v15003_v25 }
 0x98d   : > { %v11885_v8 = vpop.f32.mrb[116].mxu0 }
 0x98e   : > { %v4404_v61 = vpop.f32.mrb[117].mxu0  ;;  %v4546_v22 = vsel %vm2235_vm2, %v11885_v8, -inf }
 0x98f   : > { %4547 = vmax.xlane.f32.xlu0 %v4546_v22  ;;  %v11886_v41 = vpop.f32.mrb[118].mxu0  ;;  %v4540_v60 = vsel %vm2235_vm2, %v4404_v61, -inf }
 0x990   : > { %v4407_v54 = vpop.f32.mrb[119].mxu0  ;;  %v4549_v6 = vsel %vm2235_vm2, %v11886_v41, -inf }
 0x991   : > { %v4543_v36 = vsel %vm2235_vm2, %v4407_v54, -inf }
 0x992   : > { %4544 = vmax.xlane.f32.xlu1 %v4543_v36 }
 0x993   : > { %4541 = vmax.xlane.f32.xlu0 %v4540_v60 }
 0x997   : > { %4550 = vmax.xlane.f32.xlu0 %v4549_v6 }
 0x9ce   : > { %v15009_v13 = vpop.f32.mrb[120].mxu0 }
 0x9cf   : > { %v15011_v45 = vpop.f32.mrb[121].mxu0  ;;  %v4558_v25 = vsel %vm2235_vm2, %v15009_v13, -inf }
 0x9d0   : > { %4559 = vmax.xlane.f32.xlu0 %v4558_v25  ;;  %v15015_v22 = vpop.f32.mrb[122].mxu0  ;;  %v4552_v60 = vsel %vm2235_vm2, %v15011_v45, -inf }
 0x9d1   : > { %v15017_v48 = vpop.f32.mrb[123].mxu0  ;;  %v4561_v6 = vsel %vm2235_vm2, %v15015_v22, -inf }
 0x9d2   : > { %v4555_v36 = vsel %vm2235_vm2, %v15017_v48, -inf }
 0x9d3   : > { %4556 = vmax.xlane.f32.xlu1 %v4555_v36  ;;  %v15035_v36 = vpop.permute.xlu1 %4902 }
 0x9d4   : > { %4553 = vmax.xlane.f32.xlu0 %v4552_v60 }
 0x9d8   : > { %4562 = vmax.xlane.f32.xlu0 %v4561_v6 }
 0x9db   : > { %v15025_v17 = vpop.f32.mrb[132].mxu1 }
 0x9dc   : > { %18665 = vst [vmem:[#allocation109_spill] sm:$0xff] %v15025_v17  ;;  %v15027_v12 = vpop.f32.mrb[133].mxu1  ;;  %v15045_v17 = vpop.permute.xlu1 %5017 }
 0x9dd   : > { %18666 = vst [vmem:[#allocation110_spill] sm:$0xff] %v15027_v12  ;;  %v15029_v25 = vpop.f32.mrb[134].mxu1 }
 0x9de   : > { %18667 = vst [vmem:[#allocation111_spill] sm:$0xff] %v15029_v25  ;;  %v15031_v55 = vpop.f32.mrb[135].mxu1 }
 0x9df   : > { %18668 = vst [vmem:[#allocation112_spill] sm:$0xff] %v15031_v55 }
 0x9ee   : > { %5019 = vrot.lane.b32.xlu0 %v13919_v53, %s13330_s23 }
 0xa17   : > { %v15037_v32 = vpop.f32.mrb[136].mxu1 }
 0xa18   : > { %18669 = vst [vmem:[#allocation113_spill] sm:$0xff] %v15037_v32  ;;  %v15039_v60 = vpop.f32.mrb[137].mxu1 }
 0xa19   : > { %18670 = vst [vmem:[#allocation114_spill] sm:$0xff] %v15039_v60  ;;  %v15041_v37 = vpop.f32.mrb[138].mxu1 }
 0xa1a   : > { %18671 = vst [vmem:[#allocation115_spill] sm:$0xff] %v15041_v37  ;;  %v15043_v6 = vpop.f32.mrb[139].mxu1 }
 0xa1b   : > { %18672 = vst [vmem:[#allocation116_spill] sm:$0xff] %v15043_v6 }
 0xa1c   : > { %v4548_v12 = vpop.xlane.xlu0 %4547 }
 0xa1d   : > { %v4590_v55 = vsub.f32 %v11885_v8, %v4548_v12 }
 0xa1f   : > { %v15047_v31 = vpop.f32.mrb[140].mxu1  ;;  %v4545_v25 = vpop.xlane.xlu1 %4544  ;;  %v4608_v59 = vmul.f32 1.442695, %v4590_v55 }
 0xa20   : > { %v4589_v11 = vsub.f32 %v4407_v54, %v4545_v25  ;;  %v4542_v50 = vpop.xlane.xlu0 %4541  ;;  %v15049_v15 = vpop.f32.mrb[141].mxu1  ;;  %v4570_v32 = vsel %vm2235_vm2, %v15047_v31, -inf }
 0xa21   : > { %v4588_v33 = vsub.f32 %v4404_v61, %v4542_v50  ;;  %4571 = vmax.xlane.f32.xlu1 %v4570_v32  ;;  %v15053_v60 = vpop.f32.mrb[142].mxu1  ;;  %v4564_v12 = vsel %vm2235_vm2, %v15049_v15, -inf }
 0xa22   : > { %v4606_v37 = vmul.f32 1.442695, %v4589_v11  ;;  %v15055_v6 = vpop.f32.mrb[143].mxu1  ;;  %v4573_v11 = vsel %vm2235_vm2, %v15053_v60, -inf }
 0xa23   : > { %v4604_v29 = vmul.f32 1.442695, %v4588_v33 }
 0xa24   : > { %12897 = vpow2.f32 %v4606_v37  ;;  %v4551_v40 = vpop.xlane.xlu0 %4550 }
 0xa25   : > { %12899 = vpow2.f32 %v4604_v29  ;;  %v4591_v8 = vsub.f32 %v11886_v41, %v4551_v40  ;;  %4565 = vmax.xlane.f32.xlu1 %v4564_v12  ;;  %v4567_v40 = vsel %vm2235_vm2, %v15055_v6, -inf }
 0xa26   : > { %12901 = vpow2.f32 %v4608_v59 }
 0xa27   : > { %v4610_v54 = vmul.f32 1.442695, %v4591_v8  ;;  %v15059_v25 = vpop.f32.mrb[144].mxu1  ;;  %v4931_v8 = vsel %vm2056_vm1, %v14950_v43, 0  ;;  %v4937_v43 = vsel %vm2056_vm1, %v14967_v14, 0 }
 0xa28   : > { %v15061_v50 = vpop.f32.mrb[145].mxu1 }
 0xa29   : > { %12903 = vpow2.f32 %v4610_v54  ;;  %4574 = vmax.xlane.f32.xlu1 %v4573_v11  ;;  %v15065_v33 = vpop.f32.mrb[146].mxu1  ;;  %v4934_v54 = vsel %vm2056_vm1, %v14980_v23, 0 }
 0xa2a   : > { %v15067_v32 = vpop.f32.mrb[147].mxu1 }
 0xa2b   : > { %v4579_v29 = vsel %vm2235_vm2, %v15067_v32, -inf }
 0xa2c   : > { %4580 = vmax.xlane.f32.xlu0 %v4579_v29 }
 0xa2d   : > { %4568 = vmax.xlane.f32.xlu1 %v4567_v40 }
 0xa2e   : > { %v15073_v59 = vpop.eup %12897 }
 0xa2f   : > { %v15075_v37 = vpop.eup %12899 }
 0xa30   : > { %v4684_v55 = vpack.c.bf16 %v15073_v59, %v15075_v37  ;;  %v15079_v61 = vpop.eup %12901 }
 0xa32   : > { %11915 = vmatprep.mubr.msk.bf16.mxu0 %vm2235_vm2, %v4684_v55  ;;  %v4582_v55 = vsel %vm2235_vm2, %v15059_v25, -inf }
 0xa33   : > { %v15082_v41 = vpop.eup %12903 }
 0xa34   : > { %v4685_v12 = vpack.c.bf16 %v15082_v41, %v15079_v61 }
 0xa36   : > { %11916 = vmatmul.mubr.msk.bf16.vlgmr.msra.gmra.mrb[124].mxu0 %vm2235_vm2, %v4685_v12 }
 0xa37   : > { %11940 = vmatpush3.bf16.xpose.msra.mxu0 %v4931_v8 }
 0xa38   : > { %12196 = vmatprep.subr.msk.bf16.mxu0 %vm2056_vm1, %v14980_v23  ;;  %v4940_v23 = vsel %vm2056_vm1, %v14974_v28, 0 }
 0xa3e   : > { %4906 = vrot.lane.b32.xlu1 %v13947_v1, %s13330_s23 }
 0xa3f   : > { %11942 = vmatpush3.bf16.xpose.msra.mxu0 %v4934_v54 }
 0xa40   : > { %12197 = vmatprep.subr.msk.bf16.mxu0 %vm2056_vm1, %v14967_v14 }
 0xa42   : > { %4908 = vrot.lane.b32.xlu0 %v13943_v0, %s13330_s23 }
 0xa46   : > { %5007 = vrot.lane.b32.xlu0 %v13955_v5, %s13330_s23 }
 0xa47   : > { %11944 = vmatpush3.bf16.xpose.msra.mxu0 %v4937_v43 }
 0xa48   : > { %12198 = vmatprep.subr.msk.bf16.mxu0 %vm2056_vm1, %v14974_v28 }
 0xa4a   : > { %5011 = vrot.lane.b32.xlu0 %v13963_v46, %s13330_s23 }
 0xa4e   : > { %5264 = vrot.lane.b32.xlu0 %v13844_v52, %s13331_s25 }
 0xa4f   : > { %11946 = vmatpush3.bf16.xpose.msra.mxu0 %v4940_v23 }
 0xa52   : > { %5482 = vrot.lane.b32.xlu0 %v13844_v52, %s13332_s3 }
 0xa56   : > { %5353 = vrot.lane.b32.xlu0 %v13892_v27, %s13331_s25 }
 0xa5a   : > { %5355 = vrot.lane.b32.xlu0 %v13890_v26, %s13331_s25 }
 0xa5d   : > { %v4560_v14 = vpop.xlane.xlu0 %4559 }
 0xa5e   : > { %5486 = vrot.lane.b32.xlu0 %v13868_v20, %s13332_s3  ;;  %v4594_v29 = vsub.f32 %v15009_v13, %v4560_v14  ;;  %v4576_v13 = vsel %vm2235_vm2, %v15061_v50, -inf  ;;  %v4585_v14 = vsel %vm2235_vm2, %v15065_v33, -inf }
 0xa60   : > { %v4557_v11 = vpop.xlane.xlu1 %4556  ;;  %v4616_v43 = vmul.f32 1.442695, %v4594_v29 }
 0xa61   : > { %v4593_v28 = vsub.f32 %v15017_v48, %v4557_v11  ;;  %v4554_v40 = vpop.xlane.xlu0 %4553 }
 0xa62   : > { %v4592_v12 = vsub.f32 %v15011_v45, %v4554_v40  ;;  %4583 = vmax.xlane.f32.xlu1 %v4582_v55  ;;  %5359 = vrot.lane.b32.xlu0 %v13917_v49, %s13331_s25 }
 0xa63   : > { %v4614_v8 = vmul.f32 1.442695, %v4593_v28 }
 0xa64   : > { %v4612_v54 = vmul.f32 1.442695, %v4592_v12 }
 0xa65   : > { %12905 = vpow2.f32 %v4614_v8  ;;  %v4563_v23 = vpop.xlane.xlu0 %4562 }
 0xa66   : > { %12907 = vpow2.f32 %v4612_v54  ;;  %v4595_v48 = vsub.f32 %v15015_v22, %v4563_v23  ;;  %4577 = vmax.xlane.f32.xlu1 %v4576_v13  ;;  %5488 = vrot.lane.b32.xlu0 %v13866_v19, %s13332_s3 }
 0xa67   : > { %12909 = vpow2.f32 %v4616_v43 }
 0xa68   : > { %v4618_v45 = vmul.f32 1.442695, %v4595_v48 }
 0xa69   : > { %v5020_v8 = vpop.permute.xlu0 %5019 }
 0xa6a   : > { %12911 = vpow2.f32 %v4618_v45  ;;  %4586 = vmax.xlane.f32.xlu1 %v4585_v14  ;;  %5476 = vrot.lane.b32.xlu0 %v13923_v2, %s13332_s3 }
 0xa6e   : > { %5587 = vrot.lane.b32.xlu0 %v13892_v27, %s13332_s3 }
 0xa6f   : > { %v15137_v11 = vpop.eup %12905 }
 0xa70   : > { %18673 = vst [vmem:[#allocation117_spill] sm:$0xff] %v15137_v11  ;;  %v15139_v22 = vpop.eup %12907 }
 0xa71   : > { %18674 = vst [vmem:[#allocation118_spill] sm:$0xff] %v15139_v22  ;;  %v4686_v29 = vpack.c.bf16 %v15137_v11, %v15139_v22  ;;  %v15143_v28 = vpop.eup %12909 }
 0xa72   : > { %18675 = vst [vmem:[#allocation119_spill] sm:$0xff] %v15143_v28 }
 0xa73   : > { %11919 = vmatprep.mubr.msk.bf16.mxu0 %vm2235_vm2, %v4686_v29 }
 0xa74   : > { %v15146_v40 = vpop.eup %12911 }
 0xa75   : > { %18676 = vst [vmem:[#allocation120_spill] sm:$0xff] %v15146_v40  ;;  %v4687_v55 = vpack.c.bf16 %v15146_v40, %v15143_v28 }
 0xa77   : > { %11920 = vmatmul.mubr.msk.bf16.gmra.mrb[128].mxu0 %vm2235_vm2, %v4687_v55 }
 0xa78   : > { %11947 = vmatprep.mubr.msk.bf16.mxu0 %vm2056_vm1, %v15035_v36 }
 0xa7b   : > { %5021 = vrot.lane.b32.xlu1 %v13917_v49, %s13330_s23 }
 0xa7f   : > { %5009 = vrot.lane.b32.xlu1 %v13953_v16, %s13330_s23  ;;  %11948 = vmatmul.mubr.msk.bf16.vlgmr.msra.gmra.mrb[132].mxu0 %vm2056_vm1, %v14982_v57 }
 0xa83   : > { %5013 = vrot.lane.b32.xlu1 %v13961_v30, %s13330_s23  ;;  %s13341_s23 = smov 24  }
 0xa87   : > { %5266 = vrot.lane.b32.xlu1 %v13842_v10, %s13331_s25 }
 0xa8b   : > { %5268 = vrot.lane.b32.xlu1 %v13868_v20, %s13331_s25 }
 0xa8f   : > { %5270 = vrot.lane.b32.xlu1 %v13866_v19, %s13331_s25 }
 0xa93   : > { %5484 = vrot.lane.b32.xlu1 %v13842_v10, %s13332_s3 }
 0xa97   : > { %5357 = vrot.lane.b32.xlu1 %v13919_v53, %s13331_s25 }
 0xa9b   : > { %5474 = vrot.lane.b32.xlu1 %v13931_v42, %s13332_s3 }
 0xa9f   : > { %5589 = vrot.lane.b32.xlu1 %v13890_v26, %s13332_s3 }
 0xaae   : > { %v4572_v57 = vpop.xlane.xlu1 %4571 }
 0xaaf   : > { %v4598_v36 = vsub.f32 %v15047_v31, %v4572_v57 }
 0xab1   : > { %v4624_v54 = vmul.f32 1.442695, %v4598_v36 }
 0xab2   : > { %v4566_v12 = vpop.xlane.xlu1 %4565 }
 0xab3   : > { %v4596_v43 = vsub.f32 %v15049_v15, %v4566_v12  ;;  %12913 = vpow2.f32 %v4624_v54 }
 0xab5   : > { %v4620_v14 = vmul.f32 1.442695, %v4596_v43 }
 0xab6   : > { %v4575_v23 = vpop.xlane.xlu1 %4574 }
 0xab7   : > { %v4599_v13 = vsub.f32 %v15053_v60, %v4575_v23  ;;  %v5039_v23 = vsel %vm2056_vm1, %v15045_v17, 0 }
 0xab9   : > { %v4626_v48 = vmul.f32 1.442695, %v4599_v13  ;;  %v4581_v45 = vpop.xlane.xlu0 %4580  ;;  %v5042_v13 = vsel %vm2056_vm1, %v5020_v8, 0 }
 0xaba   : > { %v4569_v29 = vpop.xlane.xlu1 %4568 }
 0xabb   : > { %12915 = vpow2.f32 %v4626_v48  ;;  %v4597_v55 = vsub.f32 %v15055_v6, %v4569_v29  ;;  %v4601_v48 = vsub.f32 %v15067_v32, %v4581_v45 }
 0xabc   : > { %12917 = vpow2.f32 %v4620_v14 }
 0xabd   : > { %v4622_v40 = vmul.f32 1.442695, %v4597_v55  ;;  %v4909_v11 = vpop.permute.xlu0 %4908  ;;  %v15181_v57 = vpop.eup %12913  ;;  %v4630_v29 = vmul.f32 1.442695, %v4601_v48 }
 0xabe   : > { %v4907_v31 = vpop.permute.xlu1 %4906  ;;  %18677 = vst [vmem:[#allocation121_spill] sm:$0xff] %v15181_v57 }
 0xabf   : > { %12919 = vpow2.f32 %v4622_v40  ;;  %11951 = vmatprep.mubr.msk.bf16.mxu0 %vm2056_vm1, %v4907_v31 }
 0xac0   : > { %11952 = vmatmul.mubr.msk.bf16.gmra.mrb[136].mxu0 %vm2056_vm1, %v4909_v11  ;;  %v5036_v11 = vsel %vm2056_vm1, %v14985_v21, 0  ;;  %12921 = vpow2.f32 %v4630_v29 }
 0xac1   : > { %v5008_v15 = vpop.permute.xlu0 %5007 }
 0xac5   : > { %v15183_v60 = vpop.eup %12915  ;;  %v15185_v36 = vpop.permute.xlu0 %5011 }
 0xac6   : > { %18678 = vst [vmem:[#allocation122_spill] sm:$0xff] %v15183_v60  ;;  %v4689_v12 = vpack.c.bf16 %v15183_v60, %v15181_v57  ;;  %v15189_v6 = vpop.eup %12917 }
 0xac7   : > { %18679 = vst [vmem:[#allocation123_spill] sm:$0xff] %v15189_v6 }
 0xac9   : > { %v15191_v54 = vpop.eup %12919  ;;  %v5265_v43 = vpop.permute.xlu0 %5264 }
 0xaca   : > { %18680 = vst [vmem:[#allocation124_spill] sm:$0xff] %v15191_v54  ;;  %11971 = vmatprep.subr.bf16.mxu0 %v5265_v43  ;;  %v4688_v40 = vpack.c.bf16 %v15191_v54, %v15189_v6 }
 0xacb   : > { %11972 = vmatpush3.bf16.msra.mxu0 %v5265_v43 }
 0xacc   : > { %11931 = vmatprep.mubr.msk.bf16.mxu1 %vm2235_vm2, %v4688_v40 }
 0xacd   : > { %11932 = vmatmul.mubr.msk.bf16.vlgmr.msra.gmra.mrb[148].mxu1 %vm2235_vm2, %v4689_v12  ;;  %v15207_v31 = vpop.permute.xlu0 %5482 }
 0xace   : > { %11956 = vmatpush3.bf16.xpose.msra.mxu1 %v5036_v11 }
 0xacf   : > { %12200 = vmatprep.subr.msk.bf16.mxu1 %vm2056_vm1, %v15045_v17 }
 0xad6   : > { %11958 = vmatpush3.bf16.xpose.msra.mxu1 %v5039_v23 }
 0xad7   : > { %12201 = vmatprep.subr.msk.bf16.mxu1 %vm2056_vm1, %v5020_v8  ;;  %v5354_v8 = vpop.permute.xlu0 %5353 }
 0xade   : > { %11960 = vmatpush3.bf16.xpose.msra.mxu1 %v5042_v13  ;;  %v15213_v13 = vpop.eup %12921 }
 0xadf   : > { %18681 = vst [vmem:[#allocation125_spill] sm:$0xff] %v15213_v13 }
 0xaef   : > { %v4584_v14 = vpop.xlane.xlu1 %4583 }
 0xaf0   : > { %v4602_v55 = vsub.f32 %v15059_v25, %v4584_v14 }
 0xaf2   : > { %v4632_v17 = vmul.f32 1.442695, %v4602_v55 }
 0xaf3   : > { %v4578_v21 = vpop.xlane.xlu1 %4577 }
 0xaf4   : > { %v4600_v12 = vsub.f32 %v15061_v50, %v4578_v21  ;;  %v5356_v50 = vpop.permute.xlu0 %5355 }
 0xaf6   : > { %v4628_v43 = vmul.f32 1.442695, %v4600_v12 }
 0xaf7   : > { %v4587_v40 = vpop.xlane.xlu1 %4586 }
 0xaf8   : > { %12923 = vpow2.f32 %v4628_v43  ;;  %v4603_v11 = vsub.f32 %v15065_v33, %v4587_v40  ;;  %v15224_v21 = vpop.permute.xlu0 %5486 }
 0xaf9   : > { %12925 = vpow2.f32 %v4632_v17 }
 0xafa   : > { %v4634_v23 = vmul.f32 1.442695, %v4603_v11 }
 0xafb   : > { %v5022_v32 = vpop.permute.xlu1 %5021 }
 0xafc   : > { %12927 = vpow2.f32 %v4634_v23  ;;  %12202 = vmatprep.subr.msk.bf16.mxu1 %vm2056_vm1, %v5022_v32  ;;  %v5045_v25 = vsel %vm2056_vm1, %v5022_v32, 0  ;;  %v5360_v32 = vpop.permute.xlu0 %5359 }
 0xafd   : > { %11962 = vmatpush3.bf16.xpose.msra.mxu1 %v5045_v25 }
 0xafe   : > { %11987 = vmatprep.subr.bf16.mxu1 %v5354_v8 }
 0xaff   : > { %v5010_v45 = vpop.permute.xlu1 %5009 }
 0xb02   : > { %v15215_v48 = vpop.eup %12923 }
 0xb03   : > { %18682 = vst [vmem:[#allocation126_spill] sm:$0xff] %v15215_v48  ;;  %v5014_v14 = vpop.permute.xlu1 %5013  ;;  %v4690_v33 = vpack.c.bf16 %v15213_v13, %v15215_v48  ;;  %v15219_v29 = vpop.eup %12925 }
 0xb04   : > { %18683 = vst [vmem:[#allocation127_spill] sm:$0xff] %v15219_v29 }
 0xb05   : > { %11935 = vmatprep.mubr.msk.bf16.mxu1 %vm2235_vm2, %v4690_v33 }
 0xb06   : > { %v15222_v55 = vpop.eup %12927 }
 0xb07   : > { %18684 = vst [vmem:[#allocation128_spill] sm:$0xff] %v15222_v55  ;;  %v5267_v12 = vpop.permute.xlu1 %5266  ;;  %v4691_v43 = vpack.c.bf16 %v15222_v55, %v15219_v29 }
 0xb08   : > { %11973 = vmatprep.subr.bf16.mxu0 %v5267_v12 }
 0xb09   : > { %v15228_v17 = vpop.f32.mrb[124].mxu0  ;;  %11936 = vmatmul.mubr.msk.bf16.gmra.mrb[152].mxu1 %vm2235_vm2, %v4691_v43  ;;  %11974 = vmatpush3.bf16.msra.mxu0 %v5267_v12 }
 0xb0a   : > { %18685 = vst [vmem:[#allocation129_spill] sm:$0xff] %v15228_v17  ;;  %v15231_v40 = vpop.f32.mrb[125].mxu0  ;;  %11963 = vmatprep.mubr.msk.bf16.mxu1 %vm2056_vm1, %v5008_v15  ;;  %v15239_v17 = vpop.permute.xlu0 %5488 }
 0xb0b   : > { %18686 = vst [vmem:[#allocation130_spill] sm:$0xff] %v15231_v40  ;;  %v15234_v11 = vpop.f32.mrb[126].mxu0  ;;  %v5269_v23 = vpop.permute.xlu1 %5268 }
 0xb0c   : > { %18687 = vst [vmem:[#allocation131_spill] sm:$0xff] %v15234_v11  ;;  %v15236_v25 = vpop.f32.mrb[127].mxu0  ;;  %11975 = vmatprep.subr.bf16.mxu0 %v5269_v23 }
 0xb0d   : > { %18688 = vst [vmem:[#allocation132_spill] sm:$0xff] %v15236_v25  ;;  %11976 = vmatpush3.bf16.msra.mxu0 %v5269_v23 }
 0xb0e   : > { %v15247_v43 = vpop.permute.xlu0 %5476 }
 0xb0f   : > { %v5271_v33 = vpop.permute.xlu1 %5270 }
 0xb10   : > { %11977 = vmatprep.subr.bf16.mxu0 %v5271_v33 }
 0xb11   : > { %11964 = vmatmul.mubr.msk.bf16.vlgmr.msra.gmra.mrb[156].mxu1 %vm2056_vm1, %v5010_v45  ;;  %11978 = vmatpush3.bf16.msra.mxu0 %v5271_v33 }
 0xb12   : > { %11988 = vmatpush3.bf16.msra.mxu1 %v5354_v8  ;;  %11967 = vmatprep.mubr.msk.bf16.mxu1 %vm2056_vm1, %v15185_v36  ;;  %v15250_v45 = vpop.permute.xlu0 %5587 }
 0xb13   : > { %11989 = vmatprep.subr.bf16.mxu1 %v5356_v50  ;;  %12203 = vmatprep.subr.msk.bf16.mxu0 %vm2056_vm1, %v15207_v31  ;;  %v15245_v15 = vpop.permute.xlu1 %5484 }
 0xb16   : > { %11990 = vmatpush3.bf16.msra.mxu1 %v5356_v50 }
 0xb17   : > { %v5358_v12 = vpop.permute.xlu1 %5357 }
 0xb18   : > { %11991 = vmatprep.subr.bf16.mxu1 %v5358_v12 }
 0xb19   : > { %11968 = vmatmul.mubr.msk.bf16.gmra.mrb[160].mxu1 %vm2056_vm1, %v5014_v14 }
 0xb1a   : > { %11992 = vmatpush3.bf16.msra.mxu1 %v5358_v12 }
 0xb1b   : > { %11993 = vmatprep.subr.bf16.mxu1 %v5360_v32 }
 0xb1e   : > { %11994 = vmatpush3.bf16.msra.mxu1 %v5360_v32 }
 0xb1f   : > { %12207 = vmatprep.subr.msk.bf16.mxu1 %vm2056_vm1, %v15250_v45 }
 0xb4a   : > { %v15254_v36 = vpop.f32.mrb[128].mxu0 }
 0xb4b   : > { %18689 = vst [vmem:[#allocation133_spill] sm:$0xff] %v15254_v36  ;;  %v15256_v8 = vpop.f32.mrb[129].mxu0 }
 0xb4c   : > { %18690 = vst [vmem:[#allocation134_spill] sm:$0xff] %v15256_v8  ;;  %v15258_v23 = vpop.f32.mrb[130].mxu0 }
 0xb4d   : > { %18691 = vst [vmem:[#allocation135_spill] sm:$0xff] %v15258_v23  ;;  %v15260_v50 = vpop.f32.mrb[131].mxu0 }
 0xb4e   : > { %18692 = vst [vmem:[#allocation136_spill] sm:$0xff] %v15260_v50 }
 0xb52   : > { %v11949_v33 = vpop.f32.mrb[132].mxu0 }
 0xb53   : > { %v4976_v11 = vpop.f32.mrb[133].mxu0  ;;  %v5118_v14 = vsel %vm2235_vm2, %v11949_v33, -inf }
 0xb54   : > { %5119 = vmax.xlane.f32.xlu0 %v5118_v14  ;;  %v11950_v12 = vpop.f32.mrb[134].mxu0  ;;  %v5112_v40 = vsel %vm2235_vm2, %v4976_v11, -inf }
 0xb55   : > { %v4979_v25 = vpop.f32.mrb[135].mxu0  ;;  %v5121_v36 = vsel %vm2235_vm2, %v11950_v12, -inf }
 0xb56   : > { %v5115_v32 = vsel %vm2235_vm2, %v4979_v25, -inf }
 0xb57   : > { %5116 = vmax.xlane.f32.xlu1 %v5115_v32 }
 0xb58   : > { %5113 = vmax.xlane.f32.xlu0 %v5112_v40 }
 0xb5c   : > { %5122 = vmax.xlane.f32.xlu0 %v5121_v36 }
 0xb93   : > { %v15266_v8 = vpop.f32.mrb[136].mxu0 }
 0xb94   : > { %v15268_v23 = vpop.f32.mrb[137].mxu0  ;;  %v5130_v50 = vsel %vm2235_vm2, %v15266_v8, -inf }
 0xb95   : > { %5131 = vmax.xlane.f32.xlu0 %v5130_v50  ;;  %v15272_v14 = vpop.f32.mrb[138].mxu0  ;;  %v5124_v40 = vsel %vm2235_vm2, %v15268_v23, -inf }
 0xb96   : > { %v15274_v55 = vpop.f32.mrb[139].mxu0  ;;  %v5133_v36 = vsel %vm2235_vm2, %v15272_v14, -inf }
 0xb97   : > { %v5127_v32 = vsel %vm2235_vm2, %v15274_v55, -inf }
 0xb98   : > { %5128 = vmax.xlane.f32.xlu1 %v5127_v32  ;;  %v15292_v32 = vpop.permute.xlu1 %5474 }
 0xb99   : > { %5125 = vmax.xlane.f32.xlu0 %v5124_v40 }
 0xb9d   : > { %5134 = vmax.xlane.f32.xlu0 %v5133_v36 }
 0xba0   : > { %v15282_v13 = vpop.f32.mrb[148].mxu1 }
 0xba1   : > { %18693 = vst [vmem:[#allocation137_spill] sm:$0xff] %v15282_v13  ;;  %v15284_v29 = vpop.f32.mrb[149].mxu1  ;;  %v15302_v13 = vpop.permute.xlu1 %5589 }
 0xba2   : > { %18694 = vst [vmem:[#allocation138_spill] sm:$0xff] %v15284_v29  ;;  %v15286_v50 = vpop.f32.mrb[150].mxu1 }
 0xba3   : > { %18695 = vst [vmem:[#allocation139_spill] sm:$0xff] %v15286_v50  ;;  %v15288_v48 = vpop.f32.mrb[151].mxu1 }
 0xba4   : > { %18696 = vst [vmem:[#allocation140_spill] sm:$0xff] %v15288_v48 }
 0xbb3   : > { %5591 = vrot.lane.b32.xlu0 %v13919_v53, %s13332_s3 }
 0xbdc   : > { %v15294_v60 = vpop.f32.mrb[152].mxu1 }
 0xbdd   : > { %18697 = vst [vmem:[#allocation141_spill] sm:$0xff] %v15294_v60  ;;  %v15296_v40 = vpop.f32.mrb[153].mxu1 }
 0xbde   : > { %18698 = vst [vmem:[#allocation142_spill] sm:$0xff] %v15296_v40  ;;  %v15298_v54 = vpop.f32.mrb[154].mxu1 }
 0xbdf   : > { %18699 = vst [vmem:[#allocation143_spill] sm:$0xff] %v15298_v54  ;;  %v15300_v36 = vpop.f32.mrb[155].mxu1 }
 0xbe0   : > { %18700 = vst [vmem:[#allocation144_spill] sm:$0xff] %v15300_v36 }
 0xbe1   : > { %v5120_v29 = vpop.xlane.xlu0 %5119 }
 0xbe2   : > { %v5162_v48 = vsub.f32 %v11949_v33, %v5120_v29 }
 0xbe4   : > { %v15304_v57 = vpop.f32.mrb[156].mxu1  ;;  %v5117_v50 = vpop.xlane.xlu1 %5116  ;;  %v5180_v4 = vmul.f32 1.442695, %v5162_v48 }
 0xbe5   : > { %v5161_v6 = vsub.f32 %v4979_v25, %v5117_v50  ;;  %v5114_v28 = vpop.xlane.xlu0 %5113  ;;  %v15306_v22 = vpop.f32.mrb[157].mxu1  ;;  %v5142_v60 = vsel %vm2235_vm2, %v15304_v57, -inf }
 0xbe6   : > { %v5160_v3 = vsub.f32 %v4976_v11, %v5114_v28  ;;  %5143 = vmax.xlane.f32.xlu1 %v5142_v60  ;;  %v15310_v40 = vpop.f32.mrb[158].mxu1  ;;  %v5136_v29 = vsel %vm2235_vm2, %v15306_v22, -inf }
 0xbe7   : > { %v5178_v54 = vmul.f32 1.442695, %v5161_v6  ;;  %v15312_v36 = vpop.f32.mrb[159].mxu1  ;;  %v5145_v60 = vsel %vm2235_vm2, %v15310_v40, -inf }
 0xbe8   : > { %v5176_v56 = vmul.f32 1.442695, %v5160_v3 }
 0xbe9   : > { %12929 = vpow2.f32 %v5178_v54  ;;  %v5123_v44 = vpop.xlane.xlu0 %5122 }
 0xbea   : > { %12931 = vpow2.f32 %v5176_v56  ;;  %v5163_v25 = vsub.f32 %v11950_v12, %v5123_v44  ;;  %5137 = vmax.xlane.f32.xlu1 %v5136_v29  ;;  %v5139_v44 = vsel %vm2235_vm2, %v15312_v36, -inf }
 0xbeb   : > { %12933 = vpow2.f32 %v5180_v4 }
 0xbec   : > { %v5182_v33 = vmul.f32 1.442695, %v5163_v25  ;;  %v15316_v50 = vpop.f32.mrb[160].mxu1  ;;  %v5503_v25 = vsel %vm2056_vm1, %v15207_v31, 0  ;;  %v5509_v31 = vsel %vm2056_vm1, %v15224_v21, 0 }
 0xbed   : > { %v15318_v28 = vpop.f32.mrb[161].mxu1 }
 0xbee   : > { %12935 = vpow2.f32 %v5182_v33  ;;  %5146 = vmax.xlane.f32.xlu1 %v5145_v60  ;;  %v15322_v3 = vpop.f32.mrb[162].mxu1  ;;  %v5506_v33 = vsel %vm2056_vm1, %v15245_v15, 0 }
 0xbef   : > { %v15324_v6 = vpop.f32.mrb[163].mxu1 }
 0xbf0   : > { %v5151_v56 = vsel %vm2235_vm2, %v15324_v6, -inf }
 0xbf1   : > { %5152 = vmax.xlane.f32.xlu0 %v5151_v56 }
 0xbf2   : > { %5140 = vmax.xlane.f32.xlu1 %v5139_v44 }
 0xbf3   : > { %v15330_v4 = vpop.eup %12929 }
 0xbf4   : > { %v15332_v54 = vpop.eup %12931 }
 0xbf5   : > { %v5256_v48 = vpack.c.bf16 %v15330_v4, %v15332_v54  ;;  %v15336_v11 = vpop.eup %12933 }
 0xbf7   : > { %11979 = vmatprep.mubr.msk.bf16.mxu0 %vm2235_vm2, %v5256_v48  ;;  %v5154_v48 = vsel %vm2235_vm2, %v15316_v50, -inf }
 0xbf8   : > { %v15339_v12 = vpop.eup %12935 }
 0xbf9   : > { %v5257_v29 = vpack.c.bf16 %v15339_v12, %v15336_v11 }
 0xbfb   : > { %11980 = vmatmul.mubr.msk.bf16.vlgmr.msra.gmra.mrb[140].mxu0 %vm2235_vm2, %v5257_v29 }
 0xbfc   : > { %12004 = vmatpush3.bf16.xpose.msra.mxu0 %v5503_v25 }
 0xbfd   : > { %12204 = vmatprep.subr.msk.bf16.mxu0 %vm2056_vm1, %v15245_v15  ;;  %v5512_v15 = vsel %vm2056_vm1, %v15239_v17, 0 }
 0xc03   : > { %5478 = vrot.lane.b32.xlu1 %v13947_v1, %s13332_s3 }
 0xc04   : > { %12006 = vmatpush3.bf16.xpose.msra.mxu0 %v5506_v33 }
 0xc05   : > { %12205 = vmatprep.subr.msk.bf16.mxu0 %vm2056_vm1, %v15224_v21 }
 0xc07   : > { %5480 = vrot.lane.b32.xlu0 %v13943_v0, %s13332_s3 }
 0xc0b   : > { %5579 = vrot.lane.b32.xlu0 %v13955_v5, %s13332_s3 }
 0xc0c   : > { %12008 = vmatpush3.bf16.xpose.msra.mxu0 %v5509_v31 }
 0xc0d   : > { %12206 = vmatprep.subr.msk.bf16.mxu0 %vm2056_vm1, %v15239_v17 }
 0xc0f   : > { %5583 = vrot.lane.b32.xlu0 %v13963_v46, %s13332_s3 }
 0xc13   : > { %5836 = vrot.lane.b32.xlu0 %v13844_v52, %s13333_s26 }
 0xc14   : > { %12010 = vmatpush3.bf16.xpose.msra.mxu0 %v5512_v15 }
 0xc17   : > { %6054 = vrot.lane.b32.xlu0 %v13844_v52, %s13334_s2 }
 0xc1b   : > { %5925 = vrot.lane.b32.xlu0 %v13892_v27, %s13333_s26 }
 0xc1f   : > { %5927 = vrot.lane.b32.xlu0 %v13890_v26, %s13333_s26 }
 0xc22   : > { %v5132_v21 = vpop.xlane.xlu0 %5131 }
 0xc23   : > { %6058 = vrot.lane.b32.xlu0 %v13868_v20, %s13334_s2  ;;  %v5166_v56 = vsub.f32 %v15266_v8, %v5132_v21  ;;  %v5148_v8 = vsel %vm2235_vm2, %v15318_v28, -inf  ;;  %v5157_v21 = vsel %vm2235_vm2, %v15322_v3, -inf }
 0xc25   : > { %v5129_v60 = vpop.xlane.xlu1 %5128  ;;  %v5188_v31 = vmul.f32 1.442695, %v5166_v56 }
 0xc26   : > { %v5165_v17 = vsub.f32 %v15274_v55, %v5129_v60  ;;  %v5126_v44 = vpop.xlane.xlu0 %5125 }
 0xc27   : > { %v5164_v29 = vsub.f32 %v15268_v23, %v5126_v44  ;;  %5155 = vmax.xlane.f32.xlu1 %v5154_v48  ;;  %5931 = vrot.lane.b32.xlu0 %v13917_v49, %s13333_s26 }
 0xc28   : > { %v5186_v25 = vmul.f32 1.442695, %v5165_v17 }
 0xc29   : > { %v5184_v33 = vmul.f32 1.442695, %v5164_v29 }
 0xc2a   : > { %12937 = vpow2.f32 %v5186_v25  ;;  %v5135_v15 = vpop.xlane.xlu0 %5134 }
 0xc2b   : > { %12939 = vpow2.f32 %v5184_v33  ;;  %v5167_v55 = vsub.f32 %v15272_v14, %v5135_v15  ;;  %5149 = vmax.xlane.f32.xlu1 %v5148_v8  ;;  %6060 = vrot.lane.b32.xlu0 %v13866_v19, %s13334_s2  ;;  %v5608_v8 = vsel %vm2056_vm1, %v15250_v45, 0 }
 0xc2c   : > { %12941 = vpow2.f32 %v5188_v31 }
 0xc2d   : > { %v5190_v23 = vmul.f32 1.442695, %v5167_v55  ;;  %v5611_v55 = vsel %vm2056_vm1, %v15302_v13, 0 }
 0xc2f   : > { %12943 = vpow2.f32 %v5190_v23  ;;  %5158 = vmax.xlane.f32.xlu1 %v5157_v21  ;;  %6048 = vrot.lane.b32.xlu0 %v13923_v2, %s13334_s2 }
 0xc33   : > { %6159 = vrot.lane.b32.xlu0 %v13892_v27, %s13334_s2 }
 0xc34   : > { %v15394_v60 = vpop.eup %12937 }
 0xc35   : > { %v15396_v14 = vpop.eup %12939 }
 0xc36   : > { %v5258_v56 = vpack.c.bf16 %v15394_v60, %v15396_v14  ;;  %v15402_v17 = vpop.eup %12941 }
 0xc37   : > { %6050 = vrot.lane.b32.xlu0 %v13947_v1, %s13334_s2 }
 0xc38   : > { %11983 = vmatprep.mubr.msk.bf16.mxu0 %vm2235_vm2, %v5258_v56 }
 0xc39   : > { %v15405_v44 = vpop.eup %12943 }
 0xc3a   : > { %v5259_v2 = vpack.c.bf16 %v15405_v44, %v15402_v17 }
 0xc3b   : > { %6163 = vrot.lane.b32.xlu0 %v13919_v53, %s13334_s2 }
 0xc3c   : > { %11984 = vmatmul.mubr.msk.bf16.gmra.mrb[144].mxu0 %vm2235_vm2, %v5259_v2 }
 0xc3d   : > { %12011 = vmatprep.mubr.msk.bf16.mxu0 %vm2056_vm1, %v15292_v32 }
 0xc3f   : > { %6151 = vrot.lane.b32.xlu0 %v13955_v5, %s13334_s2 }
 0xc40   : > { %5593 = vrot.lane.b32.xlu1 %v13917_v49, %s13332_s3 }
 0xc43   : > { %6155 = vrot.lane.b32.xlu0 %v13963_v46, %s13334_s2 }
 0xc44   : > { %5581 = vrot.lane.b32.xlu1 %v13953_v16, %s13332_s3  ;;  %12012 = vmatmul.mubr.msk.bf16.vlgmr.msra.gmra.mrb[148].mxu0 %vm2056_vm1, %v15247_v43 }
 0xc47   : > { %6408 = vrot.lane.b32.xlu0 %v13844_v52, %s13335_s27 }
 0xc48   : > { %5585 = vrot.lane.b32.xlu1 %v13961_v30, %s13332_s3 }
 0xc4b   : > { %6412 = vrot.lane.b32.xlu0 %v13868_v20, %s13335_s27 }
 0xc4c   : > { %5838 = vrot.lane.b32.xlu1 %v13842_v10, %s13333_s26 }
 0xc4f   : > { %6497 = vrot.lane.b32.xlu0 %v13892_v27, %s13335_s27 }
 0xc50   : > { %5840 = vrot.lane.b32.xlu1 %v13868_v20, %s13333_s26 }
 0xc54   : > { %5842 = vrot.lane.b32.xlu1 %v13866_v19, %s13333_s26 }
 0xc58   : > { %6056 = vrot.lane.b32.xlu1 %v13842_v10, %s13334_s2 }
 0xc5c   : > { %5929 = vrot.lane.b32.xlu1 %v13919_v53, %s13333_s26  ;;  %s10720_s26 = sshll.u32 %s19060_s22, 6 }
 0xc60   : > { %6046 = vrot.lane.b32.xlu1 %v13931_v42, %s13334_s2  ;;  %v5592_v42 = vpop.permute.xlu0 %5591 }
 0xc61   : > { %v5614_v23 = vsel %vm2056_vm1, %v5592_v42, 0 }
 0xc64   : > { %6161 = vrot.lane.b32.xlu1 %v13890_v26, %s13334_s2 }
 0xc68   : > { %6052 = vrot.lane.b32.xlu1 %v13943_v0, %s13334_s2 }
 0xc6c   : > { %6165 = vrot.lane.b32.xlu1 %v13917_v49, %s13334_s2 }
 0xc70   : > { %6153 = vrot.lane.b32.xlu1 %v13953_v16, %s13334_s2 }
 0xc73   : > { %v5144_v52 = vpop.xlane.xlu1 %5143 }
 0xc74   : > { %6157 = vrot.lane.b32.xlu1 %v13961_v30, %s13334_s2  ;;  %v5170_v20 = vsub.f32 %v15304_v57, %v5144_v52 }
 0xc76   : > { %v5196_v1 = vmul.f32 1.442695, %v5170_v20 }
 0xc77   : > { %v5138_v27 = vpop.xlane.xlu1 %5137 }
 0xc78   : > { %6410 = vrot.lane.b32.xlu1 %v13842_v10, %s13335_s27  ;;  %v5168_v0 = vsub.f32 %v15306_v22, %v5138_v27  ;;  %12945 = vpow2.f32 %v5196_v1 }
 0xc7a   : > { %v5192_v30 = vmul.f32 1.442695, %v5168_v0 }
 0xc7b   : > { %v5147_v5 = vpop.xlane.xlu1 %5146 }
 0xc7c   : > { %v5171_v46 = vsub.f32 %v15310_v40, %v5147_v5  ;;  %6414 = vrot.lane.b32.xlu1 %v13866_v19, %s13335_s27 }
 0xc7e   : > { %v5198_v16 = vmul.f32 1.442695, %v5171_v46  ;;  %v5153_v43 = vpop.xlane.xlu0 %5152 }
 0xc7f   : > { %v5141_v32 = vpop.xlane.xlu1 %5140  ;;  %v5173_v21 = vsub.f32 %v15324_v6, %v5153_v43 }
 0xc80   : > { %12947 = vpow2.f32 %v5198_v16  ;;  %v5169_v57 = vsub.f32 %v15312_v36, %v5141_v32  ;;  %6499 = vrot.lane.b32.xlu1 %v13890_v26, %s13335_s27 }
 0xc81   : > { %12949 = vpow2.f32 %v5192_v30  ;;  %v5202_v2 = vmul.f32 1.442695, %v5173_v21 }
 0xc82   : > { %v5194_v10 = vmul.f32 1.442695, %v5169_v57  ;;  %v5481_v48 = vpop.permute.xlu0 %5480  ;;  %v15466_v40 = vpop.eup %12945 }
 0xc83   : > { %v5479_v22 = vpop.permute.xlu1 %5478 }
 0xc84   : > { %12951 = vpow2.f32 %v5194_v10  ;;  %12015 = vmatprep.mubr.msk.bf16.mxu0 %vm2056_vm1, %v5479_v22 }
 0xc85   : > { %12016 = vmatmul.mubr.msk.bf16.gmra.mrb[152].mxu0 %vm2056_vm1, %v5481_v48  ;;  %12953 = vpow2.f32 %v5202_v2 }
 0xc86   : > { %v5580_v19 = vpop.permute.xlu0 %5579 }
 0xc8a   : > { %v15468_v29 = vpop.eup %12947  ;;  %v15470_v25 = vpop.permute.xlu0 %5583 }
 0xc8b   : > { %v5261_v36 = vpack.c.bf16 %v15468_v29, %v15466_v40  ;;  %v15474_v26 = vpop.eup %12949 }
 0xc8e   : > { %v15476_v33 = vpop.eup %12951  ;;  %v5837_v31 = vpop.permute.xlu0 %5836 }
 0xc8f   : > { %12035 = vmatprep.subr.bf16.mxu0 %v5837_v31  ;;  %v5260_v15 = vpack.c.bf16 %v15476_v33, %v15474_v26  ;;  %v15498_v43 = vpop.eup %12953 }
 0xc90   : > { %12036 = vmatpush3.bf16.msra.mxu0 %v5837_v31  ;;  %18701 = vst [vmem:[#allocation145_spill] sm:$0xff] %v15498_v43 }
 0xc91   : > { %11995 = vmatprep.mubr.msk.bf16.mxu1 %vm2235_vm2, %v5260_v15 }
 0xc92   : > { %11996 = vmatmul.mubr.msk.bf16.vlgmr.msra.gmra.mrb[164].mxu1 %vm2235_vm2, %v5261_v36  ;;  %v15492_v20 = vpop.permute.xlu0 %6054 }
 0xc93   : > { %12020 = vmatpush3.bf16.xpose.msra.mxu1 %v5608_v8 }
 0xc94   : > { %12208 = vmatprep.subr.msk.bf16.mxu1 %vm2056_vm1, %v15302_v13 }
 0xc9b   : > { %12022 = vmatpush3.bf16.xpose.msra.mxu1 %v5611_v55 }
 0xc9c   : > { %12209 = vmatprep.subr.msk.bf16.mxu1 %vm2056_vm1, %v5592_v42  ;;  %v5926_v42 = vpop.permute.xlu0 %5925 }
 0xca3   : > { %12024 = vmatpush3.bf16.xpose.msra.mxu1 %v5614_v23 }
 0xcb4   : > { %v5156_v56 = vpop.xlane.xlu1 %5155 }
 0xcb5   : > { %v5174_v52 = vsub.f32 %v15316_v50, %v5156_v56 }
 0xcb7   : > { %v5204_v13 = vmul.f32 1.442695, %v5174_v52 }
 0xcb8   : > { %v5150_v45 = vpop.xlane.xlu1 %5149 }
 0xcb9   : > { %v5172_v27 = vsub.f32 %v15318_v28, %v5150_v45  ;;  %v5928_v28 = vpop.permute.xlu0 %5927 }
 0xcbb   : > { %v5200_v1 = vmul.f32 1.442695, %v5172_v27 }
 0xcbc   : > { %v5159_v0 = vpop.xlane.xlu1 %5158 }
 0xcbd   : > { %12955 = vpow2.f32 %v5200_v1  ;;  %v5175_v5 = vsub.f32 %v15322_v3, %v5159_v0  ;;  %v15509_v48 = vpop.permute.xlu0 %6058 }
 0xcbe   : > { %12957 = vpow2.f32 %v5204_v13 }
 0xcbf   : > { %v5206_v46 = vmul.f32 1.442695, %v5175_v5 }
 0xcc0   : > { %v5594_v6 = vpop.permute.xlu1 %5593 }
 0xcc1   : > { %12959 = vpow2.f32 %v5206_v46  ;;  %12210 = vmatprep.subr.msk.bf16.mxu1 %vm2056_vm1, %v5594_v6  ;;  %v5617_v50 = vsel %vm2056_vm1, %v5594_v6, 0  ;;  %v5932_v23 = vpop.permute.xlu0 %5931 }
 0xcc2   : > { %12026 = vmatpush3.bf16.xpose.msra.mxu1 %v5617_v50 }
 0xcc3   : > { %12051 = vmatprep.subr.bf16.mxu1 %v5926_v42 }
 0xcc4   : > { %v5582_v16 = vpop.permute.xlu1 %5581 }
 0xcc5   : > { %v15524_v2 = vpop.permute.xlu0 %6060 }
 0xcc7   : > { %v15500_v30 = vpop.eup %12955 }
 0xcc8   : > { %v5586_v32 = vpop.permute.xlu1 %5585  ;;  %v5262_v3 = vpack.c.bf16 %v15498_v43, %v15500_v30  ;;  %v15504_v57 = vpop.eup %12957 }
 0xcc9   : > { %v15532_v45 = vpop.permute.xlu0 %6048 }
 0xcca   : > { %11999 = vmatprep.mubr.msk.bf16.mxu1 %vm2235_vm2, %v5262_v3  ;;  %v2923_v3 = vsel %vm2235_vm2, %v14224_v51, 0.0 }
 0xccb   : > { %v15507_v10 = vpop.eup %12959 }
 0xccc   : > { %18702 = vst [vmem:[#allocation146_spill] sm:$0xff] %v15507_v10  ;;  %v5839_v22 = vpop.permute.xlu1 %5838  ;;  %v5263_v36 = vpack.c.bf16 %v15507_v10, %v15504_v57 }
 0xccd   : > { %12037 = vmatprep.subr.bf16.mxu0 %v5839_v22  ;;  %v15535_v27 = vpop.permute.xlu0 %6159 }
 0xcce   : > { %v15513_v31 = vpop.f32.mrb[140].mxu0  ;;  %12000 = vmatmul.mubr.msk.bf16.gmra.mrb[168].mxu1 %vm2235_vm2, %v5263_v36  ;;  %12038 = vmatpush3.bf16.msra.mxu0 %v5839_v22 }
 0xccf   : > { %18703 = vst [vmem:[#allocation147_spill] sm:$0xff] %v15513_v31  ;;  %v15516_v15 = vpop.f32.mrb[141].mxu0  ;;  %12027 = vmatprep.mubr.msk.bf16.mxu1 %vm2056_vm1, %v5580_v19  ;;  %v2929_v31 = vsel %vm2235_vm2, %v14233_v39, 0.0 }
 0xcd0   : > { %18704 = vst [vmem:[#allocation148_spill] sm:$0xff] %v15516_v15  ;;  %v15519_v8 = vpop.f32.mrb[142].mxu0  ;;  %v5841_v55 = vpop.permute.xlu1 %5840 }
 0xcd1   : > { %18705 = vst [vmem:[#allocation149_spill] sm:$0xff] %v15519_v8  ;;  %v15521_v21 = vpop.f32.mrb[143].mxu0  ;;  %12039 = vmatprep.subr.bf16.mxu0 %v5841_v55 }
 0xcd2   : > { %18706 = vst [vmem:[#allocation150_spill] sm:$0xff] %v15521_v21  ;;  %12040 = vmatpush3.bf16.msra.mxu0 %v5841_v55 }
 0xcd4   : > { %v5843_v56 = vpop.permute.xlu1 %5842 }
 0xcd5   : > { %12041 = vmatprep.subr.bf16.mxu0 %v5843_v56 }
 0xcd6   : > { %12028 = vmatmul.mubr.msk.bf16.vlgmr.msra.gmra.mrb[172].mxu1 %vm2056_vm1, %v5582_v16  ;;  %12042 = vmatpush3.bf16.msra.mxu0 %v5843_v56 }
 0xcd7   : > { %12052 = vmatpush3.bf16.msra.mxu1 %v5926_v42  ;;  %12031 = vmatprep.mubr.msk.bf16.mxu1 %vm2056_vm1, %v15470_v25 }
 0xcd8   : > { %12053 = vmatprep.subr.bf16.mxu1 %v5928_v28  ;;  %12211 = vmatprep.subr.msk.bf16.mxu0 %vm2056_vm1, %v15492_v20  ;;  %v15530_v19 = vpop.permute.xlu1 %6056 }
 0xcdb   : > { %12054 = vmatpush3.bf16.msra.mxu1 %v5928_v28 }
 0xcdc   : > { %v5930_v52 = vpop.permute.xlu1 %5929 }
 0xcdd   : > { %12055 = vmatprep.subr.bf16.mxu1 %v5930_v52 }
 0xcde   : > { %12032 = vmatmul.mubr.msk.bf16.gmra.mrb[176].mxu1 %vm2056_vm1, %v5586_v32 }
 0xcdf   : > { %12056 = vmatpush3.bf16.msra.mxu1 %v5930_v52 }
 0xce0   : > { %12057 = vmatprep.subr.bf16.mxu1 %v5932_v23 }
 0xce3   : > { %12058 = vmatpush3.bf16.msra.mxu1 %v5932_v23 }
 0xce4   : > { %12215 = vmatprep.subr.msk.bf16.mxu1 %vm2056_vm1, %v15535_v27 }
 0xd0f   : > { %v15539_v25 = vpop.f32.mrb[144].mxu0 }
 0xd10   : > { %18707 = vst [vmem:[#allocation151_spill] sm:$0xff] %v15539_v25  ;;  %v15541_v1 = vpop.f32.mrb[145].mxu0 }
 0xd11   : > { %18708 = vst [vmem:[#allocation152_spill] sm:$0xff] %v15541_v1  ;;  %v15543_v13 = vpop.f32.mrb[146].mxu0  ;;  %v2926_v1 = vsel %vm2235_vm2, %v14230_v24, 0.0 }
 0xd12   : > { %18709 = vst [vmem:[#allocation153_spill] sm:$0xff] %v15543_v13  ;;  %v15545_v0 = vpop.f32.mrb[147].mxu0 }
 0xd13   : > { %18710 = vst [vmem:[#allocation154_spill] sm:$0xff] %v15545_v0 }
 0xd17   : > { %v15547_v5 = vpop.f32.mrb[148].mxu0 }
 0xd18   : > { %v15549_v42 = vpop.f32.mrb[149].mxu0  ;;  %v5690_v46 = vsel %vm2235_vm2, %v15547_v5, -inf }
 0xd19   : > { %5691 = vmax.xlane.f32.xlu0 %v5690_v46  ;;  %v15553_v6 = vpop.f32.mrb[150].mxu0  ;;  %v5684_v28 = vsel %vm2235_vm2, %v15549_v42, -inf }
 0xd1a   : > { %v15555_v50 = vpop.f32.mrb[151].mxu0  ;;  %v5693_v32 = vsel %vm2235_vm2, %v15553_v6, -inf }
 0xd1b   : > { %v5687_v16 = vsel %vm2235_vm2, %v15555_v50, -inf }
 0xd1c   : > { %5688 = vmax.xlane.f32.xlu1 %v5687_v16 }
 0xd1d   : > { %5685 = vmax.xlane.f32.xlu0 %v5684_v28 }
 0xd21   : > { %5694 = vmax.xlane.f32.xlu0 %v5693_v32 }
 0xd2d   : > { %6503 = vrot.lane.b32.xlu1 %v13917_v49, %s13335_s27 }
 0xd51   : > { %2924 = vadd.xlane.f32.xlu1 %v2923_v3  ;;  %v15591_v3 = vpop.permute.xlu1 %6046 }
 0xd58   : > { %v15567_v22 = vpop.f32.mrb[152].mxu0 }
 0xd59   : > { %v15569_v36 = vpop.f32.mrb[153].mxu0  ;;  %v5702_v55 = vsel %vm2235_vm2, %v15567_v22, -inf }
 0xd5a   : > { %5703 = vmax.xlane.f32.xlu0 %v5702_v55  ;;  %v15573_v23 = vpop.f32.mrb[154].mxu0  ;;  %v5696_v49 = vsel %vm2235_vm2, %v15569_v36, -inf  ;;  %v15595_v55 = vpop.permute.xlu1 %6161 }
 0xd5b   : > { %v15575_v56 = vpop.f32.mrb[155].mxu0  ;;  %v5705_v51 = vsel %vm2235_vm2, %v15573_v23, -inf }
 0xd5c   : > { %v5699_v52 = vsel %vm2235_vm2, %v15575_v56, -inf }
 0xd5d   : > { %5700 = vmax.xlane.f32.xlu1 %v5699_v52  ;;  %v15597_v52 = vpop.permute.xlu0 %6050 }
 0xd5e   : > { %5697 = vmax.xlane.f32.xlu0 %v5696_v49  ;;  %v15599_v49 = vpop.permute.xlu1 %6052 }
 0xd62   : > { %5706 = vmax.xlane.f32.xlu0 %v5705_v51  ;;  %v15601_v51 = vpop.permute.xlu0 %6163 }
 0xd63   : > { %18715 = vst [vmem:[#allocation159_spill] sm:$0xff] %v15601_v51 }
 0xd65   : > { %v15583_v46 = vpop.f32.mrb[164].mxu1 }
 0xd66   : > { %18711 = vst [vmem:[#allocation155_spill] sm:$0xff] %v15583_v46  ;;  %v15585_v16 = vpop.f32.mrb[165].mxu1  ;;  %v15603_v46 = vpop.permute.xlu1 %6165 }
 0xd67   : > { %18712 = vst [vmem:[#allocation156_spill] sm:$0xff] %v15585_v16  ;;  %v15587_v28 = vpop.f32.mrb[166].mxu1  ;;  %18716 = vst [vmem:[#allocation160_spill] sm:$0xff] %v15603_v46  ;;  %v15605_v16 = vpop.permute.xlu0 %6151 }
 0xd68   : > { %18713 = vst [vmem:[#allocation157_spill] sm:$0xff] %v15587_v28  ;;  %v15589_v32 = vpop.f32.mrb[167].mxu1  ;;  %18717 = vst [vmem:[#allocation161_spill] sm:$0xff] %v15605_v16 }
 0xd69   : > { %18714 = vst [vmem:[#allocation158_spill] sm:$0xff] %v15589_v32 }
 0xd6a   : > { %v15607_v28 = vpop.permute.xlu1 %6153 }
 0xd6b   : > { %18718 = vst [vmem:[#allocation162_spill] sm:$0xff] %v15607_v28  ;;  %v15609_v32 = vpop.permute.xlu0 %6155 }
 0xd6c   : > { %18719 = vst [vmem:[#allocation163_spill] sm:$0xff] %v15609_v32 }
 0xd6e   : > { %v15611_v13 = vpop.permute.xlu1 %6157 }
 0xd6f   : > { %18720 = vst [vmem:[#allocation164_spill] sm:$0xff] %v15611_v13  ;;  %v15613_v25 = vpop.permute.xlu0 %6408 }
 0xd72   : > { %v15617_v0 = vpop.permute.xlu1 %6410 }
 0xd73   : > { %v15621_v8 = vpop.permute.xlu0 %6412 }
 0xd76   : > { %v15625_v21 = vpop.permute.xlu1 %6414 }
 0xd77   : > { %v15629_v15 = vpop.permute.xlu0 %6497 }
 0xd78   : > { %6501 = vrot.lane.b32.xlu0 %v13919_v53, %s13335_s27  ;;  %v2920_v53 = vsel %vm2235_vm2, %v14226_v63, 0.0  ;;  %18722 = vst [vmem:[#allocation166_spill] sm:$0xff] %v15629_v15  ;;  %s13342_s27 = smov 28  }
 0xd7a   : > { %v15637_v24 = vpop.permute.xlu1 %6499 }
 0xd7b   : > { %18726 = vst [vmem:[#allocation170_spill] sm:$0xff] %v15637_v24 }
 0xd97   : > { %2921 = vadd.xlane.f32.xlu0 %v2920_v53 }
 0xd9b   : > { %2927 = vadd.xlane.f32.xlu0 %v2926_v1 }
 0xd9f   : > { %2930 = vadd.xlane.f32.xlu0 %v2929_v31 }
 0xda1   : > { %v15627_v13 = vpop.f32.mrb[168].mxu1 }
 0xda2   : > { %18721 = vst [vmem:[#allocation165_spill] sm:$0xff] %v15627_v13  ;;  %v15631_v63 = vpop.f32.mrb[169].mxu1 }
 0xda3   : > { %18723 = vst [vmem:[#allocation167_spill] sm:$0xff] %v15631_v63  ;;  %v15633_v53 = vpop.f32.mrb[170].mxu1 }
 0xda4   : > { %18724 = vst [vmem:[#allocation168_spill] sm:$0xff] %v15633_v53  ;;  %v15635_v32 = vpop.f32.mrb[171].mxu1 }
 0xda5   : > { %18725 = vst [vmem:[#allocation169_spill] sm:$0xff] %v15635_v32 }
 0xda6   : > { %v5692_v1 = vpop.xlane.xlu0 %5691 }
 0xda7   : > { %v5734_v39 = vsub.f32 %v15547_v5, %v5692_v1 }
 0xda9   : > { %v15639_v28 = vpop.f32.mrb[172].mxu1  ;;  %v5689_v10 = vpop.xlane.xlu1 %5688  ;;  %v5752_v16 = vmul.f32 1.442695, %v5734_v39  ;;  %v3492_v39 = vsel %vm2235_vm2, %v14585_v34, 0.0 }
 0xdaa   : > { %v5733_v31 = vsub.f32 %v15555_v50, %v5689_v10  ;;  %v5686_v46 = vpop.xlane.xlu0 %5685  ;;  %v15643_v13 = vpop.f32.mrb[173].mxu1  ;;  %v5714_v63 = vsel %vm2235_vm2, %v15639_v28, -inf }
 0xdab   : > { %v5732_v53 = vsub.f32 %v15549_v42, %v5686_v46  ;;  %5715 = vmax.xlane.f32.xlu1 %v5714_v63  ;;  %v15648_v32 = vpop.f32.mrb[174].mxu1  ;;  %v5708_v10 = vsel %vm2235_vm2, %v15643_v13, -inf }
 0xdac   : > { %v5750_v24 = vmul.f32 1.442695, %v5733_v31  ;;  %v15650_v15 = vpop.f32.mrb[175].mxu1  ;;  %v5717_v46 = vsel %vm2235_vm2, %v15648_v32, -inf }
 0xdad   : > { %v5748_v43 = vmul.f32 1.442695, %v5732_v53 }
 0xdae   : > { %12961 = vpow2.f32 %v5750_v24  ;;  %v5695_v5 = vpop.xlane.xlu0 %5694 }
 0xdaf   : > { %12963 = vpow2.f32 %v5748_v43  ;;  %v5735_v50 = vsub.f32 %v15553_v6, %v5695_v5  ;;  %5709 = vmax.xlane.f32.xlu1 %v5708_v10  ;;  %v5711_v6 = vsel %vm2235_vm2, %v15650_v15, -inf }
 0xdb0   : > { %12965 = vpow2.f32 %v5752_v16 }
 0xdb1   : > { %v5754_v1 = vmul.f32 1.442695, %v5735_v50  ;;  %v15655_v51 = vpop.f32.mrb[176].mxu1 }
 0xdb2   : > { %v15657_v42 = vpop.f32.mrb[177].mxu1  ;;  %v5726_v31 = vsel %vm2235_vm2, %v15655_v51, -inf }
 0xdb3   : > { %12967 = vpow2.f32 %v5754_v1  ;;  %5718 = vmax.xlane.f32.xlu1 %v5717_v46  ;;  %v15661_v63 = vpop.f32.mrb[178].mxu1  ;;  %v3498_v1 = vsel %vm2235_vm2, %v14591_v62, 0.0  ;;  %v5720_v34 = vsel %vm2235_vm2, %v15657_v42, -inf }
 0xdb4   : > { %v15663_v53 = vpop.f32.mrb[179].mxu1  ;;  %v5729_v62 = vsel %vm2235_vm2, %v15661_v63, -inf }
 0xdb5   : > { %v5723_v43 = vsel %vm2235_vm2, %v15663_v53, -inf }
 0xdb6   : > { %5724 = vmax.xlane.f32.xlu0 %v5723_v43  ;;  %v6075_v43 = vsel %vm2056_vm1, %v15492_v20, 0  ;;  %v6078_v20 = vsel %vm2056_vm1, %v15530_v19, 0 }
 0xdb7   : > { %5712 = vmax.xlane.f32.xlu1 %v5711_v6  ;;  %v4064_v6 = vsel %vm2235_vm2, %v14824_v9, 0.0  ;;  %v4636_v9 = vsel %vm2235_vm2, %v15075_v37, 0.0  ;;  %v5208_v37 = vsel %vm2235_vm2, %v15332_v54, 0.0 }
 0xdb8   : > { %v15669_v16 = vpop.eup %12961 }
 0xdb9   : > { %v12964_v24 = vpop.eup %12963 }
 0xdba   : > { %3493 = vadd.xlane.f32.xlu0 %v3492_v39  ;;  %v5828_v5 = vpack.c.bf16 %v15669_v16, %v12964_v24  ;;  %v12966_v10 = vpop.eup %12965  ;;  %v4070_v39 = vsel %vm2235_vm2, %v14830_v7, 0.0  ;;  %v4642_v7 = vsel %vm2235_vm2, %v15079_v61, 0.0  ;;  %v5214_v61 = vsel %vm2235_vm2, %v15336_v11, 0.0 }
 0xdbb   : > { %5727 = vmax.xlane.f32.xlu1 %v5726_v31  ;;  %v3495_v31 = vsel %vm2235_vm2, %v14581_v35, 0.0  ;;  %v4067_v35 = vsel %vm2235_vm2, %v14822_v47, 0.0  ;;  %v4639_v47 = vsel %vm2235_vm2, %v15073_v59, 0.0  ;;  %v5780_v54 = vsel %vm2235_vm2, %v12964_v24, 0.0 }
 0xdbc   : > { %12043 = vmatprep.mubr.msk.bf16.mxu0 %vm2235_vm2, %v5828_v5  ;;  %v3501_v5 = vsel %vm2235_vm2, %v14594_v18, 0.0  ;;  %v4073_v18 = vsel %vm2235_vm2, %v14833_v38, 0.0  ;;  %v4645_v38 = vsel %vm2235_vm2, %v15082_v41, 0.0  ;;  %v5786_v11 = vsel %vm2235_vm2, %v12966_v10, 0.0 }
 0xdbd   : > { %v15677_v50 = vpop.eup %12967  ;;  %v5211_v59 = vsel %vm2235_vm2, %v15330_v4, 0.0  ;;  %v5217_v24 = vsel %vm2235_vm2, %v15339_v12, 0.0  ;;  %v5783_v4 = vsel %vm2235_vm2, %v15669_v16, 0.0  ;;  %v18729_v16 = vld [vmem:[#allocation63_spill] sm:$0xff] }
 0xdbe   : > { %v5829_v46 = vpack.c.bf16 %v15677_v50, %v12966_v10  ;;  %3499 = vadd.xlane.f32.xlu0 %v3498_v1  ;;  %v15732_v1 = vpop.permute.xlu1 %6503  ;;  %v5789_v12 = vsel %vm2235_vm2, %v15677_v50, 0.0 }
 0xdbf   : > { %5721 = vmax.xlane.f32.xlu1 %v5720_v34 }
 0xdc0   : > { %12044 = vmatmul.mubr.msk.bf16.vlgmr.msra.gmra.mrb[156].mxu0 %vm2235_vm2, %v5829_v46  ;;  %v18727_v46 = vld [vmem:[#allocation39_spill] sm:$0xff] }
 0xdc1   : > { %12068 = vmatpush3.bf16.xpose.msra.mxu0 %v6075_v43  ;;  %v2938_v41 = vsel %vm2235_vm2, %v18727_v46, 0.0  ;;  %v18728_v43 = vld [vmem:[#allocation62_spill] sm:$0xff]  ;;  %v18736_v46 = vld [vmem:[#allocation64_spill] sm:$0xff] }
 0xdc2   : > { %12212 = vmatprep.subr.msk.bf16.mxu0 %vm2056_vm1, %v15530_v19  ;;  %4065 = vadd.xlane.f32.xlu0 %v4064_v6  ;;  %v6081_v19 = vsel %vm2056_vm1, %v15509_v48, 0 }
 0xdc3   : > { %5730 = vmax.xlane.f32.xlu1 %v5729_v62 }
 0xdc6   : > { %4071 = vadd.xlane.f32.xlu0 %v4070_v39 }
 0xdc7   : > { %3496 = vadd.xlane.f32.xlu1 %v3495_v31 }
 0xdc9   : > { %12070 = vmatpush3.bf16.xpose.msra.mxu0 %v6078_v20 }
 0xdca   : > { %12213 = vmatprep.subr.msk.bf16.mxu0 %vm2056_vm1, %v15509_v48  ;;  %4637 = vadd.xlane.f32.xlu0 %v4636_v9  ;;  %v6084_v48 = vsel %vm2056_vm1, %v15524_v2, 0 }
 0xdcb   : > { %3502 = vadd.xlane.f32.xlu1 %v3501_v5  ;;  %v3510_v5 = vsel %vm2235_vm2, %v18729_v16, 0.0  ;;  %v5226_v16 = vsel %vm2235_vm2, %v15402_v17, 0.0 }
 0xdce   : > { %4643 = vadd.xlane.f32.xlu0 %v4642_v7 }
 0xdcf   : > { %4068 = vadd.xlane.f32.xlu1 %v4067_v35  ;;  %v18730_v35 = vld [vmem:[#allocation38_spill] sm:$0xff] }
 0xdd1   : > { %12072 = vmatpush3.bf16.xpose.msra.mxu0 %v6081_v19  ;;  %v2935_v19 = vsel %vm2235_vm2, %v18730_v35, 0.0 }
 0xdd2   : > { %12214 = vmatprep.subr.msk.bf16.mxu0 %vm2056_vm1, %v15524_v2  ;;  %5209 = vadd.xlane.f32.xlu0 %v5208_v37  ;;  %v2932_v2 = vsel %vm2235_vm2, %v14379_v58, 0.0  ;;  %v3504_v58 = vsel %vm2235_vm2, %v18728_v43, 0.0  ;;  %v18737_v43 = vld [vmem:[#allocation119_spill] sm:$0xff] }
 0xdd3   : > { %4074 = vadd.xlane.f32.xlu1 %v4073_v18 }
 0xdd6   : > { %5215 = vadd.xlane.f32.xlu0 %v5214_v61  ;;  %v18732_v61 = vld [vmem:[#allocation40_spill] sm:$0xff] }
 0xdd7   : > { %4640 = vadd.xlane.f32.xlu1 %v4639_v47  ;;  %v2941_v47 = vsel %vm2235_vm2, %v18732_v61, 0.0 }
 0xdd9   : > { %12074 = vmatpush3.bf16.xpose.msra.mxu0 %v6084_v48  ;;  %v18733_v48 = vld [vmem:[#allocation91_spill] sm:$0xff] }
 0xdda   : > { %12099 = vmatprep.subr.bf16.mxu0 %v15613_v25  ;;  %5781 = vadd.xlane.f32.xlu0 %v5780_v54  ;;  %v4082_v54 = vsel %vm2235_vm2, %v18733_v48, 0.0 }
 0xddb   : > { %4646 = vadd.xlane.f32.xlu1 %v4645_v38  ;;  %v18734_v38 = vld [vmem:[#allocation61_spill] sm:$0xff] }
 0xdde   : > { %5787 = vadd.xlane.f32.xlu0 %v5786_v11  ;;  %v15738_v34 = vpop.xlane.xlu1 %2924  ;;  %v3507_v11 = vsel %vm2235_vm2, %v18734_v38, 0.0  ;;  %v18749_v38 = vld [vmem:[#allocation93_spill] sm:$0xff] }
 0xddf   : > { %5212 = vadd.xlane.f32.xlu1 %v5211_v59  ;;  %v18735_v59 = vld [vmem:[#allocation118_spill] sm:$0xff] }
 0xde2   : > { %2933 = vadd.xlane.f32.xlu0 %v2932_v2  ;;  %v4648_v2 = vsel %vm2235_vm2, %v18735_v59, 0.0 }
 0xde3   : > { %5218 = vadd.xlane.f32.xlu1 %v5217_v24 }
 0xde6   : > { %2939 = vadd.xlane.f32.xlu0 %v2938_v41  ;;  %v3513_v41 = vsel %vm2235_vm2, %v18736_v46, 0.0 }
 0xde7   : > { %v5704_v10 = vpop.xlane.xlu0 %5703  ;;  %5784 = vadd.xlane.f32.xlu1 %v5783_v4 }
 0xde8   : > { %v5738_v62 = vsub.f32 %v15567_v22, %v5704_v10 }
 0xdea   : > { %3505 = vadd.xlane.f32.xlu0 %v3504_v58  ;;  %v5701_v6 = vpop.xlane.xlu1 %5700  ;;  %v5760_v37 = vmul.f32 1.442695, %v5738_v62  ;;  %v4654_v58 = vsel %vm2235_vm2, %v18737_v43, 0.0  ;;  %v18753_v43 = vld [vmem:[#allocation121_spill] sm:$0xff] }
 0xdeb   : > { %v5737_v39 = vsub.f32 %v15575_v56, %v5701_v6  ;;  %v5698_v31 = vpop.xlane.xlu0 %5697  ;;  %5790 = vadd.xlane.f32.xlu1 %v5789_v12  ;;  %v18731_v56 = vld [vmem:[#allocation90_spill] sm:$0xff]  ;;  %v18738_v12 = vld [vmem:[#allocation89_spill] sm:$0xff] }
 0xdec   : > { %v5736_v20 = vsub.f32 %v15569_v36, %v5698_v31  ;;  %v4076_v18 = vsel %vm2235_vm2, %v18731_v56, 0.0  ;;  %v4079_v62 = vsel %vm2235_vm2, %v18738_v12, 0.0  ;;  %v5220_v31 = vsel %vm2235_vm2, %v15396_v14, 0.0  ;;  %v18746_v56 = vld [vmem:[#allocation44_spill] sm:$0xff] }
 0xded   : > { %v5758_v9 = vmul.f32 1.442695, %v5737_v39  ;;  %v18754_v12 = vld [vmem:[#allocation96_spill] sm:$0xff] }
 0xdee   : > { %v5756_v7 = vmul.f32 1.442695, %v5736_v20  ;;  %3511 = vadd.xlane.f32.xlu0 %v3510_v5  ;;  %v18739_v20 = vld [vmem:[#allocation92_spill] sm:$0xff]  ;;  %v18740_v5 = vld [vmem:[#allocation117_spill] sm:$0xff] }
 0xdef   : > { %12969 = vpow2.f32 %v5758_v9  ;;  %v5707_v50 = vpop.xlane.xlu0 %5706  ;;  %2936 = vadd.xlane.f32.xlu1 %v2935_v19  ;;  %v4085_v9 = vsel %vm2235_vm2, %v18739_v20, 0.0  ;;  %v18743_v19 = vld [vmem:[#allocation41_spill] sm:$0xff] }
 0xdf0   : > { %12971 = vpow2.f32 %v5756_v7  ;;  %v5739_v22 = vsub.f32 %v15573_v23, %v5707_v50  ;;  %v4651_v7 = vsel %vm2235_vm2, %v18740_v5, 0.0  ;;  %v18756_v20 = vld [vmem:[#allocation37_spill] sm:$0xff] }
 0xdf1   : > { %12973 = vpow2.f32 %v5760_v37  ;;  %v2950_v37 = vsel %vm2235_vm2, %v18743_v19, 0.0  ;;  %v18760_v19 = vld [vmem:[#allocation36_spill] sm:$0xff] }
 0xdf2   : > { %v5762_v36 = vmul.f32 1.442695, %v5739_v22  ;;  %4077 = vadd.xlane.f32.xlu0 %v4076_v18  ;;  %v18745_v22 = vld [vmem:[#allocation65_spill] sm:$0xff]  ;;  %v2947_v18 = vsel %vm2235_vm2, %v18746_v56, 0.0  ;;  %v18763_v56 = vld [vmem:[#allocation47_spill] sm:$0xff] }
 0xdf3   : > { %2942 = vadd.xlane.f32.xlu1 %v2941_v47  ;;  %v18748_v47 = vld [vmem:[#allocation42_spill] sm:$0xff] }
 0xdf4   : > { %12975 = vpow2.f32 %v5762_v36  ;;  %v15815_v36 = vpop.permute.xlu0 %6501  ;;  %v2953_v48 = vsel %vm2235_vm2, %v18748_v47, 0.0 }
 0xdf5   : > { %12977 = vrcp.f32 %v15738_v34  ;;  %v18752_v34 = vld [vmem:[#allocation66_spill] sm:$0xff] }
 0xdf6   : > { %4083 = vadd.xlane.f32.xlu0 %v4082_v54 }
 0xdf7   : > { %3508 = vadd.xlane.f32.xlu1 %v3507_v11  ;;  %v4094_v11 = vsel %vm2235_vm2, %v18749_v38, 0.0  ;;  %v18764_v38 = vld [vmem:[#allocation70_spill] sm:$0xff] }
 0xdf9   : > { %v12970_v23 = vpop.eup %12969 }
 0xdfa   : > { %v12972_v24 = vpop.eup %12971  ;;  %4649 = vadd.xlane.f32.xlu0 %v4648_v2 }
 0xdfb   : > { %3514 = vadd.xlane.f32.xlu1 %v3513_v41  ;;  %v5830_v4 = vpack.c.bf16 %v12970_v23, %v12972_v24  ;;  %v12974_v10 = vpop.eup %12973  ;;  %v5792_v14 = vsel %vm2235_vm2, %v12972_v24, 0.0  ;;  %v18751_v24 = vld [vmem:[#allocation123_spill] sm:$0xff]  ;;  %v3525_v41 = vsel %vm2235_vm2, %v18752_v34, 0.0 }
 0xdfc   : > { %v5798_v35 = vsel %vm2235_vm2, %v12974_v10, 0.0  ;;  %v4660_v46 = vsel %vm2235_vm2, %v18751_v24, 0.0  ;;  %v18765_v24 = vld [vmem:[#allocation71_spill] sm:$0xff] }
 0xdfd   : > { %12047 = vmatprep.mubr.msk.bf16.mxu0 %vm2235_vm2, %v5830_v4 }
 0xdfe   : > { %v12976_v6 = vpop.eup %12975  ;;  %4655 = vadd.xlane.f32.xlu0 %v4654_v58  ;;  %v4666_v58 = vsel %vm2235_vm2, %v18753_v43, 0.0  ;;  %v18767_v43 = vld [vmem:[#allocation98_spill] sm:$0xff] }
 0xdff   : > { %4080 = vadd.xlane.f32.xlu1 %v4079_v62  ;;  %v5831_v39 = vpack.c.bf16 %v12976_v6, %v12974_v10  ;;  %v12978_v10 = vpop.eup %12977  ;;  %v4091_v62 = vsel %vm2235_vm2, %v18754_v12, 0.0 }
 0xe01   : > { %12048 = vmatmul.mubr.msk.bf16.gmra.mrb[160].mxu0 %vm2235_vm2, %v5831_v39  ;;  %v18755_v39 = vld [vmem:[#allocation35_spill] sm:$0xff] }
 0xe02   : > { %5221 = vadd.xlane.f32.xlu0 %v5220_v31  ;;  %12075 = vmatprep.mubr.msk.bf16.mxu0 %vm2056_vm1, %v15591_v3  ;;  %v18741_v3 = vld [vmem:[#allocation120_spill] sm:$0xff] }
 0xe03   : > { %4086 = vadd.xlane.f32.xlu1 %v4085_v9  ;;  %v4657_v17 = vsel %vm2235_vm2, %v18741_v3, 0.0  ;;  %v15838_v9 = vmul.f32 %v12978_v10, %v18756_v20 }
 0xe06   : > { %5227 = vadd.xlane.f32.xlu0 %v5226_v16  ;;  %v5232_v16 = vsel %vm2235_vm2, %v15474_v26, 0.0  ;;  %v18759_v26 = vld [vmem:[#allocation34_spill] sm:$0xff] }
 0xe07   : > { %4652 = vadd.xlane.f32.xlu1 %v4651_v7  ;;  %v18757_v7 = vld [vmem:[#allocation94_spill] sm:$0xff] }
 0xe09   : > { %12076 = vmatmul.mubr.msk.bf16.vlgmr.msra.gmra.mrb[164].mxu0 %vm2056_vm1, %v15532_v45  ;;  %v5223_v45 = vsel %vm2235_vm2, %v15394_v60, 0.0  ;;  %v5795_v60 = vsel %vm2235_vm2, %v12970_v23, 0.0  ;;  %v18750_v23 = vld [vmem:[#allocation68_spill] sm:$0xff] }
 0xe0a   : > { %12100 = vmatpush3.bf16.msra.mxu0 %v15613_v25  ;;  %5793 = vadd.xlane.f32.xlu0 %v5792_v14  ;;  %v18742_v25 = vld [vmem:[#allocation43_spill] sm:$0xff]  ;;  %v3519_v59 = vsel %vm2235_vm2, %v18750_v23, 0.0  ;;  %v4097_v14 = vsel %vm2235_vm2, %v18757_v7, 0.0 }
 0xe0b   : > { %12079 = vmatprep.mubr.msk.bf16.mxu0 %vm2056_vm1, %v15597_v52  ;;  %12101 = vmatprep.subr.bf16.mxu0 %v15617_v0  ;;  %v2944_v52 = vsel %vm2235_vm2, %v18742_v25, 0.0  ;;  %v18769_v7 = vld [vmem:[#allocation99_spill] sm:$0xff] }
 0xe0c   : > { %4658 = vadd.xlane.f32.xlu1 %v4657_v17  ;;  %v5238_v17 = vsel %vm2235_vm2, %v15466_v40, 0.0 }
 0xe0e   : > { %12102 = vmatpush3.bf16.msra.mxu0 %v15617_v0  ;;  %5799 = vadd.xlane.f32.xlu0 %v5798_v35  ;;  %v5229_v0 = vsel %vm2235_vm2, %v15405_v44, 0.0  ;;  %v3522_v44 = vsel %vm2235_vm2, %v18745_v22, 0.0 }
 0xe0f   : > { %12103 = vmatprep.subr.bf16.mxu0 %v15621_v8 }
 0xe10   : > { %5224 = vadd.xlane.f32.xlu1 %v5223_v45  ;;  %v18758_v45 = vld [vmem:[#allocation124_spill] sm:$0xff] }
 0xe11   : > { %12080 = vmatmul.mubr.msk.bf16.gmra.mrb[168].mxu0 %vm2056_vm1, %v15599_v49  ;;  %v18744_v49 = vld [vmem:[#allocation67_spill] sm:$0xff]  ;;  %v4663_v25 = vsel %vm2235_vm2, %v18758_v45, 0.0  ;;  %v18770_v45 = vld [vmem:[#allocation69_spill] sm:$0xff] }
 0xe12   : > { %12104 = vmatpush3.bf16.msra.mxu0 %v15621_v8  ;;  %2945 = vadd.xlane.f32.xlu0 %v2944_v52  ;;  %v3516_v50 = vsel %vm2235_vm2, %v18744_v49, 0.0  ;;  %v5801_v8 = vsel %vm2235_vm2, %v12976_v6, 0.0 }
 0xe13   : > { %12105 = vmatprep.subr.bf16.mxu0 %v15625_v21 }
 0xe14   : > { %5230 = vadd.xlane.f32.xlu1 %v5229_v0 }
 0xe16   : > { %12106 = vmatpush3.bf16.msra.mxu0 %v15625_v21  ;;  %2951 = vadd.xlane.f32.xlu0 %v2950_v37  ;;  %v18747_v21 = vld [vmem:[#allocation95_spill] sm:$0xff] }
 0xe17   : > { %v4088_v61 = vsel %vm2235_vm2, %v18747_v21, 0.0  ;;  %v5235_v21 = vsel %vm2235_vm2, %v15476_v33, 0.0 }
 0xe18   : > { %5796 = vadd.xlane.f32.xlu1 %v5795_v60  ;;  %v18761_v60 = vld [vmem:[#allocation46_spill] sm:$0xff] }
 0xe19   : > { %v2956_v49 = vsel %vm2235_vm2, %v18761_v60, 0.0 }
 0xe1a   : > { %3517 = vadd.xlane.f32.xlu0 %v3516_v50  ;;  %v18762_v50 = vld [vmem:[#allocation122_spill] sm:$0xff] }
 0xe1c   : > { %5802 = vadd.xlane.f32.xlu1 %v5801_v8  ;;  %v4669_v8 = vsel %vm2235_vm2, %v18762_v50, 0.0 }
 0xe1e   : > { %3523 = vadd.xlane.f32.xlu0 %v3522_v44 }
 0xe20   : > { %2948 = vadd.xlane.f32.xlu1 %v2947_v18  ;;  %v2962_v18 = vsel %vm2235_vm2, %v18763_v56, 0.0 }
 0xe22   : > { %4089 = vadd.xlane.f32.xlu0 %v4088_v61 }
 0xe24   : > { %2954 = vadd.xlane.f32.xlu1 %v2953_v48  ;;  %v2922_v54 = vpop.xlane.xlu0 %2921 }
 0xe25   : > { %12979 = vrcp.f32 %v2922_v54 }
 0xe26   : > { %4095 = vadd.xlane.f32.xlu0 %v4094_v11  ;;  %v3528_v11 = vsel %vm2235_vm2, %v18764_v38, 0.0  ;;  %v6180_v38 = vsel %vm2056_vm1, %v15535_v27, 0 }
 0xe28   : > { %3520 = vadd.xlane.f32.xlu1 %v3519_v59  ;;  %v2928_v2 = vpop.xlane.xlu0 %2927  ;;  %v5241_v59 = vsel %vm2235_vm2, %v15468_v29, 0.0 }
 0xe29   : > { %12981 = vrcp.f32 %v2928_v2 }
 0xe2a   : > { %4661 = vadd.xlane.f32.xlu0 %v4660_v46  ;;  %v3534_v46 = vsel %vm2235_vm2, %v18765_v24, 0.0 }
 0xe2c   : > { %3526 = vadd.xlane.f32.xlu1 %v3525_v41  ;;  %v2931_v4 = vpop.xlane.xlu0 %2930  ;;  %v18766_v41 = vld [vmem:[#allocation45_spill] sm:$0xff] }
 0xe2d   : > { %12983 = vrcp.f32 %v2931_v4  ;;  %v2959_v4 = vsel %vm2235_vm2, %v18766_v41, 0.0 }
 0xe2e   : > { %4667 = vadd.xlane.f32.xlu0 %v4666_v58  ;;  %v4100_v58 = vsel %vm2235_vm2, %v18767_v43, 0.0 }
 0xe2f   : > { %v12980_v6 = vpop.eup %12979 }
 0xe30   : > { %4092 = vadd.xlane.f32.xlu1 %v4091_v62  ;;  %v15835_v31 = vmul.f32 %v12980_v6, %v18755_v39  ;;  %v18768_v6 = vld [vmem:[#allocation48_spill] sm:$0xff] }
 0xe31   : > { %v2965_v12 = vsel %vm2235_vm2, %v18768_v6, 0.0  ;;  %v18777_v6 = vld [vmem:[#allocation159_spill] sm:$0xff] }
 0xe32   : > { %5233 = vadd.xlane.f32.xlu0 %v5232_v16  ;;  %v12251_v5 = vpack.i.bf16 %v15838_v9, %v15835_v31  ;;  %v18812_v9 = vld [vmem:[#allocation50_spill] sm:$0xff] }
 0xe33   : > { %v12982_v3 = vpop.eup %12981 }
 0xe34   : > { %4098 = vadd.xlane.f32.xlu1 %v4097_v14  ;;  %v15851_v0 = vmul.f32 %v12982_v3, %v18759_v26 }
 0xe36   : > { %5239 = vadd.xlane.f32.xlu0 %v5238_v17 }
 0xe37   : > { %v12984_v35 = vpop.eup %12983 }
 0xe38   : > { %4664 = vadd.xlane.f32.xlu1 %v4663_v25  ;;  %v5716_v52 = vpop.xlane.xlu1 %5715  ;;  %v15854_v37 = vmul.f32 %v12984_v35, %v18760_v19  ;;  %v3531_v25 = vsel %vm2235_vm2, %v18770_v45, 0.0  ;;  %v18771_v19 = vld [vmem:[#allocation126_spill] sm:$0xff]  ;;  %v18782_v45 = vld [vmem:[#allocation161_spill] sm:$0xff] }
 0xe39   : > { %v5742_v22 = vsub.f32 %v15639_v28, %v5716_v52  ;;  %v4672_v60 = vsel %vm2235_vm2, %v18771_v19, 0.0 }
 0xe3a   : > { %2957 = vadd.xlane.f32.xlu0 %v2956_v49  ;;  %v12256_v40 = vpack.i.bf16 %v15854_v37, %v15851_v0 }
 0xe3b   : > { %v5768_v61 = vmul.f32 1.442695, %v5742_v22 }
 0xe3c   : > { %4670 = vadd.xlane.f32.xlu1 %v4669_v8  ;;  %v5710_v44 = vpop.xlane.xlu1 %5709 }
 0xe3d   : > { %v5740_v47 = vsub.f32 %v15643_v13, %v5710_v44  ;;  %12985 = vpow2.f32 %v5768_v61  ;;  %v18772_v44 = vld [vmem:[#allocation72_spill] sm:$0xff] }
 0xe3e   : > { %2963 = vadd.xlane.f32.xlu0 %v2962_v18  ;;  %v3537_v56 = vsel %vm2235_vm2, %v18772_v44, 0.0 }
 0xe3f   : > { %v5764_v2 = vmul.f32 1.442695, %v5740_v47 }
 0xe40   : > { %5236 = vadd.xlane.f32.xlu1 %v5235_v21  ;;  %v5719_v48 = vpop.xlane.xlu1 %5718  ;;  %v18773_v21 = vld [vmem:[#allocation127_spill] sm:$0xff] }
 0xe41   : > { %v5743_v54 = vsub.f32 %v15648_v32, %v5719_v48  ;;  %v4678_v61 = vsel %vm2235_vm2, %v18773_v21, 0.0  ;;  %v18774_v48 = vld [vmem:[#allocation97_spill] sm:$0xff] }
 0xe42   : > { %3529 = vadd.xlane.f32.xlu0 %v3528_v11 }
 0xe43   : > { %v5770_v28 = vmul.f32 1.442695, %v5743_v54  ;;  %v5725_v23 = vpop.xlane.xlu0 %5724  ;;  %v4103_v54 = vsel %vm2235_vm2, %v18774_v48, 0.0  ;;  %v18787_v48 = vld [vmem:[#allocation102_spill] sm:$0xff] }
 0xe44   : > { %5242 = vadd.xlane.f32.xlu1 %v5241_v59  ;;  %v5713_v33 = vpop.xlane.xlu1 %5712  ;;  %v5745_v10 = vsub.f32 %v15663_v53, %v5725_v23  ;;  %v4106_v53 = vsel %vm2235_vm2, %v18769_v7, 0.0 }
 0xe45   : > { %12987 = vpow2.f32 %v5770_v28  ;;  %v5741_v13 = vsub.f32 %v15650_v15, %v5713_v33  ;;  %v5244_v28 = vsel %vm2235_vm2, %v15500_v30, 0.0  ;;  %v18775_v33 = vld [vmem:[#allocation100_spill] sm:$0xff]  ;;  %v5250_v30 = vsel %vm2235_vm2, %v15504_v57, 0.0 }
 0xe46   : > { %3535 = vadd.xlane.f32.xlu0 %v3534_v46  ;;  %12989 = vpow2.f32 %v5764_v2  ;;  %v5774_v62 = vmul.f32 1.442695, %v5745_v10  ;;  %v4109_v27 = vsel %vm2235_vm2, %v18775_v33, 0.0  ;;  %v18789_v33 = vld [vmem:[#allocation160_spill] sm:$0xff] }
 0xe47   : > { %v5766_v32 = vmul.f32 1.442695, %v5741_v13  ;;  %v3494_v34 = vpop.xlane.xlu0 %3493  ;;  %v15887_v14 = vpop.eup %12985 }
 0xe48   : > { %2960 = vadd.xlane.f32.xlu1 %v2959_v4  ;;  %v5728_v29 = vpop.xlane.xlu1 %5727  ;;  %v18776_v4 = vld [vmem:[#allocation125_spill] sm:$0xff] }
 0xe49   : > { %12991 = vpow2.f32 %v5766_v32  ;;  %v5746_v39 = vsub.f32 %v15655_v51, %v5728_v29  ;;  %v4675_v10 = vsel %vm2235_vm2, %v18776_v4, 0.0  ;;  %v6183_v29 = vsel %vm2056_vm1, %v15595_v55, 0 }
 0xe4a   : > { %4101 = vadd.xlane.f32.xlu0 %v4100_v58  ;;  %12993 = vpow2.f32 %v5774_v62 }
 0xe4b   : > { %v3500_v15 = vpop.xlane.xlu0 %3499  ;;  %v5776_v52 = vmul.f32 1.442695, %v5746_v39  ;;  %v18779_v39 = vld [vmem:[#allocation74_spill] sm:$0xff] }
 0xe4c   : > { %2966 = vadd.xlane.f32.xlu1 %v2965_v12  ;;  %v5722_v20 = vpop.xlane.xlu1 %5721  ;;  %v18778_v12 = vld [vmem:[#allocation3_spill] sm:$0xff] }
 0xe4d   : > { %v5744_v16 = vsub.f32 %v15657_v42, %v5722_v20  ;;  %v2332_v62 = vsel %vm2235_vm2, %v18778_v12, 0.0 }
 0xe4e   : > { %4107 = vadd.xlane.f32.xlu0 %v4106_v53 }
 0xe4f   : > { %v15889_v3 = vpop.eup %12987  ;;  %v5772_v17 = vmul.f32 1.442695, %v5744_v16  ;;  %v4066_v35 = vpop.xlane.xlu0 %4065  ;;  %v18780_v16 = vld [vmem:[#allocation76_spill] sm:$0xff] }
 0xe50   : > { %v5833_v51 = vpack.c.bf16 %v15889_v3, %v15887_v14  ;;  %3532 = vadd.xlane.f32.xlu1 %v3531_v25  ;;  %v5731_v42 = vpop.xlane.xlu1 %5730  ;;  %v15898_v49 = vpop.eup %12989 }
 0xe51   : > { %12995 = vpow2.f32 %v5772_v17  ;;  %v5747_v26 = vsub.f32 %v15661_v63, %v5731_v42  ;;  %v18781_v17 = vld [vmem:[#allocation128_spill] sm:$0xff] }
 0xe52   : > { %4673 = vadd.xlane.f32.xlu0 %v4672_v60  ;;  %12997 = vrcp.f32 %v3494_v34 }
 0xe53   : > { %v15900_v50 = vpop.eup %12991  ;;  %v5778_v8 = vmul.f32 1.442695, %v5747_v26  ;;  %v4072_v22 = vpop.xlane.xlu0 %4071  ;;  %12999 = vpow2.f32 %v5776_v52  ;;  %v18783_v52 = vld [vmem:[#allocation73_spill] sm:$0xff]  ;;  %v18784_v26 = vld [vmem:[#allocation75_spill] sm:$0xff] }
 0xe54   : > { %3538 = vadd.xlane.f32.xlu1 %v3537_v56  ;;  %v3497_v18 = vpop.xlane.xlu1 %3496  ;;  %v5832_v63 = vpack.c.bf16 %v15900_v50, %v15898_v49  ;;  %v15918_v23 = vpop.eup %12993 }
 0xe55   : > { %13001 = vpow2.f32 %v5778_v8  ;;  %v18785_v8 = vld [vmem:[#allocation2_spill] sm:$0xff] }
 0xe56   : > { %13003 = vrcp.f32 %v3497_v18  ;;  %4679 = vadd.xlane.f32.xlu0 %v4678_v61  ;;  %12059 = vmatprep.mubr.msk.bf16.mxu1 %vm2235_vm2, %v5832_v63  ;;  %v18786_v63 = vld [vmem:[#allocation145_spill] sm:$0xff]  ;;  %v6186_v61 = vsel %vm2056_vm1, %v18777_v6, 0 }
 0xe57   : > { %13005 = vrcp.f32 %v3500_v15  ;;  %v4638_v47 = vpop.xlane.xlu0 %4637  ;;  %12060 = vmatmul.mubr.msk.bf16.vlgmr.msra.gmra.mrb[180].mxu1 %vm2235_vm2, %v5833_v51  ;;  %v5247_v21 = vsel %vm2235_vm2, %v18786_v63, 0.0  ;;  %v18799_v63 = vld [vmem:[#allocation4_spill] sm:$0xff] }
 0xe58   : > { %4104 = vadd.xlane.f32.xlu1 %v4103_v54  ;;  %12084 = vmatpush3.bf16.xpose.msra.mxu1 %v6180_v38  ;;  %v3503_v11 = vpop.xlane.xlu1 %3502  ;;  %v18788_v38 = vld [vmem:[#allocation104_spill] sm:$0xff] }
 0xe59   : > { %12216 = vmatprep.subr.msk.bf16.mxu1 %vm2056_vm1, %v15595_v55  ;;  %13007 = vrcp.f32 %v3503_v11 }
 0xe5a   : > { %5245 = vadd.xlane.f32.xlu0 %v5244_v28  ;;  %13009 = vrcp.f32 %v4066_v35  ;;  %v4681_v35 = vsel %vm2235_vm2, %v18781_v17, 0.0  ;;  %v6189_v17 = vsel %vm2056_vm1, %v18789_v33, 0 }
 0xe5b   : > { %v15920_v59 = vpop.eup %12995  ;;  %v4644_v2 = vpop.xlane.xlu0 %4643 }
 0xe5c   : > { %4110 = vadd.xlane.f32.xlu1 %v4109_v27  ;;  %v4069_v13 = vpop.xlane.xlu1 %4068  ;;  %v5834_v24 = vpack.c.bf16 %v15918_v23, %v15920_v59  ;;  %v12998_v46 = vpop.eup %12997 }
 0xe5d   : > { %13011 = vrcp.f32 %v4069_v13  ;;  %v15928_v32 = vpop.eup %12999  ;;  %v15944_v20 = vmul.f32 %v12998_v46, %v18779_v39 }
 0xe5e   : > { %5251 = vadd.xlane.f32.xlu0 %v5250_v30  ;;  %12063 = vmatprep.mubr.msk.bf16.mxu1 %vm2235_vm2, %v5834_v24  ;;  %13013 = vrcp.f32 %v4072_v22  ;;  %v2338_v22 = vsel %vm2235_vm2, %v18785_v8, 0.0  ;;  %v18791_v30 = vld [vmem:[#allocation146_spill] sm:$0xff] }
 0xe5f   : > { %v15931_v34 = vpop.eup %13001  ;;  %v5210_v41 = vpop.xlane.xlu0 %5209  ;;  %v5253_v4 = vsel %vm2235_vm2, %v18791_v30, 0.0  ;;  %v18798_v8 = vld [vmem:[#allocation166_spill] sm:$0xff] }
 0xe60   : > { %v13004_v43 = vpop.eup %13003  ;;  %4676 = vadd.xlane.f32.xlu1 %v4675_v10  ;;  %12086 = vmatpush3.bf16.xpose.msra.mxu1 %v6183_v29  ;;  %v4075_v58 = vpop.xlane.xlu1 %4074  ;;  %v5835_v57 = vpack.c.bf16 %v15931_v34, %v15928_v32  ;;  %v18792_v29 = vld [vmem:[#allocation101_spill] sm:$0xff] }
 0xe61   : > { %v13006_v15 = vpop.eup %13005  ;;  %12217 = vmatprep.subr.msk.bf16.mxu1 %vm2056_vm1, %v18777_v6  ;;  %13015 = vrcp.f32 %v4075_v58  ;;  %v15947_v55 = vmul.f32 %v13004_v43, %v18780_v16  ;;  %v18793_v58 = vld [vmem:[#allocation103_spill] sm:$0xff]  ;;  %v18794_v6 = vld [vmem:[#allocation6_spill] sm:$0xff]  ;;  %v18795_v16 = vld [vmem:[#allocation5_spill] sm:$0xff] }
 0xe62   : > { %2333 = vadd.xlane.f32.xlu0 %v2332_v62  ;;  %12064 = vmatmul.mubr.msk.bf16.gmra.mrb[184].mxu1 %vm2235_vm2, %v5835_v57  ;;  %13017 = vrcp.f32 %v4638_v47  ;;  %v15957_v42 = vmul.f32 %v13006_v15, %v18783_v52  ;;  %v2350_v12 = vsel %vm2235_vm2, %v18794_v6, 0.0  ;;  %v18797_v52 = vld [vmem:[#allocation132_spill] sm:$0xff] }
 0xe63   : > { %v13008_v7 = vpop.eup %13007  ;;  %v5216_v53 = vpop.xlane.xlu0 %5215  ;;  %12091 = vmatprep.mubr.msk.bf16.mxu1 %vm2056_vm1, %v18782_v45  ;;  %v12261_v25 = vpack.i.bf16 %v15947_v55, %v15944_v20  ;;  %v18796_v45 = vld [vmem:[#allocation130_spill] sm:$0xff] }
 0xe64   : > { %4682 = vadd.xlane.f32.xlu1 %v4681_v35  ;;  %v4641_v51 = vpop.xlane.xlu1 %4640  ;;  %v15960_v19 = vmul.f32 %v13008_v7, %v18784_v26  ;;  %v13010_v60 = vpop.eup %13009  ;;  %v2335_v7 = vsel %vm2235_vm2, %v18795_v16, 0.0 }
 0xe65   : > { %13019 = vrcp.f32 %v4641_v51  ;;  %v15973_v54 = vmul.f32 %v13010_v60, %v18787_v48 }
 0xe66   : > { %2339 = vadd.xlane.f32.xlu0 %v2338_v22  ;;  %v12266_v44 = vpack.i.bf16 %v15960_v19, %v15957_v42  ;;  %13021 = vrcp.f32 %v4644_v2  ;;  %v18790_v2 = vld [vmem:[#allocation8_spill] sm:$0xff]  ;;  %v18820_v19 = vld [vmem:[#allocation106_spill] sm:$0xff] }
 0xe67   : > { %v13012_v56 = vpop.eup %13011  ;;  %v15966_v18 = vpop.xlane.xlu0 %5781  ;;  %v2344_v27 = vsel %vm2235_vm2, %v18790_v2, 0.0 }
 0xe68   : > { %5248 = vadd.xlane.f32.xlu1 %v5247_v21  ;;  %12088 = vmatpush3.bf16.xpose.msra.mxu1 %v6186_v61  ;;  %v4647_v47 = vpop.xlane.xlu1 %4646  ;;  %v15976_v11 = vmul.f32 %v13012_v56, %v18788_v38  ;;  %v13014_v28 = vpop.eup %13013  ;;  %v2341_v21 = vsel %vm2235_vm2, %v18799_v63, 0.0  ;;  %v18801_v38 = vld [vmem:[#allocation131_spill] sm:$0xff] }
 0xe69   : > { %12218 = vmatprep.subr.msk.bf16.mxu1 %vm2056_vm1, %v18789_v33  ;;  %13023 = vrcp.f32 %v4647_v47  ;;  %v15989_v43 = vmul.f32 %v13014_v28, %v18792_v29  ;;  %v18800_v47 = vld [vmem:[#allocation129_spill] sm:$0xff]  ;;  %v18804_v29 = vld [vmem:[#allocation163_spill] sm:$0xff] }
 0xe6a   : > { %2345 = vadd.xlane.f32.xlu0 %v2344_v27  ;;  %v12271_v13 = vpack.i.bf16 %v15976_v11, %v15973_v54  ;;  %13025 = vrcp.f32 %v5210_v41  ;;  %v18809_v63 = vld [vmem:[#allocation147_spill] sm:$0xff]  ;;  %v18814_v11 = vld [vmem:[#allocation49_spill] sm:$0xff] }
 0xe6b   : > { %v13016_v24 = vpop.eup %13015  ;;  %v15984_v46 = vpop.xlane.xlu0 %5787 }
 0xe6c   : > { %5254 = vadd.xlane.f32.xlu1 %v5253_v4  ;;  %v5213_v10 = vpop.xlane.xlu1 %5212  ;;  %v15992_v57 = vmul.f32 %v13016_v24, %v18793_v58  ;;  %v13018_v15 = vpop.eup %13017  ;;  %v18802_v24 = vld [vmem:[#allocation162_spill] sm:$0xff]  ;;  %v18803_v4 = vld [vmem:[#allocation9_spill] sm:$0xff] }
 0xe6d   : > { %13027 = vrcp.f32 %v5213_v10  ;;  %v16003_v51 = vmul.f32 %v13018_v15, %v18796_v45  ;;  %v2347_v10 = vsel %vm2235_vm2, %v18803_v4, 0.0  ;;  %v18805_v15 = vld [vmem:[#allocation148_spill] sm:$0xff] }
 0xe6e   : > { %2351 = vadd.xlane.f32.xlu0 %v2350_v12  ;;  %v12276_v41 = vpack.i.bf16 %v15992_v57, %v15989_v43  ;;  %13029 = vrcp.f32 %v5216_v53  ;;  %v18806_v12 = vld [vmem:[#allocation150_spill] sm:$0xff] }
 0xe6f   : > { %v13020_v62 = vpop.eup %13019  ;;  %v2934_v39 = vpop.xlane.xlu0 %2933 }
 0xe70   : > { %2336 = vadd.xlane.f32.xlu1 %v2335_v7  ;;  %12090 = vmatpush3.bf16.xpose.msra.mxu1 %v6189_v17  ;;  %v5219_v35 = vpop.xlane.xlu1 %5218  ;;  %v16006_v26 = vmul.f32 %v13020_v62, %v18797_v52  ;;  %v13022_v60 = vpop.eup %13021  ;;  %v18807_v7 = vld [vmem:[#allocation170_spill] sm:$0xff]  ;;  %v18808_v52 = vld [vmem:[#allocation7_spill] sm:$0xff] }
 0xe71   : > { %12115 = vmatprep.subr.bf16.mxu1 %v18798_v8  ;;  %13031 = vrcp.f32 %v5219_v35  ;;  %v16014_v48 = vmul.f32 %v13022_v60, %v18800_v47  ;;  %v2353_v60 = vsel %vm2235_vm2, %v18808_v52, 0.0  ;;  %v18810_v47 = vld [vmem:[#allocation149_spill] sm:$0xff]  ;;  %v18817_v52 = vld [vmem:[#allocation80_spill] sm:$0xff] }
 0xe72   : > { %v12281_v53 = vpack.i.bf16 %v16006_v26, %v16003_v51  ;;  %13033 = vrcp.f32 %v2934_v39  ;;  %v18846_v39 = vld [vmem:[#allocation81_spill] sm:$0xff] }
 0xe73   : > { %v13024_v22 = vpop.eup %13023  ;;  %v2940_v56 = vpop.xlane.xlu0 %2939 }
 0xe74   : > { %2342 = vadd.xlane.f32.xlu1 %v2341_v21  ;;  %v5785_v61 = vpop.xlane.xlu1 %5784  ;;  %v16017_v28 = vmul.f32 %v13024_v22, %v18801_v38  ;;  %v13026_v33 = vpop.eup %13025 }
 0xe75   : > { %v16028_v6 = vmul.f32 %v13026_v33, %v18805_v15 }
 0xe76   : > { %v12286_v2 = vpack.i.bf16 %v16017_v28, %v16014_v48  ;;  %v18832_v48 = vld [vmem:[#allocation153_spill] sm:$0xff] }
 0xe77   : > { %v13028_v27 = vpop.eup %13027  ;;  %12092 = vmatmul.mubr.msk.bf16.vlgmr.msra.gmra.mrb[188].mxu1 %vm2056_vm1, %v18802_v24  ;;  %v3506_v30 = vpop.xlane.xlu0 %3505 }
 0xe78   : > { %2348 = vadd.xlane.f32.xlu1 %v2347_v10  ;;  %12095 = vmatprep.mubr.msk.bf16.mxu1 %vm2056_vm1, %v18804_v29  ;;  %v5791_v58 = vpop.xlane.xlu1 %5790  ;;  %v16031_v62 = vmul.f32 %v13028_v27, %v18806_v12  ;;  %v13030_v16 = vpop.eup %13029  ;;  %v18815_v12 = vld [vmem:[#allocation51_spill] sm:$0xff] }
 0xe79   : > { %12116 = vmatpush3.bf16.msra.mxu1 %v18798_v8  ;;  %v16040_v21 = vmul.f32 %v13030_v16, %v18809_v63  ;;  %v18811_v8 = vld [vmem:[#allocation164_spill] sm:$0xff] }
 0xe7a   : > { %12117 = vmatprep.subr.bf16.mxu1 %v18807_v7 }
 0xe7b   : > { %v13032_v35 = vpop.eup %13031  ;;  %v3512_v45 = vpop.xlane.xlu0 %3511 }
 0xe7c   : > { %2354 = vadd.xlane.f32.xlu1 %v2353_v60  ;;  %v2937_v22 = vpop.xlane.xlu1 %2936  ;;  %v16043_v38 = vmul.f32 %v13032_v35, %v18810_v47  ;;  %v18816_v35 = vld [vmem:[#allocation78_spill] sm:$0xff] }
 0xe7d   : > { %12118 = vmatpush3.bf16.msra.mxu1 %v18807_v7  ;;  %13035 = vrcp.f32 %v2937_v22 }
 0xe7e   : > { %12119 = vmatprep.subr.bf16.mxu1 %v15815_v36  ;;  %13037 = vrcp.f32 %v2940_v56  ;;  %v13034_v56 = vpop.eup %13033 }
 0xe7f   : > { %12096 = vmatmul.mubr.msk.bf16.gmra.mrb[192].mxu1 %vm2056_vm1, %v18811_v8  ;;  %v4078_v33 = vpop.xlane.xlu0 %4077 }
 0xe80   : > { %v2943_v27 = vpop.xlane.xlu1 %2942 }
 0xe81   : > { %12120 = vmatpush3.bf16.msra.mxu1 %v15815_v36  ;;  %13039 = vrcp.f32 %v2943_v27 }
 0xe82   : > { %12121 = vmatprep.subr.bf16.mxu1 %v15732_v1  ;;  %13041 = vrcp.f32 %v3506_v30  ;;  %v18813_v30 = vld [vmem:[#allocation52_spill] sm:$0xff] }
 0xe83   : > { %v4084_v24 = vpop.xlane.xlu0 %4083 }
 0xe84   : > { %12252 = vrot.lane.b32.xlu0 %v12251_v5, %s13336_s28  ;;  %v3509_v4 = vpop.xlane.xlu1 %3508  ;;  %v16065_v5 = vmul.f32 %v13034_v56, %v18812_v9  ;;  %v18819_v56 = vld [vmem:[#allocation79_spill] sm:$0xff] }
 0xe85   : > { %12122 = vmatpush3.bf16.msra.mxu1 %v15732_v1  ;;  %13043 = vrcp.f32 %v3509_v4 }
 0xe86   : > { %13045 = vrcp.f32 %v15966_v18 }
 0xe87   : > { %v13036_v10 = vpop.eup %13035  ;;  %13047 = vrcp.f32 %v3512_v45  ;;  %v4650_v36 = vpop.xlane.xlu0 %4649 }
 0xe88   : > { %13049 = vrcp.f32 %v15984_v46  ;;  %12272 = vrot.lane.b32.xlu0 %v12271_v13, %s13337_s29  ;;  %v3515_v31 = vpop.xlane.xlu1 %3514  ;;  %v16068_v1 = vmul.f32 %v13036_v10, %v18813_v30  ;;  %v13038_v29 = vpop.eup %13037  ;;  %v18842_v30 = vld [vmem:[#allocation82_spill] sm:$0xff] }
 0xe89   : > { %13051 = vrcp.f32 %v3515_v31  ;;  %v16077_v13 = vmul.f32 %v13038_v29, %v18814_v11 }
 0xe8a   : > { %13053 = vrcp.f32 %v5791_v58 }
 0xe8b   : > { %v13040_v46 = vpop.eup %13039  ;;  %13055 = vrcp.f32 %v4078_v33  ;;  %v4656_v15 = vpop.xlane.xlu0 %4655 }
 0xe8c   : > { %13057 = vrcp.f32 %v5785_v61  ;;  %12282 = vrot.lane.b32.xlu0 %v12281_v53, %s13338_s30  ;;  %v4081_v54 = vpop.xlane.xlu1 %4080  ;;  %v16080_v16 = vmul.f32 %v13040_v46, %v18815_v12  ;;  %v13042_v58 = vpop.eup %13041  ;;  %v18821_v12 = vld [vmem:[#allocation108_spill] sm:$0xff] }
 0xe8d   : > { %12257 = vrot.lane.b32.xlu1 %v12256_v40, %s13336_s28  ;;  %13059 = vrcp.f32 %v4081_v54  ;;  %v16089_v45 = vmul.f32 %v13042_v58, %v18816_v35 }
 0xe8e   : > { %13061 = vrcp.f32 %v4084_v24  ;;  %v18818_v24 = vld [vmem:[#allocation77_spill] sm:$0xff] }
 0xe8f   : > { %v13044_v7 = vpop.eup %13043  ;;  %v5222_v51 = vpop.xlane.xlu0 %5221 }
 0xe90   : > { %v13046_v26 = vpop.eup %13045  ;;  %v4087_v53 = vpop.xlane.xlu1 %4086  ;;  %v16092_v60 = vmul.f32 %v13044_v7, %v18817_v52 }
 0xe91   : > { %v13048_v22 = vpop.eup %13047  ;;  %12262 = vrot.lane.b32.xlu1 %v12261_v25, %s13339_s20  ;;  %13063 = vrcp.f32 %v4087_v53 }
 0xe92   : > { %v13050_v0 = vpop.eup %13049  ;;  %13065 = vrcp.f32 %v4650_v36  ;;  %v16101_v4 = vmul.f32 %v13048_v22, %v18818_v24  ;;  %v18822_v22 = vld [vmem:[#allocation105_spill] sm:$0xff]  ;;  %v18825_v24 = vld [vmem:[#allocation136_spill] sm:$0xff] }
 0xe93   : > { %v13052_v40 = vpop.eup %13051  ;;  %v5228_v63 = vpop.xlane.xlu0 %5227 }
 0xe94   : > { %v12045_v47 = vpop.f32.mrb[156].mxu0  ;;  %v13054_v8 = vpop.eup %13053  ;;  %v16104_v10 = vmul.f32 %v13052_v40, %v18819_v56  ;;  %v18823_v40 = vld [vmem:[#allocation107_spill] sm:$0xff] }
 0xe95   : > { %v5894_v33 = vpop.f32.mrb[157].mxu0  ;;  %v4653_v27 = vpop.xlane.xlu1 %4652  ;;  %12267 = vrot.lane.b32.xlu1 %v12266_v44, %s13339_s20  ;;  %v16110_v36 = vmul.f32 %v13050_v0, %v12045_v47 }
 0xe96   : > { %v13056_v20 = vpop.eup %13055  ;;  %13067 = vrcp.f32 %v4653_v27  ;;  %v12046_v55 = vpop.f32.mrb[158].mxu0  ;;  %v16116_v46 = vmul.f32 %v13046_v26, %v5894_v33 }
 0xe97   : > { %v13058_v25 = vpop.eup %13057  ;;  %v16112_v31 = vmul.f32 %v13054_v8, %v12046_v55  ;;  %v5897_v9 = vpop.f32.mrb[159].mxu0  ;;  %13069 = vrcp.f32 %v4656_v15  ;;  %v16125_v44 = vmul.f32 %v13056_v20, %v18820_v19 }
 0xe98   : > { %v13060_v29 = vpop.eup %13059  ;;  %v16118_v54 = vmul.f32 %v13058_v25, %v5897_v9  ;;  %v16120_v11 = vpop.xlane.xlu0 %5793  ;;  %v18826_v9 = vld [vmem:[#allocation133_spill] sm:$0xff] }
 0xe99   : > { %v16128_v58 = vmul.f32 %v13060_v29, %v18821_v12  ;;  %v13062_v7 = vpop.eup %13061  ;;  %12277 = vrot.lane.b32.xlu1 %v12276_v41, %s13337_s29  ;;  %v4659_v26 = vpop.xlane.xlu1 %4658 }
 0xe9a   : > { %13071 = vrcp.f32 %v4659_v26  ;;  %v16141_v0 = vmul.f32 %v13062_v7, %v18822_v22 }
 0xe9b   : > { %v13064_v35 = vpop.eup %13063  ;;  %13073 = vrcp.f32 %v5222_v51  ;;  %v18824_v51 = vld [vmem:[#allocation134_spill] sm:$0xff] }
 0xe9c   : > { %v16138_v52 = vpop.xlane.xlu0 %5799  ;;  %v16144_v47 = vmul.f32 %v13064_v35, %v18823_v40  ;;  %v13066_v8 = vpop.eup %13065  ;;  %v18828_v40 = vld [vmem:[#allocation152_spill] sm:$0xff] }
 0xe9d   : > { %12287 = vrot.lane.b32.xlu1 %v12286_v2, %s13338_s30  ;;  %v5225_v43 = vpop.xlane.xlu1 %5224  ;;  %v16153_v27 = vmul.f32 %v13066_v8, %v18824_v51 }
 0xe9e   : > { %13075 = vrcp.f32 %v5225_v43  ;;  %v18829_v43 = vld [vmem:[#allocation154_spill] sm:$0xff] }
 0xe9f   : > { %13077 = vrcp.f32 %v5228_v63  ;;  %v18827_v63 = vld [vmem:[#allocation135_spill] sm:$0xff] }
 0xea0   : > { %v13068_v41 = vpop.eup %13067  ;;  %v2946_v33 = vpop.xlane.xlu0 %2945 }
 0xea1   : > { %v16156_v56 = vmul.f32 %v13068_v41, %v18825_v24  ;;  %v5231_v20 = vpop.xlane.xlu1 %5230  ;;  %v13070_v55 = vpop.eup %13069 }
 0xea2   : > { %13079 = vrcp.f32 %v5231_v20  ;;  %v16163_v29 = vmul.f32 %v13070_v55, %v18826_v9  ;;  %v18830_v9 = vld [vmem:[#allocation151_spill] sm:$0xff] }
 0xea3   : > { %13081 = vrcp.f32 %v2946_v33 }
 0xea4   : > { %v2952_v28 = vpop.xlane.xlu0 %2951  ;;  %v13072_v2 = vpop.eup %13071 }
 0xea5   : > { %v16160_v25 = vpop.xlane.xlu1 %5796  ;;  %v16166_v19 = vmul.f32 %v13072_v2, %v18827_v63  ;;  %v13074_v12 = vpop.eup %13073 }
 0xea6   : > { %v16173_v8 = vmul.f32 %v13074_v12, %v18828_v40 }
 0xea8   : > { %v3518_v7 = vpop.xlane.xlu0 %3517  ;;  %v13076_v35 = vpop.eup %13075 }
 0xea9   : > { %v16170_v22 = vpop.xlane.xlu1 %5802  ;;  %v16176_v41 = vmul.f32 %v13076_v35, %v18829_v43  ;;  %v13078_v51 = vpop.eup %13077 }
 0xeaa   : > { %v16181_v63 = vmul.f32 %v13078_v51, %v18830_v9  ;;  %v18834_v9 = vld [vmem:[#allocation54_spill] sm:$0xff] }
 0xeac   : > { %v3524_v24 = vpop.xlane.xlu0 %3523  ;;  %v13080_v55 = vpop.eup %13079  ;;  %18831 = vst [vmem:[#allocation39_spill] sm:$0xff] %v16181_v63 }
 0xead   : > { %v2949_v2 = vpop.xlane.xlu1 %2948  ;;  %v16184_v15 = vmul.f32 %v13080_v55, %v18832_v48  ;;  %v13082_v37 = vpop.eup %13081  ;;  %v18836_v55 = vld [vmem:[#allocation56_spill] sm:$0xff] }
 0xeae   : > { %13083 = vrcp.f32 %v2949_v2  ;;  %v16189_v48 = vmul.f32 %v13082_v37, %v18834_v9 }
 0xeaf   : > { %18833 = vst [vmem:[#allocation62_spill] sm:$0xff] %v16184_v15  ;;  %13085 = vrcp.f32 %v2952_v28 }
 0xeb0   : > { %v4090_v12 = vpop.xlane.xlu0 %4089  ;;  %18835 = vst [vmem:[#allocation63_spill] sm:$0xff] %v16189_v48 }
 0xeb1   : > { %v2955_v40 = vpop.xlane.xlu1 %2954 }
 0xeb2   : > { %13087 = vrcp.f32 %v2955_v40 }
 0xeb3   : > { %13089 = vrcp.f32 %v3518_v7 }
 0xeb4   : > { %v4096_v43 = vpop.xlane.xlu0 %4095 }
 0xeb5   : > { %v3521_v20 = vpop.xlane.xlu1 %3520 }
 0xeb6   : > { %13091 = vrcp.f32 %v3521_v20  ;;  %v18838_v20 = vld [vmem:[#allocation53_spill] sm:$0xff] }
 0xeb7   : > { %13093 = vrcp.f32 %v3524_v24  ;;  %v18840_v24 = vld [vmem:[#allocation55_spill] sm:$0xff] }
 0xeb8   : > { %v4662_v33 = vpop.xlane.xlu0 %4661  ;;  %v13084_v18 = vpop.eup %13083 }
 0xeb9   : > { %v3527_v51 = vpop.xlane.xlu1 %3526  ;;  %v16192_v2 = vmul.f32 %v13084_v18, %v18836_v55  ;;  %v13086_v42 = vpop.eup %13085 }
 0xeba   : > { %13095 = vrcp.f32 %v3527_v51  ;;  %v16197_v26 = vmul.f32 %v13086_v42, %v18838_v20 }
 0xebb   : > { %18837 = vst [vmem:[#allocation38_spill] sm:$0xff] %v16192_v2  ;;  %13097 = vrcp.f32 %v4090_v12  ;;  %v18844_v12 = vld [vmem:[#allocation84_spill] sm:$0xff] }
 0xebc   : > { %v4668_v28 = vpop.xlane.xlu0 %4667  ;;  %v13088_v7 = vpop.eup %13087  ;;  %18839 = vst [vmem:[#allocation90_spill] sm:$0xff] %v16197_v26  ;;  %v18862_v26 = vld [vmem:[#allocation137_spill] sm:$0xff] }
 0xebd   : > { %v4093_v35 = vpop.xlane.xlu1 %4092  ;;  %v16200_v57 = vmul.f32 %v13088_v7, %v18840_v24  ;;  %v13090_v37 = vpop.eup %13089 }
 0xebe   : > { %13099 = vrcp.f32 %v4093_v35  ;;  %v16205_v40 = vmul.f32 %v13090_v37, %v18842_v30 }
 0xebf   : > { %18841 = vst [vmem:[#allocation40_spill] sm:$0xff] %v16200_v57  ;;  %13101 = vrcp.f32 %v4096_v43  ;;  %v18848_v43 = vld [vmem:[#allocation83_spill] sm:$0xff] }
 0xec0   : > { %v5234_v9 = vpop.xlane.xlu0 %5233  ;;  %v13092_v51 = vpop.eup %13091  ;;  %18843 = vst [vmem:[#allocation91_spill] sm:$0xff] %v16205_v40 }
 0xec1   : > { %v4099_v55 = vpop.xlane.xlu1 %4098  ;;  %v16208_v61 = vmul.f32 %v13092_v51, %v18844_v12  ;;  %v13094_v42 = vpop.eup %13093  ;;  %v18850_v12 = vld [vmem:[#allocation110_spill] sm:$0xff] }
 0xec2   : > { %13103 = vrcp.f32 %v4099_v55  ;;  %v16213_v18 = vmul.f32 %v13094_v42, %v18846_v39  ;;  %v18852_v39 = vld [vmem:[#allocation112_spill] sm:$0xff] }
 0xec3   : > { %18845 = vst [vmem:[#allocation61_spill] sm:$0xff] %v16208_v61  ;;  %13105 = vrcp.f32 %v4662_v33 }
 0xec4   : > { %v5240_v20 = vpop.xlane.xlu0 %5239  ;;  %v13096_v35 = vpop.eup %13095  ;;  %18847 = vst [vmem:[#allocation118_spill] sm:$0xff] %v16213_v18 }
 0xec5   : > { %v4665_v24 = vpop.xlane.xlu1 %4664  ;;  %v16216_v53 = vmul.f32 %v13096_v35, %v18848_v43  ;;  %v13098_v30 = vpop.eup %13097 }
 0xec6   : > { %13107 = vrcp.f32 %v4665_v24  ;;  %v16223_v7 = vmul.f32 %v13098_v30, %v18850_v12  ;;  %v18856_v30 = vld [vmem:[#allocation111_spill] sm:$0xff] }
 0xec7   : > { %18849 = vst [vmem:[#allocation64_spill] sm:$0xff] %v16216_v53  ;;  %13109 = vrcp.f32 %v16120_v11 }
 0xec8   : > { %v2958_v37 = vpop.xlane.xlu0 %2957  ;;  %v13100_v55 = vpop.eup %13099  ;;  %13111 = vrcp.f32 %v4668_v28  ;;  %18851 = vst [vmem:[#allocation119_spill] sm:$0xff] %v16223_v7  ;;  %v18854_v28 = vld [vmem:[#allocation109_spill] sm:$0xff] }
 0xec9   : > { %13113 = vrcp.f32 %v16138_v52  ;;  %v4671_v33 = vpop.xlane.xlu1 %4670  ;;  %v16226_v42 = vmul.f32 %v13100_v55, %v18852_v39  ;;  %v13102_v35 = vpop.eup %13101 }
 0xeca   : > { %13115 = vrcp.f32 %v4671_v33  ;;  %v16233_v51 = vmul.f32 %v13102_v35, %v18854_v28 }
 0xecb   : > { %18853 = vst [vmem:[#allocation89_spill] sm:$0xff] %v16226_v42  ;;  %13117 = vrcp.f32 %v16170_v22 }
 0xecc   : > { %v2964_v11 = vpop.xlane.xlu0 %2963  ;;  %v13104_v43 = vpop.eup %13103  ;;  %13119 = vrcp.f32 %v5234_v9  ;;  %18855 = vst [vmem:[#allocation92_spill] sm:$0xff] %v16233_v51  ;;  %v18858_v9 = vld [vmem:[#allocation138_spill] sm:$0xff] }
 0xecd   : > { %13121 = vrcp.f32 %v16160_v25  ;;  %v5237_v52 = vpop.xlane.xlu1 %5236  ;;  %v16236_v12 = vmul.f32 %v13104_v43, %v18856_v30  ;;  %v13106_v55 = vpop.eup %13105  ;;  %v18860_v25 = vld [vmem:[#allocation140_spill] sm:$0xff] }
 0xece   : > { %13123 = vrcp.f32 %v5237_v52  ;;  %v16241_v18 = vmul.f32 %v13106_v55, %v18858_v9  ;;  %v18864_v55 = vld [vmem:[#allocation139_spill] sm:$0xff] }
 0xecf   : > { %18857 = vst [vmem:[#allocation117_spill] sm:$0xff] %v16236_v12  ;;  %13125 = vrcp.f32 %v5240_v20 }
 0xed0   : > { %v3530_v33 = vpop.xlane.xlu0 %3529  ;;  %v13108_v39 = vpop.eup %13107  ;;  %18859 = vst [vmem:[#allocation120_spill] sm:$0xff] %v16241_v18 }
 0xed1   : > { %v13110_v24 = vpop.eup %13109  ;;  %v5243_v17 = vpop.xlane.xlu1 %5242  ;;  %v16244_v53 = vmul.f32 %v13108_v39, %v18860_v25 }
 0xed2   : > { %v13112_v35 = vpop.eup %13111  ;;  %13127 = vrcp.f32 %v5243_v17 }
 0xed3   : > { %18861 = vst [vmem:[#allocation43_spill] sm:$0xff] %v16244_v53  ;;  %v13114_v43 = vpop.eup %13113  ;;  %13129 = vrcp.f32 %v2958_v37  ;;  %v16249_v57 = vmul.f32 %v13112_v35, %v18862_v26 }
 0xed4   : > { %v3536_v28 = vpop.xlane.xlu0 %3535  ;;  %v13116_v30 = vpop.eup %13115 }
 0xed5   : > { %v12049_v22 = vpop.f32.mrb[160].mxu0  ;;  %v13118_v51 = vpop.eup %13117  ;;  %18863 = vst [vmem:[#allocation41_spill] sm:$0xff] %v16249_v57  ;;  %v16252_v9 = vmul.f32 %v13116_v30, %v18864_v55  ;;  %v18870_v55 = vld [vmem:[#allocation156_spill] sm:$0xff] }
 0xed6   : > { %v2961_v20 = vpop.xlane.xlu1 %2960  ;;  %v5910_v12 = vpop.f32.mrb[161].mxu0  ;;  %v16254_v7 = vmul.f32 %v13114_v43, %v12049_v22 }
 0xed7   : > { %18865 = vst [vmem:[#allocation67_spill] sm:$0xff] %v16252_v9  ;;  %v13120_v39 = vpop.eup %13119  ;;  %13131 = vrcp.f32 %v2961_v20  ;;  %v12050_v17 = vpop.f32.mrb[162].mxu0  ;;  %v16260_v26 = vmul.f32 %v13110_v24, %v5910_v12 }
 0xed8   : > { %v13122_v25 = vpop.eup %13121  ;;  %18866 = vst [vmem:[#allocation65_spill] sm:$0xff] %v16254_v7  ;;  %v16256_v42 = vmul.f32 %v13118_v51, %v12050_v17  ;;  %v4102_v52 = vpop.xlane.xlu0 %4101  ;;  %13133 = vrcp.f32 %v2964_v11  ;;  %v16267_v22 = vmul.f32 %v13120_v39, %v18870_v55  ;;  %v18872_v51 = vld [vmem:[#allocation158_spill] sm:$0xff]  ;;  %v18874_v39 = vld [vmem:[#allocation155_spill] sm:$0xff] }
 0xed9   : > { %v5913_v37 = vpop.f32.mrb[163].mxu0  ;;  %v13124_v53 = vpop.eup %13123  ;;  %18868 = vst [vmem:[#allocation95_spill] sm:$0xff] %v16260_v26 }
 0xeda   : > { %18867 = vst [vmem:[#allocation44_spill] sm:$0xff] %v16256_v42  ;;  %v16262_v35 = vmul.f32 %v13122_v25, %v5913_v37  ;;  %v2967_v20 = vpop.xlane.xlu1 %2966  ;;  %18871 = vst [vmem:[#allocation93_spill] sm:$0xff] %v16267_v22  ;;  %v16270_v43 = vmul.f32 %v13124_v53, %v18872_v51  ;;  %v13126_v17 = vpop.eup %13125  ;;  %v18876_v51 = vld [vmem:[#allocation157_spill] sm:$0xff] }
 0xedb   : > { %13135 = vrcp.f32 %v2967_v20  ;;  %v16283_v55 = vmul.f32 %v13126_v17, %v18874_v39  ;;  %v18878_v39 = vld [vmem:[#allocation58_spill] sm:$0xff] }
 0xedc   : > { %18869 = vst [vmem:[#allocation42_spill] sm:$0xff] %v16262_v35  ;;  %18873 = vst [vmem:[#allocation68_spill] sm:$0xff] %v16270_v43  ;;  %v13128_v24 = vpop.eup %13127  ;;  %13137 = vrcp.f32 %v3530_v33  ;;  %v4108_v12 = vpop.xlane.xlu0 %4107 }
 0xedd   : > { %v16276_v25 = vpop.f32.mrb[164].mxu0  ;;  %18875 = vst [vmem:[#allocation123_spill] sm:$0xff] %v16283_v55  ;;  %v16286_v18 = vmul.f32 %v13128_v24, %v18876_v51  ;;  %v13130_v20 = vpop.eup %13129  ;;  %v18880_v51 = vld [vmem:[#allocation60_spill] sm:$0xff] }
 0xede   : > { %v3533_v37 = vpop.xlane.xlu1 %3532  ;;  %v16278_v30 = vpop.f32.mrb[165].mxu0  ;;  %v6262_v53 = vsel %vm2235_vm2, %v16276_v25, -inf }
 0xedf   : > { %18877 = vst [vmem:[#allocation66_spill] sm:$0xff] %v16286_v18  ;;  %13139 = vrcp.f32 %v3533_v37  ;;  %v16288_v11 = vpop.f32.mrb[166].mxu0  ;;  %6263 = vmax.xlane.f32.xlu0 %v6262_v53  ;;  %v6256_v24 = vsel %vm2235_vm2, %v16278_v30, -inf  ;;  %v16299_v37 = vmul.f32 %v13130_v20, %v18878_v39  ;;  %v18882_v39 = vld [vmem:[#allocation57_spill] sm:$0xff] }
 0xee0   : > { %v16290_v33 = vpop.f32.mrb[167].mxu0  ;;  %13141 = vrcp.f32 %v3536_v28  ;;  %v4674_v57 = vpop.xlane.xlu0 %4673  ;;  %v6265_v20 = vsel %vm2235_vm2, %v16288_v11, -inf }
 0xee1   : > { %v13132_v9 = vpop.eup %13131  ;;  %v6259_v22 = vsel %vm2235_vm2, %v16290_v33, -inf  ;;  %18879 = vst [vmem:[#allocation121_spill] sm:$0xff] %v16299_v37 }
 0xee2   : > { %v3539_v17 = vpop.xlane.xlu1 %3538  ;;  %6260 = vmax.xlane.f32.xlu1 %v6259_v22  ;;  %v16302_v53 = vmul.f32 %v13132_v9, %v18880_v51  ;;  %v13134_v43 = vpop.eup %13133 }
 0xee3   : > { %13143 = vrcp.f32 %v3539_v17  ;;  %6257 = vmax.xlane.f32.xlu0 %v6256_v24  ;;  %v16315_v17 = vmul.f32 %v13134_v43, %v18882_v39  ;;  %v18884_v24 = vld [vmem:[#allocation59_spill] sm:$0xff] }
 0xee4   : > { %18881 = vst [vmem:[#allocation96_spill] sm:$0xff] %v16302_v53  ;;  %13145 = vrcp.f32 %v4102_v52  ;;  %v16306_v18 = vpop.f32.mrb[168].mxu0  ;;  %v4680_v48 = vpop.xlane.xlu0 %4679 }
 0xee5   : > { %v13136_v55 = vpop.eup %13135  ;;  %v16308_v40 = vpop.f32.mrb[169].mxu0  ;;  %v6274_v9 = vsel %vm2235_vm2, %v16306_v18, -inf  ;;  %18883 = vst [vmem:[#allocation35_spill] sm:$0xff] %v16315_v17 }
 0xee6   : > { %v4105_v22 = vpop.xlane.xlu1 %4104  ;;  %v16318_v51 = vmul.f32 %v13136_v55, %v18884_v24  ;;  %v13138_v28 = vpop.eup %13137  ;;  %6275 = vmax.xlane.f32.xlu1 %v6274_v9  ;;  %v6268_v43 = vsel %vm2235_vm2, %v16308_v40, -inf }
 0xee7   : > { %13147 = vrcp.f32 %v4105_v22  ;;  %v16320_v52 = vpop.f32.mrb[170].mxu0  ;;  %6266 = vmax.xlane.f32.xlu0 %v6265_v20  ;;  %v18886_v22 = vld [vmem:[#allocation86_spill] sm:$0xff]  ;;  %v18888_v20 = vld [vmem:[#allocation88_spill] sm:$0xff] }
 0xee8   : > { %18885 = vst [vmem:[#allocation37_spill] sm:$0xff] %v16318_v51  ;;  %v16322_v37 = vpop.f32.mrb[171].mxu0  ;;  %13149 = vrcp.f32 %v4108_v12  ;;  %v6277_v55 = vsel %vm2235_vm2, %v16320_v52, -inf  ;;  %v16331_v39 = vmul.f32 %v13138_v28, %v18886_v22  ;;  %v5810_v51 = vsel %vm2235_vm2, %v15887_v14, 0.0  ;;  %v18890_v22 = vld [vmem:[#allocation85_spill] sm:$0xff] }
 0xee9   : > { %v13140_v61 = vpop.eup %13139  ;;  %v6271_v28 = vsel %vm2235_vm2, %v16322_v37, -inf  ;;  %v5804_v12 = vsel %vm2235_vm2, %v15898_v49, 0.0 }
 0xeea   : > { %v4111_v2 = vpop.xlane.xlu1 %4110  ;;  %18887 = vst [vmem:[#allocation94_spill] sm:$0xff] %v16331_v39  ;;  %v16334_v9 = vmul.f32 %v13140_v61, %v18888_v20  ;;  %v13142_v24 = vpop.eup %13141  ;;  %6278 = vmax.xlane.f32.xlu1 %v6277_v55  ;;  %v18892_v61 = vld [vmem:[#allocation87_spill] sm:$0xff] }
 0xeeb   : > { %13151 = vrcp.f32 %v4111_v2  ;;  %6269 = vmax.xlane.f32.xlu0 %v6268_v43  ;;  %v16343_v7 = vmul.f32 %v13142_v24, %v18890_v22  ;;  %v5246_v43 = vpop.xlane.xlu0 %5245  ;;  %v5813_v24 = vsel %vm2235_vm2, %v15889_v3, 0.0  ;;  %v18894_v22 = vld [vmem:[#allocation114_spill] sm:$0xff]  ;;  %v5822_v3 = vsel %vm2235_vm2, %v15928_v32, 0.0 }
 0xeec   : > { %18889 = vst [vmem:[#allocation124_spill] sm:$0xff] %v16334_v9  ;;  %13153 = vrcp.f32 %v4674_v57  ;;  %v5816_v32 = vsel %vm2235_vm2, %v15920_v59, 0.0  ;;  %v5819_v59 = vsel %vm2235_vm2, %v15918_v23, 0.0 }
 0xeed   : > { %v13144_v53 = vpop.eup %13143  ;;  %18891 = vst [vmem:[#allocation34_spill] sm:$0xff] %v16343_v7 }
 0xeee   : > { %v4677_v17 = vpop.xlane.xlu1 %4676  ;;  %v16346_v20 = vmul.f32 %v13144_v53, %v18892_v61  ;;  %v13146_v2 = vpop.eup %13145  ;;  %6272 = vmax.xlane.f32.xlu1 %v6271_v28  ;;  %v18896_v61 = vld [vmem:[#allocation116_spill] sm:$0xff] }
 0xeef   : > { %13155 = vrcp.f32 %v4677_v17  ;;  %5811 = vadd.xlane.f32.xlu0 %v5810_v51  ;;  %v16355_v53 = vmul.f32 %v13146_v2, %v18894_v22  ;;  %v5252_v57 = vpop.xlane.xlu0 %5251  ;;  %v5807_v2 = vsel %vm2235_vm2, %v15900_v50, 0.0  ;;  %v18898_v22 = vld [vmem:[#allocation113_spill] sm:$0xff]  ;;  %v5825_v50 = vsel %vm2235_vm2, %v15931_v34, 0.0  ;;  %v18908_v34 = vld [vmem:[#allocation143_spill] sm:$0xff] }
 0xef0   : > { %18893 = vst [vmem:[#allocation36_spill] sm:$0xff] %v16346_v20  ;;  %13157 = vrcp.f32 %v4680_v48 }
 0xef1   : > { %v13148_v55 = vpop.eup %13147  ;;  %18895 = vst [vmem:[#allocation46_spill] sm:$0xff] %v16355_v53 }
 0xef2   : > { %v4683_v14 = vpop.xlane.xlu1 %4682  ;;  %v16358_v17 = vmul.f32 %v13148_v55, %v18896_v61  ;;  %v13150_v51 = vpop.eup %13149  ;;  %5814 = vadd.xlane.f32.xlu1 %v5813_v24  ;;  %v18900_v61 = vld [vmem:[#allocation115_spill] sm:$0xff] }
 0xef3   : > { %13159 = vrcp.f32 %v4683_v14  ;;  %5805 = vadd.xlane.f32.xlu0 %v5804_v12  ;;  %v16367_v55 = vmul.f32 %v13150_v51, %v18898_v22  ;;  %v18902_v51 = vld [vmem:[#allocation142_spill] sm:$0xff] }
 0xef4   : > { %18897 = vst [vmem:[#allocation122_spill] sm:$0xff] %v16358_v17  ;;  %13161 = vrcp.f32 %v5246_v43 }
 0xef5   : > { %v13152_v28 = vpop.eup %13151  ;;  %18899 = vst [vmem:[#allocation47_spill] sm:$0xff] %v16367_v55 }
 0xef6   : > { %v5249_v49 = vpop.xlane.xlu1 %5248  ;;  %v16370_v14 = vmul.f32 %v13152_v28, %v18900_v61  ;;  %v13154_v12 = vpop.eup %13153  ;;  %5808 = vadd.xlane.f32.xlu1 %v5807_v2  ;;  %v18904_v28 = vld [vmem:[#allocation144_spill] sm:$0xff]  ;;  %v18906_v2 = vld [vmem:[#allocation141_spill] sm:$0xff] }
 0xef7   : > { %13163 = vrcp.f32 %v5249_v49  ;;  %5823 = vadd.xlane.f32.xlu0 %v5822_v3  ;;  %v16379_v22 = vmul.f32 %v13154_v12, %v18902_v51 }
 0xef8   : > { %18901 = vst [vmem:[#allocation70_spill] sm:$0xff] %v16370_v14  ;;  %13165 = vrcp.f32 %v5252_v57 }
 0xef9   : > { %v13156_v24 = vpop.eup %13155  ;;  %18903 = vst [vmem:[#allocation71_spill] sm:$0xff] %v16379_v22 }
 0xefa   : > { %v5255_v48 = vpop.xlane.xlu1 %5254  ;;  %v16382_v61 = vmul.f32 %v13156_v24, %v18904_v28  ;;  %v13158_v49 = vpop.eup %13157  ;;  %5826 = vadd.xlane.f32.xlu1 %v5825_v50  ;;  %v18912_v28 = vld [vmem:[#allocation169_spill] sm:$0xff] }
 0xefb   : > { %13167 = vrcp.f32 %v5255_v48  ;;  %5817 = vadd.xlane.f32.xlu0 %v5816_v32  ;;  %v16389_v43 = vmul.f32 %v13158_v49, %v18906_v2  ;;  %v18910_v32 = vld [vmem:[#allocation167_spill] sm:$0xff]  ;;  %v18914_v2 = vld [vmem:[#allocation165_spill] sm:$0xff]  ;;  %v16432_v48 = vpop.xlane.xlu0 %2333 }
 0xefc   : > { %18905 = vst [vmem:[#allocation45_spill] sm:$0xff] %v16382_v61  ;;  %18920 = vst [vmem:[#allocation100_spill] sm:$0xff] %v16432_v48 }
 0xefd   : > { %v13160_v3 = vpop.eup %13159  ;;  %18907 = vst [vmem:[#allocation98_spill] sm:$0xff] %v16389_v43 }
 0xefe   : > { %v16392_v12 = vmul.f32 %v13160_v3, %v18908_v34  ;;  %v13162_v51 = vpop.eup %13161  ;;  %5820 = vadd.xlane.f32.xlu1 %v5819_v59  ;;  %v18916_v34 = vld [vmem:[#allocation168_spill] sm:$0xff] }
 0xeff   : > { %v16397_v50 = vmul.f32 %v13162_v51, %v18910_v32 }
 0xf00   : > { %18909 = vst [vmem:[#allocation48_spill] sm:$0xff] %v16392_v12 }
 0xf01   : > { %v13164_v24 = vpop.eup %13163  ;;  %18911 = vst [vmem:[#allocation99_spill] sm:$0xff] %v16397_v50 }
 0xf02   : > { %v16400_v57 = vmul.f32 %v13164_v24, %v18912_v28  ;;  %v13166_v22 = vpop.eup %13165 }
 0xf03   : > { %v16405_v3 = vmul.f32 %v13166_v22, %v18914_v2 }
 0xf04   : > { %18913 = vst [vmem:[#allocation69_spill] sm:$0xff] %v16400_v57  ;;  %v16436_v57 = vpop.xlane.xlu0 %2339 }
 0xf05   : > { %v13168_v49 = vpop.eup %13167  ;;  %18915 = vst [vmem:[#allocation126_spill] sm:$0xff] %v16405_v3  ;;  %18922 = vst [vmem:[#allocation159_spill] sm:$0xff] %v16436_v57 }
 0xf06   : > { %v16408_v59 = vmul.f32 %v13168_v49, %v18916_v34  ;;  %v16428_v49 = vpop.xlane.xlu1 %2336 }
 0xf07   : > { %18918 = vst [vmem:[#allocation127_spill] sm:$0xff] %v16428_v49 }
 0xf08   : > { %18917 = vst [vmem:[#allocation72_spill] sm:$0xff] %v16408_v59  ;;  %v16448_v14 = vpop.xlane.xlu0 %2345 }
 0xf09   : > { %18924 = vst [vmem:[#allocation74_spill] sm:$0xff] %v16448_v14 }
 0xf0a   : > { %v16430_v34 = vpop.xlane.xlu1 %2342 }
 0xf0b   : > { %18919 = vst [vmem:[#allocation97_spill] sm:$0xff] %v16430_v34 }
 0xf0c   : > { %v16458_v17 = vpop.xlane.xlu0 %2351 }
 0xf0d   : > { %18926 = vst [vmem:[#allocation128_spill] sm:$0xff] %v16458_v17 }
 0xf0e   : > { %v16434_v50 = vpop.xlane.xlu1 %2348 }
 0xf0f   : > { %18921 = vst [vmem:[#allocation125_spill] sm:$0xff] %v16434_v50 }
 0xf10   : > { %v16464_v34 = vpop.permute.xlu0 %12252 }
 0xf11   : > { %18928 = vst [vmem:[#allocation73_spill] sm:$0xff] %v16464_v34 }
 0xf12   : > { %v16442_v43 = vpop.xlane.xlu1 %2354 }
 0xf13   : > { %18923 = vst [vmem:[#allocation3_spill] sm:$0xff] %v16442_v43 }
 0xf14   : > { %v16468_v48 = vpop.permute.xlu0 %12272 }
 0xf15   : > { %18930 = vst [vmem:[#allocation2_spill] sm:$0xff] %v16468_v48 }
 0xf16   : > { %v16450_v7 = vpop.permute.xlu1 %12257 }
 0xf17   : > { %18925 = vst [vmem:[#allocation76_spill] sm:$0xff] %v16450_v7 }
 0xf18   : > { %v16472_v7 = vpop.permute.xlu0 %12282 }
 0xf19   : > { %18932 = vst [vmem:[#allocation102_spill] sm:$0xff] %v16472_v7 }
 0xf1a   : > { %v16462_v9 = vpop.permute.xlu1 %12262 }
 0xf1b   : > { %18927 = vst [vmem:[#allocation161_spill] sm:$0xff] %v16462_v9 }
 0xf1e   : > { %v16466_v57 = vpop.permute.xlu1 %12267 }
 0xf1f   : > { %18929 = vst [vmem:[#allocation75_spill] sm:$0xff] %v16466_v57 }
 0xf22   : > { %v16470_v14 = vpop.permute.xlu1 %12277 }
 0xf23   : > { %18931 = vst [vmem:[#allocation145_spill] sm:$0xff] %v16470_v14 }
 0xf26   : > { %v16474_v49 = vpop.permute.xlu1 %12287 }
 0xf27   : > { %18933 = vst [vmem:[#allocation104_spill] sm:$0xff] %v16474_v49 }
 0xf2a   : > { %v16412_v61 = vpop.f32.mrb[180].mxu1 }
 0xf2b   : > { %v16414_v51 = vpop.f32.mrb[181].mxu1 }
 0xf2c   : > { %v16416_v24 = vpop.f32.mrb[182].mxu1 }
 0xf2d   : > { %v16418_v32 = vpop.f32.mrb[183].mxu1 }
 0xf35   : > { %v16420_v28 = vpop.f32.mrb[184].mxu1 }
 0xf36   : > { %v16422_v23 = vpop.f32.mrb[185].mxu1 }
 0xf37   : > { %v16424_v22 = vpop.f32.mrb[186].mxu1 }
 0xf38   : > { %v16426_v2 = vpop.f32.mrb[187].mxu1 }
 0xf4a   : > { %v16438_v3 = vpop.f32.mrb[188].mxu1 }
 0xf4b   : > { %v16440_v59 = vpop.f32.mrb[189].mxu1 }
 0xf4c   : > { %v16444_v12 = vpop.f32.mrb[190].mxu1 }
 0xf4d   : > { %v16446_v55 = vpop.f32.mrb[191].mxu1 }
 0xf52   : > { %v16452_v20 = vpop.f32.mrb[192].mxu1 }
 0xf53   : > { %v16454_v53 = vpop.f32.mrb[193].mxu1 }
 0xf54   : > { %v16456_v50 = vpop.f32.mrb[194].mxu1 }
 0xf55   : > { %v16460_v39 = vpop.f32.mrb[195].mxu1 }
 0xf6c   : > { %v6264_v42 = vpop.xlane.xlu0 %6263 }
 0xf6d   : > { %v6306_v63 = vsub.f32 %v16276_v25, %v6264_v42 }
 0xf6f   : > { %v6324_v15 = vmul.f32 1.442695, %v6306_v63  ;;  %v6261_v26 = vpop.xlane.xlu1 %6260 }
 0xf70   : > { %v6305_v35 = vsub.f32 %v16290_v33, %v6261_v26  ;;  %v6258_v9 = vpop.xlane.xlu0 %6257 }
 0xf71   : > { %13169 = vpow2.f32 %v6324_v15  ;;  %v6304_v34 = vsub.f32 %v16278_v30, %v6258_v9 }
 0xf72   : > { %v6322_v57 = vmul.f32 1.442695, %v6305_v35 }
 0xf73   : > { %v6320_v43 = vmul.f32 1.442695, %v6304_v34  ;;  %v6276_v14 = vpop.xlane.xlu1 %6275 }
 0xf74   : > { %13171 = vpow2.f32 %v6322_v57  ;;  %v6267_v48 = vpop.xlane.xlu0 %6266  ;;  %v6310_v49 = vsub.f32 %v16306_v18, %v6276_v14 }
 0xf75   : > { %13173 = vpow2.f32 %v6320_v43  ;;  %v6307_v7 = vsub.f32 %v16288_v11, %v6267_v48 }
 0xf76   : > { %v6332_v42 = vmul.f32 1.442695, %v6310_v49 }
 0xf77   : > { %v6326_v17 = vmul.f32 1.442695, %v6307_v7  ;;  %v6279_v25 = vpop.xlane.xlu1 %6278 }
 0xf78   : > { %v6270_v63 = vpop.xlane.xlu0 %6269  ;;  %v6311_v15 = vsub.f32 %v16320_v52, %v6279_v25 }
 0xf79   : > { %13175 = vpow2.f32 %v6326_v17  ;;  %v6308_v26 = vsub.f32 %v16308_v40, %v6270_v63 }
 0xf7a   : > { %13177 = vpow2.f32 %v6332_v42  ;;  %v6334_v33 = vmul.f32 1.442695, %v6311_v15 }
 0xf7b   : > { %v13170_v35 = vpop.eup %13169  ;;  %v6328_v30 = vmul.f32 1.442695, %v6308_v26  ;;  %v6273_v57 = vpop.xlane.xlu1 %6272 }
 0xf7c   : > { %v5812_v9 = vpop.xlane.xlu0 %5811  ;;  %v6358_v43 = vsel %vm2235_vm2, %v13170_v35, 0.0  ;;  %v6309_v18 = vsub.f32 %v16322_v37, %v6273_v57 }
 0xf7d   : > { %13179 = vpow2.f32 %v6328_v30  ;;  %6359 = vadd.xlane.f32.xlu0 %v6358_v43 }
 0xf7e   : > { %v13172_v7 = vpop.eup %13171  ;;  %13181 = vpow2.f32 %v6334_v33  ;;  %v6330_v17 = vmul.f32 1.442695, %v6309_v18 }
 0xf7f   : > { %v13174_v11 = vpop.eup %13173  ;;  %13183 = vrcp.f32 %v5812_v9  ;;  %v5815_v14 = vpop.xlane.xlu1 %5814  ;;  %v6355_v57 = vsel %vm2235_vm2, %v13172_v7, 0.0 }
 0xf80   : > { %v5806_v40 = vpop.xlane.xlu0 %5805  ;;  %v6352_v52 = vsel %vm2235_vm2, %v13174_v11, 0.0  ;;  %v6400_v48 = vpack.c.bf16 %v13172_v7, %v13174_v11  ;;  %13185 = vpow2.f32 %v6330_v17 }
 0xf81   : > { %6353 = vadd.xlane.f32.xlu0 %v6352_v52  ;;  %13187 = vrcp.f32 %v5815_v14 }
 0xf82   : > { %12107 = vmatprep.mubr.msk.bf16.mxu0 %vm2235_vm2, %v6400_v48  ;;  %13189 = vrcp.f32 %v5806_v40  ;;  %v6286_v48 = vsel %vm2235_vm2, %v16438_v3, -inf }
 0xf83   : > { %v13176_v49 = vpop.eup %13175  ;;  %v5809_v63 = vpop.xlane.xlu1 %5808 }
 0xf84   : > { %v13178_v34 = vpop.eup %13177  ;;  %v6401_v42 = vpack.c.bf16 %v13176_v49, %v13170_v35  ;;  %v5824_v37 = vpop.xlane.xlu0 %5823  ;;  %v6361_v25 = vsel %vm2235_vm2, %v13176_v49, 0.0  ;;  %13191 = vrcp.f32 %v5809_v63 }
 0xf85   : > { %6362 = vadd.xlane.f32.xlu1 %v6361_v25  ;;  %v6370_v26 = vsel %vm2235_vm2, %v13178_v34, 0.0  ;;  %13193 = vrcp.f32 %v5824_v37  ;;  %v6280_v25 = vsel %vm2235_vm2, %v16440_v59, -inf }
 0xf86   : > { %6371 = vadd.xlane.f32.xlu0 %v6370_v26  ;;  %12108 = vmatmul.mubr.msk.bf16.vlgmr.msra.gmra.mrb[172].mxu0 %vm2235_vm2, %v6401_v42 }
 0xf87   : > { %v13180_v15 = vpop.eup %13179  ;;  %v5827_v9 = vpop.xlane.xlu1 %5826 }
 0xf88   : > { %v13182_v30 = vpop.eup %13181  ;;  %v5818_v33 = vpop.xlane.xlu0 %5817  ;;  %v6364_v35 = vsel %vm2235_vm2, %v13180_v15, 0.0  ;;  %13195 = vrcp.f32 %v5827_v9 }
 0xf89   : > { %6356 = vadd.xlane.f32.xlu1 %v6355_v57  ;;  %v6403_v43 = vpack.c.bf16 %v13182_v30, %v13178_v34  ;;  %v13184_v18 = vpop.eup %13183  ;;  %13197 = vrcp.f32 %v5818_v33  ;;  %v6373_v40 = vsel %vm2235_vm2, %v13182_v30, 0.0  ;;  %v6283_v33 = vsel %vm2235_vm2, %v16446_v55, -inf }
 0xf8a   : > { %6365 = vadd.xlane.f32.xlu0 %v6364_v35  ;;  %v13186_v11 = vpop.eup %13185  ;;  %v16497_v49 = vmul.f32 %v13184_v18, %v16412_v61  ;;  %v6289_v57 = vsel %vm2235_vm2, %v16444_v12, -inf  ;;  %v6298_v18 = vsel %vm2235_vm2, %v16452_v20, -inf }
 0xf8b   : > { %v5821_v17 = vpop.xlane.xlu1 %5820  ;;  %v6402_v14 = vpack.c.bf16 %v13186_v11, %v13180_v15  ;;  %v13188_v52 = vpop.eup %13187  ;;  %v6367_v37 = vsel %vm2235_vm2, %v13186_v11, 0.0 }
 0xf8c   : > { %13199 = vrcp.f32 %v5821_v17  ;;  %v13190_v7 = vpop.eup %13189  ;;  %v16500_v34 = vmul.f32 %v13188_v52, %v16416_v24  ;;  %v6301_v52 = vsel %vm2235_vm2, %v16456_v50, -inf }
 0xf8d   : > { %6374 = vadd.xlane.f32.xlu1 %v6373_v40  ;;  %12111 = vmatprep.mubr.msk.bf16.mxu0 %vm2235_vm2, %v6402_v14  ;;  %v16509_v26 = vmul.f32 %v13190_v7, %v16414_v51  ;;  %v18934_v40 = vld [vmem:[#allocation12_spill] sm:$0xff]  ;;  %v18937_v7 = vld [vmem:[#allocation13_spill] sm:$0xff] }
 0xf8e   : > { %6287 = vmax.xlane.f32.xlu0 %v6286_v48  ;;  %12112 = vmatmul.mubr.msk.bf16.gmra.mrb[176].mxu0 %vm2235_vm2, %v6403_v43  ;;  %v13192_v42 = vpop.eup %13191  ;;  %v12446_v63 = vpack.i.bf16 %v16500_v34, %v16497_v49  ;;  %v2356_v14 = vsel %vm2235_vm2, %v18934_v40, 0.0  ;;  %v18936_v48 = vpack.i.bf16 %v16118_v54, %v16116_v46  ;;  %v18942_v46 = vpack.i.bf16 %v16144_v47, %v16141_v0 }
 0xf8f   : > { %v16512_v61 = vmul.f32 %v13192_v42, %v16418_v32  ;;  %v13194_v24 = vpop.eup %13193  ;;  %v2359_v42 = vsel %vm2235_vm2, %v18937_v7, 0.0  ;;  %v18945_v47 = vpack.i.bf16 %v16112_v31, %v16110_v36 }
 0xf90   : > { %v16521_v51 = vmul.f32 %v13194_v24, %v16420_v28  ;;  %v6292_v28 = vsel %vm2235_vm2, %v16454_v53, -inf  ;;  %v18939_v24 = vpack.i.bf16 %v16043_v38, %v16040_v21  ;;  %v18943_v21 = vpack.i.bf16 %v16166_v19, %v16163_v29  ;;  %v18944_v38 = vld [vmem:[#allocation11_spill] sm:$0xff] }
 0xf91   : > { %6368 = vadd.xlane.f32.xlu1 %v6367_v37  ;;  %v12441_v15 = vpack.i.bf16 %v16512_v61, %v16509_v26  ;;  %v18938_v37 = vld [vmem:[#allocation10_spill] sm:$0xff]  ;;  %v2365_v54 = vsel %vm2235_vm2, %v18944_v38, 0.0  ;;  %v18946_v19 = vld [vmem:[#allocation15_spill] sm:$0xff]  ;;  %v18998_v61 = vld [vmem:[#allocation161_spill] sm:$0xff] }
 0xf92   : > { %6281 = vmax.xlane.f32.xlu0 %v6280_v25  ;;  %v13196_v30 = vpop.eup %13195  ;;  %v2362_v25 = vsel %vm2235_vm2, %v18938_v37, 0.0 }
 0xf93   : > { %v13198_v9 = vpop.eup %13197  ;;  %v16524_v32 = vmul.f32 %v13196_v30, %v16424_v22 }
 0xf94   : > { %v16531_v11 = vmul.f32 %v13198_v9, %v16422_v23  ;;  %v6295_v23 = vsel %vm2235_vm2, %v16460_v39, -inf }
 0xf95   : > { %6284 = vmax.xlane.f32.xlu1 %v6283_v33  ;;  %v12516_v43 = vpack.i.bf16 %v16524_v32, %v16521_v51  ;;  %v2368_v33 = vsel %vm2235_vm2, %v18946_v19, 0.0 }
 0xf96   : > { %6290 = vmax.xlane.f32.xlu0 %v6289_v57  ;;  %v13200_v35 = vpop.eup %13199 }
 0xf97   : > { %v16534_v17 = vmul.f32 %v13200_v35, %v16426_v2  ;;  %v18935_v2 = vpack.i.bf16 %v16031_v62, %v16028_v6  ;;  %v18940_v6 = vpack.i.bf16 %v16080_v16, %v16077_v13  ;;  %v18941_v62 = vpack.i.bf16 %v16104_v10, %v16101_v4 }
 0xf98   : > { %v18947_v35 = vpack.i.bf16 %v16068_v1, %v16065_v5 }
 0xf99   : > { %6299 = vmax.xlane.f32.xlu1 %v6298_v18  ;;  %v12511_v22 = vpack.i.bf16 %v16534_v17, %v16531_v11 }
 0xf9a   : > { %6293 = vmax.xlane.f32.xlu0 %v6292_v28 }
 0xf9d   : > { %2357 = vadd.xlane.f32.xlu1 %v2356_v14  ;;  %v18948_v14 = vpack.i.bf16 %v16092_v60, %v16089_v45  ;;  %v18950_v60 = vpack.i.bf16 %v16156_v56, %v16153_v27 }
 0xfa1   : > { %6302 = vmax.xlane.f32.xlu1 %v6301_v52 }
 0xfa5   : > { %6296 = vmax.xlane.f32.xlu1 %v6295_v23 }
 0xfb0   : > { %12292 = vrot.lane.b32.xlu0 %v18935_v2, %s13340_s21 }
 0xfb6   : > { %12302 = vrot.lane.b32.xlu1 %v18936_v48, %s13341_s23 }
 0xfcf   : > { %2360 = vadd.xlane.f32.xlu0 %v2359_v42 }
 0xfda   : > { %2363 = vadd.xlane.f32.xlu1 %v2362_v25 }
 0xfe5   : > { %12297 = vrot.lane.b32.xlu0 %v18939_v24, %s13340_s21 }
 0xfeb   : > { %12317 = vrot.lane.b32.xlu1 %v18940_v6, %s13336_s28 }
 0xfef   : > { %12327 = vrot.lane.b32.xlu1 %v18941_v62, %s13339_s20 }
 0xff3   : > { %12337 = vrot.lane.b32.xlu1 %v18942_v46, %s13337_s29 }
 0xff7   : > { %12347 = vrot.lane.b32.xlu1 %v18943_v21, %s13338_s30  ;;  %v18952_v21 = vld [vmem:[#allocation27_spill] sm:$0xff] }
0x1004   : > { %2366 = vadd.xlane.f32.xlu0 %v2365_v54 }
0x100a   : > { %v16580_v13 = vpop.xlane.xlu0 %6359 }
0x100e   : > { %v16582_v16 = vpop.xlane.xlu0 %6353 }
0x1012   : > { %v16584_v4 = vpop.xlane.xlu1 %6362 }
0x1013   : > { %v16586_v10 = vpop.xlane.xlu0 %6371 }
0x1016   : > { %v16588_v30 = vpop.xlane.xlu1 %6356 }
0x1017   : > { %v16590_v0 = vpop.xlane.xlu0 %6365 }
0x101a   : > { %12307 = vrot.lane.b32.xlu0 %v18945_v47, %s13341_s23  ;;  %v16596_v29 = vpop.xlane.xlu1 %6374 }
0x101b   : > { %v6288_v9 = vpop.xlane.xlu0 %6287  ;;  %2369 = vadd.xlane.f32.xlu1 %v2368_v33 }
0x101c   : > { %v6314_v57 = vsub.f32 %v16438_v3, %v6288_v9 }
0x101e   : > { %12312 = vrot.lane.b32.xlu0 %v18947_v35, %s13336_s28  ;;  %v16605_v18 = vpop.xlane.xlu1 %6368  ;;  %v6340_v31 = vmul.f32 1.442695, %v6314_v57  ;;  %v18953_v57 = vld [vmem:[#allocation16_spill] sm:$0xff] }
0x101f   : > { %v6282_v28 = vpop.xlane.xlu0 %6281  ;;  %v2371_v35 = vsel %vm2235_vm2, %v18953_v57, 0.0  ;;  %v18959_v57 = vld [vmem:[#allocation29_spill] sm:$0xff] }
0x1020   : > { %v6312_v36 = vsub.f32 %v16440_v59, %v6282_v28  ;;  %13201 = vpow2.f32 %v6340_v31  ;;  %v18949_v59 = vpack.i.bf16 %v16128_v58, %v16125_v44  ;;  %v18951_v44 = vpack.i.bf16 %v16176_v41, %v16173_v8  ;;  %v12635_v31 = vld [vmem:[%s18413_s11] sm:$0xff]  }
0x1021   : > { %12131 = vmatprep.subr.bf16.mxu0 %v12635_v31 }
0x1022   : > { %v6336_v40 = vmul.f32 1.442695, %v6312_v36  ;;  %12322 = vrot.lane.b32.xlu0 %v18948_v14, %s13339_s20  ;;  %v6285_v52 = vpop.xlane.xlu1 %6284  ;;  %12132 = vmatpush3.bf16.msra.mxu0 %v12635_v31  ;;  %v18961_v31 = vld [vmem:[#allocation39_spill] sm:$0xff] }
0x1023   : > { %v6291_v23 = vpop.xlane.xlu0 %6290  ;;  %v6313_v3 = vsub.f32 %v16446_v55, %v6285_v52 }
0x1024   : > { %v6315_v2 = vsub.f32 %v16444_v12, %v6291_v23  ;;  %13203 = vpow2.f32 %v6336_v40 }
0x1025   : > { %v6338_v5 = vmul.f32 1.442695, %v6313_v3 }
0x1026   : > { %v6342_v1 = vmul.f32 1.442695, %v6315_v2  ;;  %12332 = vrot.lane.b32.xlu0 %v18949_v59, %s13337_s29  ;;  %v6300_v48 = vpop.xlane.xlu1 %6299 }
0x1027   : > { %13205 = vpow2.f32 %v6338_v5  ;;  %v6318_v45 = vsub.f32 %v16452_v20, %v6300_v48  ;;  %v6294_v12 = vpop.xlane.xlu0 %6293  ;;  %v18954_v48 = vld [vmem:[#allocation128_spill] sm:$0xff] }
0x1028   : > { %13207 = vpow2.f32 %v6342_v1  ;;  %v6316_v7 = vsub.f32 %v16454_v53, %v6294_v12 }
0x1029   : > { %v6348_v42 = vmul.f32 1.442695, %v6318_v45 }
0x102a   : > { %12342 = vrot.lane.b32.xlu0 %v18950_v60, %s13338_s30  ;;  %v2358_v55 = vpop.xlane.xlu1 %2357  ;;  %v13202_v37 = vpop.eup %13201  ;;  %v6344_v6 = vmul.f32 1.442695, %v6316_v7  ;;  %v18955_v60 = vld [vmem:[#allocation3_spill] sm:$0xff] }
0x102b   : > { %13209 = vrcp.f32 %v2358_v55  ;;  %v6382_v28 = vsel %vm2235_vm2, %v13202_v37, 0.0 }
0x102c   : > { %13211 = vpow2.f32 %v6348_v42 }
0x102e   : > { %12352 = vrot.lane.b32.xlu0 %v18951_v44, %s13340_s21  ;;  %v6303_v58 = vpop.xlane.xlu1 %6302  ;;  %v13204_v25 = vpop.eup %13203 }
0x102f   : > { %v6319_v20 = vsub.f32 %v16456_v50, %v6303_v58  ;;  %v6376_v36 = vsel %vm2235_vm2, %v13204_v25, 0.0 }
0x1031   : > { %v16629_v24 = vpop.eup %13205  ;;  %v6350_v27 = vmul.f32 1.442695, %v6319_v20 }
0x1032   : > { %v16631_v56 = vpop.eup %13207  ;;  %v6297_v62 = vpop.xlane.xlu1 %6296  ;;  %v6404_v53 = vpack.c.bf16 %v16629_v24, %v13204_v25 }
0x1033   : > { %v6405_v46 = vpack.c.bf16 %v16631_v56, %v13202_v37  ;;  %13213 = vpow2.f32 %v6350_v27  ;;  %v6317_v8 = vsub.f32 %v16460_v39, %v6297_v62 }
0x1034   : > { %12123 = vmatprep.mubr.msk.bf16.mxu1 %vm2235_vm2, %v6404_v53  ;;  %13215 = vpow2.f32 %v6344_v6 }
0x1035   : > { %v6346_v41 = vmul.f32 1.442695, %v6317_v8  ;;  %12124 = vmatmul.mubr.msk.bf16.vlgmr.msra.gmra.mrb[196].mxu1 %vm2235_vm2, %v6405_v46  ;;  %v13210_v50 = vpop.eup %13209 }
0x1036   : > { %v16639_v38 = vmul.f32 %v13210_v50, %v18952_v21  ;;  %v16641_v54 = vpop.eup %13211  ;;  %v16678_v7 = vpop.permute.xlu1 %12302  ;;  %v18956_v21 = vld [vmem:[#allocation42_spill] sm:$0xff] }
0x1037   : > { %13217 = vpow2.f32 %v6346_v41 }
0x1038   : > { %13219 = vrcp.f32 %v16580_v13  ;;  %v16667_v13 = vpop.permute.xlu0 %12292 }
0x1039   : > { %13221 = vrcp.f32 %v16582_v16 }
0x103a   : > { %13223 = vrcp.f32 %v16584_v4 }
0x103b   : > { %13225 = vrcp.f32 %v16588_v30  ;;  %v12636_v30 = vld [vmem:[%s18413_s11 + $0x8] sm:$0xff]  }
0x103c   : > { %13227 = vrcp.f32 %v16586_v10  ;;  %12133 = vmatprep.subr.bf16.mxu0 %v12636_v30 }
0x103d   : > { %v16643_v47 = vpop.eup %13213  ;;  %13229 = vrcp.f32 %v16590_v0  ;;  %12134 = vmatpush3.bf16.msra.mxu0 %v12636_v30  ;;  %v18963_v30 = vld [vmem:[#allocation22_spill] sm:$0xff] }
0x103e   : > { %v6407_v19 = vpack.c.bf16 %v16643_v47, %v16641_v54  ;;  %v16647_v33 = vpop.eup %13215  ;;  %13231 = vrcp.f32 %v16596_v29 }
0x103f   : > { %13233 = vrcp.f32 %v16605_v18 }
0x1041   : > { %v16649_v39 = vpop.eup %13217 }
0x1042   : > { %v6406_v9 = vpack.c.bf16 %v16649_v39, %v16647_v33  ;;  %v13220_v16 = vpop.eup %13219 }
0x1043   : > { %v13222_v40 = vpop.eup %13221 }
0x1044   : > { %12127 = vmatprep.mubr.msk.bf16.mxu1 %vm2235_vm2, %v6406_v9  ;;  %v13224_v52 = vpop.eup %13223 }
0x1045   : > { %12128 = vmatmul.mubr.msk.bf16.gmra.mrb[200].mxu1 %vm2235_vm2, %v6407_v19  ;;  %v13226_v10 = vpop.eup %13225  ;;  %v18957_v19 = vld [vmem:[#allocation95_spill] sm:$0xff] }
0x1046   : > { %v13228_v18 = vpop.eup %13227  ;;  %v18958_v9 = vpack.i.bf16 %v18956_v21, %v18957_v19  ;;  %v6394_v21 = vsel %vm2235_vm2, %v16641_v54, 0.0  ;;  %v6385_v19 = vsel %vm2235_vm2, %v16631_v56, 0.0  ;;  %v18969_v54 = vld [vmem:[#allocation44_spill] sm:$0xff]  ;;  %v18970_v56 = vld [vmem:[#allocation65_spill] sm:$0xff] }
0x1047   : > { %v13230_v12 = vpop.eup %13229 }
0x1048   : > { %v13232_v44 = vpop.eup %13231 }
0x1049   : > { %v13234_v37 = vpop.eup %13233 }
0x104d   : > { %2372 = vadd.xlane.f32.xlu0 %v2371_v35 }
0x1051   : > { %6383 = vadd.xlane.f32.xlu0 %v6382_v28 }
0x1055   : > { %6377 = vadd.xlane.f32.xlu0 %v6376_v36  ;;  %v18960_v36 = vld [vmem:[#allocation62_spill] sm:$0xff] }
0x1059   : > { %v12109_v4 = vpop.f32.mrb[172].mxu0 }
0x105a   : > { %v6466_v14 = vpop.f32.mrb[173].mxu0  ;;  %v6604_v3 = vmul.f32 %v13220_v16, %v12109_v4  ;;  %v18962_v16 = vpack.i.bf16 %v18960_v36, %v18961_v31  ;;  %v18968_v31 = vld [vmem:[#allocation28_spill] sm:$0xff] }
0x105b   : > { %v12110_v23 = vpop.f32.mrb[174].mxu0  ;;  %v6602_v0 = vmul.f32 %v13222_v40, %v6466_v14  ;;  %v18964_v14 = vld [vmem:[#allocation24_spill] sm:$0xff] }
0x105c   : > { %v6605_v2 = vmul.f32 %v13224_v52, %v12110_v23  ;;  %v2361_v5 = vpop.xlane.xlu0 %2360  ;;  %v6469_v1 = vpop.f32.mrb[175].mxu0 }
0x105d   : > { %13235 = vrcp.f32 %v2361_v5  ;;  %v6603_v59 = vmul.f32 %v13226_v10, %v6469_v1 }
0x105e   : > { %13237 = vrcp.f32 %v18954_v48  ;;  %v12356_v45 = vpack.i.bf16 %v6605_v2, %v6604_v3 }
0x105f   : > { %13239 = vrcp.f32 %v18955_v60  ;;  %v12361_v29 = vpack.i.bf16 %v6603_v59, %v6602_v0 }
0x1060   : > { %12357 = vrot.lane.b32.xlu1 %v12356_v45, %s13342_s27 }
0x1061   : > { %v12113_v55 = vpop.f32.mrb[176].mxu0 }
0x1062   : > { %v6482_v42 = vpop.f32.mrb[177].mxu0  ;;  %v16681_v20 = vmul.f32 %v13228_v18, %v12113_v55 }
0x1063   : > { %v12114_v58 = vpop.f32.mrb[178].mxu0  ;;  %v6606_v6 = vmul.f32 %v13230_v12, %v6482_v42 }
0x1064   : > { %12362 = vrot.lane.b32.xlu1 %v12361_v29, %s13342_s27  ;;  %v6609_v25 = vmul.f32 %v13232_v44, %v12114_v58  ;;  %v6485_v27 = vpop.f32.mrb[179].mxu0  ;;  %v18965_v29 = vld [vmem:[#allocation26_spill] sm:$0xff] }
0x1065   : > { %v6607_v62 = vmul.f32 %v13234_v37, %v6485_v27 }
0x1066   : > { %v12386_v46 = vpack.i.bf16 %v6609_v25, %v16681_v20 }
0x1067   : > { %v13236_v53 = vpop.eup %13235  ;;  %v2364_v8 = vpop.xlane.xlu1 %2363  ;;  %v12381_v50 = vpack.i.bf16 %v6607_v62, %v6606_v6  ;;  %v18966_v6 = vld [vmem:[#allocation17_spill] sm:$0xff] }
0x1068   : > { %v13238_v41 = vpop.eup %13237  ;;  %13241 = vrcp.f32 %v2364_v8  ;;  %12372 = vrot.lane.b32.xlu1 %v18958_v9, %s13341_s23  ;;  %v16689_v35 = vmul.f32 %v13236_v53, %v18959_v57  ;;  %v2377_v62 = vsel %vm2235_vm2, %v18966_v6, 0.0  ;;  %v18967_v53 = vld [vmem:[#allocation14_spill] sm:$0xff]  ;;  %v6388_v57 = vsel %vm2235_vm2, %v16647_v33, 0.0 }
0x1069   : > { %v13240_v28 = vpop.eup %13239  ;;  %v2596_v40 = vmul.f32 %v13238_v41, %v18963_v30  ;;  %v2374_v8 = vsel %vm2235_vm2, %v18967_v53, 0.0  ;;  %v16716_v41 = vpop.permute.xlu0 %12297  ;;  %v18972_v33 = vld [vmem:[#allocation38_spill] sm:$0xff]  ;;  %v18993_v53 = vld [vmem:[#allocation121_spill] sm:$0xff] }
0x106a   : > { %v2597_v52 = vmul.f32 %v13240_v28, %v18964_v14  ;;  %v6379_v28 = vsel %vm2235_vm2, %v16629_v24, 0.0  ;;  %v18975_v14 = vld [vmem:[#allocation61_spill] sm:$0xff] }
0x106b   : > { %12367 = vrot.lane.b32.xlu0 %v18962_v16, %s13340_s21  ;;  %v12318_v4 = vpop.permute.xlu1 %12317 }
0x106c   : > { %v12320_v23 = vunpack.i.h.bf16 %v12318_v4  ;;  %v12319_v10 = vunpack.i.l.bf16 %v12318_v4  ;;  %v18971_v4 = vpack.i.bf16 %v18969_v54, %v18970_v56  ;;  %v18999_v56 = vld [vmem:[#allocation124_spill] sm:$0xff] }
0x106e   : > { %v7073_v3 = vsel %vm2056_vm1, %v2597_v52, %v12320_v23  ;;  %v7072_v2 = vsel %vm2056_vm1, %v2596_v40, %v12319_v10  ;;  %v18973_v40 = vld [vmem:[#allocation63_spill] sm:$0xff]  ;;  %v18978_v10 = vld [vmem:[#allocation89_spill] sm:$0xff] }
0x106f   : > { %v12328_v5 = vpop.permute.xlu1 %12327  ;;  %v18974_v24 = vpack.i.bf16 %v18972_v33, %v18973_v40  ;;  %v18976_v52 = vld [vmem:[#allocation91_spill] sm:$0xff] }
0x1070   : > { %v12330_v1 = vunpack.i.h.bf16 %v12328_v5  ;;  %v12329_v0 = vunpack.i.l.bf16 %v12328_v5  ;;  %v18977_v23 = vpack.i.bf16 %v18975_v14, %v18976_v52  ;;  %v18981_v5 = vld [vmem:[#allocation31_spill] sm:$0xff]  ;;  %v19003_v52 = vld [vmem:[#allocation76_spill] sm:$0xff] }
0x1072   : > { %v13242_v59 = vpop.eup %13241  ;;  %v7089_v48 = vsel %vm7082_vm3, %v7072_v2, %v12329_v0  ;;  %v7090_v45 = vsel %vm7082_vm3, %v7073_v3, %v12330_v1  ;;  %v18979_v3 = vld [vmem:[#allocation119_spill] sm:$0xff] }
0x1073   : > { %v12338_v60 = vpop.permute.xlu1 %12337  ;;  %v16702_v18 = vmul.f32 %v13242_v59, %v18965_v29  ;;  %v18980_v2 = vpack.i.bf16 %v18978_v10, %v18979_v3  ;;  %v18983_v59 = vld [vmem:[#allocation43_spill] sm:$0xff]  ;;  %v12260_v3 = vunpack.i.h.bf16 %v19003_v52 }
0x1074   : > { %v12340_v55 = vunpack.i.h.bf16 %v12338_v60  ;;  %v12339_v12 = vunpack.i.l.bf16 %v12338_v60  ;;  %v18986_v60 = vld [vmem:[#allocation100_spill] sm:$0xff]  ;;  %v18987_v29 = vld [vmem:[#allocation159_spill] sm:$0xff] }
0x1076   : > { %v7106_v42 = vsel %vm7099_vm4, %v7089_v48, %v12339_v12  ;;  %v7107_v44 = vsel %vm7099_vm4, %v7090_v45, %v12340_v55  ;;  %v18984_v48 = vld [vmem:[#allocation120_spill] sm:$0xff]  ;;  %v18989_v12 = vld [vmem:[#allocation93_spill] sm:$0xff] }
0x1077   : > { %v12348_v58 = vpop.permute.xlu1 %12347  ;;  %v18985_v45 = vpack.i.bf16 %v18983_v59, %v18984_v48  ;;  %v18988_v55 = vld [vmem:[#allocation68_spill] sm:$0xff]  ;;  %v19006_v48 = vld [vmem:[#allocation2_spill] sm:$0xff] }
0x1078   : > { %v12350_v37 = vunpack.i.h.bf16 %v12348_v58  ;;  %v12349_v20 = vunpack.i.l.bf16 %v12348_v58 }
0x107a   : > { %v16707_v25 = vsel %vm7116_vm5, %v7106_v42, %v12349_v20  ;;  %v16710_v27 = vsel %vm7116_vm5, %v7107_v44, %v12350_v37  ;;  %v18990_v42 = vpack.i.bf16 %v18988_v55, %v18989_v12  ;;  %v18991_v44 = vld [vmem:[#allocation97_spill] sm:$0xff] }
0x107b   : > { %v19007_v55 = vld [vmem:[#allocation145_spill] sm:$0xff] }
0x107c   : > { %v12279_v12 = vunpack.i.l.bf16 %v19007_v55 }
0x108a   : > { %2378 = vadd.xlane.f32.xlu0 %v2377_v62  ;;  %v18992_v62 = vld [vmem:[#allocation96_spill] sm:$0xff] }
0x108c   : > { %2375 = vadd.xlane.f32.xlu1 %v2374_v8  ;;  %v18994_v8 = vpack.i.bf16 %v18992_v62, %v18993_v53  ;;  %v19009_v62 = vld [vmem:[#allocation122_spill] sm:$0xff] }
0x108d   : > { %v19010_v53 = vld [vmem:[#allocation46_spill] sm:$0xff] }
0x108e   : > { %6395 = vadd.xlane.f32.xlu0 %v6394_v21  ;;  %v18995_v21 = vld [vmem:[#allocation73_spill] sm:$0xff] }
0x108f   : > { %v12255_v26 = vunpack.i.h.bf16 %v18995_v21 }
0x1090   : > { %6386 = vadd.xlane.f32.xlu1 %v6385_v19  ;;  %v12254_v19 = vunpack.i.l.bf16 %v18995_v21  ;;  %v6397_v21 = vsel %vm2235_vm2, %v16643_v47, 0.0 }
0x1091   : > { %v2367_v9 = vpop.xlane.xlu0 %2366 }
0x1092   : > { %13243 = vrcp.f32 %v2367_v9  ;;  %6389 = vadd.xlane.f32.xlu0 %v6388_v57  ;;  %v18996_v9 = vld [vmem:[#allocation21_spill] sm:$0xff] }
0x1094   : > { %6380 = vadd.xlane.f32.xlu1 %v6379_v28 }
0x1095   : > { %v16751_v0 = vpop.permute.xlu0 %12307 }
0x1099   : > { %v16764_v58 = vpop.permute.xlu0 %12312 }
0x109c   : > { %v13244_v36 = vpop.eup %13243 }
0x109d   : > { %v16727_v16 = vmul.f32 %v13244_v36, %v18968_v31  ;;  %v16770_v6 = vpop.permute.xlu0 %12322  ;;  %v18997_v31 = vld [vmem:[#allocation19_spill] sm:$0xff] }
0x10a1   : > { %v16793_v59 = vpop.permute.xlu0 %12332 }
0x10a5   : > { %12382 = vrot.lane.b32.xlu1 %v12381_v50, %s13342_s27 }
0x10a8   : > { %12377 = vrot.lane.b32.xlu0 %v18971_v4, %s13341_s23  ;;  %v2370_v30 = vpop.xlane.xlu1 %2369  ;;  %v19000_v4 = vld [vmem:[#allocation94_spill] sm:$0xff] }
0x10a9   : > { %13245 = vrcp.f32 %v2370_v30  ;;  %12387 = vrot.lane.b32.xlu1 %v12386_v46, %s13342_s27  ;;  %v18982_v46 = vld [vmem:[#allocation127_spill] sm:$0xff]  ;;  %v19001_v30 = vpack.i.bf16 %v18999_v56, %v19000_v4  ;;  %v12300_v56 = vunpack.i.h.bf16 %v16716_v41  ;;  %v12299_v4 = vunpack.i.l.bf16 %v16716_v41 }
0x10aa   : > { %13247 = vrcp.f32 %v18982_v46  ;;  %v12295_v41 = vunpack.i.h.bf16 %v16667_v13 }
0x10ab   : > { %13249 = vrcp.f32 %v18986_v60 }
0x10ac   : > { %12392 = vrot.lane.b32.xlu0 %v18974_v24, %s13336_s28  ;;  %13251 = vrcp.f32 %v18987_v29  ;;  %v19002_v24 = vld [vmem:[#allocation18_spill] sm:$0xff] }
0x10ad   : > { %13253 = vrcp.f32 %v18991_v44  ;;  %v19008_v44 = vld [vmem:[#allocation102_spill] sm:$0xff] }
0x10b0   : > { %12402 = vrot.lane.b32.xlu0 %v18977_v23, %s13339_s20  ;;  %v12259_v23 = vunpack.i.l.bf16 %v19003_v52 }
0x10b3   : > { %v13246_v50 = vpop.eup %13245 }
0x10b4   : > { %12412 = vrot.lane.b32.xlu0 %v18980_v2, %s13337_s29  ;;  %v16748_v1 = vmul.f32 %v13246_v50, %v18981_v5  ;;  %v13248_v37 = vpop.eup %13247  ;;  %v19004_v50 = vld [vmem:[#allocation20_spill] sm:$0xff]  ;;  %v12264_v2 = vunpack.i.l.bf16 %v18998_v61  ;;  %v19005_v5 = vld [vmem:[#allocation75_spill] sm:$0xff] }
0x10b5   : > { %v13250_v20 = vpop.eup %13249  ;;  %v2591_v57 = vmul.f32 %v13248_v37, %v18996_v9  ;;  %v12269_v46 = vunpack.i.l.bf16 %v19005_v5  ;;  %v12270_v29 = vunpack.i.h.bf16 %v19005_v5  ;;  %v12285_v37 = vunpack.i.h.bf16 %v19008_v44 }
0x10b6   : > { %v13252_v28 = vpop.eup %13251  ;;  %v2590_v54 = vmul.f32 %v13250_v20, %v18997_v31  ;;  %v12280_v20 = vunpack.i.h.bf16 %v19007_v55 }
0x10b7   : > { %v13254_v36 = vpop.eup %13253  ;;  %v7067_v40 = vsel %vm2056_vm1, %v2591_v57, %v12255_v26  ;;  %v2592_v14 = vmul.f32 %v13252_v28, %v19002_v24  ;;  %v19012_v57 = vld [vmem:[#allocation104_spill] sm:$0xff]  ;;  %v12309_v24 = vunpack.i.l.bf16 %v16751_v0 }
0x10b8   : > { %12422 = vrot.lane.b32.xlu0 %v18985_v45, %s13338_s30  ;;  %v7066_v33 = vsel %vm2056_vm1, %v2590_v54, %v12254_v19  ;;  %v2593_v10 = vmul.f32 %v13254_v36, %v19004_v50  ;;  %v12275_v45 = vunpack.i.h.bf16 %v19006_v48  ;;  %v12284_v19 = vunpack.i.l.bf16 %v19008_v44 }
0x10b9   : > { %v7068_v9 = vsel %vm2056_vm1, %v2592_v14, %v12259_v23  ;;  %v12290_v28 = vunpack.i.h.bf16 %v19012_v57  ;;  %v12289_v36 = vunpack.i.l.bf16 %v19012_v57  ;;  %v7083_v26 = vsel %vm7082_vm3, %v7066_v33, %v12264_v2  ;;  %v16823_v14 = vpop.permute.xlu0 %12342 }
0x10ba   : > { %v7069_v31 = vsel %vm2056_vm1, %v2593_v10, %v12260_v3  ;;  %v6391_v33 = vsel %vm2235_vm2, %v16649_v39, 0.0  ;;  %v12294_v10 = vunpack.i.l.bf16 %v16667_v13 }
0x10bc   : > { %12432 = vrot.lane.b32.xlu0 %v18990_v42, %s13340_s21  ;;  %v12274_v42 = vunpack.i.l.bf16 %v19006_v48  ;;  %v12304_v48 = vunpack.i.l.bf16 %v16678_v7 }
0x10be   : > { %v7100_v52 = vsel %vm7099_vm4, %v7083_v26, %v12274_v42  ;;  %v16842_v42 = vpop.permute.xlu0 %12352 }
0x10bf   : > { %v7117_v55 = vsel %vm7116_vm5, %v7100_v52, %v12284_v19  ;;  %v19024_v52 = vld [vmem:[#allocation41_spill] sm:$0xff] }
0x10c0   : > { %12442 = vrot.lane.b32.xlu0 %v12441_v15, %s13341_s23  ;;  %v12265_v15 = vunpack.i.h.bf16 %v18998_v61  ;;  %v7085_v61 = vsel %vm7082_vm3, %v7068_v9, %v12269_v46  ;;  %v12305_v46 = vunpack.i.h.bf16 %v16678_v7 }
0x10c1   : > { %v7102_v47 = vsel %vm7099_vm4, %v7085_v61, %v12279_v12  ;;  %v19016_v61 = vld [vmem:[#allocation64_spill] sm:$0xff] }
0x10c2   : > { %v7084_v60 = vsel %vm7082_vm3, %v7067_v40, %v12265_v15  ;;  %v7086_v15 = vsel %vm7082_vm3, %v7069_v31, %v12270_v29  ;;  %v12310_v40 = vunpack.i.h.bf16 %v16751_v0  ;;  %v7119_v23 = vsel %vm7116_vm5, %v7102_v47, %v12289_v36  ;;  %v19013_v36 = vld [vmem:[#allocation40_spill] sm:$0xff]  ;;  %v19014_v31 = vld [vmem:[#allocation90_spill] sm:$0xff] }
0x10c3   : > { %v7101_v54 = vsel %vm7099_vm4, %v7084_v60, %v12275_v45  ;;  %v7136_v3 = vsel %vm7133_vm6, %v7119_v23, %v12299_v4 }
0x10c4   : > { %12452 = vrot.lane.b32.xlu0 %v18994_v8, %s13336_s28  ;;  %v19011_v8 = vpack.i.bf16 %v19009_v62, %v19010_v53  ;;  %v7153_v45 = vsel %vm7150_vm7, %v7136_v3, %v12309_v24  ;;  %v7118_v12 = vsel %vm7116_vm5, %v7101_v54, %v12285_v37  ;;  %v7134_v62 = vsel %vm7133_vm6, %v7117_v55, %v12294_v10  ;;  %v19030_v3 = vld [vmem:[#allocation35_spill] sm:$0xff] }
0x10c5   : > { %v7135_v7 = vsel %vm7133_vm6, %v7118_v12, %v12295_v41  ;;  %v19015_v54 = vpack.i.bf16 %v19013_v36, %v19014_v31  ;;  %v19027_v41 = vld [vmem:[#allocation123_spill] sm:$0xff]  ;;  %v19038_v12 = vld [vmem:[#allocation74_spill] sm:$0xff]  ;;  %v12315_v36 = vunpack.i.h.bf16 %v16764_v58  ;;  %v12314_v31 = vunpack.i.l.bf16 %v16764_v58 }
0x10c6   : > { %v7152_v9 = vsel %vm7150_vm7, %v7135_v7, %v12305_v46 }
0x10c8   : > { %12462 = vrot.lane.b32.xlu0 %v19001_v30, %s13339_s20  ;;  %v7103_v30 = vsel %vm7099_vm4, %v7086_v15, %v12280_v20  ;;  %v19017_v15 = vld [vmem:[#allocation118_spill] sm:$0xff] }
0x10c9   : > { %v7120_v50 = vsel %vm7116_vm5, %v7103_v30, %v12290_v28  ;;  %v19018_v47 = vpack.i.bf16 %v19016_v61, %v19017_v15  ;;  %v19020_v30 = vld [vmem:[#allocation117_spill] sm:$0xff]  ;;  %v12324_v61 = vunpack.i.l.bf16 %v16770_v6 }
0x10ca   : > { %v7137_v2 = vsel %vm7133_vm6, %v7120_v50, %v12300_v56  ;;  %v19019_v56 = vld [vmem:[#allocation33_spill] sm:$0xff]  ;;  %v19026_v50 = vld [vmem:[#allocation66_spill] sm:$0xff] }
0x10cb   : > { %v7154_v60 = vsel %vm7150_vm7, %v7137_v2, %v12310_v40  ;;  %v19021_v40 = vld [vmem:[#allocation92_spill] sm:$0xff]  ;;  %v19028_v10 = vpack.i.bf16 %v19026_v50, %v19027_v41  ;;  %v12344_v50 = vunpack.i.l.bf16 %v16823_v14 }
0x10cc   : > { %12472 = vrot.lane.b32.xlu0 %v19011_v8, %s13337_s29  ;;  %v19022_v24 = vpack.i.bf16 %v19020_v30, %v19021_v40  ;;  %v12325_v30 = vunpack.i.h.bf16 %v16770_v6  ;;  %v12334_v40 = vunpack.i.l.bf16 %v16793_v59  ;;  %v12354_v6 = vunpack.i.l.bf16 %v16842_v42 }
0x10cd   : > { %6398 = vadd.xlane.f32.xlu1 %v6397_v21  ;;  %v7151_v21 = vsel %vm7150_vm7, %v7134_v62, %v12304_v48  ;;  %v19035_v48 = vld [vmem:[#allocation70_spill] sm:$0xff] }
0x10d1   : > { %6392 = vadd.xlane.f32.xlu1 %v6391_v33  ;;  %v19023_v33 = vld [vmem:[#allocation67_spill] sm:$0xff] }
0x10d2   : > { %v12358_v0 = vpop.permute.xlu1 %12357  ;;  %v19025_v23 = vpack.i.bf16 %v19023_v33, %v19024_v52 }
0x10d3   : > { %v12360_v39 = vunpack.i.h.bf16 %v12358_v0  ;;  %v12359_v5 = vunpack.i.l.bf16 %v12358_v0  ;;  %v19029_v0 = vld [vmem:[#allocation37_spill] sm:$0xff] }
0x10d4   : > { %v19031_v2 = vpack.i.bf16 %v19029_v0, %v19030_v3 }
0x10d5   : > { %v7170_v29 = vsel %vm7167_vm8, %v7153_v45, %v12359_v5  ;;  %v7171_v13 = vsel %vm7167_vm8, %v7154_v60, %v12360_v39  ;;  %v19032_v39 = vld [vmem:[#allocation36_spill] sm:$0xff]  ;;  %v19033_v5 = vld [vmem:[#allocation34_spill] sm:$0xff]  ;;  %v19036_v45 = vld [vmem:[#allocation47_spill] sm:$0xff] }
0x10d6   : > { %v7185_v44 = vpack.c.bf16 %v7171_v13, %v7170_v29  ;;  %v12363_v20 = vpop.permute.xlu1 %12362  ;;  %v19034_v46 = vpack.i.bf16 %v19032_v39, %v19033_v5  ;;  %v19037_v60 = vpack.i.bf16 %v19035_v48, %v19036_v45 }
0x10d7   : > { %v12365_v53 = vunpack.i.h.bf16 %v12363_v20  ;;  %v12364_v8 = vunpack.i.l.bf16 %v12363_v20 }
0x10d9   : > { %v7168_v57 = vsel %vm7167_vm8, %v7151_v21, %v12364_v8  ;;  %v7169_v19 = vsel %vm7167_vm8, %v7152_v9, %v12365_v53 }
0x10da   : > { %v7184_v28 = vpack.c.bf16 %v7169_v19, %v7168_v57  ;;  %v2373_v37 = vpop.xlane.xlu0 %2372  ;;  %v12373_v62 = vpop.permute.xlu1 %12372 }
0x10db   : > { %13255 = vrcp.f32 %v2373_v37  ;;  %v12375_v5 = vunpack.i.h.bf16 %v12373_v62 }
0x10dc   : > { %12135 = vmatprep.mubr.msk.bf16.mxu0 %vm972_vm0, %v7184_v28  ;;  %13257 = vrcp.f32 %v19038_v12 }
0x10dd   : > { %12136 = vmatmul.mubr.msk.bf16.vlgmr.msra.gmra.mrb[180].mxu0 %vm972_vm0, %v7185_v44  ;;  %v19039_v44 = vld [vmem:[#allocation125_spill] sm:$0xff] }
0x10de   : > { %v6384_v29 = vpop.xlane.xlu0 %6383  ;;  %13259 = vrcp.f32 %v19039_v44 }
0x10e2   : > { %12397 = vrot.lane.b32.xlu1 %v19015_v54, %s13336_s28  ;;  %v6378_v55 = vpop.xlane.xlu0 %6377  ;;  %v19040_v54 = vld [vmem:[#allocation23_spill] sm:$0xff] }
0x10e5   : > { %v13256_v26 = vpop.eup %13255 }
0x10e6   : > { %12407 = vrot.lane.b32.xlu1 %v19018_v47, %s13339_s20  ;;  %v16861_v4 = vmul.f32 %v13256_v26, %v19019_v56  ;;  %v16901_v20 = vpop.permute.xlu0 %12367  ;;  %v13258_v9 = vpop.eup %13257  ;;  %v19041_v47 = vld [vmem:[#allocation25_spill] sm:$0xff] }
0x10e7   : > { %v2594_v26 = vmul.f32 %v13258_v9, %v19040_v54  ;;  %v12370_v9 = vunpack.i.h.bf16 %v16901_v20 }
0x10e8   : > { %v13260_v19 = vpop.eup %13259 }
0x10e9   : > { %v2595_v56 = vmul.f32 %v13260_v19, %v19041_v47  ;;  %v7070_v58 = vsel %vm2056_vm1, %v2594_v26, %v12314_v31 }
0x10ea   : > { %12417 = vrot.lane.b32.xlu1 %v19022_v24, %s13337_s29  ;;  %v12335_v24 = vunpack.i.h.bf16 %v16793_v59  ;;  %v7087_v41 = vsel %vm7082_vm3, %v7070_v58, %v12324_v61 }
0x10eb   : > { %v7071_v52 = vsel %vm2056_vm1, %v2595_v56, %v12315_v36 }
0x10ec   : > { %v7088_v59 = vsel %vm7082_vm3, %v7071_v52, %v12325_v30 }
0x10ed   : > { %v7105_v39 = vsel %vm7099_vm4, %v7088_v59, %v12335_v24 }
0x10ee   : > { %12427 = vrot.lane.b32.xlu1 %v19025_v23, %s13338_s30  ;;  %v12345_v23 = vunpack.i.h.bf16 %v16823_v14  ;;  %v19042_v14 = vld [vmem:[#allocation32_spill] sm:$0xff] }
0x10f2   : > { %12437 = vrot.lane.b32.xlu1 %v19028_v10, %s13340_s21  ;;  %v12355_v10 = vunpack.i.h.bf16 %v16842_v42  ;;  %v7122_v42 = vsel %vm7116_vm5, %v7105_v39, %v12345_v23 }
0x10f4   : > { %v7139_v12 = vsel %vm7133_vm6, %v7122_v42, %v12355_v10 }
0x10f5   : > { %v7156_v54 = vsel %vm7150_vm7, %v7139_v12, %v12375_v5 }
0x10f6   : > { %12447 = vrot.lane.b32.xlu1 %v12446_v63, %s13341_s23 }
0x10fa   : > { %12457 = vrot.lane.b32.xlu1 %v19031_v2, %s13336_s28  ;;  %v7104_v2 = vsel %vm7099_vm4, %v7087_v41, %v12334_v40 }
0x10fe   : > { %12467 = vrot.lane.b32.xlu1 %v19034_v46, %s13339_s20  ;;  %v12374_v46 = vunpack.i.l.bf16 %v12373_v62  ;;  %v12369_v62 = vunpack.i.l.bf16 %v16901_v20 }
0x1100   : > { %v7140_v23 = vsel %vm7133_vm6, %v16707_v25, %v12369_v62  ;;  %v19053_v62 = vld [vmem:[#allocation69_spill] sm:$0xff] }
0x1102   : > { %12477 = vrot.lane.b32.xlu1 %v19037_v60, %s13337_s29 }
0x1108   : > { %v16891_v13 = vpop.f32.mrb[196].mxu1 }
0x1109   : > { %v16893_v49 = vpop.f32.mrb[197].mxu1 }
0x110a   : > { %v16895_v34 = vpop.f32.mrb[198].mxu1 }
0x110b   : > { %v16897_v63 = vpop.f32.mrb[199].mxu1 }
0x1117   : > { %v2379_v7 = vpop.xlane.xlu0 %2378 }
0x1118   : > { %13261 = vrcp.f32 %v2379_v7  ;;  %v16903_v53 = vpop.f32.mrb[200].mxu1  ;;  %v19043_v7 = vld [vmem:[#allocation30_spill] sm:$0xff] }
0x1119   : > { %v16905_v8 = vpop.f32.mrb[201].mxu1  ;;  %v2376_v21 = vpop.xlane.xlu1 %2375 }
0x111a   : > { %13263 = vrcp.f32 %v2376_v21  ;;  %v16907_v57 = vpop.f32.mrb[202].mxu1 }
0x111b   : > { %v16909_v28 = vpop.xlane.xlu0 %6395  ;;  %v16911_v37 = vpop.f32.mrb[203].mxu1  ;;  %13265 = vrcp.f32 %v6384_v29  ;;  %v7121_v29 = vsel %vm7116_vm5, %v7104_v2, %v12344_v50  ;;  %v7141_v50 = vsel %vm7133_vm6, %v16710_v27, %v12370_v9 }
0x111d   : > { %v6387_v15 = vpop.xlane.xlu1 %6386 }
0x111e   : > { %13267 = vrcp.f32 %v6387_v15 }
0x111f   : > { %v16921_v33 = vpop.xlane.xlu0 %6389  ;;  %13269 = vrcp.f32 %v6378_v55  ;;  %v7138_v55 = vsel %vm7133_vm6, %v7121_v29, %v12354_v6 }
0x1120   : > { %v7155_v26 = vsel %vm7150_vm7, %v7138_v55, %v12374_v46  ;;  %v19048_v55 = vld [vmem:[#allocation126_spill] sm:$0xff] }
0x1121   : > { %v6381_v0 = vpop.xlane.xlu1 %6380 }
0x1122   : > { %v13262_v3 = vpop.eup %13261  ;;  %13271 = vrcp.f32 %v6381_v0 }
0x1123   : > { %v12378_v48 = vpop.permute.xlu0 %12377  ;;  %v16934_v45 = vmul.f32 %v13262_v3, %v19042_v14  ;;  %v19044_v14 = vld [vmem:[#allocation48_spill] sm:$0xff]  ;;  %13273 = vrcp.f32 %v16909_v28 }
0x1124   : > { %v13264_v60 = vpop.eup %13263  ;;  %v12380_v61 = vunpack.i.h.bf16 %v12378_v48  ;;  %v12379_v15 = vunpack.i.l.bf16 %v12378_v48 }
0x1125   : > { %v12383_v44 = vpop.permute.xlu1 %12382  ;;  %v16941_v21 = vmul.f32 %v13264_v60, %v19043_v7  ;;  %v13266_v31 = vpop.eup %13265  ;;  %v19045_v60 = vld [vmem:[#allocation98_spill] sm:$0xff] }
0x1126   : > { %v12385_v19 = vunpack.i.h.bf16 %v12383_v44  ;;  %v12384_v36 = vunpack.i.l.bf16 %v12383_v44  ;;  %v6612_v24 = vmul.f32 %v13266_v31, %v16891_v13  ;;  %v7157_v0 = vsel %vm7150_vm7, %v7140_v23, %v12379_v15  ;;  %v19051_v44 = vld [vmem:[#allocation71_spill] sm:$0xff] }
0x1127   : > { %v16947_v47 = vpop.permute.xlu0 %12392  ;;  %v7158_v3 = vsel %vm7150_vm7, %v7141_v50, %v12380_v61  ;;  %v19046_v29 = vpack.i.bf16 %v19044_v14, %v19045_v60 }
0x1128   : > { %v13268_v56 = vpop.eup %13267  ;;  %v7172_v30 = vsel %vm7167_vm8, %v7155_v26, %v12384_v36  ;;  %v7173_v40 = vsel %vm7167_vm8, %v7156_v54, %v12385_v19  ;;  %v19054_v19 = vld [vmem:[#allocation99_spill] sm:$0xff] }
0x1129   : > { %v7186_v52 = vpack.c.bf16 %v7173_v40, %v7172_v30  ;;  %v12388_v20 = vpop.permute.xlu1 %12387  ;;  %v6613_v58 = vmul.f32 %v13268_v56, %v16895_v34  ;;  %v13270_v6 = vpop.eup %13269  ;;  %v19055_v36 = vpack.i.bf16 %v19053_v62, %v19054_v19 }
0x112a   : > { %v12390_v41 = vunpack.i.h.bf16 %v12388_v20  ;;  %v12389_v10 = vunpack.i.l.bf16 %v12388_v20  ;;  %v6610_v39 = vmul.f32 %v13270_v6, %v16893_v49  ;;  %v19047_v49 = vld [vmem:[#allocation72_spill] sm:$0xff] }
0x112b   : > { %v16959_v59 = vpop.permute.xlu0 %12402  ;;  %12139 = vmatprep.mubr.msk.bf16.mxu0 %vm972_vm0, %v7186_v52  ;;  %v12481_v13 = vpack.i.bf16 %v6613_v58, %v6612_v24  ;;  %v19049_v12 = vpack.i.bf16 %v19047_v49, %v19048_v55 }
0x112c   : > { %v13272_v2 = vpop.eup %13271  ;;  %v7174_v34 = vsel %vm7167_vm8, %v7157_v0, %v12389_v10  ;;  %v7175_v25 = vsel %vm7167_vm8, %v7158_v3, %v12390_v41  ;;  %v12405_v14 = vunpack.i.h.bf16 %v16959_v59 }
0x112d   : > { %v7187_v27 = vpack.c.bf16 %v7175_v25, %v7174_v34  ;;  %12482 = vrot.lane.b32.xlu1 %v12481_v13, %s13342_s27  ;;  %v6611_v5 = vmul.f32 %v13272_v2, %v16897_v63  ;;  %v19050_v63 = vld [vmem:[#allocation45_spill] sm:$0xff] }
0x112e   : > { %v19052_v7 = vpack.i.bf16 %v19050_v63, %v19051_v44 }
0x112f   : > { %v16967_v46 = vpop.permute.xlu0 %12412  ;;  %12140 = vmatmul.mubr.msk.bf16.gmra.mrb[184].mxu0 %vm972_vm0, %v7187_v27  ;;  %v12486_v48 = vpack.i.bf16 %v6611_v5, %v6610_v39  ;;  %v12395_v5 = vunpack.i.h.bf16 %v16947_v47 }
0x1130   : > { %v12415_v62 = vunpack.i.h.bf16 %v16967_v46 }
0x1131   : > { %12497 = vrot.lane.b32.xlu1 %v19046_v29, %s13338_s30  ;;  %12487 = vrot.lane.b32.xlu0 %v12486_v48, %s13342_s27  ;;  %v12394_v48 = vunpack.i.l.bf16 %v16947_v47 }
0x1133   : > { %v16975_v42 = vpop.permute.xlu0 %12422  ;;  %v7074_v49 = vsel %vm2056_vm1, %v16639_v38, %v12394_v48 }
0x1135   : > { %12507 = vrot.lane.b32.xlu1 %v19049_v12, %s13340_s21  ;;  %12492 = vrot.lane.b32.xlu0 %v19052_v7, %s13338_s30  ;;  %s18320_s30 = scalar_lea.vmem %s18421_s19, %s10720_s26 }
0x1137   : > { %v16985_v9 = vpop.permute.xlu0 %12432 }
0x1139   : > { %12517 = vrot.lane.b32.xlu1 %v12516_v43, %s13341_s23  ;;  %12502 = vrot.lane.b32.xlu0 %v19055_v36, %s13340_s21 }
0x113b   : > { %v16995_v31 = vpop.permute.xlu0 %12442 }
0x113d   : > { %12512 = vrot.lane.b32.xlu0 %v12511_v22, %s13341_s23 }
0x113f   : > { %v12453_v54 = vpop.permute.xlu0 %12452 }
0x1140   : > { %v12455_v26 = vunpack.i.h.bf16 %v12453_v54  ;;  %v12454_v61 = vunpack.i.l.bf16 %v12453_v54 }
0x1142   : > { %v7079_v15 = vsel %vm2056_vm1, %v16861_v4, %v12455_v26  ;;  %v7078_v51 = vsel %vm2056_vm1, %v16748_v1, %v12454_v61  ;;  %v13274_v4 = vpop.eup %13273 }
0x1143   : > { %v12463_v32 = vpop.permute.xlu0 %12462  ;;  %v6616_v52 = vmul.f32 %v13274_v4, %v16903_v53 }
0x1144   : > { %v12465_v43 = vunpack.i.h.bf16 %v12463_v32  ;;  %v12464_v56 = vunpack.i.l.bf16 %v12463_v32 }
0x1146   : > { %v17006_v30 = vsel %vm7082_vm3, %v7078_v51, %v12464_v56  ;;  %v17009_v40 = vsel %vm7082_vm3, %v7079_v15, %v12465_v43  ;;  %v12424_v56 = vunpack.i.l.bf16 %v16975_v42 }
0x115a   : > { %v6399_v11 = vpop.xlane.xlu1 %6398 }
0x115b   : > { %13275 = vrcp.f32 %v6399_v11 }
0x115c   : > { %13277 = vrcp.f32 %v16921_v33 }
0x115e   : > { %v6393_v17 = vpop.xlane.xlu1 %6392 }
0x115f   : > { %13279 = vrcp.f32 %v6393_v17 }
0x1162   : > { %v12398_v22 = vpop.permute.xlu1 %12397 }
0x1163   : > { %v12400_v60 = vunpack.i.h.bf16 %v12398_v22  ;;  %v12399_v29 = vunpack.i.l.bf16 %v12398_v22  ;;  %v17055_v22 = vpop.permute.xlu0 %12472 }
0x1165   : > { %v13276_v1 = vpop.eup %13275  ;;  %v7076_v38 = vsel %vm2056_vm1, %v16702_v18, %v12399_v29  ;;  %v12434_v18 = vunpack.i.l.bf16 %v16985_v9 }
0x1166   : > { %v12408_v24 = vpop.permute.xlu1 %12407  ;;  %v6617_v20 = vmul.f32 %v13276_v1, %v16907_v57  ;;  %v13278_v58 = vpop.eup %13277 }
0x1167   : > { %v6614_v41 = vmul.f32 %v13278_v58, %v16905_v8  ;;  %v12410_v55 = vunpack.i.h.bf16 %v12408_v24  ;;  %v12409_v12 = vunpack.i.l.bf16 %v12408_v24 }
0x1168   : > { %v12526_v23 = vpack.i.bf16 %v6617_v20, %v6616_v52 }
0x1169   : > { %v13280_v50 = vpop.eup %13279  ;;  %v7093_v15 = vsel %vm7082_vm3, %v7076_v38, %v12409_v12 }
0x116a   : > { %12527 = vrot.lane.b32.xlu1 %v12526_v23, %s13342_s27  ;;  %v12418_v28 = vpop.permute.xlu1 %12417  ;;  %v6615_v33 = vmul.f32 %v13280_v50, %v16911_v37  ;;  %v12445_v23 = vunpack.i.h.bf16 %v16995_v31  ;;  %v12444_v50 = vunpack.i.l.bf16 %v16995_v31 }
0x116b   : > { %v12420_v7 = vunpack.i.h.bf16 %v12418_v28  ;;  %v12419_v47 = vunpack.i.l.bf16 %v12418_v28 }
0x116c   : > { %v12521_v10 = vpack.i.bf16 %v6615_v33, %v6614_v41 }
0x116d   : > { %v7110_v11 = vsel %vm7099_vm4, %v7093_v15, %v12419_v47 }
0x116e   : > { %12522 = vrot.lane.b32.xlu0 %v12521_v10, %s13342_s27  ;;  %v12428_v6 = vpop.permute.xlu1 %12427 }
0x116f   : > { %v12430_v19 = vunpack.i.h.bf16 %v12428_v6  ;;  %v12429_v36 = vunpack.i.l.bf16 %v12428_v6 }
0x1171   : > { %v7127_v4 = vsel %vm7116_vm5, %v7110_v11, %v12429_v36 }
0x1172   : > { %v12438_v0 = vpop.permute.xlu1 %12437 }
0x1173   : > { %v12440_v26 = vunpack.i.h.bf16 %v12438_v0  ;;  %v12439_v61 = vunpack.i.l.bf16 %v12438_v0 }
0x1175   : > { %v7144_v52 = vsel %vm7133_vm6, %v7127_v4, %v12439_v61 }
0x1176   : > { %v12448_v3 = vpop.permute.xlu1 %12447 }
0x1177   : > { %v12450_v32 = vunpack.i.h.bf16 %v12448_v3  ;;  %v12449_v43 = vunpack.i.l.bf16 %v12448_v3 }
0x1179   : > { %v7161_v28 = vsel %vm7150_vm7, %v7144_v52, %v12449_v43 }
0x117a   : > { %v12458_v13 = vpop.permute.xlu1 %12457 }
0x117b   : > { %v12460_v53 = vunpack.i.h.bf16 %v12458_v13  ;;  %v12459_v2 = vunpack.i.l.bf16 %v12458_v13 }
0x117d   : > { %v7081_v57 = vsel %vm2056_vm1, %v16934_v45, %v12460_v53  ;;  %v7080_v34 = vsel %vm2056_vm1, %v16941_v21, %v12459_v2  ;;  %v12404_v45 = vunpack.i.l.bf16 %v16959_v59  ;;  %v7075_v21 = vsel %vm2056_vm1, %v16689_v35, %v12395_v5 }
0x117e   : > { %v12468_v25 = vpop.permute.xlu1 %12467  ;;  %v7092_v44 = vsel %vm7082_vm3, %v7075_v21, %v12405_v14  ;;  %v12414_v59 = vunpack.i.l.bf16 %v16967_v46  ;;  %v7077_v35 = vsel %vm2056_vm1, %v16727_v16, %v12400_v60  ;;  %v12425_v46 = vunpack.i.h.bf16 %v16975_v42  ;;  %v17082_v14 = vld [vmem:[%s18414_s12] ss:$0 sm:$0xff] }
0x117f   : > { %v12470_v39 = vunpack.i.h.bf16 %v12468_v25  ;;  %v12469_v8 = vunpack.i.l.bf16 %v12468_v25  ;;  %v7091_v63 = vsel %vm7082_vm3, %v7074_v49, %v12404_v45  ;;  %v7094_v51 = vsel %vm7082_vm3, %v7077_v35, %v12410_v55 }
0x1180   : > { %v7111_v17 = vsel %vm7099_vm4, %v7094_v51, %v12420_v7  ;;  %v12435_v16 = vunpack.i.h.bf16 %v16985_v9  ;;  %v7108_v41 = vsel %vm7099_vm4, %v7091_v63, %v12414_v59  ;;  %v7109_v33 = vsel %vm7099_vm4, %v7092_v44, %v12415_v62 }
0x1181   : > { %v17024_v37 = vsel %vm7082_vm3, %v7080_v34, %v12469_v8  ;;  %v17027_v27 = vsel %vm7082_vm3, %v7081_v57, %v12470_v39  ;;  %v7128_v1 = vsel %vm7116_vm5, %v7111_v17, %v12430_v19  ;;  %v7125_v0 = vsel %vm7116_vm5, %v7108_v41, %v12424_v56 }
0x1182   : > { %v17041_v54 = vpop.permute.xlu1 %12477  ;;  %v7145_v20 = vsel %vm7133_vm6, %v7128_v1, %v12440_v26  ;;  %v7126_v3 = vsel %vm7116_vm5, %v7109_v33, %v12425_v46  ;;  %v7142_v31 = vsel %vm7133_vm6, %v7125_v0, %v12434_v18  ;;  %v12474_v18 = vunpack.i.l.bf16 %v17055_v22 }
0x1183   : > { %v7162_v9 = vsel %vm7150_vm7, %v7145_v20, %v12450_v32  ;;  %v7143_v2 = vsel %vm7133_vm6, %v7126_v3, %v12435_v16  ;;  %v7159_v25 = vsel %vm7150_vm7, %v7142_v31, %v12444_v50  ;;  %v12480_v38 = vunpack.i.h.bf16 %v17041_v54 }
0x1184   : > { %v7160_v39 = vsel %vm7150_vm7, %v7143_v2, %v12445_v23  ;;  %v12479_v26 = vunpack.i.l.bf16 %v17041_v54  ;;  %v12475_v16 = vunpack.i.h.bf16 %v17055_v22  ;;  %v7112_v33 = vsel %vm7099_vm4, %v17006_v30, %v12474_v18 }
0x1185   : > { %v7115_v56 = vsel %vm7099_vm4, %v17027_v27, %v12480_v38 }
0x1186   : > { %v7114_v46 = vsel %vm7099_vm4, %v17024_v37, %v12479_v26 }
0x119f   : > { %v12483_v24 = vpop.permute.xlu1 %12482 }
0x11a0   : > { %v12485_v42 = vunpack.i.h.bf16 %v12483_v24  ;;  %v12484_v58 = vunpack.i.l.bf16 %v12483_v24 }
0x11a2   : > { %v7178_v10 = vsel %vm7167_vm8, %v7161_v28, %v12484_v58  ;;  %v7179_v6 = vsel %vm7167_vm8, %v7162_v9, %v12485_v42 }
0x11a3   : > { %v7189_v13 = vpack.c.bf16 %v7179_v6, %v7178_v10  ;;  %v12488_v53 = vpop.permute.xlu0 %12487  ;;  %v12498_v59 = vpop.permute.xlu1 %12497  ;;  %v7113_v10 = vsel %vm7099_vm4, %v17009_v40, %v12475_v16 }
0x11a4   : > { %v12490_v57 = vunpack.i.h.bf16 %v12488_v53  ;;  %v12489_v34 = vunpack.i.l.bf16 %v12488_v53  ;;  %v12500_v61 = vunpack.i.h.bf16 %v12498_v59  ;;  %v12499_v15 = vunpack.i.l.bf16 %v12498_v59 }
0x11a6   : > { %v7177_v8 = vsel %vm7167_vm8, %v7160_v39, %v12490_v57  ;;  %v7176_v5 = vsel %vm7167_vm8, %v7159_v25, %v12489_v34  ;;  %v7131_v4 = vsel %vm7116_vm5, %v7114_v46, %v12499_v15  ;;  %v7132_v54 = vsel %vm7116_vm5, %v7115_v56, %v12500_v61 }
0x11a7   : > { %v7188_v48 = vpack.c.bf16 %v7177_v8, %v7176_v5  ;;  %v12493_v19 = vpop.permute.xlu0 %12492  ;;  %v12508_v36 = vpop.permute.xlu1 %12507 }
0x11a8   : > { %v12510_v32 = vunpack.i.h.bf16 %v12508_v36  ;;  %v12509_v43 = vunpack.i.l.bf16 %v12508_v36  ;;  %v12495_v24 = vunpack.i.h.bf16 %v12493_v19  ;;  %v12494_v52 = vunpack.i.l.bf16 %v12493_v19 }
0x11a9   : > { %12143 = vmatprep.mubr.msk.bf16.mxu0 %vm972_vm0, %v7188_v48 }
0x11aa   : > { %12144 = vmatmul.mubr.msk.bf16.gmra.mrb[188].mxu0 %vm972_vm0, %v7189_v13  ;;  %v7148_v20 = vsel %vm7133_vm6, %v7131_v4, %v12509_v43  ;;  %v7149_v37 = vsel %vm7133_vm6, %v7132_v54, %v12510_v32  ;;  %v7130_v3 = vsel %vm7116_vm5, %v7113_v10, %v12495_v24  ;;  %v7129_v13 = vsel %vm7116_vm5, %v7112_v33, %v12494_v52 }
0x11ab   : > { %v12503_v35 = vpop.permute.xlu0 %12502  ;;  %v12518_v51 = vpop.permute.xlu1 %12517 }
0x11ac   : > { %v12520_v11 = vunpack.i.h.bf16 %v12518_v51  ;;  %v12519_v17 = vunpack.i.l.bf16 %v12518_v51  ;;  %v12505_v58 = vunpack.i.h.bf16 %v12503_v35  ;;  %v12504_v27 = vunpack.i.l.bf16 %v12503_v35 }
0x11ae   : > { %v7165_v28 = vsel %vm7150_vm7, %v7148_v20, %v12519_v17  ;;  %v7166_v22 = vsel %vm7150_vm7, %v7149_v37, %v12520_v11  ;;  %v7146_v2 = vsel %vm7133_vm6, %v7129_v13, %v12504_v27  ;;  %v7147_v57 = vsel %vm7133_vm6, %v7130_v3, %v12505_v58 }
0x11af   : > { %v12513_v1 = vpop.permute.xlu0 %12512 }
0x11b0   : > { %v12137_v45 = vpop.f32.mrb[180].mxu0  ;;  %v12515_v9 = vunpack.i.h.bf16 %v12513_v1  ;;  %v12514_v41 = vunpack.i.l.bf16 %v12513_v1 }
0x11b1   : > { %v7273_v60 = vpop.f32.mrb[181].mxu0  ;;  %v17088_v55 = vadd.f32 %v12137_v45, %v17082_v14 }
0x11b2   : > { %v17085_v29 = vadd.f32 %v17082_v14, %v7273_v60  ;;  %v12138_v21 = vpop.f32.mrb[182].mxu0  ;;  %v7163_v30 = vsel %vm7150_vm7, %v7146_v2, %v12514_v41  ;;  %v7164_v40 = vsel %vm7150_vm7, %v7147_v57, %v12515_v9 }
0x11b3   : > { %v7276_v49 = vpop.f32.mrb[183].mxu0  ;;  %v17098_v7 = vadd.f32 %v12138_v21, %v17082_v14  ;;  %v7342_v47 = vsel %vm972_vm0, %v17088_v55, 0.0 }
0x11b4   : > { %v17091_v12 = vadd.f32 %v17082_v14, %v7276_v49  ;;  %v7336_v63 = vsel %vm972_vm0, %v17085_v29, 0.0 }
0x11b5   : > { %7337 = vadd.xlane.f32.xlu0 %v7336_v63  ;;  %v7345_v62 = vsel %vm972_vm0, %v17098_v7, 0.0 }
0x11b6   : > { %v7339_v44 = vsel %vm972_vm0, %v17091_v12, 0.0 }
0x11b7   : > { %7340 = vadd.xlane.f32.xlu1 %v7339_v44 }
0x11b9   : > { %7343 = vadd.xlane.f32.xlu0 %v7342_v47 }
0x11bd   : > { %7346 = vadd.xlane.f32.xlu0 %v7345_v62 }
0x11dc   : > { %v12528_v42 = vpop.permute.xlu1 %12527 }
0x11dd   : > { %v12530_v23 = vunpack.i.h.bf16 %v12528_v42  ;;  %v12529_v50 = vunpack.i.l.bf16 %v12528_v42 }
0x11df   : > { %v7182_v6 = vsel %vm7167_vm8, %v7165_v28, %v12529_v50  ;;  %v7183_v0 = vsel %vm7167_vm8, %v7166_v22, %v12530_v23 }
0x11e0   : > { %v7191_v53 = vpack.c.bf16 %v7183_v0, %v7182_v6  ;;  %v12523_v31 = vpop.permute.xlu0 %12522 }
0x11e1   : > { %v12525_v34 = vunpack.i.h.bf16 %v12523_v31  ;;  %v12524_v25 = vunpack.i.l.bf16 %v12523_v31 }
0x11e3   : > { %v7181_v39 = vsel %vm7167_vm8, %v7164_v40, %v12525_v34  ;;  %v7180_v8 = vsel %vm7167_vm8, %v7163_v30, %v12524_v25 }
0x11e4   : > { %v7190_v5 = vpack.c.bf16 %v7181_v39, %v7180_v8 }
0x11e6   : > { %12147 = vmatprep.mubr.msk.bf16.mxu0 %vm972_vm0, %v7190_v5 }
0x11e7   : > { %12148 = vmatmul.mubr.msk.bf16.gmra.mrb[192].mxu0 %vm972_vm0, %v7191_v53 }
0x1202   : > { %v12141_v48 = vpop.f32.mrb[184].mxu0 }
0x1203   : > { %v7289_v45 = vpop.f32.mrb[185].mxu0  ;;  %v17138_v63 = vadd.f32 %v12141_v48, %v17082_v14 }
0x1204   : > { %v17135_v60 = vadd.f32 %v17082_v14, %v7289_v45  ;;  %v12142_v21 = vpop.f32.mrb[186].mxu0 }
0x1205   : > { %v7292_v49 = vpop.f32.mrb[187].mxu0  ;;  %v17146_v62 = vadd.f32 %v12142_v21, %v17082_v14  ;;  %v7354_v19 = vsel %vm972_vm0, %v17138_v63, 0.0 }
0x1206   : > { %v17141_v44 = vadd.f32 %v17082_v14, %v7292_v49  ;;  %v7348_v47 = vsel %vm972_vm0, %v17135_v60, 0.0 }
0x1207   : > { %7349 = vadd.xlane.f32.xlu0 %v7348_v47  ;;  %v7357_v36 = vsel %vm972_vm0, %v17146_v62, 0.0 }
0x1208   : > { %v7351_v59 = vsel %vm972_vm0, %v17141_v44, 0.0 }
0x1209   : > { %7352 = vadd.xlane.f32.xlu1 %v7351_v59 }
0x120b   : > { %7355 = vadd.xlane.f32.xlu0 %v7354_v19 }
0x120d   : > { %7358 = vadd.xlane.f32.xlu1 %v7357_v36 }
0x1242   : > { %v7338_v16 = vpop.xlane.xlu0 %7337 }
0x1243   : > { %v7385_v4 = vmul.f32 0.03125, %v7338_v16  ;;  %v13343_v16 = vmov 0  }
0x1244   : > { %v7341_v54 = vpop.xlane.xlu1 %7340  ;;  %7863 = vmatprep.mubr.bf16.mxu1 %v13343_v16  ;;  %7976 = vmatprep.mubr.bf16.mxu0 %v13343_v16 }
0x1245   : > { %v7386_v20 = vmul.f32 0.03125, %v7341_v54  ;;  %v17178_v58 = vsub.f32 %v17085_v29, %v7385_v4 }
0x1246   : > { %v7344_v18 = vpop.xlane.xlu0 %7343 }
0x1247   : > { %v7387_v50 = vmul.f32 0.03125, %v7344_v18  ;;  %v17189_v33 = vsub.f32 %v17091_v12, %v7386_v20  ;;  %v7417_v53 = vmul.f32 %v17178_v58, %v17178_v58 }
0x1249   : > { %v17197_v0 = vsub.f32 %v17088_v55, %v7387_v50  ;;  %v7418_v55 = vmul.f32 %v17189_v33, %v17189_v33  ;;  %v7433_v30 = vsel %vm972_vm0, %v7417_v53, 0.0  ;;  %v12654_v53 = vld [vmem:[%s18417_s15 + $0x1c] ss:$48 sps:$4 sm:$0xff]  }
0x124a   : > { %v7347_v1 = vpop.xlane.xlu0 %7346 }
0x124b   : > { %v7388_v10 = vmul.f32 0.03125, %v7347_v1  ;;  %v7419_v40 = vmul.f32 %v17197_v0, %v17197_v0  ;;  %v7436_v8 = vsel %vm972_vm0, %v7418_v55, 0.0 }
0x124d   : > { %v17204_v31 = vsub.f32 %v17098_v7, %v7388_v10  ;;  %v7439_v45 = vsel %vm972_vm0, %v7419_v40, 0.0 }
0x124f   : > { %v7420_v5 = vmul.f32 %v17204_v31, %v17204_v31 }
0x1251   : > { %v7442_v49 = vsel %vm972_vm0, %v7420_v5, 0.0 }
0x127d   : > { %v12145_v35 = vpop.f32.mrb[188].mxu0 }
0x127e   : > { %v7305_v38 = vpop.f32.mrb[189].mxu0  ;;  %v17158_v51 = vadd.f32 %v12145_v35, %v17082_v14  ;;  %v12639_v35 = vld [vmem:[%s18417_s15 + $0x4] ss:$48 sps:$4 sm:$0xff]  }
0x127f   : > { %v17155_v26 = vadd.f32 %v17082_v14, %v7305_v38  ;;  %v12146_v61 = vpop.f32.mrb[190].mxu0  ;;  %v12642_v38 = vld [vmem:[%s18417_s15 + $0xc] ss:$48 sps:$4 sm:$0xff]   ;;  %7831 = vmatprep.subr.bf16.mxu1 %v12639_v35 }
0x1280   : > { %v7308_v15 = vpop.f32.mrb[191].mxu0  ;;  %v17166_v46 = vadd.f32 %v12146_v61, %v17082_v14  ;;  %v7366_v11 = vsel %vm972_vm0, %v17158_v51, 0.0  ;;  %v12637_v61 = vld [vmem:[%s18417_s15] ss:$48 sps:$4 sm:$0xff]   ;;  %7944 = vmatprep.subr.bf16.mxu0 %v12642_v38 }
0x1281   : > { %v17161_v32 = vadd.f32 %v17082_v14, %v7308_v15  ;;  %v7360_v43 = vsel %vm972_vm0, %v17155_v26, 0.0  ;;  %v12640_v15 = vld [vmem:[%s18417_s15 + $0x8] ss:$48 sps:$4 sm:$0xff]   ;;  %7832 = vmatpush1.bf16.msra.mxu1 %v12637_v61 }
0x1282   : > { %7361 = vadd.xlane.f32.xlu0 %v7360_v43  ;;  %v7369_v17 = vsel %vm972_vm0, %v17166_v46, 0.0  ;;  %7945 = vmatpush1.bf16.msra.mxu0 %v12640_v15  ;;  %v12645_v43 = vld [vmem:[%s18417_s15 + $0x64] ss:$48 sps:$4 sm:$0xff]  }
0x1283   : > { %v7363_v56 = vsel %vm972_vm0, %v17161_v32, 0.0  ;;  %7833 = vmatprep.subr.bf16.mxu1 %v12645_v43 }
0x1284   : > { %7364 = vadd.xlane.f32.xlu1 %v7363_v56  ;;  %v12648_v56 = vld [vmem:[%s18417_s15 + $0x6c] ss:$48 sps:$4 sm:$0xff]  }
0x1285   : > { %7946 = vmatprep.subr.bf16.mxu0 %v12648_v56 }
0x1286   : > { %7367 = vadd.xlane.f32.xlu0 %v7366_v11  ;;  %v12643_v11 = vld [vmem:[%s18417_s15 + $0x60] ss:$48 sps:$4 sm:$0xff]  }
0x1287   : > { %7834 = vmatpush1.bf16.msra.mxu1 %v12643_v11 }
0x1288   : > { %7370 = vadd.xlane.f32.xlu1 %v7369_v17  ;;  %v12646_v17 = vld [vmem:[%s18417_s15 + $0x68] ss:$48 sps:$4 sm:$0xff]  }
0x1289   : > { %7947 = vmatpush1.bf16.msra.mxu0 %v12646_v17 }
0x128a   : > { %8170 = vmatprep.subr.bf16.mxu0 %v12654_v53 }
0x1294   : > { %v7350_v27 = vpop.xlane.xlu0 %7349 }
0x1295   : > { %v7389_v3 = vmul.f32 0.03125, %v7350_v27 }
0x1296   : > { %v7353_v41 = vpop.xlane.xlu1 %7352 }
0x1297   : > { %v17211_v34 = vsub.f32 %v17135_v60, %v7389_v3 }
0x1298   : > { %v7356_v12 = vpop.xlane.xlu0 %7355 }
0x1299   : > { %v7391_v25 = vmul.f32 0.03125, %v7356_v12  ;;  %v7421_v60 = vmul.f32 %v17211_v34, %v17211_v34 }
0x129a   : > { %v7359_v57 = vpop.xlane.xlu1 %7358 }
0x129b   : > { %v7392_v39 = vmul.f32 0.03125, %v7359_v57  ;;  %v17223_v48 = vsub.f32 %v17138_v63, %v7391_v25  ;;  %v7445_v47 = vsel %vm972_vm0, %v7421_v60, 0.0 }
0x129d   : > { %v17229_v21 = vsub.f32 %v17146_v62, %v7392_v39  ;;  %v7423_v63 = vmul.f32 %v17223_v48, %v17223_v48 }
0x129f   : > { %v7424_v19 = vmul.f32 %v17229_v21, %v17229_v21  ;;  %v7451_v62 = vsel %vm972_vm0, %v7423_v63, 0.0 }
0x12a1   : > { %v7454_v36 = vsel %vm972_vm0, %v7424_v19, 0.0 }
0x12ba   : > { %v12149_v24 = vpop.f32.mrb[192].mxu0 }
0x12bb   : > { %v7321_v52 = vpop.f32.mrb[193].mxu0  ;;  %v17181_v28 = vadd.f32 %v12149_v24, %v17082_v14 }
0x12bc   : > { %v17175_v37 = vadd.f32 %v17082_v14, %v7321_v52  ;;  %v12150_v42 = vpop.f32.mrb[194].mxu0 }
0x12bd   : > { %v7324_v23 = vpop.f32.mrb[195].mxu0  ;;  %v17192_v29 = vadd.f32 %v12150_v42, %v17082_v14  ;;  %v7378_v13 = vsel %vm972_vm0, %v17181_v28, 0.0 }
0x12be   : > { %v17184_v22 = vadd.f32 %v17082_v14, %v7324_v23  ;;  %v7372_v9 = vsel %vm972_vm0, %v17175_v37, 0.0  ;;  %v7390_v14 = vmul.f32 0.03125, %v7353_v41 }
0x12bf   : > { %7373 = vadd.xlane.f32.xlu0 %v7372_v9  ;;  %v7381_v2 = vsel %vm972_vm0, %v17192_v29, 0.0 }
0x12c0   : > { %v7375_v6 = vsel %vm972_vm0, %v17184_v22, 0.0  ;;  %v17217_v7 = vsub.f32 %v17141_v44, %v7390_v14 }
0x12c1   : > { %7376 = vadd.xlane.f32.xlu1 %v7375_v6 }
0x12c2   : > { %v7422_v44 = vmul.f32 %v17217_v7, %v17217_v7 }
0x12c3   : > { %7379 = vadd.xlane.f32.xlu0 %v7378_v13 }
0x12c4   : > { %v7448_v59 = vsel %vm972_vm0, %v7422_v44, 0.0 }
0x12c5   : > { %7382 = vadd.xlane.f32.xlu1 %v7381_v2 }
0x12c7   : > { %7434 = vadd.xlane.f32.xlu0 %v7433_v30 }
0x12c9   : > { %7437 = vadd.xlane.f32.xlu1 %v7436_v8 }
0x12cb   : > { %7440 = vadd.xlane.f32.xlu0 %v7439_v45 }
0x12cd   : > { %7443 = vadd.xlane.f32.xlu1 %v7442_v49 }
0x12cf   : > { %7446 = vadd.xlane.f32.xlu0 %v7445_v47 }
0x12d1   : > { %7449 = vadd.xlane.f32.xlu1 %v7448_v59 }
0x12d3   : > { %7452 = vadd.xlane.f32.xlu0 %v7451_v62 }
0x12d5   : > { %7455 = vadd.xlane.f32.xlu1 %v7454_v36 }
0x130f   : > { %v7362_v18 = vpop.xlane.xlu0 %7361 }
0x1310   : > { %v7393_v4 = vmul.f32 0.03125, %v7362_v18 }
0x1311   : > { %v7365_v54 = vpop.xlane.xlu1 %7364 }
0x1312   : > { %v17269_v1 = vsub.f32 %v17155_v26, %v7393_v4  ;;  %v7394_v24 = vmul.f32 0.03125, %v7365_v54 }
0x1313   : > { %v7368_v52 = vpop.xlane.xlu0 %7367 }
0x1314   : > { %v17272_v20 = vsub.f32 %v17161_v32, %v7394_v24  ;;  %v7395_v42 = vmul.f32 0.03125, %v7368_v52  ;;  %v7425_v27 = vmul.f32 %v17269_v1, %v17269_v1 }
0x1315   : > { %v7371_v23 = vpop.xlane.xlu1 %7370 }
0x1316   : > { %v17277_v50 = vsub.f32 %v17158_v51, %v7395_v42  ;;  %v7396_v9 = vmul.f32 0.03125, %v7371_v23  ;;  %v7457_v41 = vsel %vm972_vm0, %v7425_v27, 0.0  ;;  %v7426_v26 = vmul.f32 %v17272_v20, %v17272_v20 }
0x1317   : > { %7458 = vadd.xlane.f32.xlu0 %v7457_v41 }
0x1318   : > { %v17283_v10 = vsub.f32 %v17166_v46, %v7396_v9  ;;  %v7460_v32 = vsel %vm972_vm0, %v7426_v26, 0.0  ;;  %v7427_v6 = vmul.f32 %v17277_v50, %v17277_v50  ;;  %v12651_v46 = vld [vmem:[%s18417_s15 + $0x14] ss:$48 sps:$4 sm:$0xff]   ;;  %v17325_v9 = vld [vmem:[%s18415_s13] ss:$0 sm:$0xff] }
0x1319   : > { %7461 = vadd.xlane.f32.xlu1 %v7460_v32  ;;  %8057 = vmatprep.subr.bf16.mxu1 %v12651_v46  ;;  %v17333_v46 = vld [vmem:[%s18416_s14] ss:$0 sm:$0xff] }
0x131a   : > { %v7463_v3 = vsel %vm972_vm0, %v7427_v6, 0.0  ;;  %v7428_v51 = vmul.f32 %v17283_v10, %v17283_v10 }
0x131b   : > { %7464 = vadd.xlane.f32.xlu0 %v7463_v3 }
0x131c   : > { %v7466_v13 = vsel %vm972_vm0, %v7428_v51, 0.0 }
0x131d   : > { %7467 = vadd.xlane.f32.xlu1 %v7466_v13 }
0x134c   : > { %v7374_v12 = vpop.xlane.xlu0 %7373 }
0x134d   : > { %v7397_v14 = vmul.f32 0.03125, %v7374_v12 }
0x134e   : > { %v7377_v2 = vpop.xlane.xlu1 %7376 }
0x134f   : > { %v17299_v55 = vsub.f32 %v17175_v37, %v7397_v14  ;;  %v7398_v57 = vmul.f32 0.03125, %v7377_v2 }
0x1350   : > { %v7380_v25 = vpop.xlane.xlu0 %7379 }
0x1351   : > { %v17302_v30 = vsub.f32 %v17184_v22, %v7398_v57  ;;  %v7399_v40 = vmul.f32 0.03125, %v7380_v25  ;;  %v7429_v39 = vmul.f32 %v17299_v55, %v17299_v55 }
0x1352   : > { %v7383_v8 = vpop.xlane.xlu1 %7382 }
0x1353   : > { %v17307_v5 = vsub.f32 %v17181_v28, %v7399_v40  ;;  %v7400_v45 = vmul.f32 0.03125, %v7383_v8  ;;  %v7469_v60 = vsel %vm972_vm0, %v7429_v39, 0.0  ;;  %v7430_v37 = vmul.f32 %v17302_v30, %v17302_v30  ;;  %v12649_v8 = vld [vmem:[%s18417_s15 + $0x10] ss:$48 sps:$4 sm:$0xff]  }
0x1354   : > { %7470 = vadd.xlane.f32.xlu0 %v7469_v60  ;;  %v7435_v49 = vpop.xlane.xlu0 %7434  ;;  %v12652_v60 = vld [vmem:[%s18417_s15 + $0x18] ss:$48 sps:$4 sm:$0xff]  }
0x1355   : > { %v17313_v44 = vsub.f32 %v17192_v29, %v7400_v45  ;;  %v7481_v22 = vmul.f32 0.03125, %v7435_v49  ;;  %v7472_v47 = vsel %vm972_vm0, %v7430_v37, 0.0  ;;  %v7431_v63 = vmul.f32 %v17307_v5, %v17307_v5 }
0x1356   : > { %v7438_v59 = vpop.xlane.xlu1 %7437  ;;  %7473 = vadd.xlane.f32.xlu1 %v7472_v47 }
0x1357   : > { %v7497_v28 = vadd.f32 1e-05, %v7481_v22  ;;  %v7482_v19 = vmul.f32 0.03125, %v7438_v59  ;;  %v7475_v62 = vsel %vm972_vm0, %v7431_v63, 0.0  ;;  %v7432_v36 = vmul.f32 %v17313_v44, %v17313_v44 }
0x1358   : > { %7476 = vadd.xlane.f32.xlu0 %v7475_v62  ;;  %v7441_v35 = vpop.xlane.xlu0 %7440 }
0x1359   : > { %13281 = vrsqrt.f32 %v7497_v28  ;;  %v7498_v29 = vadd.f32 1e-05, %v7482_v19  ;;  %v7483_v38 = vmul.f32 0.03125, %v7441_v35  ;;  %v7478_v61 = vsel %vm972_vm0, %v7432_v36, 0.0 }
0x135a   : > { %7479 = vadd.xlane.f32.xlu1 %v7478_v61  ;;  %v7444_v15 = vpop.xlane.xlu1 %7443 }
0x135b   : > { %13283 = vrsqrt.f32 %v7498_v29  ;;  %v7499_v43 = vadd.f32 1e-05, %v7483_v38  ;;  %v7484_v56 = vmul.f32 0.03125, %v7444_v15  ;;  %v12657_v29 = vld [vmem:[%s18417_s15 + $0x74] ss:$48 sps:$4 sm:$0xff]  }
0x135c   : > { %v7447_v11 = vpop.xlane.xlu0 %7446  ;;  %v12655_v15 = vld [vmem:[%s18417_s15 + $0x70] ss:$48 sps:$4 sm:$0xff]  }
0x135d   : > { %13285 = vrsqrt.f32 %v7499_v43  ;;  %v7500_v17 = vadd.f32 1e-05, %v7484_v56  ;;  %v7485_v18 = vmul.f32 0.03125, %v7447_v11 }
0x135e   : > { %v7450_v4 = vpop.xlane.xlu1 %7449 }
0x135f   : > { %13287 = vrsqrt.f32 %v7500_v17  ;;  %v7486_v54 = vmul.f32 0.03125, %v7450_v4  ;;  %v7501_v24 = vadd.f32 1e-05, %v7485_v18  ;;  %v12663_v18 = vld [vmem:[%s18417_s15 + $0x24] ss:$48 sps:$4 sm:$0xff]  }
0x1360   : > { %v7453_v42 = vpop.xlane.xlu0 %7452  ;;  %v12666_v4 = vld [vmem:[%s18417_s15 + $0x2c] ss:$48 sps:$4 sm:$0xff]  }
0x1361   : > { %v7502_v52 = vadd.f32 1e-05, %v7486_v54  ;;  %v7487_v6 = vmul.f32 0.03125, %v7453_v42 }
0x1362   : > { %v7456_v27 = vpop.xlane.xlu1 %7455 }
0x1363   : > { %v13282_v23 = vpop.eup %13281  ;;  %13289 = vrsqrt.f32 %v7502_v52  ;;  %v7488_v41 = vmul.f32 0.03125, %v7456_v27  ;;  %v7503_v2 = vadd.f32 1e-05, %v7487_v6 }
0x1364   : > { %v7529_v26 = vmul.f32 %v13282_v23, %v17178_v58  ;;  %13291 = vrsqrt.f32 %v7501_v24 }
0x1365   : > { %v13284_v32 = vpop.eup %13283  ;;  %v7504_v53 = vadd.f32 1e-05, %v7488_v41 }
0x1366   : > { %v7552_v3 = vmul.f32 %v17325_v9, %v7529_v26  ;;  %v7530_v51 = vmul.f32 %v13284_v32, %v17189_v33 }
0x1367   : > { %v13286_v13 = vpop.eup %13285  ;;  %13293 = vrsqrt.f32 %v7504_v53 }
0x1368   : > { %v7553_v12 = vmul.f32 %v17325_v9, %v7530_v51  ;;  %v17337_v58 = vadd.f32 %v17333_v46, %v7552_v3  ;;  %v7531_v25 = vmul.f32 %v13286_v13, %v17197_v0  ;;  %13295 = vrsqrt.f32 %v7503_v2 }
0x1369   : > { %v13288_v14 = vpop.eup %13287 }
0x136a   : > { %v17340_v57 = vadd.f32 %v17333_v46, %v7553_v12  ;;  %v7532_v33 = vmul.f32 %v13288_v14, %v17204_v31  ;;  %v7554_v0 = vmul.f32 %v17325_v9, %v7531_v25 }
0x136c   : > { %v7555_v40 = vmul.f32 %v17325_v9, %v7532_v33  ;;  %v17347_v39 = vpack.c.bf16 %v17340_v57, %v17337_v58  ;;  %v17367_v22 = vadd.f32 %v17333_v46, %v7554_v0 }
0x136d   : > { %v13290_v45 = vpop.eup %13289 }
0x136e   : > { %10573 = vmatmul.mubr.msk.bf16.vlgmr.msra.gmra.mrb[204].mxu1 %vm972_vm0, %v17347_v39  ;;  %10581 = vmatmul.mubr.msk.bf16.vlgmr.msra.gmra.mrb[196].mxu0 %vm972_vm0, %v17347_v39  ;;  %v13292_v31 = vpop.eup %13291  ;;  %v17363_v37 = vadd.f32 %v17333_v46, %v7555_v40  ;;  %v7534_v49 = vmul.f32 %v13290_v45, %v17217_v7 }
0x136f   : > { %7873 = vmatprep.mubr.bf16.mxu1 %v13343_v16  ;;  %7986 = vmatprep.mubr.bf16.mxu0 %v13343_v16  ;;  %v7533_v47 = vmul.f32 %v13292_v31, %v17211_v34 }
0x1370   : > { %8058 = vmatpush1.bf16.msra.mxu1 %v12649_v8  ;;  %8171 = vmatpush1.bf16.msra.mxu0 %v12652_v60  ;;  %v7557_v63 = vmul.f32 %v17325_v9, %v7534_v49  ;;  %v17373_v59 = vpack.c.bf16 %v17363_v37, %v17367_v22 }
0x1371   : > { %v13294_v28 = vpop.eup %13293  ;;  %v7556_v19 = vmul.f32 %v17325_v9, %v7533_v47  ;;  %8059 = vmatprep.subr.bf16.mxu1 %v12657_v29 }
0x1372   : > { %v13296_v7 = vpop.eup %13295  ;;  %v17383_v34 = vadd.f32 %v17333_v46, %v7557_v63  ;;  %v7536_v62 = vmul.f32 %v13294_v28, %v17229_v21  ;;  %v12660_v21 = vld [vmem:[%s18417_s15 + $0x7c] ss:$48 sps:$4 sm:$0xff]  }
0x1373   : > { %v17387_v36 = vadd.f32 %v17333_v46, %v7556_v19  ;;  %v7535_v35 = vmul.f32 %v13296_v7, %v17223_v48  ;;  %v12658_v48 = vld [vmem:[%s18417_s15 + $0x78] ss:$48 sps:$4 sm:$0xff]   ;;  %8172 = vmatprep.subr.bf16.mxu0 %v12660_v21 }
0x1374   : > { %v7559_v38 = vmul.f32 %v17325_v9, %v7536_v62  ;;  %8060 = vmatpush1.bf16.msra.mxu1 %v12655_v15  ;;  %8173 = vmatpush1.bf16.msra.mxu0 %v12658_v48 }
0x1375   : > { %v17396_v61 = vpack.c.bf16 %v17383_v34, %v17387_v36  ;;  %v7558_v43 = vmul.f32 %v17325_v9, %v7535_v35  ;;  %8283 = vmatprep.subr.bf16.mxu1 %v12663_v18  ;;  %8396 = vmatprep.subr.bf16.mxu0 %v12666_v4 }
0x1376   : > { %10574 = vmatmul.mubr.msk.bf16.gmra.mrb[208].mxu1 %vm972_vm0, %v17373_v59  ;;  %10582 = vmatmul.mubr.msk.bf16.gmra.mrb[200].mxu0 %vm972_vm0, %v17373_v59  ;;  %v17415_v56 = vadd.f32 %v17333_v46, %v7559_v38 }
0x1377   : > { %7883 = vmatprep.mubr.bf16.mxu1 %v13343_v16  ;;  %7996 = vmatprep.mubr.bf16.mxu0 %v13343_v16  ;;  %v17418_v11 = vadd.f32 %v17333_v46, %v7558_v43 }
0x1379   : > { %v17422_v17 = vpack.c.bf16 %v17415_v56, %v17418_v11 }
0x137e   : > { %10575 = vmatmul.mubr.msk.bf16.gmra.mrb[212].mxu1 %vm972_vm0, %v17396_v61  ;;  %10583 = vmatmul.mubr.msk.bf16.gmra.mrb[204].mxu0 %vm972_vm0, %v17396_v61 }
0x137f   : > { %7893 = vmatprep.mubr.bf16.mxu1 %v13343_v16  ;;  %8006 = vmatprep.mubr.bf16.mxu0 %v13343_v16 }
0x1386   : > { %10576 = vmatmul.mubr.msk.bf16.gmra.mrb[216].mxu1 %vm972_vm0, %v17422_v17  ;;  %10584 = vmatmul.mubr.msk.bf16.gmra.mrb[208].mxu0 %vm972_vm0, %v17422_v17 }
0x1387   : > { %7903 = vmatprep.mubr.bf16.mxu1 %v13343_v16  ;;  %8016 = vmatprep.mubr.bf16.mxu0 %v13343_v16 }
0x13a4   : > { %v7459_v54 = vpop.xlane.xlu0 %7458 }
0x13a5   : > { %v7489_v24 = vmul.f32 0.03125, %v7459_v54 }
0x13a6   : > { %v7462_v52 = vpop.xlane.xlu1 %7461 }
0x13a7   : > { %v7505_v42 = vadd.f32 1e-05, %v7489_v24  ;;  %v7490_v27 = vmul.f32 0.03125, %v7462_v52 }
0x13a8   : > { %v7465_v23 = vpop.xlane.xlu0 %7464 }
0x13a9   : > { %13297 = vrsqrt.f32 %v7505_v42  ;;  %v7506_v41 = vadd.f32 1e-05, %v7490_v27  ;;  %v7491_v26 = vmul.f32 0.03125, %v7465_v23 }
0x13aa   : > { %v7468_v32 = vpop.xlane.xlu1 %7467 }
0x13ab   : > { %13299 = vrsqrt.f32 %v7506_v41  ;;  %v7507_v6 = vadd.f32 1e-05, %v7491_v26  ;;  %v7492_v3 = vmul.f32 0.03125, %v7468_v32 }
0x13ad   : > { %13301 = vrsqrt.f32 %v7507_v6  ;;  %v7508_v51 = vadd.f32 1e-05, %v7492_v3 }
0x13af   : > { %13303 = vrsqrt.f32 %v7508_v51  ;;  %v12669_v51 = vld [vmem:[%s18417_s15 + $0x84] ss:$48 sps:$4 sm:$0xff]  }
0x13b3   : > { %v13298_v13 = vpop.eup %13297 }
0x13b4   : > { %v7537_v53 = vmul.f32 %v13298_v13, %v17269_v1  ;;  %v12672_v13 = vld [vmem:[%s18417_s15 + $0x8c] ss:$48 sps:$4 sm:$0xff]  }
0x13b5   : > { %v13300_v12 = vpop.eup %13299 }
0x13b6   : > { %v7560_v14 = vmul.f32 %v17325_v9, %v7537_v53  ;;  %v7538_v2 = vmul.f32 %v13300_v12, %v17272_v20  ;;  %v12667_v53 = vld [vmem:[%s18417_s15 + $0x80] ss:$48 sps:$4 sm:$0xff]   ;;  %v12670_v12 = vld [vmem:[%s18417_s15 + $0x88] ss:$48 sps:$4 sm:$0xff]  }
0x13b7   : > { %v13302_v25 = vpop.eup %13301 }
0x13b8   : > { %v7561_v33 = vmul.f32 %v17325_v9, %v7538_v2  ;;  %v17441_v8 = vadd.f32 %v17333_v46, %v7560_v14  ;;  %v7539_v60 = vmul.f32 %v13302_v25, %v17277_v50  ;;  %v12673_v14 = vld [vmem:[%s18419_s17 + $0x40] sm:$0xff]   ;;  %v7627_v25 = vlaneseq }
0x13b9   : > { %v13304_v40 = vpop.eup %13303  ;;  %v12675_v2 = vld [vmem:[%s18419_s17 + $0xc0] sm:$0xff]  }
0x13ba   : > { %v17444_v45 = vadd.f32 %v17333_v46, %v7561_v33  ;;  %v7540_v0 = vmul.f32 %v13304_v40, %v17283_v10  ;;  %v7562_v20 = vmul.f32 %v17325_v9, %v7539_v60  ;;  %v17576_v33 = vshrl.u32 %v7627_v25, 7 }
0x13bc   : > { %v7563_v1 = vmul.f32 %v17325_v9, %v7540_v0  ;;  %v17451_v31 = vpack.c.bf16 %v17444_v45, %v17441_v8  ;;  %v17464_v10 = vadd.f32 %v17333_v46, %v7562_v20  ;;  %v7629_v40 = vsub.s32 0, %v17576_v33  ;;  %v17587_v0 = vld [vmem:[%s18418_s16] sm:$0xff] }
0x13bd   : > { %v18549_v60 = vsub.s32 2, %v17576_v33  ;;  %v18547_v20 = vsub.s32 3, %v17576_v33 }
0x13be   : > { %10577 = vmatmul.mubr.msk.bf16.gmra.mrb[220].mxu1 %vm972_vm0, %v17451_v31  ;;  %10585 = vmatmul.mubr.msk.bf16.gmra.mrb[212].mxu0 %vm972_vm0, %v17451_v31  ;;  %v17461_v50 = vadd.f32 %v17333_v46, %v7563_v1  ;;  %v18548_v1 = vsub.s32 1, %v17576_v33 }
0x13bf   : > { %7913 = vmatprep.mubr.bf16.mxu1 %v13343_v16  ;;  %8026 = vmatprep.mubr.bf16.mxu0 %v13343_v16 }
0x13c0   : > { %v17468_v49 = vpack.c.bf16 %v17461_v50, %v17464_v10 }
0x13c6   : > { %10578 = vmatmul.mubr.msk.bf16.gmra.mrb[224].mxu1 %vm972_vm0, %v17468_v49  ;;  %10586 = vmatmul.mubr.msk.bf16.gmra.mrb[216].mxu0 %vm972_vm0, %v17468_v49 }
0x13c7   : > { %7923 = vmatprep.mubr.bf16.mxu1 %v13343_v16  ;;  %8036 = vmatprep.mubr.bf16.mxu0 %v13343_v16 }
0x13e1   : > { %v7471_v47 = vpop.xlane.xlu0 %7470 }
0x13e2   : > { %v7493_v63 = vmul.f32 0.03125, %v7471_v47  ;;  %v17596_v47 = vrot.slane %v17587_v0, %v7629_v40 }
0x13e3   : > { %v7474_v28 = vpop.xlane.xlu1 %7473 }
0x13e4   : > { %v7509_v19 = vadd.f32 1e-05, %v7493_v63  ;;  %v7494_v7 = vmul.f32 0.03125, %v7474_v28  ;;  %v17601_v63 = vrot.slane %v17587_v0, %v18549_v60  ;;  %v17606_v28 = vrot.slane %v17587_v0, %v18548_v1 }
0x13e5   : > { %v7477_v62 = vpop.xlane.xlu0 %7476 }
0x13e6   : > { %13305 = vrsqrt.f32 %v7509_v19  ;;  %v7510_v35 = vadd.f32 1e-05, %v7494_v7  ;;  %v7495_v29 = vmul.f32 0.03125, %v7477_v62  ;;  %v17611_v19 = vrot.slane %v17587_v0, %v18547_v20 }
0x13e7   : > { %v7480_v38 = vpop.xlane.xlu1 %7479 }
0x13e8   : > { %13307 = vrsqrt.f32 %v7510_v35  ;;  %v7511_v15 = vadd.f32 1e-05, %v7495_v29  ;;  %v7496_v21 = vmul.f32 0.03125, %v7480_v38 }
0x13ea   : > { %13309 = vrsqrt.f32 %v7511_v15  ;;  %v7512_v48 = vadd.f32 1e-05, %v7496_v21 }
0x13ec   : > { %13311 = vrsqrt.f32 %v7512_v48 }
0x13f0   : > { %v13306_v43 = vpop.eup %13305 }
0x13f1   : > { %v7541_v18 = vmul.f32 %v13306_v43, %v17299_v55 }
0x13f2   : > { %v13308_v4 = vpop.eup %13307 }
0x13f3   : > { %v7564_v54 = vmul.f32 %v17325_v9, %v7541_v18  ;;  %v7542_v24 = vmul.f32 %v13308_v4, %v17302_v30 }
0x13f4   : > { %v13310_v52 = vpop.eup %13309 }
0x13f5   : > { %v7565_v42 = vmul.f32 %v17325_v9, %v7542_v24  ;;  %v17481_v23 = vadd.f32 %v17333_v46, %v7564_v54  ;;  %v7543_v26 = vmul.f32 %v13310_v52, %v17307_v5 }
0x13f6   : > { %v13312_v27 = vpop.eup %13311 }
0x13f7   : > { %v17484_v41 = vadd.f32 %v17333_v46, %v7565_v42  ;;  %v7544_v32 = vmul.f32 %v13312_v27, %v17313_v44  ;;  %v7566_v30 = vmul.f32 %v17325_v9, %v7543_v26 }
0x13f9   : > { %v7567_v55 = vmul.f32 %v17325_v9, %v7544_v32  ;;  %v17491_v6 = vpack.c.bf16 %v17484_v41, %v17481_v23  ;;  %v17504_v44 = vadd.f32 %v17333_v46, %v7566_v30  ;;  %v12661_v9 = vld [vmem:[%s18417_s15 + $0x20] ss:$48 sps:$4 sm:$0xff]  }
0x13fb   : > { %10579 = vmatmul.mubr.msk.bf16.gmra.mrb[228].mxu1 %vm972_vm0, %v17491_v6  ;;  %10587 = vmatmul.mubr.msk.bf16.gmra.mrb[220].mxu0 %vm972_vm0, %v17491_v6  ;;  %v17501_v5 = vadd.f32 %v17333_v46, %v7567_v55  ;;  %v12664_v46 = vld [vmem:[%s18417_s15 + $0x28] ss:$48 sps:$4 sm:$0xff]  }
0x13fc   : > { %7933 = vmatprep.mubr.bf16.mxu1 %v13343_v16  ;;  %8046 = vmatprep.mubr.bf16.mxu0 %v13343_v16 }
0x13fd   : > { %v17508_v3 = vpack.c.bf16 %v17501_v5, %v17504_v44 }
0x1403   : > { %10580 = vmatmul.mubr.msk.bf16.gmra.mrb[232].mxu1 %vm972_vm0, %v17508_v3  ;;  %10588 = vmatmul.mubr.msk.bf16.gmra.mrb[224].mxu0 %vm972_vm0, %v17508_v3 }
0x1404   : > { %8089 = vmatprep.mubr.bf16.mxu1 %v13343_v16  ;;  %8202 = vmatprep.mubr.bf16.mxu0 %v13343_v16 }
0x140b   : > { %10589 = vmatmul.mubr.msk.bf16.vlgmr.msra.gmra.mrb[236].mxu1 %vm972_vm0, %v17347_v39  ;;  %10597 = vmatmul.mubr.msk.bf16.vlgmr.msra.gmra.mrb[228].mxu0 %vm972_vm0, %v17347_v39 }
0x140c   : > { %8284 = vmatpush1.bf16.msra.mxu1 %v12661_v9  ;;  %8397 = vmatpush1.bf16.msra.mxu0 %v12664_v46 }
0x140d   : > { %8099 = vmatprep.mubr.bf16.mxu1 %v13343_v16  ;;  %8212 = vmatprep.mubr.bf16.mxu0 %v13343_v16 }
0x140e   : > { %8285 = vmatprep.subr.bf16.mxu1 %v12669_v51  ;;  %8398 = vmatprep.subr.bf16.mxu0 %v12672_v13 }
0x1410   : > { %8286 = vmatpush1.bf16.msra.mxu1 %v12667_v53  ;;  %8399 = vmatpush1.bf16.msra.mxu0 %v12670_v12 }
0x1411   : > { %11155 = vmatprep.subr.bf16.mxu1 %v12673_v14  ;;  %11219 = vmatprep.subr.bf16.mxu0 %v12675_v2 }
0x1413   : > { %10590 = vmatmul.mubr.msk.bf16.gmra.mrb[240].mxu1 %vm972_vm0, %v17373_v59  ;;  %10598 = vmatmul.mubr.msk.bf16.gmra.mrb[232].mxu0 %vm972_vm0, %v17373_v59 }
0x1414   : > { %8109 = vmatprep.mubr.bf16.mxu1 %v13343_v16  ;;  %8222 = vmatprep.mubr.bf16.mxu0 %v13343_v16 }
0x141b   : > { %10591 = vmatmul.mubr.msk.bf16.gmra.mrb[244].mxu1 %vm972_vm0, %v17396_v61  ;;  %10599 = vmatmul.mubr.msk.bf16.gmra.mrb[236].mxu0 %vm972_vm0, %v17396_v61 }
0x141c   : > { %8119 = vmatprep.mubr.bf16.mxu1 %v13343_v16  ;;  %8232 = vmatprep.mubr.bf16.mxu0 %v13343_v16 }
0x1423   : > { %10592 = vmatmul.mubr.msk.bf16.gmra.mrb[248].mxu1 %vm972_vm0, %v17422_v17  ;;  %10600 = vmatmul.mubr.msk.bf16.gmra.mrb[240].mxu0 %vm972_vm0, %v17422_v17 }
0x1424   : > { %8129 = vmatprep.mubr.bf16.mxu1 %v13343_v16  ;;  %8242 = vmatprep.mubr.bf16.mxu0 %v13343_v16 }
0x142b   : > { %10593 = vmatmul.mubr.msk.bf16.gmra.mrb[252].mxu1 %vm972_vm0, %v17451_v31  ;;  %10601 = vmatmul.mubr.msk.bf16.gmra.mrb[244].mxu0 %vm972_vm0, %v17451_v31 }
0x142c   : > { %8139 = vmatprep.mubr.bf16.mxu1 %v13343_v16  ;;  %8252 = vmatprep.mubr.bf16.mxu0 %v13343_v16 }
0x1433   : > { %10594 = vmatmul.mubr.msk.bf16.gmra.mrb[0].mxu1 %vm972_vm0, %v17468_v49  ;;  %10602 = vmatmul.mubr.msk.bf16.gmra.mrb[248].mxu0 %vm972_vm0, %v17468_v49 }
0x1434   : > { %8149 = vmatprep.mubr.bf16.mxu1 %v13343_v16  ;;  %8262 = vmatprep.mubr.bf16.mxu0 %v13343_v16 }
0x143b   : > { %10595 = vmatmul.mubr.msk.bf16.gmra.mrb[4].mxu1 %vm972_vm0, %v17491_v6  ;;  %10603 = vmatmul.mubr.msk.bf16.gmra.mrb[252].mxu0 %vm972_vm0, %v17491_v6 }
0x143c   : > { %8159 = vmatprep.mubr.bf16.mxu1 %v13343_v16  ;;  %8272 = vmatprep.mubr.bf16.mxu0 %v13343_v16 }
0x1441   : > { %v7865_v7 = vpop.f32.mrb[204].mxu1  ;;  %v7978_v62 = vpop.f32.mrb[196].mxu0 }
0x1442   : > { %v7866_v35 = vadd.f32 %v7865_v7, %v17596_v47  ;;  %v7979_v29 = vadd.f32 %v7978_v62, %v17601_v63  ;;  %v7867_v38 = vpop.f32.mrb[205].mxu1  ;;  %v7980_v15 = vpop.f32.mrb[197].mxu0  ;;  %v12674_v62 = vld [vmem:[%s18419_s17] sm:$0xff]  }
0x1443   : > { %v7868_v21 = vadd.f32 %v7867_v38, %v17606_v28  ;;  %v7981_v48 = vadd.f32 %v7980_v15, %v17611_v19  ;;  %v7869_v43 = vpop.f32.mrb[206].mxu1  ;;  %v7982_v18 = vpop.f32.mrb[198].mxu0  ;;  %10596 = vmatmul.mubr.msk.bf16.gmra.mrb[8].mxu1 %vm972_vm0, %v17508_v3  ;;  %10604 = vmatmul.mubr.msk.bf16.gmra.mrb[0].mxu0 %vm972_vm0, %v17508_v3 }
0x1444   : > { %v7870_v4 = vadd.f32 %v7869_v43, %v17596_v47  ;;  %v7983_v54 = vadd.f32 %v7982_v18, %v17601_v63  ;;  %v7871_v24 = vpop.f32.mrb[207].mxu1  ;;  %v7984_v52 = vpop.f32.mrb[199].mxu0  ;;  %8315 = vmatprep.mubr.bf16.mxu1 %v13343_v16  ;;  %8428 = vmatprep.mubr.bf16.mxu0 %v13343_v16  ;;  %v8509_v26 = vmax.f32 %v7866_v35, 0.0  ;;  %v8511_v32 = vmax.f32 %v7979_v29, 0.0  ;;  %v12676_v35 = vld [vmem:[%s18419_s17 + $0x80] sm:$0xff]   ;;  %v12678_v43 = vld [vmem:[%s18419_s17 + $0xc8] sm:$0xff]  }
0x1445   : > { %v7872_v42 = vadd.f32 %v7871_v24, %v17606_v28  ;;  %v7985_v27 = vadd.f32 %v7984_v52, %v17611_v19  ;;  %v8510_v9 = vmax.f32 %v7868_v21, 0.0  ;;  %v8512_v46 = vmax.f32 %v7981_v48, 0.0  ;;  %v12677_v48 = vld [vmem:[%s18419_s17 + $0x48] sm:$0xff]  }
0x1446   : > { %v8521_v55 = vmax.f32 %v7870_v4, 0.0  ;;  %v8523_v30 = vmax.f32 %v7983_v54, 0.0 }
0x1447   : > { %v8522_v51 = vmax.f32 %v7872_v42, 0.0  ;;  %v8524_v13 = vmax.f32 %v7985_v27, 0.0 }
0x1448   : > { %v17627_v53 = vpack.c.bf16 %v8521_v55, %v8509_v26  ;;  %v17629_v12 = vpack.c.bf16 %v8523_v30, %v8511_v32  ;;  %v12680_v30 = vld [vmem:[%s18419_s17 + $0x88] sm:$0xff]  }
0x1449   : > { %v17631_v14 = vpack.c.bf16 %v8522_v51, %v8510_v9  ;;  %v17633_v2 = vpack.c.bf16 %v8524_v13, %v8512_v46  ;;  %v7875_v25 = vpop.f32.mrb[208].mxu1  ;;  %v7988_v7 = vpop.f32.mrb[200].mxu0 }
0x144a   : > { %v7876_v29 = vadd.f32 %v7875_v25, %v17596_v47  ;;  %v7989_v38 = vadd.f32 %v7988_v7, %v17601_v63  ;;  %v7877_v15 = vpop.f32.mrb[209].mxu1  ;;  %v7990_v21 = vpop.f32.mrb[201].mxu0  ;;  %v12681_v25 = vld [vmem:[%s18419_s17 + $0x50] sm:$0xff]  }
0x144b   : > { %v7878_v18 = vadd.f32 %v7877_v15, %v17606_v28  ;;  %v7991_v4 = vadd.f32 %v7990_v21, %v17611_v19  ;;  %v7879_v54 = vpop.f32.mrb[210].mxu1  ;;  %v7992_v24 = vpop.f32.mrb[202].mxu0  ;;  %10605 = vmatmul.mubr.msk.bf16.vlgmr.msra.gmra.mrb[12].mxu1 %vm972_vm0, %v17347_v39  ;;  %10613 = vmatmul.mubr.msk.bf16.vlgmr.msra.gmra.mrb[4].mxu0 %vm972_vm0, %v17347_v39  ;;  %v12679_v39 = vld [vmem:[%s18419_s17 + $0x8] sm:$0xff]   ;;  %v12682_v7 = vld [vmem:[%s18419_s17 + $0xd0] sm:$0xff]  }
0x144c   : > { %v7880_v52 = vadd.f32 %v7879_v54, %v17596_v47  ;;  %v7993_v42 = vadd.f32 %v7992_v24, %v17601_v63  ;;  %v7881_v27 = vpop.f32.mrb[211].mxu1  ;;  %v7994_v26 = vpop.f32.mrb[203].mxu0  ;;  %8325 = vmatprep.mubr.bf16.mxu1 %v13343_v16  ;;  %8438 = vmatprep.mubr.bf16.mxu0 %v13343_v16  ;;  %v8533_v9 = vmax.f32 %v7876_v29, 0.0  ;;  %v8535_v46 = vmax.f32 %v7989_v38, 0.0 }
0x144d   : > { %v7882_v32 = vadd.f32 %v7881_v27, %v17606_v28  ;;  %v7995_v55 = vadd.f32 %v7994_v26, %v17611_v19  ;;  %11156 = vmatpush3.bf16.msra.mxu1 %v12674_v62  ;;  %11220 = vmatpush3.bf16.msra.mxu0 %v12676_v35  ;;  %v8534_v62 = vmax.f32 %v7878_v18, 0.0  ;;  %v8536_v35 = vmax.f32 %v7991_v4, 0.0  ;;  %v12684_v18 = vld [vmem:[%s18419_s17 + $0x90] sm:$0xff]  }
0x144e   : > { %v8545_v51 = vmax.f32 %v7880_v52, 0.0  ;;  %v8547_v13 = vmax.f32 %v7993_v42, 0.0  ;;  %11157 = vmatprep.subr.bf16.mxu1 %v12677_v48  ;;  %11221 = vmatprep.subr.bf16.mxu0 %v12678_v43  ;;  %v12683_v52 = vld [vmem:[%s18419_s17 + $0x10] sm:$0xff]  }
0x144f   : > { %v8546_v15 = vmax.f32 %v7882_v32, 0.0  ;;  %v8548_v21 = vmax.f32 %v7995_v55, 0.0  ;;  %v12685_v32 = vld [vmem:[%s18419_s17 + $0x58] sm:$0xff]  }
0x1450   : > { %v17673_v54 = vpack.c.bf16 %v8545_v51, %v8533_v9  ;;  %v17675_v29 = vpack.c.bf16 %v8547_v13, %v8535_v46  ;;  %v12686_v55 = vld [vmem:[%s18419_s17 + $0xd8] sm:$0xff]  }
0x1451   : > { %v17677_v38 = vpack.c.bf16 %v8546_v15, %v8534_v62  ;;  %v17679_v48 = vpack.c.bf16 %v8548_v21, %v8536_v35  ;;  %v7885_v43 = vpop.f32.mrb[212].mxu1  ;;  %v7998_v24 = vpop.f32.mrb[204].mxu0  ;;  %11158 = vmatpush3.bf16.msra.mxu1 %v12679_v39  ;;  %11222 = vmatpush3.bf16.msra.mxu0 %v12680_v30  ;;  %v12688_v15 = vld [vmem:[%s18419_s17 + $0x98] sm:$0xff]  }
0x1452   : > { %v7886_v4 = vadd.f32 %v7885_v43, %v17596_v47  ;;  %v7999_v42 = vadd.f32 %v7998_v24, %v17601_v63  ;;  %v7887_v27 = vpop.f32.mrb[213].mxu1  ;;  %v8000_v26 = vpop.f32.mrb[205].mxu0  ;;  %11159 = vmatprep.subr.bf16.mxu1 %v12681_v25  ;;  %11223 = vmatprep.subr.bf16.mxu0 %v12682_v7 }
0x1453   : > { %v7888_v39 = vadd.f32 %v7887_v27, %v17606_v28  ;;  %v8001_v30 = vadd.f32 %v8000_v26, %v17611_v19  ;;  %v7889_v9 = vpop.f32.mrb[214].mxu1  ;;  %v8002_v46 = vpop.f32.mrb[206].mxu0  ;;  %10606 = vmatmul.mubr.msk.bf16.gmra.mrb[16].mxu1 %vm972_vm0, %v17373_v59  ;;  %10614 = vmatmul.mubr.msk.bf16.gmra.mrb[8].mxu0 %vm972_vm0, %v17373_v59  ;;  %v12687_v59 = vld [vmem:[%s18419_s17 + $0x18] sm:$0xff]   ;;  %v12689_v26 = vld [vmem:[%s18419_s17 + $0x60] sm:$0xff]  }
0x1454   : > { %v7890_v51 = vadd.f32 %v7889_v9, %v17596_v47  ;;  %v8003_v13 = vadd.f32 %v8002_v46, %v17601_v63  ;;  %v7891_v25 = vpop.f32.mrb[215].mxu1  ;;  %v8004_v7 = vpop.f32.mrb[207].mxu0  ;;  %8335 = vmatprep.mubr.bf16.mxu1 %v13343_v16  ;;  %8448 = vmatprep.mubr.bf16.mxu0 %v13343_v16  ;;  %v8557_v21 = vmax.f32 %v7886_v4, 0.0  ;;  %v8559_v43 = vmax.f32 %v7999_v42, 0.0 }
0x1455   : > { %v7892_v62 = vadd.f32 %v7891_v25, %v17606_v28  ;;  %v8005_v35 = vadd.f32 %v8004_v7, %v17611_v19  ;;  %11160 = vmatpush3.bf16.msra.mxu1 %v12683_v52  ;;  %11224 = vmatpush3.bf16.msra.mxu0 %v12684_v18  ;;  %v12690_v52 = vld [vmem:[%s18419_s17 + $0xe0] sm:$0xff]   ;;  %v8558_v18 = vmax.f32 %v7888_v39, 0.0  ;;  %v8560_v9 = vmax.f32 %v8001_v30, 0.0 }
0x1456   : > { %v8569_v24 = vmax.f32 %v7890_v51, 0.0  ;;  %v8571_v27 = vmax.f32 %v8003_v13, 0.0  ;;  %11161 = vmatprep.subr.bf16.mxu1 %v12685_v32  ;;  %11225 = vmatprep.subr.bf16.mxu0 %v12686_v55  ;;  %v12691_v13 = vld [vmem:[%s18419_s17 + $0x20] sm:$0xff]  }
0x1457   : > { %v8570_v46 = vmax.f32 %v7892_v62, 0.0  ;;  %v8572_v25 = vmax.f32 %v8005_v35, 0.0  ;;  %v12692_v39 = vld [vmem:[%s18419_s17 + $0xa0] sm:$0xff]  }
0x1458   : > { %v17719_v7 = vpack.c.bf16 %v8569_v24, %v8557_v21  ;;  %v17721_v4 = vpack.c.bf16 %v8571_v27, %v8559_v43 }
0x1459   : > { %v17723_v42 = vpack.c.bf16 %v8570_v46, %v8558_v18  ;;  %v17725_v32 = vpack.c.bf16 %v8572_v25, %v8560_v9  ;;  %v7895_v55 = vpop.f32.mrb[216].mxu1  ;;  %v8008_v51 = vpop.f32.mrb[208].mxu0  ;;  %11162 = vmatpush3.bf16.msra.mxu1 %v12687_v59  ;;  %11226 = vmatpush3.bf16.msra.mxu0 %v12688_v15  ;;  %v12693_v59 = vld [vmem:[%s18419_s17 + $0x68] sm:$0xff]  }
0x145a   : > { %v7896_v30 = vadd.f32 %v7895_v55, %v17596_v47  ;;  %v8009_v62 = vadd.f32 %v8008_v51, %v17601_v63  ;;  %v7897_v35 = vpop.f32.mrb[217].mxu1  ;;  %v8010_v21 = vpop.f32.mrb[209].mxu0  ;;  %11163 = vmatprep.subr.bf16.mxu1 %v12689_v26  ;;  %11227 = vmatprep.subr.bf16.mxu0 %v12690_v52  ;;  %v12694_v15 = vld [vmem:[%s18419_s17 + $0xe8] sm:$0xff]  }
0x145b   : > { %v7898_v43 = vadd.f32 %v7897_v35, %v17606_v28  ;;  %v8011_v24 = vadd.f32 %v8010_v21, %v17611_v19  ;;  %v7899_v27 = vpop.f32.mrb[218].mxu1  ;;  %v8012_v18 = vpop.f32.mrb[210].mxu0  ;;  %10607 = vmatmul.mubr.msk.bf16.gmra.mrb[20].mxu1 %vm972_vm0, %v17396_v61  ;;  %10615 = vmatmul.mubr.msk.bf16.gmra.mrb[12].mxu0 %vm972_vm0, %v17396_v61  ;;  %v12695_v61 = vld [vmem:[%s18419_s17 + $0x28] sm:$0xff]  }
0x145c   : > { %v7900_v26 = vadd.f32 %v7899_v27, %v17596_v47  ;;  %v8013_v52 = vadd.f32 %v8012_v18, %v17601_v63  ;;  %v7901_v9 = vpop.f32.mrb[219].mxu1  ;;  %v8014_v46 = vpop.f32.mrb[211].mxu0  ;;  %8345 = vmatprep.mubr.bf16.mxu1 %v13343_v16  ;;  %8458 = vmatprep.mubr.bf16.mxu0 %v13343_v16  ;;  %v12696_v51 = vld [vmem:[%s18419_s17 + $0xa8] sm:$0xff]   ;;  %v8581_v35 = vmax.f32 %v7896_v30, 0.0  ;;  %v8583_v21 = vmax.f32 %v8009_v62, 0.0 }
0x145d   : > { %v7902_v25 = vadd.f32 %v7901_v9, %v17606_v28  ;;  %v8015_v55 = vadd.f32 %v8014_v46, %v17611_v19  ;;  %11164 = vmatpush3.bf16.msra.mxu1 %v12691_v13  ;;  %11228 = vmatpush3.bf16.msra.mxu0 %v12692_v39  ;;  %v12697_v9 = vld [vmem:[%s18419_s17 + $0x70] sm:$0xff]   ;;  %v8582_v39 = vmax.f32 %v7898_v43, 0.0  ;;  %v8584_v46 = vmax.f32 %v8011_v24, 0.0  ;;  %v12701_v24 = vld [vmem:[%s18419_s17 + $0x78] sm:$0xff]  }
0x145e   : > { %v8593_v27 = vmax.f32 %v7900_v26, 0.0  ;;  %v8595_v18 = vmax.f32 %v8013_v52, 0.0  ;;  %11165 = vmatprep.subr.bf16.mxu1 %v12693_v59  ;;  %11229 = vmatprep.subr.bf16.mxu0 %v12694_v15  ;;  %v12698_v13 = vld [vmem:[%s18419_s17 + $0xf0] sm:$0xff]   ;;  %v12704_v26 = vld [vmem:[%s18419_s17 + $0xb8] sm:$0xff]   ;;  %v12707_v52 = vld [vmem:[%s18419_s17 + $0x1c0] sm:$0xff]  }
0x145f   : > { %v8594_v20 = vmax.f32 %v7902_v25, 0.0  ;;  %v8596_v1 = vmax.f32 %v8015_v55, 0.0  ;;  %v12699_v15 = vld [vmem:[%s18419_s17 + $0x30] sm:$0xff]  }
0x1460   : > { %v17765_v60 = vpack.c.bf16 %v8593_v27, %v8581_v35  ;;  %v17767_v30 = vpack.c.bf16 %v8595_v18, %v8583_v21  ;;  %v12700_v43 = vld [vmem:[%s18419_s17 + $0xb0] sm:$0xff]   ;;  %v12717_v21 = vld [vmem:[%s18419_s17 + $0x158] sm:$0xff]  }
0x1461   : > { %v17769_v62 = vpack.c.bf16 %v8594_v20, %v8582_v39  ;;  %v17771_v59 = vpack.c.bf16 %v8596_v1, %v8584_v46  ;;  %11166 = vmatpush3.bf16.msra.mxu1 %v12695_v61  ;;  %11230 = vmatpush3.bf16.msra.mxu0 %v12696_v51  ;;  %v12702_v1 = vld [vmem:[%s18419_s17 + $0xf8] sm:$0xff]   ;;  %v12716_v25 = vld [vmem:[%s18419_s17 + $0x190] sm:$0xff]  }
0x1462   : > { %11167 = vmatprep.subr.bf16.mxu1 %v12697_v9  ;;  %11231 = vmatprep.subr.bf16.mxu0 %v12698_v13  ;;  %v12703_v20 = vld [vmem:[%s18419_s17 + $0x38] sm:$0xff]  }
0x1463   : > { %10608 = vmatmul.mubr.msk.bf16.gmra.mrb[24].mxu1 %vm972_vm0, %v17422_v17  ;;  %10616 = vmatmul.mubr.msk.bf16.gmra.mrb[16].mxu0 %vm972_vm0, %v17422_v17  ;;  %v12705_v17 = vld [vmem:[%s18419_s17 + $0x140] sm:$0xff]   ;;  %v12719_v27 = vld [vmem:[%s18419_s17 + $0x1d8] sm:$0xff]  }
0x1464   : > { %8355 = vmatprep.mubr.bf16.mxu1 %v13343_v16  ;;  %8468 = vmatprep.mubr.bf16.mxu0 %v13343_v16 }
0x1465   : > { %11168 = vmatpush3.bf16.msra.mxu1 %v12699_v15  ;;  %11232 = vmatpush3.bf16.msra.mxu0 %v12700_v43 }
0x1466   : > { %11169 = vmatprep.subr.bf16.mxu1 %v12701_v24  ;;  %11233 = vmatprep.subr.bf16.mxu0 %v12702_v1 }
0x1469   : > { %11170 = vmatpush3.bf16.msra.mxu1 %v12703_v20  ;;  %11234 = vmatpush3.bf16.msra.mxu0 %v12704_v26 }
0x146a   : > { %11283 = vmatprep.subr.bf16.mxu1 %v12705_v17  ;;  %11347 = vmatprep.subr.bf16.mxu0 %v12707_v52 }
0x146b   : > { %10609 = vmatmul.mubr.msk.bf16.gmra.mrb[28].mxu1 %vm972_vm0, %v17451_v31  ;;  %10617 = vmatmul.mubr.msk.bf16.gmra.mrb[20].mxu0 %vm972_vm0, %v17451_v31  ;;  %v12706_v31 = vld [vmem:[%s18419_s17 + $0x100] sm:$0xff]  }
0x146c   : > { %8365 = vmatprep.mubr.bf16.mxu1 %v13343_v16  ;;  %8478 = vmatprep.mubr.bf16.mxu0 %v13343_v16 }
0x1473   : > { %10610 = vmatmul.mubr.msk.bf16.gmra.mrb[32].mxu1 %vm972_vm0, %v17468_v49  ;;  %10618 = vmatmul.mubr.msk.bf16.gmra.mrb[24].mxu0 %vm972_vm0, %v17468_v49  ;;  %v12708_v49 = vld [vmem:[%s18419_s17 + $0x180] sm:$0xff]  }
0x1474   : > { %8375 = vmatprep.mubr.bf16.mxu1 %v13343_v16  ;;  %8488 = vmatprep.mubr.bf16.mxu0 %v13343_v16 }
0x147b   : > { %10611 = vmatmul.mubr.msk.bf16.gmra.mrb[36].mxu1 %vm972_vm0, %v17491_v6  ;;  %10619 = vmatmul.mubr.msk.bf16.gmra.mrb[28].mxu0 %vm972_vm0, %v17491_v6  ;;  %v12711_v6 = vld [vmem:[%s18419_s17 + $0x1c8] sm:$0xff]  }
0x147c   : > { %8385 = vmatprep.mubr.bf16.mxu1 %v13343_v16  ;;  %8498 = vmatprep.mubr.bf16.mxu0 %v13343_v16  ;;  %v12709_v16 = vld [vmem:[%s18419_s17 + $0x148] sm:$0xff]  }
0x1483   : > { %10612 = vmatmul.mubr.msk.bf16.gmra.mrb[40].mxu1 %vm972_vm0, %v17508_v3  ;;  %10620 = vmatmul.mubr.msk.bf16.gmra.mrb[32].mxu0 %vm972_vm0, %v17508_v3  ;;  %v12710_v3 = vld [vmem:[%s18419_s17 + $0x108] sm:$0xff]  }
0x1484   : > { %9597 = vmatprep.mubr.bf16.mxu1 %v17631_v14  ;;  %9694 = vmatprep.mubr.bf16.mxu0 %v17633_v2  ;;  %v12712_v14 = vld [vmem:[%s18419_s17 + $0x188] sm:$0xff]  }
0x148b   : > { %9598 = vmatmul.mubr.bf16.vlgmr.msra.gmra.mrb[44].mxu1 %v17627_v53  ;;  %9695 = vmatmul.mubr.bf16.vlgmr.msra.gmra.mrb[36].mxu0 %v17629_v12  ;;  %v12713_v53 = vld [vmem:[%s18419_s17 + $0x150] sm:$0xff]  }
0x148c   : > { %9605 = vmatprep.mubr.bf16.mxu1 %v17677_v38  ;;  %9702 = vmatprep.mubr.bf16.mxu0 %v17679_v48  ;;  %v12715_v12 = vld [vmem:[%s18419_s17 + $0x1d0] sm:$0xff]  }
0x148d   : > { %11284 = vmatpush3.bf16.msra.mxu1 %v12706_v31  ;;  %11348 = vmatpush3.bf16.msra.mxu0 %v12708_v49  ;;  %v12714_v48 = vld [vmem:[%s18419_s17 + $0x110] sm:$0xff]   ;;  %v12723_v31 = vld [vmem:[%s18419_s17 + $0x1e0] sm:$0xff]  }
0x148e   : > { %11285 = vmatprep.subr.bf16.mxu1 %v12709_v16  ;;  %11349 = vmatprep.subr.bf16.mxu0 %v12711_v6 }
0x1491   : > { %v7905_v2 = vpop.f32.mrb[220].mxu1  ;;  %v8018_v38 = vpop.f32.mrb[212].mxu0  ;;  %11286 = vmatpush3.bf16.msra.mxu1 %v12710_v3  ;;  %11350 = vmatpush3.bf16.msra.mxu0 %v12712_v14 }
0x1492   : > { %v7906_v55 = vadd.f32 %v7905_v2, %v17596_v47  ;;  %v8019_v61 = vadd.f32 %v8018_v38, %v17601_v63  ;;  %v7907_v51 = vpop.f32.mrb[221].mxu1  ;;  %v8020_v35 = vpop.f32.mrb[213].mxu0  ;;  %11287 = vmatprep.subr.bf16.mxu1 %v12713_v53  ;;  %11351 = vmatprep.subr.bf16.mxu0 %v12715_v12 }
0x1493   : > { %v7908_v18 = vadd.f32 %v7907_v51, %v17606_v28  ;;  %v8021_v9 = vadd.f32 %v8020_v35, %v17611_v19  ;;  %v7909_v13 = vpop.f32.mrb[222].mxu1  ;;  %v8022_v39 = vpop.f32.mrb[214].mxu0  ;;  %9606 = vmatmul.mubr.bf16.gmra.mrb[48].mxu1 %v17673_v54  ;;  %9703 = vmatmul.mubr.bf16.gmra.mrb[40].mxu0 %v17675_v29  ;;  %v12718_v54 = vld [vmem:[%s18419_s17 + $0x118] sm:$0xff]  }
0x1494   : > { %v7910_v46 = vadd.f32 %v7909_v13, %v17596_v47  ;;  %v8023_v15 = vadd.f32 %v8022_v39, %v17601_v63  ;;  %v7911_v43 = vpop.f32.mrb[223].mxu1  ;;  %v8024_v24 = vpop.f32.mrb[215].mxu0  ;;  %9613 = vmatprep.mubr.bf16.mxu1 %v17723_v42  ;;  %9710 = vmatprep.mubr.bf16.mxu0 %v17725_v32  ;;  %v12720_v29 = vld [vmem:[%s18419_s17 + $0x198] sm:$0xff]   ;;  %v8605_v26 = vmax.f32 %v7906_v55, 0.0  ;;  %v8607_v17 = vmax.f32 %v8019_v61, 0.0  ;;  %v12721_v32 = vld [vmem:[%s18419_s17 + $0x160] sm:$0xff]  }
0x1495   : > { %v7912_v1 = vadd.f32 %v7911_v43, %v17606_v28  ;;  %v8025_v20 = vadd.f32 %v8024_v24, %v17611_v19  ;;  %11288 = vmatpush3.bf16.msra.mxu1 %v12714_v48  ;;  %11352 = vmatpush3.bf16.msra.mxu0 %v12716_v25  ;;  %v8606_v49 = vmax.f32 %v7908_v18, 0.0  ;;  %v8608_v16 = vmax.f32 %v8021_v9, 0.0  ;;  %v12722_v25 = vld [vmem:[%s18419_s17 + $0x120] sm:$0xff]   ;;  %v12727_v18 = vld [vmem:[%s18419_s17 + $0x1e8] sm:$0xff]  }
0x1496   : > { %v8617_v52 = vmax.f32 %v7910_v46, 0.0  ;;  %v8619_v42 = vmax.f32 %v8023_v15, 0.0  ;;  %11289 = vmatprep.subr.bf16.mxu1 %v12717_v21  ;;  %11353 = vmatprep.subr.bf16.mxu0 %v12719_v27  ;;  %v12724_v55 = vld [vmem:[%s18419_s17 + $0x1a0] sm:$0xff]   ;;  %v12725_v27 = vld [vmem:[%s18419_s17 + $0x168] sm:$0xff]  }
0x1497   : > { %v8618_v6 = vmax.f32 %v7912_v1, 0.0  ;;  %v8620_v3 = vmax.f32 %v8025_v20, 0.0 }
0x1498   : > { %v17891_v14 = vpack.c.bf16 %v8617_v52, %v8605_v26  ;;  %v17893_v53 = vpack.c.bf16 %v8619_v42, %v8607_v17  ;;  %v12731_v52 = vld [vmem:[%s18419_s17 + $0x1f0] sm:$0xff]  }
0x1499   : > { %v8750_v12 = vpack.c.bf16 %v8618_v6, %v8606_v49  ;;  %v8752_v2 = vpack.c.bf16 %v8620_v3, %v8608_v16  ;;  %v7915_v38 = vpop.f32.mrb[224].mxu1  ;;  %v8028_v48 = vpop.f32.mrb[216].mxu0  ;;  %11290 = vmatpush3.bf16.msra.mxu1 %v12718_v54  ;;  %11354 = vmatpush3.bf16.msra.mxu0 %v12720_v29 }
0x149a   : > { %v7916_v61 = vadd.f32 %v7915_v38, %v17596_v47  ;;  %v8029_v51 = vadd.f32 %v8028_v48, %v17601_v63  ;;  %v7917_v35 = vpop.f32.mrb[225].mxu1  ;;  %v8030_v21 = vpop.f32.mrb[217].mxu0  ;;  %11291 = vmatprep.subr.bf16.mxu1 %v12721_v32  ;;  %11355 = vmatprep.subr.bf16.mxu0 %v12723_v31  ;;  %v12730_v48 = vld [vmem:[%s18419_s17 + $0x130] sm:$0xff]  }
0x149b   : > { %v7918_v9 = vadd.f32 %v7917_v35, %v17606_v28  ;;  %v8031_v13 = vadd.f32 %v8030_v21, %v17611_v19  ;;  %v7919_v39 = vpop.f32.mrb[226].mxu1  ;;  %v8032_v46 = vpop.f32.mrb[218].mxu0  ;;  %9614 = vmatmul.mubr.bf16.gmra.mrb[52].mxu1 %v17719_v7  ;;  %9711 = vmatmul.mubr.bf16.gmra.mrb[44].mxu0 %v17721_v4  ;;  %v12726_v7 = vld [vmem:[%s18419_s17 + $0x128] sm:$0xff]   ;;  %v12736_v35 = vld [vmem:[%s18419_s17 + $0x1b8] sm:$0xff]  }
0x149c   : > { %v7920_v15 = vadd.f32 %v7919_v39, %v17596_v47  ;;  %v8033_v43 = vadd.f32 %v8032_v46, %v17601_v63  ;;  %v7921_v24 = vpop.f32.mrb[227].mxu1  ;;  %v8034_v1 = vpop.f32.mrb[219].mxu0  ;;  %9621 = vmatprep.mubr.bf16.mxu1 %v17769_v62  ;;  %9718 = vmatprep.mubr.bf16.mxu0 %v17771_v59  ;;  %v12728_v4 = vld [vmem:[%s18419_s17 + $0x1a8] sm:$0xff]   ;;  %v8629_v29 = vmax.f32 %v7916_v61, 0.0  ;;  %v8631_v26 = vmax.f32 %v8029_v51, 0.0  ;;  %v12729_v59 = vld [vmem:[%s18419_s17 + $0x170] sm:$0xff]  }
0x149d   : > { %v7922_v20 = vadd.f32 %v7921_v24, %v17606_v28  ;;  %v8035_v54 = vadd.f32 %v8034_v1, %v17611_v19  ;;  %11292 = vmatpush3.bf16.msra.mxu1 %v12722_v25  ;;  %11356 = vmatpush3.bf16.msra.mxu0 %v12724_v55  ;;  %v8630_v42 = vmax.f32 %v7918_v9, 0.0  ;;  %v8632_v32 = vmax.f32 %v8031_v13, 0.0  ;;  %v12732_v25 = vld [vmem:[%s18419_s17 + $0x1b0] sm:$0xff]   ;;  %v12733_v55 = vld [vmem:[%s18419_s17 + $0x178] sm:$0xff]  }
0x149e   : > { %v8641_v17 = vmax.f32 %v7920_v15, 0.0  ;;  %v8643_v62 = vmax.f32 %v8033_v43, 0.0  ;;  %11293 = vmatprep.subr.bf16.mxu1 %v12725_v27  ;;  %11357 = vmatprep.subr.bf16.mxu0 %v12727_v18  ;;  %v12735_v61 = vld [vmem:[%s18419_s17 + $0x1f8] sm:$0xff]  }
0x149f   : > { %v8642_v31 = vmax.f32 %v7922_v20, 0.0  ;;  %v8644_v49 = vmax.f32 %v8035_v54, 0.0  ;;  %v12734_v51 = vld [vmem:[%s18419_s17 + $0x138] sm:$0xff]   ;;  %v7645_v54 = vsub.s32 4, %v17576_v33 }
0x14a0   : > { %v8761_v16 = vpack.c.bf16 %v8641_v17, %v8629_v29  ;;  %v8763_v6 = vpack.c.bf16 %v8643_v62, %v8631_v26 }
0x14a1   : > { %v8762_v3 = vpack.c.bf16 %v8642_v31, %v8630_v42  ;;  %v8764_v38 = vpack.c.bf16 %v8644_v49, %v8632_v32  ;;  %11294 = vmatpush3.bf16.msra.mxu1 %v12726_v7  ;;  %11358 = vmatpush3.bf16.msra.mxu0 %v12728_v4  ;;  %v7653_v31 = vsub.s32 6, %v17576_v33 }
0x14a2   : > { %11295 = vmatprep.subr.bf16.mxu1 %v12729_v59  ;;  %11359 = vmatprep.subr.bf16.mxu0 %v12731_v52 }
0x14a3   : > { %9622 = vmatmul.mubr.bf16.gmra.mrb[56].mxu1 %v17765_v60  ;;  %9719 = vmatmul.mubr.bf16.gmra.mrb[48].mxu0 %v17767_v30  ;;  %v12737_v60 = vld [vmem:[%s18419_s17 + $0x240] sm:$0xff]  }
0x14a4   : > { %9629 = vmatprep.mubr.bf16.mxu1 %v8750_v12  ;;  %9726 = vmatprep.mubr.bf16.mxu0 %v8752_v2  ;;  %v12739_v30 = vld [vmem:[%s18419_s17 + $0x2c0] sm:$0xff]  }
0x14a5   : > { %11296 = vmatpush3.bf16.msra.mxu1 %v12730_v48  ;;  %11360 = vmatpush3.bf16.msra.mxu0 %v12732_v25  ;;  %v7657_v48 = vsub.s32 7, %v17576_v33 }
0x14a6   : > { %11297 = vmatprep.subr.bf16.mxu1 %v12733_v55  ;;  %11361 = vmatprep.subr.bf16.mxu0 %v12735_v61 }
0x14a9   : > { %11298 = vmatpush3.bf16.msra.mxu1 %v12734_v51  ;;  %11362 = vmatpush3.bf16.msra.mxu0 %v12736_v35 }
0x14aa   : > { %11411 = vmatprep.subr.bf16.mxu1 %v12737_v60  ;;  %11475 = vmatprep.subr.bf16.mxu0 %v12739_v30 }
0x14ab   : > { %9630 = vmatmul.mubr.bf16.gmra.mrb[60].mxu1 %v17891_v14  ;;  %9727 = vmatmul.mubr.bf16.gmra.mrb[52].mxu0 %v17893_v53 }
0x14ac   : > { %9637 = vmatprep.mubr.bf16.mxu1 %v8762_v3  ;;  %9734 = vmatprep.mubr.bf16.mxu0 %v8764_v38  ;;  %v7649_v38 = vsub.s32 5, %v17576_v33 }
0x14b3   : > { %9638 = vmatmul.mubr.bf16.gmra.mrb[64].mxu1 %v8761_v16  ;;  %9735 = vmatmul.mubr.bf16.gmra.mrb[56].mxu0 %v8763_v6 }
0x14ce   : > { %v7925_v12 = vpop.f32.mrb[228].mxu1  ;;  %v8038_v2 = vpop.f32.mrb[220].mxu0 }
0x14cf   : > { %v7926_v21 = vadd.f32 %v7925_v12, %v17596_v47  ;;  %v8039_v27 = vadd.f32 %v8038_v2, %v17601_v63  ;;  %v7927_v18 = vpop.f32.mrb[229].mxu1  ;;  %v8040_v9 = vpop.f32.mrb[221].mxu0  ;;  %v17976_v2 = vrot.slane %v17587_v0, %v7645_v54 }
0x14d0   : > { %v7928_v13 = vadd.f32 %v7927_v18, %v17606_v28  ;;  %v8041_v39 = vadd.f32 %v8040_v9, %v17611_v19  ;;  %v7929_v46 = vpop.f32.mrb[230].mxu1  ;;  %v8042_v14 = vpop.f32.mrb[222].mxu0 }
0x14d1   : > { %v7930_v53 = vadd.f32 %v7929_v46, %v17596_v47  ;;  %v8043_v15 = vadd.f32 %v8042_v14, %v17601_v63  ;;  %v7931_v43 = vpop.f32.mrb[231].mxu1  ;;  %v8044_v24 = vpop.f32.mrb[223].mxu0  ;;  %v8653_v7 = vmax.f32 %v7926_v21, 0.0  ;;  %v8655_v4 = vmax.f32 %v8039_v27, 0.0 }
0x14d2   : > { %v7932_v1 = vadd.f32 %v7931_v43, %v17606_v28  ;;  %v8045_v20 = vadd.f32 %v8044_v24, %v17611_v19  ;;  %v8654_v17 = vmax.f32 %v7928_v13, 0.0  ;;  %v8656_v62 = vmax.f32 %v8041_v39, 0.0 }
0x14d3   : > { %v8665_v29 = vmax.f32 %v7930_v53, 0.0  ;;  %v8667_v26 = vmax.f32 %v8043_v15, 0.0  ;;  %v17981_v13 = vrot.slane %v17587_v0, %v7653_v31  ;;  %v17986_v14 = vrot.slane %v17587_v0, %v7649_v38 }
0x14d4   : > { %v8666_v59 = vmax.f32 %v7932_v1, 0.0  ;;  %v8668_v52 = vmax.f32 %v8045_v20, 0.0  ;;  %v17989_v53 = vrot.slane %v17587_v0, %v7657_v48 }
0x14d5   : > { %v8773_v42 = vpack.c.bf16 %v8665_v29, %v8653_v7  ;;  %v8775_v32 = vpack.c.bf16 %v8667_v26, %v8655_v4 }
0x14d6   : > { %v8774_v49 = vpack.c.bf16 %v8666_v59, %v8654_v17  ;;  %v8776_v16 = vpack.c.bf16 %v8668_v52, %v8656_v62  ;;  %v7935_v6 = vpop.f32.mrb[232].mxu1  ;;  %v8048_v3 = vpop.f32.mrb[224].mxu0 }
0x14d7   : > { %v7936_v25 = vadd.f32 %v7935_v6, %v17596_v47  ;;  %v8049_v55 = vadd.f32 %v8048_v3, %v17601_v63  ;;  %v7937_v61 = vpop.f32.mrb[233].mxu1  ;;  %v8050_v51 = vpop.f32.mrb[225].mxu0 }
0x14d8   : > { %v7938_v35 = vadd.f32 %v7937_v61, %v17606_v28  ;;  %v8051_v60 = vadd.f32 %v8050_v51, %v17611_v19  ;;  %v7939_v30 = vpop.f32.mrb[234].mxu1  ;;  %v8052_v12 = vpop.f32.mrb[226].mxu0  ;;  %9645 = vmatprep.mubr.bf16.mxu1 %v8774_v49  ;;  %9742 = vmatprep.mubr.bf16.mxu0 %v8776_v16 }
0x14d9   : > { %v7940_v21 = vadd.f32 %v7939_v30, %v17596_v47  ;;  %v8053_v27 = vadd.f32 %v8052_v12, %v17601_v63  ;;  %v7941_v18 = vpop.f32.mrb[235].mxu1  ;;  %v8054_v9 = vpop.f32.mrb[227].mxu0  ;;  %9646 = vmatmul.mubr.bf16.gmra.mrb[68].mxu1 %v8773_v42  ;;  %9743 = vmatmul.mubr.bf16.gmra.mrb[60].mxu0 %v8775_v32  ;;  %v8677_v47 = vmax.f32 %v7936_v25, 0.0  ;;  %v8679_v15 = vmax.f32 %v8049_v55, 0.0 }
0x14da   : > { %v7942_v39 = vadd.f32 %v7941_v18, %v17606_v28  ;;  %v8055_v46 = vadd.f32 %v8054_v9, %v17611_v19  ;;  %v8678_v24 = vmax.f32 %v7938_v35, 0.0  ;;  %v8680_v1 = vmax.f32 %v8051_v60, 0.0 }
0x14db   : > { %v8689_v63 = vmax.f32 %v7940_v21, 0.0  ;;  %v8691_v43 = vmax.f32 %v8053_v27, 0.0 }
0x14dc   : > { %v8690_v20 = vmax.f32 %v7942_v39, 0.0  ;;  %v8692_v54 = vmax.f32 %v8055_v46, 0.0 }
0x14dd   : > { %v8785_v7 = vpack.c.bf16 %v8689_v63, %v8677_v47  ;;  %v8787_v4 = vpack.c.bf16 %v8691_v43, %v8679_v15  ;;  %v12738_v47 = vld [vmem:[%s18419_s17 + $0x200] sm:$0xff]  }
0x14de   : > { %v8786_v29 = vpack.c.bf16 %v8690_v20, %v8678_v24  ;;  %v8788_v28 = vpack.c.bf16 %v8692_v54, %v8680_v1  ;;  %v8091_v26 = vpop.f32.mrb[236].mxu1  ;;  %v8204_v19 = vpop.f32.mrb[228].mxu0  ;;  %v12740_v15 = vld [vmem:[%s18419_s17 + $0x280] sm:$0xff]   ;;  %v12741_v20 = vld [vmem:[%s18419_s17 + $0x248] sm:$0xff]  }
0x14df   : > { %v8092_v17 = vadd.f32 %v8091_v26, %v17976_v2  ;;  %v8205_v62 = vadd.f32 %v8204_v19, %v17981_v13  ;;  %v8093_v0 = vpop.f32.mrb[237].mxu1  ;;  %v8206_v59 = vpop.f32.mrb[229].mxu0  ;;  %v12743_v54 = vld [vmem:[%s18419_s17 + $0x2c8] sm:$0xff]  }
0x14e0   : > { %v8094_v52 = vadd.f32 %v8093_v0, %v17986_v14  ;;  %v8207_v42 = vadd.f32 %v8206_v59, %v17989_v53  ;;  %v8095_v32 = vpop.f32.mrb[238].mxu1  ;;  %v8208_v31 = vpop.f32.mrb[230].mxu0  ;;  %9653 = vmatprep.mubr.bf16.mxu1 %v8786_v29  ;;  %9750 = vmatprep.mubr.bf16.mxu0 %v8788_v28 }
0x14e1   : > { %v8096_v49 = vadd.f32 %v8095_v32, %v17976_v2  ;;  %v8209_v16 = vadd.f32 %v8208_v31, %v17981_v13  ;;  %v8097_v6 = vpop.f32.mrb[239].mxu1  ;;  %v8210_v3 = vpop.f32.mrb[231].mxu0  ;;  %9654 = vmatmul.mubr.bf16.gmra.mrb[72].mxu1 %v8785_v7  ;;  %9751 = vmatmul.mubr.bf16.gmra.mrb[64].mxu0 %v8787_v4  ;;  %v8513_v25 = vmax.f32 %v8092_v17, 0.0  ;;  %v8515_v55 = vmax.f32 %v8205_v62, 0.0 }
0x14e2   : > { %v8098_v38 = vadd.f32 %v8097_v6, %v17986_v14  ;;  %v8211_v48 = vadd.f32 %v8210_v3, %v17989_v53  ;;  %v8514_v35 = vmax.f32 %v8094_v52, 0.0  ;;  %v8516_v60 = vmax.f32 %v8207_v42, 0.0  ;;  %v12742_v52 = vld [vmem:[%s18419_s17 + $0x208] sm:$0xff]   ;;  %v12745_v6 = vld [vmem:[%s18419_s17 + $0x250] sm:$0xff]  }
0x14e3   : > { %v8525_v61 = vmax.f32 %v8096_v49, 0.0  ;;  %v8527_v51 = vmax.f32 %v8209_v16, 0.0  ;;  %v12744_v42 = vld [vmem:[%s18419_s17 + $0x288] sm:$0xff]   ;;  %v12747_v3 = vld [vmem:[%s18419_s17 + $0x2d0] sm:$0xff]  }
0x14e4   : > { %v8526_v30 = vmax.f32 %v8098_v38, 0.0  ;;  %v8528_v12 = vmax.f32 %v8211_v48, 0.0 }
0x14e5   : > { %v8705_v21 = vpack.c.bf16 %v8525_v61, %v8513_v25  ;;  %v8707_v27 = vpack.c.bf16 %v8527_v51, %v8515_v55 }
0x14e6   : > { %v8706_v18 = vpack.c.bf16 %v8526_v30, %v8514_v35  ;;  %v8708_v9 = vpack.c.bf16 %v8528_v12, %v8516_v60  ;;  %v8101_v39 = vpop.f32.mrb[240].mxu1  ;;  %v8214_v46 = vpop.f32.mrb[232].mxu0 }
0x14e7   : > { %v8102_v63 = vadd.f32 %v8101_v39, %v17976_v2  ;;  %v8215_v43 = vadd.f32 %v8214_v46, %v17981_v13  ;;  %v8103_v24 = vpop.f32.mrb[241].mxu1  ;;  %v8216_v1 = vpop.f32.mrb[233].mxu0 }
0x14e8   : > { %v8104_v7 = vadd.f32 %v8103_v24, %v17986_v14  ;;  %v8217_v4 = vadd.f32 %v8216_v1, %v17989_v53  ;;  %v8105_v29 = vpop.f32.mrb[242].mxu1  ;;  %v8218_v28 = vpop.f32.mrb[234].mxu0  ;;  %9791 = vmatprep.mubr.bf16.mxu1 %v8706_v18  ;;  %9888 = vmatprep.mubr.bf16.mxu0 %v8708_v9 }
0x14e9   : > { %v8106_v26 = vadd.f32 %v8105_v29, %v17976_v2  ;;  %v8219_v19 = vadd.f32 %v8218_v28, %v17981_v13  ;;  %v8107_v17 = vpop.f32.mrb[243].mxu1  ;;  %v8220_v62 = vpop.f32.mrb[235].mxu0  ;;  %9792 = vmatmul.mubr.bf16.vlgmr.msra.gmra.mrb[76].mxu1 %v8705_v21  ;;  %9889 = vmatmul.mubr.bf16.vlgmr.msra.gmra.mrb[68].mxu0 %v8707_v27  ;;  %v8537_v32 = vmax.f32 %v8102_v63, 0.0  ;;  %v8539_v31 = vmax.f32 %v8215_v43, 0.0  ;;  %v12746_v21 = vld [vmem:[%s18419_s17 + $0x210] sm:$0xff]  }
0x14ea   : > { %v8108_v0 = vadd.f32 %v8107_v17, %v17986_v14  ;;  %v8221_v59 = vadd.f32 %v8220_v62, %v17989_v53  ;;  %11412 = vmatpush3.bf16.msra.mxu1 %v12738_v47  ;;  %11476 = vmatpush3.bf16.msra.mxu0 %v12740_v15  ;;  %v8538_v38 = vmax.f32 %v8104_v7, 0.0  ;;  %v8540_v48 = vmax.f32 %v8217_v4, 0.0  ;;  %v12748_v27 = vld [vmem:[%s18419_s17 + $0x290] sm:$0xff]   ;;  %v12749_v47 = vld [vmem:[%s18419_s17 + $0x258] sm:$0xff]  }
0x14eb   : > { %v8549_v49 = vmax.f32 %v8106_v26, 0.0  ;;  %v8551_v16 = vmax.f32 %v8219_v19, 0.0  ;;  %11413 = vmatprep.subr.bf16.mxu1 %v12741_v20  ;;  %11477 = vmatprep.subr.bf16.mxu0 %v12743_v54  ;;  %v12751_v15 = vld [vmem:[%s18419_s17 + $0x2d8] sm:$0xff]  }
0x14ec   : > { %v8550_v25 = vmax.f32 %v8108_v0, 0.0  ;;  %v8552_v55 = vmax.f32 %v8221_v59, 0.0  ;;  %v12750_v26 = vld [vmem:[%s18419_s17 + $0x218] sm:$0xff]  }
0x14ed   : > { %v8717_v61 = vpack.c.bf16 %v8549_v49, %v8537_v32  ;;  %v8719_v51 = vpack.c.bf16 %v8551_v16, %v8539_v31  ;;  %v12752_v19 = vld [vmem:[%s18419_s17 + $0x298] sm:$0xff]  }
0x14ee   : > { %v8718_v35 = vpack.c.bf16 %v8550_v25, %v8538_v38  ;;  %v8720_v60 = vpack.c.bf16 %v8552_v55, %v8540_v48  ;;  %v8111_v30 = vpop.f32.mrb[244].mxu1  ;;  %v8224_v12 = vpop.f32.mrb[236].mxu0  ;;  %11414 = vmatpush3.bf16.msra.mxu1 %v12742_v52  ;;  %11478 = vmatpush3.bf16.msra.mxu0 %v12744_v42  ;;  %v12753_v52 = vld [vmem:[%s18419_s17 + $0x260] sm:$0xff]  }
0x14ef   : > { %v8112_v18 = vadd.f32 %v8111_v30, %v17976_v2  ;;  %v8225_v9 = vadd.f32 %v8224_v12, %v17981_v13  ;;  %v8113_v39 = vpop.f32.mrb[245].mxu1  ;;  %v8226_v46 = vpop.f32.mrb[237].mxu0  ;;  %11415 = vmatprep.subr.bf16.mxu1 %v12745_v6  ;;  %11479 = vmatprep.subr.bf16.mxu0 %v12747_v3  ;;  %v12755_v42 = vld [vmem:[%s18419_s17 + $0x2e0] sm:$0xff]  }
0x14f0   : > { %v8114_v63 = vadd.f32 %v8113_v39, %v17986_v14  ;;  %v8227_v43 = vadd.f32 %v8226_v46, %v17989_v53  ;;  %v8115_v24 = vpop.f32.mrb[246].mxu1  ;;  %v8228_v1 = vpop.f32.mrb[238].mxu0  ;;  %9799 = vmatprep.mubr.bf16.mxu1 %v8718_v35  ;;  %9896 = vmatprep.mubr.bf16.mxu0 %v8720_v60 }
0x14f1   : > { %v8116_v20 = vadd.f32 %v8115_v24, %v17976_v2  ;;  %v8229_v54 = vadd.f32 %v8228_v1, %v17981_v13  ;;  %v8117_v7 = vpop.f32.mrb[247].mxu1  ;;  %v8230_v4 = vpop.f32.mrb[239].mxu0  ;;  %9800 = vmatmul.mubr.bf16.gmra.mrb[80].mxu1 %v8717_v61  ;;  %9897 = vmatmul.mubr.bf16.gmra.mrb[72].mxu0 %v8719_v51  ;;  %v8561_v17 = vmax.f32 %v8112_v18, 0.0  ;;  %v8563_v62 = vmax.f32 %v8225_v9, 0.0  ;;  %v12754_v61 = vld [vmem:[%s18419_s17 + $0x220] sm:$0xff]  }
0x14f2   : > { %v8118_v29 = vadd.f32 %v8117_v7, %v17986_v14  ;;  %v8231_v28 = vadd.f32 %v8230_v4, %v17989_v53  ;;  %11416 = vmatpush3.bf16.msra.mxu1 %v12746_v21  ;;  %11480 = vmatpush3.bf16.msra.mxu0 %v12748_v27  ;;  %v8562_v32 = vmax.f32 %v8114_v63, 0.0  ;;  %v8564_v31 = vmax.f32 %v8227_v43, 0.0  ;;  %v12756_v51 = vld [vmem:[%s18419_s17 + $0x2a0] sm:$0xff]   ;;  %v12757_v21 = vld [vmem:[%s18419_s17 + $0x268] sm:$0xff]  }
0x14f3   : > { %v8573_v0 = vmax.f32 %v8116_v20, 0.0  ;;  %v8575_v59 = vmax.f32 %v8229_v54, 0.0  ;;  %11417 = vmatprep.subr.bf16.mxu1 %v12749_v47  ;;  %11481 = vmatprep.subr.bf16.mxu0 %v12751_v15  ;;  %v12759_v27 = vld [vmem:[%s18419_s17 + $0x2e8] sm:$0xff]  }
0x14f4   : > { %v8574_v49 = vmax.f32 %v8118_v29, 0.0  ;;  %v8576_v16 = vmax.f32 %v8231_v28, 0.0  ;;  %v12758_v20 = vld [vmem:[%s18419_s17 + $0x228] sm:$0xff]  }
0x14f5   : > { %v8729_v6 = vpack.c.bf16 %v8573_v0, %v8561_v17  ;;  %v8731_v3 = vpack.c.bf16 %v8575_v59, %v8563_v62  ;;  %v12760_v54 = vld [vmem:[%s18419_s17 + $0x2a8] sm:$0xff]  }
0x14f6   : > { %v8730_v38 = vpack.c.bf16 %v8574_v49, %v8562_v32  ;;  %v8732_v48 = vpack.c.bf16 %v8576_v16, %v8564_v31  ;;  %v8121_v25 = vpop.f32.mrb[248].mxu1  ;;  %v8234_v55 = vpop.f32.mrb[240].mxu0  ;;  %11418 = vmatpush3.bf16.msra.mxu1 %v12750_v26  ;;  %11482 = vmatpush3.bf16.msra.mxu0 %v12752_v19  ;;  %v12761_v26 = vld [vmem:[%s18419_s17 + $0x270] sm:$0xff]  }
0x14f7   : > { %v8122_v35 = vadd.f32 %v8121_v25, %v17976_v2  ;;  %v8235_v60 = vadd.f32 %v8234_v55, %v17981_v13  ;;  %v8123_v30 = vpop.f32.mrb[249].mxu1  ;;  %v8236_v12 = vpop.f32.mrb[241].mxu0  ;;  %11419 = vmatprep.subr.bf16.mxu1 %v12753_v52  ;;  %11483 = vmatprep.subr.bf16.mxu0 %v12755_v42  ;;  %v12763_v19 = vld [vmem:[%s18419_s17 + $0x2f0] sm:$0xff]  }
0x14f8   : > { %v8124_v18 = vadd.f32 %v8123_v30, %v17986_v14  ;;  %v8237_v9 = vadd.f32 %v8236_v12, %v17989_v53  ;;  %v8125_v39 = vpop.f32.mrb[250].mxu1  ;;  %v8238_v46 = vpop.f32.mrb[242].mxu0  ;;  %9807 = vmatprep.mubr.bf16.mxu1 %v8730_v38  ;;  %9904 = vmatprep.mubr.bf16.mxu0 %v8732_v48 }
0x14f9   : > { %v8126_v47 = vadd.f32 %v8125_v39, %v17976_v2  ;;  %v8239_v15 = vadd.f32 %v8238_v46, %v17981_v13  ;;  %v8127_v63 = vpop.f32.mrb[251].mxu1  ;;  %v8240_v43 = vpop.f32.mrb[243].mxu0  ;;  %9808 = vmatmul.mubr.bf16.gmra.mrb[84].mxu1 %v8729_v6  ;;  %9905 = vmatmul.mubr.bf16.gmra.mrb[76].mxu0 %v8731_v3  ;;  %v8585_v7 = vmax.f32 %v8122_v35, 0.0  ;;  %v8587_v4 = vmax.f32 %v8235_v60, 0.0  ;;  %v12762_v6 = vld [vmem:[%s18419_s17 + $0x230] sm:$0xff]  }
0x14fa   : > { %v8128_v24 = vadd.f32 %v8127_v63, %v17986_v14  ;;  %v8241_v1 = vadd.f32 %v8240_v43, %v17989_v53  ;;  %11420 = vmatpush3.bf16.msra.mxu1 %v12754_v61  ;;  %11484 = vmatpush3.bf16.msra.mxu0 %v12756_v51  ;;  %v8586_v17 = vmax.f32 %v8124_v18, 0.0  ;;  %v8588_v62 = vmax.f32 %v8237_v9, 0.0  ;;  %v12764_v3 = vld [vmem:[%s18419_s17 + $0x2b0] sm:$0xff]   ;;  %v12765_v61 = vld [vmem:[%s18419_s17 + $0x278] sm:$0xff]  }
0x14fb   : > { %v8597_v29 = vmax.f32 %v8126_v47, 0.0  ;;  %v8599_v28 = vmax.f32 %v8239_v15, 0.0  ;;  %11421 = vmatprep.subr.bf16.mxu1 %v12757_v21  ;;  %11485 = vmatprep.subr.bf16.mxu0 %v12759_v27  ;;  %v12767_v51 = vld [vmem:[%s18419_s17 + $0x2f8] sm:$0xff]  }
0x14fc   : > { %v8598_v0 = vmax.f32 %v8128_v24, 0.0  ;;  %v8600_v59 = vmax.f32 %v8241_v1, 0.0  ;;  %v12766_v47 = vld [vmem:[%s18419_s17 + $0x238] sm:$0xff]  }
0x14fd   : > { %v8741_v52 = vpack.c.bf16 %v8597_v29, %v8585_v7  ;;  %v8743_v42 = vpack.c.bf16 %v8599_v28, %v8587_v4  ;;  %v12768_v15 = vld [vmem:[%s18419_s17 + $0x2b8] sm:$0xff]  }
0x14fe   : > { %v8742_v32 = vpack.c.bf16 %v8598_v0, %v8586_v17  ;;  %v8744_v31 = vpack.c.bf16 %v8600_v59, %v8588_v62  ;;  %v8131_v49 = vpop.f32.mrb[252].mxu1  ;;  %v8244_v16 = vpop.f32.mrb[244].mxu0  ;;  %11422 = vmatpush3.bf16.msra.mxu1 %v12758_v20  ;;  %11486 = vmatpush3.bf16.msra.mxu0 %v12760_v54 }
0x14ff   : > { %v8132_v38 = vadd.f32 %v8131_v49, %v17976_v2  ;;  %v8245_v48 = vadd.f32 %v8244_v16, %v17981_v13  ;;  %v8133_v25 = vpop.f32.mrb[253].mxu1  ;;  %v8246_v55 = vpop.f32.mrb[245].mxu0  ;;  %11423 = vmatprep.subr.bf16.mxu1 %v12761_v26  ;;  %11487 = vmatprep.subr.bf16.mxu0 %v12763_v19 }
0x1500   : > { %v8134_v35 = vadd.f32 %v8133_v25, %v17986_v14  ;;  %v8247_v60 = vadd.f32 %v8246_v55, %v17989_v53  ;;  %v8135_v30 = vpop.f32.mrb[254].mxu1  ;;  %v8248_v12 = vpop.f32.mrb[246].mxu0  ;;  %9815 = vmatprep.mubr.bf16.mxu1 %v8742_v32  ;;  %9912 = vmatprep.mubr.bf16.mxu0 %v8744_v31 }
0x1501   : > { %v8136_v21 = vadd.f32 %v8135_v30, %v17976_v2  ;;  %v8249_v27 = vadd.f32 %v8248_v12, %v17981_v13  ;;  %v8137_v18 = vpop.f32.mrb[255].mxu1  ;;  %v8250_v9 = vpop.f32.mrb[247].mxu0  ;;  %9816 = vmatmul.mubr.bf16.gmra.mrb[88].mxu1 %v8741_v52  ;;  %9913 = vmatmul.mubr.bf16.gmra.mrb[80].mxu0 %v8743_v42  ;;  %v8609_v63 = vmax.f32 %v8132_v38, 0.0  ;;  %v8611_v43 = vmax.f32 %v8245_v48, 0.0 }
0x1502   : > { %v8138_v39 = vadd.f32 %v8137_v18, %v17986_v14  ;;  %v8251_v46 = vadd.f32 %v8250_v9, %v17989_v53  ;;  %11424 = vmatpush3.bf16.msra.mxu1 %v12762_v6  ;;  %11488 = vmatpush3.bf16.msra.mxu0 %v12764_v3  ;;  %v8610_v20 = vmax.f32 %v8134_v35, 0.0  ;;  %v8612_v54 = vmax.f32 %v8247_v60, 0.0 }
0x1503   : > { %v8621_v24 = vmax.f32 %v8136_v21, 0.0  ;;  %v8623_v1 = vmax.f32 %v8249_v27, 0.0  ;;  %11425 = vmatprep.subr.bf16.mxu1 %v12765_v61  ;;  %11489 = vmatprep.subr.bf16.mxu0 %v12767_v51 }
0x1504   : > { %v8622_v7 = vmax.f32 %v8138_v39, 0.0  ;;  %v8624_v4 = vmax.f32 %v8251_v46, 0.0 }
0x1505   : > { %v8753_v29 = vpack.c.bf16 %v8621_v24, %v8609_v63  ;;  %v8755_v28 = vpack.c.bf16 %v8623_v1, %v8611_v43 }
0x1506   : > { %v8754_v26 = vpack.c.bf16 %v8622_v7, %v8610_v20  ;;  %v8756_v19 = vpack.c.bf16 %v8624_v4, %v8612_v54  ;;  %v8141_v17 = vpop.f32.mrb[0].mxu1  ;;  %v8254_v62 = vpop.f32.mrb[248].mxu0  ;;  %11426 = vmatpush3.bf16.msra.mxu1 %v12766_v47  ;;  %11490 = vmatpush3.bf16.msra.mxu0 %v12768_v15 }
0x1507   : > { %v8142_v0 = vadd.f32 %v8141_v17, %v17976_v2  ;;  %v8255_v59 = vadd.f32 %v8254_v62, %v17981_v13  ;;  %v8143_v52 = vpop.f32.mrb[1].mxu1  ;;  %v8256_v42 = vpop.f32.mrb[249].mxu0 }
0x1508   : > { %v8144_v32 = vadd.f32 %v8143_v52, %v17986_v14  ;;  %v8257_v31 = vadd.f32 %v8256_v42, %v17989_v53  ;;  %v8145_v49 = vpop.f32.mrb[2].mxu1  ;;  %v8258_v16 = vpop.f32.mrb[250].mxu0  ;;  %9823 = vmatprep.mubr.bf16.mxu1 %v8754_v26  ;;  %9920 = vmatprep.mubr.bf16.mxu0 %v8756_v19 }
0x1509   : > { %v8146_v6 = vadd.f32 %v8145_v49, %v17976_v2  ;;  %v8259_v3 = vadd.f32 %v8258_v16, %v17981_v13  ;;  %v8147_v38 = vpop.f32.mrb[3].mxu1  ;;  %v8260_v48 = vpop.f32.mrb[251].mxu0  ;;  %9824 = vmatmul.mubr.bf16.gmra.mrb[92].mxu1 %v8753_v29  ;;  %9921 = vmatmul.mubr.bf16.gmra.mrb[84].mxu0 %v8755_v28  ;;  %v8633_v61 = vmax.f32 %v8142_v0, 0.0  ;;  %v8635_v51 = vmax.f32 %v8255_v59, 0.0 }
0x150a   : > { %v8148_v25 = vadd.f32 %v8147_v38, %v17986_v14  ;;  %v8261_v55 = vadd.f32 %v8260_v48, %v17989_v53  ;;  %v8634_v30 = vmax.f32 %v8144_v32, 0.0  ;;  %v8636_v12 = vmax.f32 %v8257_v31, 0.0  ;;  %v7624_v38 = vld [vmem:[%s18418_s16 + $0x8] sm:$0xf] }
0x150b   : > { %v8645_v35 = vmax.f32 %v8146_v6, 0.0  ;;  %v8647_v60 = vmax.f32 %v8259_v3, 0.0 }
0x150c   : > { %v8646_v21 = vmax.f32 %v8148_v25, 0.0  ;;  %v8648_v27 = vmax.f32 %v8261_v55, 0.0 }
0x150d   : > { %v8765_v18 = vpack.c.bf16 %v8645_v35, %v8633_v61  ;;  %v8767_v9 = vpack.c.bf16 %v8647_v60, %v8635_v51 }
0x150e   : > { %v8766_v39 = vpack.c.bf16 %v8646_v21, %v8634_v30  ;;  %v8768_v46 = vpack.c.bf16 %v8648_v27, %v8636_v12  ;;  %v8151_v47 = vpop.f32.mrb[4].mxu1  ;;  %v8264_v15 = vpop.f32.mrb[252].mxu0 }
0x150f   : > { %v8152_v63 = vadd.f32 %v8151_v47, %v17976_v2  ;;  %v8265_v43 = vadd.f32 %v8264_v15, %v17981_v13  ;;  %v8153_v24 = vpop.f32.mrb[5].mxu1  ;;  %v8266_v1 = vpop.f32.mrb[253].mxu0 }
0x1510   : > { %v8154_v20 = vadd.f32 %v8153_v24, %v17986_v14  ;;  %v8267_v54 = vadd.f32 %v8266_v1, %v17989_v53  ;;  %v8155_v7 = vpop.f32.mrb[6].mxu1  ;;  %v8268_v4 = vpop.f32.mrb[254].mxu0  ;;  %9831 = vmatprep.mubr.bf16.mxu1 %v8766_v39  ;;  %9928 = vmatprep.mubr.bf16.mxu0 %v8768_v46 }
0x1511   : > { %v8156_v29 = vadd.f32 %v8155_v7, %v17976_v2  ;;  %v8269_v28 = vadd.f32 %v8268_v4, %v17981_v13  ;;  %v8157_v26 = vpop.f32.mrb[7].mxu1  ;;  %v8270_v19 = vpop.f32.mrb[255].mxu0  ;;  %9832 = vmatmul.mubr.bf16.gmra.mrb[96].mxu1 %v8765_v18  ;;  %9929 = vmatmul.mubr.bf16.gmra.mrb[88].mxu0 %v8767_v9  ;;  %v8657_v0 = vmax.f32 %v8152_v63, 0.0  ;;  %v8659_v59 = vmax.f32 %v8265_v43, 0.0 }
0x1512   : > { %v8158_v17 = vadd.f32 %v8157_v26, %v17986_v14  ;;  %v8271_v62 = vadd.f32 %v8270_v19, %v17989_v53  ;;  %v8658_v32 = vmax.f32 %v8154_v20, 0.0  ;;  %v8660_v31 = vmax.f32 %v8267_v54, 0.0 }
0x1513   : > { %v8669_v52 = vmax.f32 %v8156_v29, 0.0  ;;  %v8671_v42 = vmax.f32 %v8269_v28, 0.0  ;;  %v18146_v9 = vrot.slane %v7624_v38, %v7629_v40  ;;  %v19056_v63 = vsub.s32 2, %v17576_v33 }
0x1514   : > { %v8670_v49 = vmax.f32 %v8158_v17, 0.0  ;;  %v8672_v16 = vmax.f32 %v8271_v62, 0.0  ;;  %v19057_v20 = vsub.s32 1, %v17576_v33 }
0x1515   : > { %v8777_v6 = vpack.c.bf16 %v8669_v52, %v8657_v0  ;;  %v8779_v3 = vpack.c.bf16 %v8671_v42, %v8659_v59  ;;  %v18152_v43 = vrot.slane %v7624_v38, %v19056_v63 }
0x1516   : > { %v8778_v48 = vpack.c.bf16 %v8670_v49, %v8658_v32  ;;  %v8780_v25 = vpack.c.bf16 %v8672_v16, %v8660_v31  ;;  %v8161_v55 = vpop.f32.mrb[8].mxu1  ;;  %v8274_v61 = vpop.f32.mrb[0].mxu0  ;;  %v18158_v40 = vrot.slane %v7624_v38, %v19057_v20 }
0x1517   : > { %v8162_v51 = vadd.f32 %v8161_v55, %v17976_v2  ;;  %v8275_v35 = vadd.f32 %v8274_v61, %v17981_v13  ;;  %v8163_v60 = vpop.f32.mrb[9].mxu1  ;;  %v8276_v30 = vpop.f32.mrb[1].mxu0 }
0x1518   : > { %v8164_v12 = vadd.f32 %v8163_v60, %v17986_v14  ;;  %v8277_v21 = vadd.f32 %v8276_v30, %v17989_v53  ;;  %v8165_v27 = vpop.f32.mrb[10].mxu1  ;;  %v8278_v18 = vpop.f32.mrb[2].mxu0  ;;  %9839 = vmatprep.mubr.bf16.mxu1 %v8778_v48  ;;  %9936 = vmatprep.mubr.bf16.mxu0 %v8780_v25 }
0x1519   : > { %v8166_v39 = vadd.f32 %v8165_v27, %v17976_v2  ;;  %v8279_v46 = vadd.f32 %v8278_v18, %v17981_v13  ;;  %v8167_v47 = vpop.f32.mrb[11].mxu1  ;;  %v8280_v15 = vpop.f32.mrb[3].mxu0  ;;  %9840 = vmatmul.mubr.bf16.gmra.mrb[100].mxu1 %v8777_v6  ;;  %9937 = vmatmul.mubr.bf16.gmra.mrb[92].mxu0 %v8779_v3  ;;  %v19058_v2 = vsub.s32 3, %v17576_v33  ;;  %v8681_v13 = vmax.f32 %v8162_v51, 0.0 }
0x151a   : > { %v8168_v24 = vadd.f32 %v8167_v47, %v17986_v14  ;;  %v8281_v1 = vadd.f32 %v8280_v15, %v17989_v53  ;;  %v8683_v7 = vmax.f32 %v8275_v35, 0.0  ;;  %v8682_v28 = vmax.f32 %v8164_v12, 0.0 }
0x151b   : > { %v18162_v54 = vrot.slane %v7624_v38, %v19058_v2  ;;  %v8693_v4 = vmax.f32 %v8166_v39, 0.0  ;;  %v8695_v29 = vmax.f32 %v8279_v46, 0.0  ;;  %v8684_v26 = vmax.f32 %v8277_v21, 0.0 }
0x151c   : > { %v8694_v19 = vmax.f32 %v8168_v24, 0.0  ;;  %v8696_v17 = vmax.f32 %v8281_v1, 0.0 }
0x151d   : > { %v8789_v62 = vpack.c.bf16 %v8693_v4, %v8681_v13  ;;  %v8791_v14 = vpack.c.bf16 %v8695_v29, %v8683_v7 }
0x151e   : > { %v8790_v0 = vpack.c.bf16 %v8694_v19, %v8682_v28  ;;  %v8792_v53 = vpack.c.bf16 %v8696_v17, %v8684_v26  ;;  %v8317_v59 = vpop.f32.mrb[12].mxu1  ;;  %v8430_v52 = vpop.f32.mrb[4].mxu0 }
0x151f   : > { %v8318_v42 = vadd.f32 %v8317_v59, %v18146_v9  ;;  %v8431_v33 = vadd.f32 %v8430_v52, %v18152_v43  ;;  %v8319_v32 = vpop.f32.mrb[13].mxu1  ;;  %v8432_v31 = vpop.f32.mrb[5].mxu0 }
0x1520   : > { %v8320_v49 = vadd.f32 %v8319_v32, %v18158_v40  ;;  %v8433_v16 = vadd.f32 %v8432_v31, %v18162_v54  ;;  %v8321_v6 = vpop.f32.mrb[14].mxu1  ;;  %v8434_v3 = vpop.f32.mrb[6].mxu0  ;;  %9847 = vmatprep.mubr.bf16.mxu1 %v8790_v0  ;;  %9944 = vmatprep.mubr.bf16.mxu0 %v8792_v53 }
0x1521   : > { %v8322_v38 = vadd.f32 %v8321_v6, %v18146_v9  ;;  %v8435_v48 = vadd.f32 %v8434_v3, %v18152_v43  ;;  %v8323_v25 = vpop.f32.mrb[15].mxu1  ;;  %v8436_v55 = vpop.f32.mrb[7].mxu0  ;;  %9848 = vmatmul.mubr.bf16.gmra.mrb[104].mxu1 %v8789_v62  ;;  %9945 = vmatmul.mubr.bf16.gmra.mrb[96].mxu0 %v8791_v14  ;;  %v8517_v35 = vmax.f32 %v8318_v42, 0.0  ;;  %v8519_v60 = vmax.f32 %v8431_v33, 0.0 }
0x1522   : > { %v8324_v61 = vadd.f32 %v8323_v25, %v18158_v40  ;;  %v8437_v51 = vadd.f32 %v8436_v55, %v18162_v54  ;;  %v8518_v21 = vmax.f32 %v8320_v49, 0.0  ;;  %v8520_v27 = vmax.f32 %v8433_v16, 0.0 }
0x1523   : > { %v8529_v30 = vmax.f32 %v8322_v38, 0.0  ;;  %v8531_v12 = vmax.f32 %v8435_v48, 0.0 }
0x1524   : > { %v8530_v18 = vmax.f32 %v8324_v61, 0.0  ;;  %v8532_v39 = vmax.f32 %v8437_v51, 0.0 }
0x1525   : > { %v8709_v46 = vpack.c.bf16 %v8529_v30, %v8517_v35  ;;  %v8711_v47 = vpack.c.bf16 %v8531_v12, %v8519_v60 }
0x1526   : > { %v8710_v15 = vpack.c.bf16 %v8530_v18, %v8518_v21  ;;  %v8712_v63 = vpack.c.bf16 %v8532_v39, %v8520_v27  ;;  %v8327_v24 = vpop.f32.mrb[16].mxu1  ;;  %v8440_v1 = vpop.f32.mrb[8].mxu0 }
0x1527   : > { %v8328_v20 = vadd.f32 %v8327_v24, %v18146_v9  ;;  %v8441_v2 = vadd.f32 %v8440_v1, %v18152_v43  ;;  %v8329_v13 = vpop.f32.mrb[17].mxu1  ;;  %v8442_v7 = vpop.f32.mrb[9].mxu0 }
0x1528   : > { %v8330_v4 = vadd.f32 %v8329_v13, %v18158_v40  ;;  %v8443_v29 = vadd.f32 %v8442_v7, %v18162_v54  ;;  %v8331_v28 = vpop.f32.mrb[18].mxu1  ;;  %v8444_v26 = vpop.f32.mrb[10].mxu0  ;;  %9985 = vmatprep.mubr.bf16.mxu1 %v8710_v15  ;;  %10082 = vmatprep.mubr.bf16.mxu0 %v8712_v63 }
0x1529   : > { %v8332_v19 = vadd.f32 %v8331_v28, %v18146_v9  ;;  %v8445_v17 = vadd.f32 %v8444_v26, %v18152_v43  ;;  %v8333_v62 = vpop.f32.mrb[19].mxu1  ;;  %v8446_v14 = vpop.f32.mrb[11].mxu0  ;;  %9986 = vmatmul.mubr.bf16.vlgmr.msra.gmra.mrb[108].mxu1 %v8709_v46  ;;  %10083 = vmatmul.mubr.bf16.vlgmr.msra.gmra.mrb[100].mxu0 %v8711_v47  ;;  %v8541_v59 = vmax.f32 %v8328_v20, 0.0  ;;  %v8543_v52 = vmax.f32 %v8441_v2, 0.0 }
0x152a   : > { %v8334_v0 = vadd.f32 %v8333_v62, %v18158_v40  ;;  %v8447_v53 = vadd.f32 %v8446_v14, %v18162_v54  ;;  %v8542_v32 = vmax.f32 %v8330_v4, 0.0  ;;  %v8544_v31 = vmax.f32 %v8443_v29, 0.0 }
0x152b   : > { %v8553_v42 = vmax.f32 %v8332_v19, 0.0  ;;  %v8555_v33 = vmax.f32 %v8445_v17, 0.0 }
0x152c   : > { %v8554_v49 = vmax.f32 %v8334_v0, 0.0  ;;  %v8556_v16 = vmax.f32 %v8447_v53, 0.0 }
0x152d   : > { %v8721_v6 = vpack.c.bf16 %v8553_v42, %v8541_v59  ;;  %v8723_v3 = vpack.c.bf16 %v8555_v33, %v8543_v52 }
0x152e   : > { %v8722_v38 = vpack.c.bf16 %v8554_v49, %v8542_v32  ;;  %v8724_v48 = vpack.c.bf16 %v8556_v16, %v8544_v31  ;;  %v8337_v25 = vpop.f32.mrb[20].mxu1  ;;  %v8450_v55 = vpop.f32.mrb[12].mxu0 }
0x152f   : > { %v8338_v61 = vadd.f32 %v8337_v25, %v18146_v9  ;;  %v8451_v51 = vadd.f32 %v8450_v55, %v18152_v43  ;;  %v8339_v35 = vpop.f32.mrb[21].mxu1  ;;  %v8452_v60 = vpop.f32.mrb[13].mxu0 }
0x1530   : > { %v8340_v30 = vadd.f32 %v8339_v35, %v18158_v40  ;;  %v8453_v12 = vadd.f32 %v8452_v60, %v18162_v54  ;;  %v8341_v21 = vpop.f32.mrb[22].mxu1  ;;  %v8454_v27 = vpop.f32.mrb[14].mxu0  ;;  %9993 = vmatprep.mubr.bf16.mxu1 %v8722_v38  ;;  %10090 = vmatprep.mubr.bf16.mxu0 %v8724_v48 }
0x1531   : > { %v8342_v18 = vadd.f32 %v8341_v21, %v18146_v9  ;;  %v8455_v39 = vadd.f32 %v8454_v27, %v18152_v43  ;;  %v8343_v46 = vpop.f32.mrb[23].mxu1  ;;  %v8456_v47 = vpop.f32.mrb[15].mxu0  ;;  %9994 = vmatmul.mubr.bf16.gmra.mrb[112].mxu1 %v8721_v6  ;;  %10091 = vmatmul.mubr.bf16.gmra.mrb[104].mxu0 %v8723_v3  ;;  %v8565_v24 = vmax.f32 %v8338_v61, 0.0  ;;  %v8567_v1 = vmax.f32 %v8451_v51, 0.0 }
0x1532   : > { %v8344_v15 = vadd.f32 %v8343_v46, %v18158_v40  ;;  %v8457_v63 = vadd.f32 %v8456_v47, %v18162_v54  ;;  %v8566_v13 = vmax.f32 %v8340_v30, 0.0  ;;  %v8568_v7 = vmax.f32 %v8453_v12, 0.0 }
0x1533   : > { %v8577_v20 = vmax.f32 %v8342_v18, 0.0  ;;  %v8579_v2 = vmax.f32 %v8455_v39, 0.0 }
0x1534   : > { %v8578_v4 = vmax.f32 %v8344_v15, 0.0  ;;  %v8580_v29 = vmax.f32 %v8457_v63, 0.0 }
0x1535   : > { %v8733_v28 = vpack.c.bf16 %v8577_v20, %v8565_v24  ;;  %v8735_v26 = vpack.c.bf16 %v8579_v2, %v8567_v1 }
0x1536   : > { %v8734_v19 = vpack.c.bf16 %v8578_v4, %v8566_v13  ;;  %v8736_v17 = vpack.c.bf16 %v8580_v29, %v8568_v7  ;;  %v8347_v62 = vpop.f32.mrb[24].mxu1  ;;  %v8460_v14 = vpop.f32.mrb[16].mxu0 }
0x1537   : > { %v8348_v0 = vadd.f32 %v8347_v62, %v18146_v9  ;;  %v8461_v53 = vadd.f32 %v8460_v14, %v18152_v43  ;;  %v8349_v59 = vpop.f32.mrb[25].mxu1  ;;  %v8462_v52 = vpop.f32.mrb[17].mxu0 }
0x1538   : > { %v8350_v42 = vadd.f32 %v8349_v59, %v18158_v40  ;;  %v8463_v33 = vadd.f32 %v8462_v52, %v18162_v54  ;;  %v8351_v32 = vpop.f32.mrb[26].mxu1  ;;  %v8464_v31 = vpop.f32.mrb[18].mxu0  ;;  %10001 = vmatprep.mubr.bf16.mxu1 %v8734_v19  ;;  %10098 = vmatprep.mubr.bf16.mxu0 %v8736_v17 }
0x1539   : > { %v8352_v49 = vadd.f32 %v8351_v32, %v18146_v9  ;;  %v8465_v16 = vadd.f32 %v8464_v31, %v18152_v43  ;;  %v8353_v6 = vpop.f32.mrb[27].mxu1  ;;  %v8466_v3 = vpop.f32.mrb[19].mxu0  ;;  %10002 = vmatmul.mubr.bf16.gmra.mrb[116].mxu1 %v8733_v28  ;;  %10099 = vmatmul.mubr.bf16.gmra.mrb[108].mxu0 %v8735_v26  ;;  %v8589_v25 = vmax.f32 %v8348_v0, 0.0  ;;  %v8591_v55 = vmax.f32 %v8461_v53, 0.0 }
0x153a   : > { %v8354_v38 = vadd.f32 %v8353_v6, %v18158_v40  ;;  %v8467_v48 = vadd.f32 %v8466_v3, %v18162_v54  ;;  %v8590_v35 = vmax.f32 %v8350_v42, 0.0  ;;  %v8592_v60 = vmax.f32 %v8463_v33, 0.0 }
0x153b   : > { %v8601_v61 = vmax.f32 %v8352_v49, 0.0  ;;  %v8603_v51 = vmax.f32 %v8465_v16, 0.0 }
0x153c   : > { %v8602_v30 = vmax.f32 %v8354_v38, 0.0  ;;  %v8604_v12 = vmax.f32 %v8467_v48, 0.0 }
0x153d   : > { %v8745_v21 = vpack.c.bf16 %v8601_v61, %v8589_v25  ;;  %v8747_v27 = vpack.c.bf16 %v8603_v51, %v8591_v55 }
0x153e   : > { %v8746_v18 = vpack.c.bf16 %v8602_v30, %v8590_v35  ;;  %v8748_v39 = vpack.c.bf16 %v8604_v12, %v8592_v60  ;;  %v8357_v46 = vpop.f32.mrb[28].mxu1  ;;  %v8470_v47 = vpop.f32.mrb[20].mxu0 }
0x153f   : > { %v8358_v15 = vadd.f32 %v8357_v46, %v18146_v9  ;;  %v8471_v63 = vadd.f32 %v8470_v47, %v18152_v43  ;;  %v8359_v24 = vpop.f32.mrb[29].mxu1  ;;  %v8472_v1 = vpop.f32.mrb[21].mxu0 }
0x1540   : > { %v8360_v20 = vadd.f32 %v8359_v24, %v18158_v40  ;;  %v8473_v2 = vadd.f32 %v8472_v1, %v18162_v54  ;;  %v8361_v13 = vpop.f32.mrb[30].mxu1  ;;  %v8474_v7 = vpop.f32.mrb[22].mxu0  ;;  %10009 = vmatprep.mubr.bf16.mxu1 %v8746_v18  ;;  %10106 = vmatprep.mubr.bf16.mxu0 %v8748_v39 }
0x1541   : > { %v8362_v4 = vadd.f32 %v8361_v13, %v18146_v9  ;;  %v8475_v29 = vadd.f32 %v8474_v7, %v18152_v43  ;;  %v8363_v28 = vpop.f32.mrb[31].mxu1  ;;  %v8476_v26 = vpop.f32.mrb[23].mxu0  ;;  %10010 = vmatmul.mubr.bf16.gmra.mrb[120].mxu1 %v8745_v21  ;;  %10107 = vmatmul.mubr.bf16.gmra.mrb[112].mxu0 %v8747_v27  ;;  %v8613_v62 = vmax.f32 %v8358_v15, 0.0  ;;  %v8615_v14 = vmax.f32 %v8471_v63, 0.0 }
0x1542   : > { %v8364_v19 = vadd.f32 %v8363_v28, %v18158_v40  ;;  %v8477_v17 = vadd.f32 %v8476_v26, %v18162_v54  ;;  %v8614_v59 = vmax.f32 %v8360_v20, 0.0  ;;  %v8616_v52 = vmax.f32 %v8473_v2, 0.0 }
0x1543   : > { %v8625_v0 = vmax.f32 %v8362_v4, 0.0  ;;  %v8627_v53 = vmax.f32 %v8475_v29, 0.0 }
0x1544   : > { %v8626_v42 = vmax.f32 %v8364_v19, 0.0  ;;  %v8628_v33 = vmax.f32 %v8477_v17, 0.0 }
0x1545   : > { %v8757_v32 = vpack.c.bf16 %v8625_v0, %v8613_v62  ;;  %v8759_v31 = vpack.c.bf16 %v8627_v53, %v8615_v14 }
0x1546   : > { %v8758_v49 = vpack.c.bf16 %v8626_v42, %v8614_v59  ;;  %v8760_v16 = vpack.c.bf16 %v8628_v33, %v8616_v52  ;;  %v8367_v6 = vpop.f32.mrb[32].mxu1  ;;  %v8480_v3 = vpop.f32.mrb[24].mxu0 }
0x1547   : > { %v8368_v38 = vadd.f32 %v8367_v6, %v18146_v9  ;;  %v8481_v48 = vadd.f32 %v8480_v3, %v18152_v43  ;;  %v8369_v25 = vpop.f32.mrb[33].mxu1  ;;  %v8482_v55 = vpop.f32.mrb[25].mxu0 }
0x1548   : > { %v8370_v61 = vadd.f32 %v8369_v25, %v18158_v40  ;;  %v8483_v51 = vadd.f32 %v8482_v55, %v18162_v54  ;;  %v8371_v35 = vpop.f32.mrb[34].mxu1  ;;  %v8484_v60 = vpop.f32.mrb[26].mxu0  ;;  %10017 = vmatprep.mubr.bf16.mxu1 %v8758_v49  ;;  %10114 = vmatprep.mubr.bf16.mxu0 %v8760_v16 }
0x1549   : > { %v8372_v30 = vadd.f32 %v8371_v35, %v18146_v9  ;;  %v8485_v12 = vadd.f32 %v8484_v60, %v18152_v43  ;;  %v8373_v21 = vpop.f32.mrb[35].mxu1  ;;  %v8486_v27 = vpop.f32.mrb[27].mxu0  ;;  %10018 = vmatmul.mubr.bf16.gmra.mrb[124].mxu1 %v8757_v32  ;;  %10115 = vmatmul.mubr.bf16.gmra.mrb[116].mxu0 %v8759_v31  ;;  %v8637_v46 = vmax.f32 %v8368_v38, 0.0  ;;  %v8639_v47 = vmax.f32 %v8481_v48, 0.0 }
0x154a   : > { %v8374_v18 = vadd.f32 %v8373_v21, %v18158_v40  ;;  %v8487_v39 = vadd.f32 %v8486_v27, %v18162_v54  ;;  %v8638_v24 = vmax.f32 %v8370_v61, 0.0  ;;  %v8640_v1 = vmax.f32 %v8483_v51, 0.0 }
0x154b   : > { %v8649_v15 = vmax.f32 %v8372_v30, 0.0  ;;  %v8651_v63 = vmax.f32 %v8485_v12, 0.0 }
0x154c   : > { %v8650_v20 = vmax.f32 %v8374_v18, 0.0  ;;  %v8652_v2 = vmax.f32 %v8487_v39, 0.0 }
0x154d   : > { %v8769_v13 = vpack.c.bf16 %v8649_v15, %v8637_v46  ;;  %v8771_v7 = vpack.c.bf16 %v8651_v63, %v8639_v47 }
0x154e   : > { %v8770_v4 = vpack.c.bf16 %v8650_v20, %v8638_v24  ;;  %v8772_v29 = vpack.c.bf16 %v8652_v2, %v8640_v1  ;;  %v8377_v28 = vpop.f32.mrb[36].mxu1  ;;  %v8490_v26 = vpop.f32.mrb[28].mxu0 }
0x154f   : > { %v8378_v19 = vadd.f32 %v8377_v28, %v18146_v9  ;;  %v8491_v17 = vadd.f32 %v8490_v26, %v18152_v43  ;;  %v8379_v62 = vpop.f32.mrb[37].mxu1  ;;  %v8492_v14 = vpop.f32.mrb[29].mxu0 }
0x1550   : > { %v8380_v0 = vadd.f32 %v8379_v62, %v18158_v40  ;;  %v8493_v53 = vadd.f32 %v8492_v14, %v18162_v54  ;;  %v8381_v59 = vpop.f32.mrb[38].mxu1  ;;  %v8494_v52 = vpop.f32.mrb[30].mxu0  ;;  %10025 = vmatprep.mubr.bf16.mxu1 %v8770_v4  ;;  %10122 = vmatprep.mubr.bf16.mxu0 %v8772_v29 }
0x1551   : > { %v8382_v42 = vadd.f32 %v8381_v59, %v18146_v9  ;;  %v8495_v33 = vadd.f32 %v8494_v52, %v18152_v43  ;;  %v8383_v32 = vpop.f32.mrb[39].mxu1  ;;  %v8496_v31 = vpop.f32.mrb[31].mxu0  ;;  %10026 = vmatmul.mubr.bf16.gmra.mrb[128].mxu1 %v8769_v13  ;;  %10123 = vmatmul.mubr.bf16.gmra.mrb[120].mxu0 %v8771_v7  ;;  %v8661_v6 = vmax.f32 %v8378_v19, 0.0  ;;  %v8663_v3 = vmax.f32 %v8491_v17, 0.0 }
0x1552   : > { %v8384_v49 = vadd.f32 %v8383_v32, %v18158_v40  ;;  %v8497_v16 = vadd.f32 %v8496_v31, %v18162_v54  ;;  %v8662_v25 = vmax.f32 %v8380_v0, 0.0  ;;  %v8664_v55 = vmax.f32 %v8493_v53, 0.0 }
0x1553   : > { %v8673_v38 = vmax.f32 %v8382_v42, 0.0  ;;  %v8675_v48 = vmax.f32 %v8495_v33, 0.0 }
0x1554   : > { %v8674_v61 = vmax.f32 %v8384_v49, 0.0  ;;  %v8676_v51 = vmax.f32 %v8497_v16, 0.0 }
0x1555   : > { %v8781_v35 = vpack.c.bf16 %v8673_v38, %v8661_v6  ;;  %v8783_v60 = vpack.c.bf16 %v8675_v48, %v8663_v3 }
0x1556   : > { %v8782_v30 = vpack.c.bf16 %v8674_v61, %v8662_v25  ;;  %v8784_v12 = vpack.c.bf16 %v8676_v51, %v8664_v55  ;;  %v8387_v21 = vpop.f32.mrb[40].mxu1  ;;  %v8500_v27 = vpop.f32.mrb[32].mxu0 }
0x1557   : > { %v8388_v18 = vadd.f32 %v8387_v21, %v18146_v9  ;;  %v8501_v39 = vadd.f32 %v8500_v27, %v18152_v43  ;;  %v8389_v46 = vpop.f32.mrb[41].mxu1  ;;  %v8502_v47 = vpop.f32.mrb[33].mxu0 }
0x1558   : > { %v8390_v15 = vadd.f32 %v8389_v46, %v18158_v40  ;;  %v8503_v63 = vadd.f32 %v8502_v47, %v18162_v54  ;;  %v8391_v24 = vpop.f32.mrb[42].mxu1  ;;  %v8504_v1 = vpop.f32.mrb[34].mxu0  ;;  %10033 = vmatprep.mubr.bf16.mxu1 %v8782_v30  ;;  %10130 = vmatprep.mubr.bf16.mxu0 %v8784_v12 }
0x1559   : > { %v8392_v20 = vadd.f32 %v8391_v24, %v18146_v9  ;;  %v8505_v2 = vadd.f32 %v8504_v1, %v18152_v43  ;;  %v8393_v13 = vpop.f32.mrb[43].mxu1  ;;  %v8506_v7 = vpop.f32.mrb[35].mxu0  ;;  %10034 = vmatmul.mubr.bf16.gmra.mrb[132].mxu1 %v8781_v35  ;;  %10131 = vmatmul.mubr.bf16.gmra.mrb[124].mxu0 %v8783_v60  ;;  %v8685_v28 = vmax.f32 %v8388_v18, 0.0  ;;  %v8687_v26 = vmax.f32 %v8501_v39, 0.0 }
0x155a   : > { %v8394_v4 = vadd.f32 %v8393_v13, %v18158_v40  ;;  %v8507_v29 = vadd.f32 %v8506_v7, %v18162_v54  ;;  %v8686_v62 = vmax.f32 %v8390_v15, 0.0  ;;  %v8688_v14 = vmax.f32 %v8503_v63, 0.0 }
0x155b   : > { %v8697_v19 = vmax.f32 %v8392_v20, 0.0  ;;  %v8699_v17 = vmax.f32 %v8505_v2, 0.0 }
0x155c   : > { %v8698_v0 = vmax.f32 %v8394_v4, 0.0  ;;  %v8700_v53 = vmax.f32 %v8507_v29, 0.0 }
0x155d   : > { %v8793_v59 = vpack.c.bf16 %v8697_v19, %v8685_v28  ;;  %v8795_v9 = vpack.c.bf16 %v8699_v17, %v8687_v26 }
0x155e   : > { %v8794_v52 = vpack.c.bf16 %v8698_v0, %v8686_v62  ;;  %v8796_v43 = vpack.c.bf16 %v8700_v53, %v8688_v14  ;;  %v11171_v42 = vpop.f32.mrb[44].mxu1  ;;  %v11235_v33 = vpop.f32.mrb[36].mxu0 }
0x155f   : > { %v11172_v32 = vpop.f32.mrb[45].mxu1  ;;  %v11236_v31 = vpop.f32.mrb[37].mxu0 }
0x1560   : > { %v11173_v49 = vadd.f32 %v11172_v32, %v11171_v42  ;;  %v11237_v40 = vadd.f32 %v11236_v31, %v11235_v33  ;;  %v11174_v16 = vpop.f32.mrb[46].mxu1  ;;  %v11238_v54 = vpop.f32.mrb[38].mxu0  ;;  %10041 = vmatprep.mubr.bf16.mxu1 %v8794_v52  ;;  %10138 = vmatprep.mubr.bf16.mxu0 %v8796_v43 }
0x1561   : > { %v11175_v6 = vpop.f32.mrb[47].mxu1  ;;  %v11239_v3 = vpop.f32.mrb[39].mxu0  ;;  %10042 = vmatmul.mubr.bf16.gmra.mrb[136].mxu1 %v8793_v59  ;;  %10139 = vmatmul.mubr.bf16.gmra.mrb[128].mxu0 %v8795_v9 }
0x1562   : > { %v18228_v38 = vadd.f32 %v11237_v40, %v11173_v49  ;;  %v11176_v48 = vadd.f32 %v11175_v6, %v11174_v16  ;;  %v11240_v25 = vadd.f32 %v11239_v3, %v11238_v54 }
0x1564   : > { %v18230_v55 = vadd.f32 %v11240_v25, %v11176_v48 }
0x1566   : > { %v11177_v61 = vpop.f32.mrb[48].mxu1  ;;  %v11241_v51 = vpop.f32.mrb[40].mxu0 }
0x1567   : > { %v11178_v35 = vpop.f32.mrb[49].mxu1  ;;  %v11242_v60 = vpop.f32.mrb[41].mxu0 }
0x1568   : > { %v11179_v30 = vadd.f32 %v11178_v35, %v11177_v61  ;;  %v11243_v12 = vadd.f32 %v11242_v60, %v11241_v51  ;;  %v11180_v21 = vpop.f32.mrb[50].mxu1  ;;  %v11244_v27 = vpop.f32.mrb[42].mxu0 }
0x1569   : > { %v11181_v18 = vpop.f32.mrb[51].mxu1  ;;  %v11245_v39 = vpop.f32.mrb[43].mxu0 }
0x156a   : > { %v18232_v46 = vadd.f32 %v11243_v12, %v11179_v30  ;;  %v11182_v47 = vadd.f32 %v11181_v18, %v11180_v21  ;;  %v11246_v15 = vadd.f32 %v11245_v39, %v11244_v27 }
0x156c   : > { %v18234_v63 = vadd.f32 %v11246_v15, %v11182_v47 }
0x156e   : > { %v11183_v24 = vpop.f32.mrb[52].mxu1  ;;  %v11247_v1 = vpop.f32.mrb[44].mxu0 }
0x156f   : > { %v11184_v20 = vpop.f32.mrb[53].mxu1  ;;  %v11248_v2 = vpop.f32.mrb[45].mxu0 }
0x1570   : > { %v11185_v13 = vadd.f32 %v11184_v20, %v11183_v24  ;;  %v11249_v7 = vadd.f32 %v11248_v2, %v11247_v1  ;;  %v11186_v4 = vpop.f32.mrb[54].mxu1  ;;  %v11250_v29 = vpop.f32.mrb[46].mxu0 }
0x1571   : > { %v11187_v28 = vpop.f32.mrb[55].mxu1  ;;  %v11251_v26 = vpop.f32.mrb[47].mxu0 }
0x1572   : > { %v18236_v19 = vadd.f32 %v11249_v7, %v11185_v13  ;;  %v11188_v17 = vadd.f32 %v11187_v28, %v11186_v4  ;;  %v11252_v62 = vadd.f32 %v11251_v26, %v11250_v29 }
0x1574   : > { %v18238_v14 = vadd.f32 %v11252_v62, %v11188_v17 }
0x1576   : > { %v11189_v0 = vpop.f32.mrb[56].mxu1  ;;  %v11253_v53 = vpop.f32.mrb[48].mxu0 }
0x1577   : > { %v11190_v59 = vpop.f32.mrb[57].mxu1  ;;  %v11254_v9 = vpop.f32.mrb[49].mxu0 }
0x1578   : > { %v11191_v52 = vadd.f32 %v11190_v59, %v11189_v0  ;;  %v11255_v43 = vadd.f32 %v11254_v9, %v11253_v53  ;;  %v11192_v42 = vpop.f32.mrb[58].mxu1  ;;  %v11256_v33 = vpop.f32.mrb[50].mxu0 }
0x1579   : > { %v11193_v32 = vpop.f32.mrb[59].mxu1  ;;  %v11257_v31 = vpop.f32.mrb[51].mxu0 }
0x157a   : > { %v18240_v49 = vadd.f32 %v11255_v43, %v11191_v52  ;;  %v11194_v40 = vadd.f32 %v11193_v32, %v11192_v42  ;;  %v11258_v16 = vadd.f32 %v11257_v31, %v11256_v33 }
0x157c   : > { %v18242_v54 = vadd.f32 %v11258_v16, %v11194_v40 }
0x157e   : > { %v11195_v6 = vpop.f32.mrb[60].mxu1  ;;  %v11259_v3 = vpop.f32.mrb[52].mxu0 }
0x157f   : > { %v11196_v48 = vpop.f32.mrb[61].mxu1  ;;  %v11260_v25 = vpop.f32.mrb[53].mxu0 }
0x1580   : > { %v11197_v61 = vadd.f32 %v11196_v48, %v11195_v6  ;;  %v11261_v51 = vadd.f32 %v11260_v25, %v11259_v3  ;;  %v11198_v35 = vpop.f32.mrb[62].mxu1  ;;  %v11262_v60 = vpop.f32.mrb[54].mxu0 }
0x1581   : > { %v11199_v30 = vpop.f32.mrb[63].mxu1  ;;  %v11263_v12 = vpop.f32.mrb[55].mxu0 }
0x1582   : > { %v18244_v21 = vadd.f32 %v11261_v51, %v11197_v61  ;;  %v11200_v27 = vadd.f32 %v11199_v30, %v11198_v35  ;;  %v11264_v18 = vadd.f32 %v11263_v12, %v11262_v60 }
0x1584   : > { %v18246_v39 = vadd.f32 %v11264_v18, %v11200_v27 }
0x1586   : > { %v11201_v47 = vpop.f32.mrb[64].mxu1  ;;  %v11265_v15 = vpop.f32.mrb[56].mxu0 }
0x1587   : > { %v11202_v24 = vpop.f32.mrb[65].mxu1  ;;  %v11266_v1 = vpop.f32.mrb[57].mxu0 }
0x1588   : > { %v11203_v20 = vadd.f32 %v11202_v24, %v11201_v47  ;;  %v11267_v2 = vadd.f32 %v11266_v1, %v11265_v15  ;;  %v11204_v13 = vpop.f32.mrb[66].mxu1  ;;  %v11268_v7 = vpop.f32.mrb[58].mxu0 }
0x1589   : > { %v11205_v4 = vpop.f32.mrb[67].mxu1  ;;  %v11269_v29 = vpop.f32.mrb[59].mxu0 }
0x158a   : > { %v18248_v28 = vadd.f32 %v11267_v2, %v11203_v20  ;;  %v11206_v26 = vadd.f32 %v11205_v4, %v11204_v13  ;;  %v11270_v17 = vadd.f32 %v11269_v29, %v11268_v7 }
0x158c   : > { %v18250_v62 = vadd.f32 %v11270_v17, %v11206_v26 }
0x15ac   : > { %v11207_v0 = vpop.f32.mrb[68].mxu1  ;;  %v11271_v53 = vpop.f32.mrb[60].mxu0 }
0x15ad   : > { %v11208_v59 = vpop.f32.mrb[69].mxu1  ;;  %v11272_v9 = vpop.f32.mrb[61].mxu0 }
0x15ae   : > { %v11209_v52 = vadd.f32 %v11208_v59, %v11207_v0  ;;  %v11273_v43 = vadd.f32 %v11272_v9, %v11271_v53  ;;  %v11210_v42 = vpop.f32.mrb[70].mxu1  ;;  %v11274_v33 = vpop.f32.mrb[62].mxu0 }
0x15af   : > { %v11211_v32 = vpop.f32.mrb[71].mxu1  ;;  %v11275_v31 = vpop.f32.mrb[63].mxu0 }
0x15b0   : > { %v18252_v40 = vadd.f32 %v11273_v43, %v11209_v52  ;;  %v11212_v16 = vadd.f32 %v11211_v32, %v11210_v42  ;;  %v11276_v6 = vadd.f32 %v11275_v31, %v11274_v33 }
0x15b2   : > { %v18254_v3 = vadd.f32 %v11276_v6, %v11212_v16 }
0x15b4   : > { %v11213_v48 = vpop.f32.mrb[72].mxu1  ;;  %v11277_v25 = vpop.f32.mrb[64].mxu0 }
0x15b5   : > { %v11214_v61 = vpop.f32.mrb[73].mxu1  ;;  %v11278_v51 = vpop.f32.mrb[65].mxu0 }
0x15b6   : > { %v11215_v35 = vadd.f32 %v11214_v61, %v11213_v48  ;;  %v11279_v60 = vadd.f32 %v11278_v51, %v11277_v25  ;;  %v11216_v30 = vpop.f32.mrb[74].mxu1  ;;  %v11280_v12 = vpop.f32.mrb[66].mxu0 }
0x15b7   : > { %v11217_v27 = vpop.f32.mrb[75].mxu1  ;;  %v11281_v18 = vpop.f32.mrb[67].mxu0 }
0x15b8   : > { %v18256_v47 = vadd.f32 %v11279_v60, %v11215_v35  ;;  %v11218_v15 = vadd.f32 %v11217_v27, %v11216_v30  ;;  %v11282_v24 = vadd.f32 %v11281_v18, %v11280_v12 }
0x15ba   : > { %v18258_v1 = vadd.f32 %v11282_v24, %v11218_v15 }
0x15bc   : > { %v11299_v20 = vpop.f32.mrb[76].mxu1  ;;  %v11363_v2 = vpop.f32.mrb[68].mxu0 }
0x15bd   : > { %v11300_v13 = vpop.f32.mrb[77].mxu1  ;;  %v11364_v7 = vpop.f32.mrb[69].mxu0 }
0x15be   : > { %v11301_v4 = vadd.f32 %v11300_v13, %v11299_v20  ;;  %v11365_v29 = vadd.f32 %v11364_v7, %v11363_v2  ;;  %v11302_v26 = vpop.f32.mrb[78].mxu1  ;;  %v11366_v17 = vpop.f32.mrb[70].mxu0 }
0x15bf   : > { %v11303_v0 = vpop.f32.mrb[79].mxu1  ;;  %v11367_v53 = vpop.f32.mrb[71].mxu0 }
0x15c0   : > { %v9794_v59 = vadd.f32 %v11301_v4, %v18228_v38  ;;  %v11304_v9 = vadd.f32 %v11303_v0, %v11302_v26  ;;  %v11368_v52 = vadd.f32 %v11367_v53, %v11366_v17 }
0x15c2   : > { %v18261_v43 = vadd.f32 %v11365_v29, %v9794_v59  ;;  %v9797_v42 = vadd.f32 %v11304_v9, %v18230_v55 }
0x15c4   : > { %v18264_v33 = vadd.f32 %v11368_v52, %v9797_v42  ;;  %v11305_v32 = vpop.f32.mrb[80].mxu1  ;;  %v11369_v31 = vpop.f32.mrb[72].mxu0 }
0x15c5   : > { %v11306_v16 = vpop.f32.mrb[81].mxu1  ;;  %v11370_v6 = vpop.f32.mrb[73].mxu0 }
0x15c6   : > { %v11307_v48 = vadd.f32 %v11306_v16, %v11305_v32  ;;  %v11371_v25 = vadd.f32 %v11370_v6, %v11369_v31  ;;  %v11308_v61 = vpop.f32.mrb[82].mxu1  ;;  %v11372_v51 = vpop.f32.mrb[74].mxu0 }
0x15c7   : > { %v11309_v35 = vpop.f32.mrb[83].mxu1  ;;  %v11373_v60 = vpop.f32.mrb[75].mxu0 }
0x15c8   : > { %v9802_v38 = vadd.f32 %v11307_v48, %v18232_v46  ;;  %v11310_v30 = vadd.f32 %v11309_v35, %v11308_v61  ;;  %v11374_v12 = vadd.f32 %v11373_v60, %v11372_v51 }
0x15ca   : > { %v18267_v27 = vadd.f32 %v11371_v25, %v9802_v38  ;;  %v9805_v55 = vadd.f32 %v11310_v30, %v18234_v63 }
0x15cc   : > { %v18270_v18 = vadd.f32 %v11374_v12, %v9805_v55  ;;  %v11311_v15 = vpop.f32.mrb[84].mxu1  ;;  %v11375_v24 = vpop.f32.mrb[76].mxu0 }
0x15cd   : > { %v11312_v20 = vpop.f32.mrb[85].mxu1  ;;  %v11376_v2 = vpop.f32.mrb[77].mxu0 }
0x15ce   : > { %v11313_v13 = vadd.f32 %v11312_v20, %v11311_v15  ;;  %v11377_v7 = vadd.f32 %v11376_v2, %v11375_v24  ;;  %v11314_v4 = vpop.f32.mrb[86].mxu1  ;;  %v11378_v29 = vpop.f32.mrb[78].mxu0 }
0x15cf   : > { %v11315_v26 = vpop.f32.mrb[87].mxu1  ;;  %v11379_v17 = vpop.f32.mrb[79].mxu0 }
0x15d0   : > { %v9810_v46 = vadd.f32 %v11313_v13, %v18236_v19  ;;  %v11316_v0 = vadd.f32 %v11315_v26, %v11314_v4  ;;  %v11380_v53 = vadd.f32 %v11379_v17, %v11378_v29 }
0x15d2   : > { %v18273_v59 = vadd.f32 %v11377_v7, %v9810_v46  ;;  %v9813_v63 = vadd.f32 %v11316_v0, %v18238_v14 }
0x15d4   : > { %v18276_v9 = vadd.f32 %v11380_v53, %v9813_v63  ;;  %v11317_v52 = vpop.f32.mrb[88].mxu1  ;;  %v11381_v42 = vpop.f32.mrb[80].mxu0 }
0x15d5   : > { %v11318_v32 = vpop.f32.mrb[89].mxu1  ;;  %v11382_v31 = vpop.f32.mrb[81].mxu0 }
0x15d6   : > { %v11319_v16 = vadd.f32 %v11318_v32, %v11317_v52  ;;  %v11383_v6 = vadd.f32 %v11382_v31, %v11381_v42  ;;  %v11320_v48 = vpop.f32.mrb[90].mxu1  ;;  %v11384_v25 = vpop.f32.mrb[82].mxu0 }
0x15d7   : > { %v11321_v61 = vpop.f32.mrb[91].mxu1  ;;  %v11385_v51 = vpop.f32.mrb[83].mxu0 }
0x15d8   : > { %v9818_v19 = vadd.f32 %v11319_v16, %v18240_v49  ;;  %v11322_v35 = vadd.f32 %v11321_v61, %v11320_v48  ;;  %v11386_v60 = vadd.f32 %v11385_v51, %v11384_v25 }
0x15da   : > { %v18279_v38 = vadd.f32 %v11383_v6, %v9818_v19  ;;  %v9821_v14 = vadd.f32 %v11322_v35, %v18242_v54 }
0x15dc   : > { %v18282_v30 = vadd.f32 %v11386_v60, %v9821_v14  ;;  %v11323_v12 = vpop.f32.mrb[92].mxu1  ;;  %v11387_v55 = vpop.f32.mrb[84].mxu0 }
0x15dd   : > { %v11324_v15 = vpop.f32.mrb[93].mxu1  ;;  %v11388_v24 = vpop.f32.mrb[85].mxu0 }
0x15de   : > { %v11325_v20 = vadd.f32 %v11324_v15, %v11323_v12  ;;  %v11389_v2 = vadd.f32 %v11388_v24, %v11387_v55  ;;  %v11326_v13 = vpop.f32.mrb[94].mxu1  ;;  %v11390_v7 = vpop.f32.mrb[86].mxu0 }
0x15df   : > { %v11327_v4 = vpop.f32.mrb[95].mxu1  ;;  %v11391_v29 = vpop.f32.mrb[87].mxu0 }
0x15e0   : > { %v9826_v49 = vadd.f32 %v11325_v20, %v18244_v21  ;;  %v11328_v26 = vadd.f32 %v11327_v4, %v11326_v13  ;;  %v11392_v17 = vadd.f32 %v11391_v29, %v11390_v7 }
0x15e2   : > { %v18285_v46 = vadd.f32 %v11389_v2, %v9826_v49  ;;  %v9829_v54 = vadd.f32 %v11328_v26, %v18246_v39 }
0x15e4   : > { %v18288_v0 = vadd.f32 %v11392_v17, %v9829_v54  ;;  %v11329_v53 = vpop.f32.mrb[96].mxu1  ;;  %v11393_v63 = vpop.f32.mrb[88].mxu0 }
0x15e5   : > { %v11330_v52 = vpop.f32.mrb[97].mxu1  ;;  %v11394_v42 = vpop.f32.mrb[89].mxu0 }
0x15e6   : > { %v11331_v32 = vadd.f32 %v11330_v52, %v11329_v53  ;;  %v11395_v31 = vadd.f32 %v11394_v42, %v11393_v63  ;;  %v11332_v16 = vpop.f32.mrb[98].mxu1  ;;  %v11396_v6 = vpop.f32.mrb[90].mxu0 }
0x15e7   : > { %v11333_v48 = vpop.f32.mrb[99].mxu1  ;;  %v11397_v25 = vpop.f32.mrb[91].mxu0 }
0x15e8   : > { %v9834_v21 = vadd.f32 %v11331_v32, %v18248_v28  ;;  %v11334_v61 = vadd.f32 %v11333_v48, %v11332_v16  ;;  %v11398_v51 = vadd.f32 %v11397_v25, %v11396_v6 }
0x15ea   : > { %v18291_v19 = vadd.f32 %v11395_v31, %v9834_v21  ;;  %v9837_v39 = vadd.f32 %v11334_v61, %v18250_v62 }
0x15ec   : > { %v18294_v35 = vadd.f32 %v11398_v51, %v9837_v39  ;;  %v11335_v60 = vpop.f32.mrb[100].mxu1  ;;  %v11399_v14 = vpop.f32.mrb[92].mxu0 }
0x15ed   : > { %v11336_v12 = vpop.f32.mrb[101].mxu1  ;;  %v11400_v55 = vpop.f32.mrb[93].mxu0 }
0x15ee   : > { %v11337_v15 = vadd.f32 %v11336_v12, %v11335_v60  ;;  %v11401_v24 = vadd.f32 %v11400_v55, %v11399_v14  ;;  %v11338_v20 = vpop.f32.mrb[102].mxu1  ;;  %v11402_v2 = vpop.f32.mrb[94].mxu0 }
0x15ef   : > { %v11339_v13 = vpop.f32.mrb[103].mxu1  ;;  %v11403_v7 = vpop.f32.mrb[95].mxu0 }
0x15f0   : > { %v9842_v28 = vadd.f32 %v11337_v15, %v18252_v40  ;;  %v11340_v4 = vadd.f32 %v11339_v13, %v11338_v20  ;;  %v11404_v29 = vadd.f32 %v11403_v7, %v11402_v2 }
0x15f2   : > { %v18297_v49 = vadd.f32 %v11401_v24, %v9842_v28  ;;  %v9845_v62 = vadd.f32 %v11340_v4, %v18254_v3  ;;  %v18314_v4 = vld [vmem:[%s18420_s18] ss:$0 sm:$0xff] }
0x15f4   : > { %v18300_v26 = vadd.f32 %v11404_v29, %v9845_v62  ;;  %v11341_v17 = vpop.f32.mrb[104].mxu1  ;;  %v11405_v54 = vpop.f32.mrb[96].mxu0 }
0x15f5   : > { %v11342_v53 = vpop.f32.mrb[105].mxu1  ;;  %v11406_v63 = vpop.f32.mrb[97].mxu0 }
0x15f6   : > { %v11343_v52 = vadd.f32 %v11342_v53, %v11341_v17  ;;  %v11407_v42 = vadd.f32 %v11406_v63, %v11405_v54  ;;  %v11344_v32 = vpop.f32.mrb[106].mxu1  ;;  %v11408_v31 = vpop.f32.mrb[98].mxu0 }
0x15f7   : > { %v11345_v16 = vpop.f32.mrb[107].mxu1  ;;  %v11409_v6 = vpop.f32.mrb[99].mxu0 }
0x15f8   : > { %v9850_v40 = vadd.f32 %v11343_v52, %v18256_v47  ;;  %v11346_v48 = vadd.f32 %v11345_v16, %v11344_v32  ;;  %v11410_v25 = vadd.f32 %v11409_v6, %v11408_v31 }
0x15fa   : > { %v18303_v21 = vadd.f32 %v11407_v42, %v9850_v40  ;;  %v9853_v3 = vadd.f32 %v11346_v48, %v18258_v1 }
0x15fc   : > { %v18306_v61 = vadd.f32 %v11410_v25, %v9853_v3  ;;  %v11427_v51 = vpop.f32.mrb[108].mxu1  ;;  %v11491_v39 = vpop.f32.mrb[100].mxu0 }
0x15fd   : > { %v11428_v60 = vpop.f32.mrb[109].mxu1  ;;  %v11492_v14 = vpop.f32.mrb[101].mxu0 }
0x15fe   : > { %v11429_v12 = vadd.f32 %v11428_v60, %v11427_v51  ;;  %v11493_v55 = vadd.f32 %v11492_v14, %v11491_v39  ;;  %v11430_v15 = vpop.f32.mrb[110].mxu1  ;;  %v11494_v24 = vpop.f32.mrb[102].mxu0 }
0x15ff   : > { %v11431_v20 = vpop.f32.mrb[111].mxu1  ;;  %v11495_v2 = vpop.f32.mrb[103].mxu0 }
0x1600   : > { %v9988_v47 = vadd.f32 %v11429_v12, %v18261_v43  ;;  %v11432_v13 = vadd.f32 %v11431_v20, %v11430_v15  ;;  %v11496_v7 = vadd.f32 %v11495_v2, %v11494_v24 }
0x1602   : > { %v10085_v28 = vadd.f32 %v11493_v55, %v9988_v47  ;;  %v9991_v1 = vadd.f32 %v11432_v13, %v18264_v33 }
0x1604   : > { %v10147_v29 = vadd.f32 %v10085_v28, %v17337_v58  ;;  %v10088_v62 = vadd.f32 %v11496_v7, %v9991_v1  ;;  %v11433_v17 = vpop.f32.mrb[112].mxu1  ;;  %v11497_v54 = vpop.f32.mrb[104].mxu0 }
0x1605   : > { %v11434_v43 = vpop.f32.mrb[113].mxu1  ;;  %v11498_v53 = vpop.f32.mrb[105].mxu0 }
0x1606   : > { %v10170_v33 = vadd.f32 %v18314_v4, %v10147_v29  ;;  %v10148_v63 = vadd.f32 %v10088_v62, %v17340_v57  ;;  %v11435_v52 = vadd.f32 %v11434_v43, %v11433_v17  ;;  %v11499_v42 = vadd.f32 %v11498_v53, %v11497_v54  ;;  %v11436_v32 = vpop.f32.mrb[114].mxu1  ;;  %v11500_v58 = vpop.f32.mrb[106].mxu0 }
0x1607   : > { %v11437_v31 = vpop.f32.mrb[115].mxu1  ;;  %v11501_v16 = vpop.f32.mrb[107].mxu0 }
0x1608   : > { %10186 = vst.msk [vmem:[%s18320_s30] sm:$0xff] %vm972_vm0, %v10170_v33  ;;  %v10171_v6 = vadd.f32 %v18314_v4, %v10148_v63  ;;  %v9996_v40 = vadd.f32 %v11435_v52, %v18267_v27  ;;  %v11438_v48 = vadd.f32 %v11437_v31, %v11436_v32  ;;  %v11502_v25 = vadd.f32 %v11501_v16, %v11500_v58 }
0x160a   : > { %10187 = vst.msk [vmem:[%s18320_s30 + $0x8] sm:$0xff] %vm972_vm0, %v10171_v6  ;;  %v10093_v3 = vadd.f32 %v11499_v42, %v9996_v40  ;;  %v9999_v57 = vadd.f32 %v11438_v48, %v18270_v18 }
0x160c   : > { %v10149_v51 = vadd.f32 %v10093_v3, %v17367_v22  ;;  %v10096_v39 = vadd.f32 %v11502_v25, %v9999_v57  ;;  %v11439_v60 = vpop.f32.mrb[116].mxu1  ;;  %v11503_v14 = vpop.f32.mrb[108].mxu0 }
0x160d   : > { %v11440_v12 = vpop.f32.mrb[117].mxu1  ;;  %v11504_v55 = vpop.f32.mrb[109].mxu0 }
0x160e   : > { %v10172_v15 = vadd.f32 %v18314_v4, %v10149_v51  ;;  %v10150_v27 = vadd.f32 %v10096_v39, %v17363_v37  ;;  %v11441_v24 = vadd.f32 %v11440_v12, %v11439_v60  ;;  %v11505_v20 = vadd.f32 %v11504_v55, %v11503_v14  ;;  %v11442_v2 = vpop.f32.mrb[118].mxu1  ;;  %v11506_v47 = vpop.f32.mrb[110].mxu0 }
0x160f   : > { %v11443_v13 = vpop.f32.mrb[119].mxu1  ;;  %v11507_v7 = vpop.f32.mrb[111].mxu0 }
0x1610   : > { %10188 = vst.msk [vmem:[%s18320_s30 + $0x10] sm:$0xff] %vm972_vm0, %v10172_v15  ;;  %v10173_v22 = vadd.f32 %v18314_v4, %v10150_v27  ;;  %v10004_v18 = vadd.f32 %v11441_v24, %v18273_v59  ;;  %v11444_v28 = vadd.f32 %v11443_v13, %v11442_v2  ;;  %v11508_v1 = vadd.f32 %v11507_v7, %v11506_v47 }
0x1612   : > { %10189 = vst.msk [vmem:[%s18320_s30 + $0x18] sm:$0xff] %vm972_vm0, %v10173_v22  ;;  %v10101_v29 = vadd.f32 %v11505_v20, %v10004_v18  ;;  %v10007_v37 = vadd.f32 %v11444_v28, %v18276_v9 }
0x1614   : > { %v10151_v62 = vadd.f32 %v10101_v29, %v17387_v36  ;;  %v10104_v17 = vadd.f32 %v11508_v1, %v10007_v37  ;;  %v11445_v54 = vpop.f32.mrb[120].mxu1  ;;  %v11509_v43 = vpop.f32.mrb[112].mxu0 }
0x1615   : > { %v11446_v53 = vpop.f32.mrb[121].mxu1  ;;  %v11510_v33 = vpop.f32.mrb[113].mxu0 }
0x1616   : > { %v10174_v63 = vadd.f32 %v18314_v4, %v10151_v62  ;;  %v10152_v59 = vadd.f32 %v10104_v17, %v17383_v34  ;;  %v11447_v52 = vadd.f32 %v11446_v53, %v11445_v54  ;;  %v11511_v42 = vadd.f32 %v11510_v33, %v11509_v43  ;;  %v11448_v32 = vpop.f32.mrb[122].mxu1  ;;  %v11512_v58 = vpop.f32.mrb[114].mxu0 }
0x1617   : > { %v11449_v31 = vpop.f32.mrb[123].mxu1  ;;  %v11513_v16 = vpop.f32.mrb[115].mxu0 }
0x1618   : > { %10190 = vst.msk [vmem:[%s18320_s30 + $0x20] sm:$0xff] %vm972_vm0, %v10174_v63  ;;  %v10175_v36 = vadd.f32 %v18314_v4, %v10152_v59  ;;  %v10012_v9 = vadd.f32 %v11447_v52, %v18279_v38  ;;  %v11450_v6 = vadd.f32 %v11449_v31, %v11448_v32  ;;  %v11514_v40 = vadd.f32 %v11513_v16, %v11512_v58 }
0x161a   : > { %10191 = vst.msk [vmem:[%s18320_s30 + $0x28] sm:$0xff] %vm972_vm0, %v10175_v36  ;;  %v10109_v48 = vadd.f32 %v11511_v42, %v10012_v9  ;;  %v10015_v34 = vadd.f32 %v11450_v6, %v18282_v30 }
0x161c   : > { %v10153_v25 = vadd.f32 %v10109_v48, %v17418_v11  ;;  %v10112_v3 = vadd.f32 %v11514_v40, %v10015_v34  ;;  %v11451_v57 = vpop.f32.mrb[124].mxu1  ;;  %v11515_v51 = vpop.f32.mrb[116].mxu0 }
0x161d   : > { %v11452_v39 = vpop.f32.mrb[125].mxu1  ;;  %v11516_v60 = vpop.f32.mrb[117].mxu0 }
0x161e   : > { %v10176_v14 = vadd.f32 %v18314_v4, %v10153_v25  ;;  %v10154_v38 = vadd.f32 %v10112_v3, %v17415_v56  ;;  %v11453_v12 = vadd.f32 %v11452_v39, %v11451_v57  ;;  %v11517_v55 = vadd.f32 %v11516_v60, %v11515_v51  ;;  %v11454_v15 = vpop.f32.mrb[126].mxu1  ;;  %v11518_v27 = vpop.f32.mrb[118].mxu0 }
0x161f   : > { %v11455_v24 = vpop.f32.mrb[127].mxu1  ;;  %v11519_v20 = vpop.f32.mrb[119].mxu0 }
0x1620   : > { %10192 = vst.msk [vmem:[%s18320_s30 + $0x30] sm:$0xff] %vm972_vm0, %v10176_v14  ;;  %v10177_v11 = vadd.f32 %v18314_v4, %v10154_v38  ;;  %v10020_v30 = vadd.f32 %v11453_v12, %v18285_v46  ;;  %v11456_v2 = vadd.f32 %v11455_v24, %v11454_v15  ;;  %v11520_v47 = vadd.f32 %v11519_v20, %v11518_v27 }
0x1622   : > { %10193 = vst.msk [vmem:[%s18320_s30 + $0x38] sm:$0xff] %vm972_vm0, %v10177_v11  ;;  %v10117_v13 = vadd.f32 %v11517_v55, %v10020_v30  ;;  %v10023_v56 = vadd.f32 %v11456_v2, %v18288_v0 }
0x1624   : > { %v10155_v7 = vadd.f32 %v10117_v13, %v17441_v8  ;;  %v10120_v22 = vadd.f32 %v11520_v47, %v10023_v56  ;;  %v11457_v18 = vpop.f32.mrb[128].mxu1  ;;  %v11521_v28 = vpop.f32.mrb[120].mxu0 }
0x1625   : > { %v11458_v1 = vpop.f32.mrb[129].mxu1  ;;  %v11522_v29 = vpop.f32.mrb[121].mxu0 }
0x1626   : > { %v10178_v37 = vadd.f32 %v18314_v4, %v10155_v7  ;;  %v10156_v46 = vadd.f32 %v10120_v22, %v17444_v45  ;;  %v11459_v62 = vadd.f32 %v11458_v1, %v11457_v18  ;;  %v11523_v17 = vadd.f32 %v11522_v29, %v11521_v28  ;;  %v11460_v54 = vpop.f32.mrb[130].mxu1  ;;  %v11524_v43 = vpop.f32.mrb[122].mxu0 }
0x1627   : > { %v11461_v53 = vpop.f32.mrb[131].mxu1  ;;  %v11525_v33 = vpop.f32.mrb[123].mxu0 }
0x1628   : > { %10194 = vst.msk [vmem:[%s18320_s30 + $0x40] sm:$0xff] %vm972_vm0, %v10178_v37  ;;  %v10179_v8 = vadd.f32 %v18314_v4, %v10156_v46  ;;  %v10028_v0 = vadd.f32 %v11459_v62, %v18291_v19  ;;  %v11462_v63 = vadd.f32 %v11461_v53, %v11460_v54  ;;  %v11526_v59 = vadd.f32 %v11525_v33, %v11524_v43 }
0x162a   : > { %10195 = vst.msk [vmem:[%s18320_s30 + $0x48] sm:$0xff] %vm972_vm0, %v10179_v8  ;;  %v10125_v52 = vadd.f32 %v11523_v17, %v10028_v0  ;;  %v10031_v45 = vadd.f32 %v11462_v63, %v18294_v35 }
0x162c   : > { %v10157_v42 = vadd.f32 %v10125_v52, %v17464_v10  ;;  %v10128_v32 = vadd.f32 %v11526_v59, %v10031_v45  ;;  %v11463_v58 = vpop.f32.mrb[132].mxu1  ;;  %v11527_v31 = vpop.f32.mrb[124].mxu0 }
0x162d   : > { %v11464_v16 = vpop.f32.mrb[133].mxu1  ;;  %v11528_v36 = vpop.f32.mrb[125].mxu0 }
0x162e   : > { %v10180_v9 = vadd.f32 %v18314_v4, %v10157_v42  ;;  %v10158_v19 = vadd.f32 %v10128_v32, %v17461_v50  ;;  %v11465_v6 = vadd.f32 %v11464_v16, %v11463_v58  ;;  %v11529_v40 = vadd.f32 %v11528_v36, %v11527_v31  ;;  %v11466_v48 = vpop.f32.mrb[134].mxu1  ;;  %v11530_v34 = vpop.f32.mrb[126].mxu0 }
0x162f   : > { %v11467_v25 = vpop.f32.mrb[135].mxu1  ;;  %v11531_v3 = vpop.f32.mrb[127].mxu0 }
0x1630   : > { %10196 = vst.msk [vmem:[%s18320_s30 + $0x50] sm:$0xff] %vm972_vm0, %v10180_v9  ;;  %v10181_v10 = vadd.f32 %v18314_v4, %v10158_v19  ;;  %v10036_v35 = vadd.f32 %v11465_v6, %v18297_v49  ;;  %v11468_v57 = vadd.f32 %v11467_v25, %v11466_v48  ;;  %v11532_v51 = vadd.f32 %v11531_v3, %v11530_v34 }
0x1632   : > { %10197 = vst.msk [vmem:[%s18320_s30 + $0x58] sm:$0xff] %vm972_vm0, %v10181_v10  ;;  %v10133_v39 = vadd.f32 %v11529_v40, %v10036_v35  ;;  %v10039_v50 = vadd.f32 %v11468_v57, %v18300_v26 }
0x1634   : > { %v10159_v60 = vadd.f32 %v10133_v39, %v17481_v23  ;;  %v10136_v14 = vadd.f32 %v11532_v51, %v10039_v50  ;;  %v11469_v38 = vpop.f32.mrb[136].mxu1  ;;  %v11533_v12 = vpop.f32.mrb[128].mxu0 }
0x1635   : > { %v11470_v55 = vpop.f32.mrb[137].mxu1  ;;  %v11534_v15 = vpop.f32.mrb[129].mxu0 }
0x1636   : > { %v10182_v27 = vadd.f32 %v18314_v4, %v10159_v60  ;;  %v10160_v49 = vadd.f32 %v10136_v14, %v17484_v41  ;;  %v11471_v24 = vadd.f32 %v11470_v55, %v11469_v38  ;;  %v11535_v20 = vadd.f32 %v11534_v15, %v11533_v12  ;;  %v11472_v11 = vpop.f32.mrb[138].mxu1  ;;  %v11536_v30 = vpop.f32.mrb[130].mxu0 }
0x1637   : > { %v11473_v2 = vpop.f32.mrb[139].mxu1  ;;  %v11537_v26 = vpop.f32.mrb[131].mxu0 }
0x1638   : > { %10198 = vst.msk [vmem:[%s18320_s30 + $0x60] sm:$0xff] %vm972_vm0, %v10182_v27  ;;  %v10183_v23 = vadd.f32 %v18314_v4, %v10160_v49  ;;  %v10044_v47 = vadd.f32 %v11471_v24, %v18303_v21  ;;  %v11474_v13 = vadd.f32 %v11473_v2, %v11472_v11  ;;  %v11538_v56 = vadd.f32 %v11537_v26, %v11536_v30 }
0x163a   : > { %10199 = vst.msk [vmem:[%s18320_s30 + $0x68] sm:$0xff] %vm972_vm0, %v10183_v23  ;;  %v10141_v7 = vadd.f32 %v11535_v20, %v10044_v47  ;;  %v10047_v41 = vadd.f32 %v11474_v13, %v18306_v61 }
0x163c   : > { %v10161_v22 = vadd.f32 %v10141_v7, %v17504_v44  ;;  %v10144_v18 = vadd.f32 %v11538_v56, %v10047_v41 }
0x163e   : > { %v10184_v28 = vadd.f32 %v18314_v4, %v10161_v22  ;;  %v10162_v1 = vadd.f32 %v10144_v18, %v17501_v5 }
0x1640   : > { %10200 = vst.msk [vmem:[%s18320_s30 + $0x70] sm:$0xff] %vm972_vm0, %v10184_v28  ;;  %v10185_v29 = vadd.f32 %v18314_v4, %v10162_v1 }
0x1642   : > { %10201 = vst.msk [vmem:[%s18320_s30 + $0x78] sm:$0xff] %vm972_vm0, %v10185_v29 }
0x1643 PF: > { %s29_s0 = sadd.s32 1, %s13319_s0  }
0x1644   : > { %p26_p4 = scmp.ge.s32.totalorder %s29_s0, 4  }
0x1646   :  { %28 = sbr.rel (!%p26_p4) target bundleno = 5 (0x5), region = 129 }

</bundles_post_ra>
